<compile_context>
chip_gen: v7x
topology: tpu7x:2x2x1
jax: 0.10.0
libtpu: 0.0.40
codegen_flags: <defaults>
</compile_context>

<pallas_src>
import functools

import jax
import jax.numpy as jnp
from jax.experimental import pallas as pl
from jax.experimental.pallas import tpu as pltpu


def _round_up(x, m):
    return (x + m - 1) // m * m


def gru_kernel(emb_ref, h0_ref, wih_ref, whh_ref, bx_ref, bhn_ref,
               hout_ref, h_scratch,
               *, seq_len, hidden, hidden_pad, time_chunk, mask_tail):
    """One grid step == one (batch tile, time chunk).

    Grid: (num_batch_tiles [parallel], num_time_chunks [arbitrary/sequential]).

    emb_ref:   (TC, Bt, Ep) bf16  time-major embedding chunk
    h0_ref:    (Bt, Hp)  f32     initial hidden state
    wih_ref:   (Ep, 3Hp) bf16    fused input->hidden weights, per-gate lane-padded
    whh_ref:   (Hp, 3Hp) bf16    fused hidden->hidden weights, per-gate lane-padded
    bx_ref:    (1, 3Hp)  f32     b_ih (all gates) + b_hh (r,z gates), folded
    bhn_ref:   (1, Hp)   f32     b_hn only (stays inside r * (...))
    hout_ref:  (Bt, Hp)  f32     final hidden state for this batch tile
    h_scratch: (Bt, Hp)  f32     hidden-state carry across time chunks
    """
    c = pl.program_id(1)
    nc = pl.num_programs(1)
    Hp = hidden_pad
    TC = time_chunk

    @pl.when(c == 0)
    def _():
        # Explicitly zero the padded hidden lanes of the carried state so their
        # recurrence can never leak, regardless of how the wrapper padded h0.
        lane = jax.lax.broadcasted_iota(jnp.int32, h_scratch.shape, 1)
        h_scratch[...] = jnp.where(lane < hidden, h0_ref[...], 0.0)

    wih = wih_ref[...]                              # (Ep, 3Hp) bf16, VMEM-resident
    whh = whh_ref[...]                              # (Hp, 3Hp) bf16, VMEM-resident
    bx = bx_ref[...]                                # (1, 3Hp) f32
    bhn = bhn_ref[...]                              # (1, Hp)  f32

    def make_step(masked):
        def step(i, h_prev):
            # In-kernel input projection for this timestep (bf16 in / f32 acc).
            # It has no data dependence on h, so within the unrolled chunk the
            # scheduler overlaps it with the previous step's gate math.
            x_t = jnp.dot(emb_ref[i], wih,
                          preferred_element_type=jnp.float32) + bx      # (Bt, 3Hp)
            # Single fused MXU push on the serial path: (Bt,Hp) x (Hp,3Hp).
            h_proj = jnp.dot(h_prev.astype(whh.dtype), whh,
                             preferred_element_type=jnp.float32)        # (Bt, 3Hp)
            # One slab for r and z; sigmoid(v) = 0.5*tanh(0.5*v)+0.5 -> one EUP op/elem.
            rz = 0.5 * jnp.tanh(0.5 * (x_t[:, :2 * Hp] + h_proj[:, :2 * Hp])) + 0.5
            r = rz[:, :Hp]
            z = rz[:, Hp:]
            # PyTorch nn.GRU: n = tanh(W_in x + b_in + r * (W_hn h + b_hn))
            n = jnp.tanh(x_t[:, 2 * Hp:] + r * (h_proj[:, 2 * Hp:] + bhn))
            h_new = n + z * (h_prev - n)             # == (1-z)*n + z*h_prev
            if masked:
                # Padded timesteps beyond the true sequence length hold h fixed.
                keep = ((c * TC + i) < seq_len).astype(jnp.float32)
                h_new = h_prev + keep * (h_new - h_prev)
            return h_new
        return step

    h_init = h_scratch[...]
    if mask_tail:
        # Only the last time chunk contains padded timesteps; keep the per-step
        # compare+select off the hot path of every other chunk.
        @pl.when(c < nc - 1)
        def _():
            h_scratch[...] = jax.lax.fori_loop(0, TC, make_step(False), h_init,
                                               unroll=True)

        @pl.when(c == nc - 1)
        def _():
            h_scratch[...] = jax.lax.fori_loop(0, TC, make_step(True), h_init,
                                               unroll=True)
    else:
        h_scratch[...] = jax.lax.fori_loop(0, TC, make_step(False), h_init,
                                           unroll=True)

    @pl.when(c == nc - 1)
    def _():
        hout_ref[...] = h_scratch[...].astype(hout_ref.dtype)


def gru_net_forward(params, inputs, h0, *, time_chunk=16, batch_tile=None):
    """Forward pass equivalent to GRUNet.forward(inputs, h0) in eval mode.

    inputs: int32 (B, T) token ids
    h0:     float32 (1, B, H)
    returns (out (B, 1), h (1, B, H))
    """
    embd = params["embd"]                           # (V, E)
    w_ih, b_ih = params["w_ih"], params["b_ih"]     # (E, 3H), (3H,)  gate order (r,z,n)
    w_hh, b_hh = params["w_hh"], params["b_hh"]     # (H, 3H), (3H,)
    w_fc, b_fc = params["w_fc"], params["b_fc"]     # (H, 1), (1,)

    B, T = inputs.shape
    E = embd.shape[1]
    H = w_hh.shape[0]
    Hp = _round_up(H, 128)                          # lane-pad each gate block
    Ep = _round_up(E, 128)

    if batch_tile is None:
        B8 = _round_up(B, 8)
        # Feed as many MXU rows as possible (up to 256 for v6e/v7x's 256-wide MXU),
        # but keep >= 2 batch tiles when B allows so the "parallel" batch axis can
        # shard across v7x's two TensorCores.
        if B8 >= 16:
            batch_tile = min(256, _round_up(max(B8 // 2, 8), 8))
        else:
            batch_tile = B8
    assert batch_tile % 8 == 0, "batch_tile must be a multiple of 8 sublanes"
    Bt = batch_tile
    Bp = _round_up(B, Bt)

    TC = max(1, min(time_chunk, T))
    Tp = _round_up(T, TC)
    mask_tail = Tp != T

    # --- Lane-pad fused weights per gate: columns [r | z | n], each padded H -> Hp.
    def pad_gate_cols(w, rows_to):                  # (rows, 3H) -> (rows_to, 3Hp)
        r = w.reshape(w.shape[0], 3, H)
        r = jnp.pad(r, ((0, 0), (0, 0), (0, Hp - H))).reshape(w.shape[0], 3 * Hp)
        return jnp.pad(r, ((0, rows_to - w.shape[0]), (0, 0)))

    def pad_gate_vec(b):                            # (3H,) -> (3Hp,)
        return jnp.pad(b.reshape(3, H), ((0, 0), (0, Hp - H))).reshape(3 * Hp)

    w_ih_p = pad_gate_cols(w_ih, Ep).astype(jnp.bfloat16)               # (Ep, 3Hp)
    w_hh_p = pad_gate_cols(w_hh, Hp).astype(jnp.bfloat16)               # (Hp, 3Hp)
    # Fold biases: r/z gates take b_ih + b_hh in the input projection; the n gate
    # takes only b_in there, b_hn stays in-kernel (it is multiplied by r).
    b_hh_rz = jnp.concatenate([b_hh[:2 * H], jnp.zeros((H,), b_hh.dtype)])
    b_x = pad_gate_vec(b_ih + b_hh_rz)[None, :].astype(jnp.float32)     # (1, 3Hp)
    b_hn = jnp.pad(b_hh[2 * H:], (0, Hp - H))[None, :].astype(jnp.float32)  # (1, Hp)

    # --- Embedding gather, time-major, bf16.  Padding happens on the small
    # pre-projection tensors (token ids / embedding table), never on a (T,B,3Hp) slab.
    # TODO(synk): Dropout2d(0.3) is identity at inference; training-mode channel
    # dropout is not implemented here.
    embd_p = jnp.pad(embd, ((0, 0), (0, Ep - E))).astype(jnp.bfloat16)      # (V, Ep)
    inputs_p = jnp.pad(inputs, ((0, Bp - B), (0, Tp - T)))                  # (Bp, Tp)
    emb_tm = jnp.take(embd_p, inputs_p.T, axis=0)                           # (Tp, Bp, Ep)
    h0_p = jnp.pad(h0[0].astype(jnp.float32), ((0, Bp - B), (0, Hp - H)))   # (Bp, Hp)

    # --- Explicit VMEM budget: double-buffered inputs/output + scratch, with headroom,
    # capped at v7x's 64 MiB physical VMEM (v5e/v6e have 128 MiB of slack).
    bytes_stream = TC * Bt * Ep * 2                                   # emb chunk (bf16)
    bytes_consts = ((Ep + Hp) * 3 * Hp * 2                            # W_ih, W_hh (bf16)
                    + (3 * Hp + Hp) * 4 + Bt * Hp * 4)                # b_x, b_hn, h0
    bytes_out = Bt * Hp * 4
    bytes_scratch = Bt * Hp * 4
    vmem_need = 2 * (bytes_stream + bytes_consts + bytes_out) + bytes_scratch
    vmem_limit = int(min(max(int(vmem_need * 1.25) + (4 << 20), 32 << 20), 64 << 20))

    kernel = functools.partial(
        gru_kernel, seq_len=T, hidden=H, hidden_pad=Hp, time_chunk=TC,
        mask_tail=mask_tail)

    h_last = pl.pallas_call(
        kernel,
        out_shape=jax.ShapeDtypeStruct((Bp, Hp), jnp.float32),
        grid_spec=pltpu.PrefetchScalarGridSpec(
            num_scalar_prefetch=0,
            grid=(Bp // Bt, Tp // TC),
            in_specs=[
                pl.BlockSpec((TC, Bt, Ep), lambda b, c: (c, b, 0)),    # emb chunk
                pl.BlockSpec((Bt, Hp), lambda b, c: (b, 0)),           # h0
                pl.BlockSpec((Ep, 3 * Hp), lambda b, c: (0, 0)),       # W_ih (const)
                pl.BlockSpec((Hp, 3 * Hp), lambda b, c: (0, 0)),       # W_hh (const)
                pl.BlockSpec((1, 3 * Hp), lambda b, c: (0, 0)),        # b_x  (const)
                pl.BlockSpec((1, Hp), lambda b, c: (0, 0)),            # b_hn (const)
            ],
            out_specs=pl.BlockSpec((Bt, Hp), lambda b, c: (b, 0)),     # h_T
            scratch_shapes=[pltpu.VMEM((Bt, Hp), jnp.float32)],        # h carry
        ),
        compiler_params=pltpu.CompilerParams(
            # Time axis MUST stay "arbitrary": h is carried in VMEM scratch and
            # h_out is written only on the last time chunk.  Batch tiles are
            # independent -> "parallel" (can shard across v7x's 2nd TensorCore).
            dimension_semantics=("parallel", "arbitrary"),
            vmem_limit_bytes=vmem_limit),
    )(emb_tm, h0_p, w_ih_p, w_hh_p, b_x, b_hn)

    # Final Linear(H,1) + sigmoid on the last hidden state, in plain JAX (a 1-lane
    # output would waste the MXU / produce masked stores in-kernel).
    h_T = h_last[:B, :H]
    out = jax.nn.sigmoid(h_T @ w_fc + b_fc)
    return out, h_T[None]                                              # (B,1), (1,B,H)


def init_params(key, vocab, embd_dim, hidden):
    """Deterministic init. GRU weights stored fused + pre-transposed:
    w_ih (E, 3H) / w_hh (H, 3H) with gate order (r, z, n) along the last axis
    (i.e. the transpose of PyTorch's (3H, E) / (3H, H) weight_ih_l0 / weight_hh_l0)."""
    ks = jax.random.split(key, 7)
    bound = 1.0 / jnp.sqrt(jnp.float32(hidden))
    u = lambda k, shape: jax.random.uniform(k, shape, jnp.float32, -bound, bound)
    return {
        "embd": jax.random.normal(ks[0], (vocab, embd_dim), jnp.float32) * 0.1,
        "w_ih": u(ks[1], (embd_dim, 3 * hidden)),
        "w_hh": u(ks[2], (hidden, 3 * hidden)),
        "b_ih": u(ks[3], (3 * hidden,)),
        "b_hh": u(ks[4], (3 * hidden,)),
        "w_fc": u(ks[5], (hidden, 1)),
        "b_fc": u(ks[6], (1,)),
    }


if __name__ == "__main__":
    # Small shapes: B=16 -> 2 batch tiles (parallel axis), T=20 with time_chunk=16 ->
    # 2 time chunks and a ragged tail (exercises the last-chunk mask branch),
    # H=48 / E=32 exercise lane padding of both the gate blocks and the embedding.
    B, T, V, E, H = 16, 20, 64, 32, 48

    key = jax.random.PRNGKey(0)
    k_param, k_tok = jax.random.split(key)

    params = init_params(k_param, V, E, H)
    inputs = jax.random.randint(k_tok, (B, T), 0, V, dtype=jnp.int32)
    h0 = jnp.zeros((1, B, H), jnp.float32)       # init_hidden(batch_size)

    out, h = jax.jit(gru_net_forward)(params, inputs, h0)
    jax.block_until_ready((out, h))

    assert out.shape == (B, 1) and h.shape == (1, B, H)
    assert bool(jnp.all(jnp.isfinite(out))) and bool(jnp.all(jnp.isfinite(h)))
    assert bool(jnp.all((out > 0.0) & (out < 1.0)))
    print("KERNEL_OK")
</pallas_src>

<mosaic_0001>
module attributes {stable_mosaic.version = 11 : i64} {
  func.func @gru_kernel(%arg0: i32, %arg1: i32, %arg2: memref<16x8x128xbf16, #tpu.memory_space<vmem>>, %arg3: memref<8x128xf32, #tpu.memory_space<vmem>>, %arg4: memref<128x384xbf16, #tpu.memory_space<vmem>>, %arg5: memref<128x384xbf16, #tpu.memory_space<vmem>>, %arg6: memref<1x384xf32, #tpu.memory_space<vmem>>, %arg7: memref<1x128xf32, #tpu.memory_space<vmem>>, %arg8: memref<8x128xf32, #tpu.memory_space<vmem>>, %arg9: memref<8x128xf32, #tpu.memory_space<vmem>>) attributes {dimension_semantics = [#tpu.dimension_semantics<parallel>, #tpu.dimension_semantics<arbitrary>], iteration_bounds = array<i64: 2, 2>, scalar_prefetch = 0 : i64, scratch_operands = 1 : i64, tpu.core_type = #tpu.core_type<tc>, window_params = [{transform_indices = @transform_0, window_bounds = array<i64: 16, 8, 128>}, {transform_indices = @transform_1, window_bounds = array<i64: 8, 128>}, {pipeline_mode = #tpu.pipeline_mode<synchronous>, transform_indices = @transform_2, window_bounds = array<i64: 128, 384>}, {pipeline_mode = #tpu.pipeline_mode<synchronous>, transform_indices = @transform_3, window_bounds = array<i64: 128, 384>}, {pipeline_mode = #tpu.pipeline_mode<synchronous>, transform_indices = @transform_4, window_bounds = array<i64: 1, 384>}, {pipeline_mode = #tpu.pipeline_mode<synchronous>, transform_indices = @transform_5, window_bounds = array<i64: 1, 128>}, {transform_indices = @transform_6, window_bounds = array<i64: 8, 128>}]} {
    %c0_i32 = arith.constant 0 : i32
    %0 = arith.cmpi eq, %arg1, %c0_i32 : i32
    %1 = arith.extui %0 : i1 to i32
    %c0_i32_0 = arith.constant 0 : i32
    %2 = arith.cmpi ne, %1, %c0_i32_0 : i32
    scf.if %2 {
      %17 = tpu.iota {dimensions = array<i32: 1>} : vector<8x128xi32>
      %c48_i32 = arith.constant 48 : i32
      %18 = vector.broadcast %c48_i32 : i32 to vector<8x128xi32>
      %19 = arith.cmpi slt, %17, %18 : vector<8x128xi32>
      %c0_15 = arith.constant 0 : index
      %c0_16 = arith.constant 0 : index
      %20 = vector.load %arg3[%c0_15, %c0_16] : memref<8x128xf32, #tpu.memory_space<vmem>>, vector<8x128xf32>
      %cst = arith.constant 0.000000e+00 : f32
      %21 = vector.broadcast %cst : f32 to vector<8x128xf32>
      %22 = arith.select %19, %20, %21 : vector<8x128xi1>, vector<8x128xf32>
      %c0_17 = arith.constant 0 : index
      %c0_18 = arith.constant 0 : index
      %23 = vector.load %arg9[%c0_17, %c0_18] : memref<8x128xf32, #tpu.memory_space<vmem>>, vector<8x128xf32>
      tpu.vector_store %arg9[%c0_17, %c0_18], %22 {strides = array<i32>} : memref<8x128xf32, #tpu.memory_space<vmem>>, vector<8x128xf32>,
    } else {
    }
    %c0 = arith.constant 0 : index
    %c0_1 = arith.constant 0 : index
    %3 = vector.load %arg4[%c0, %c0_1] : memref<128x384xbf16, #tpu.memory_space<vmem>>, vector<128x384xbf16>
    %c0_2 = arith.constant 0 : index
    %c0_3 = arith.constant 0 : index
    %4 = vector.load %arg5[%c0_2, %c0_3] : memref<128x384xbf16, #tpu.memory_space<vmem>>, vector<128x384xbf16>
    %c0_4 = arith.constant 0 : index
    %c0_5 = arith.constant 0 : index
    %5 = vector.load %arg6[%c0_4, %c0_5] : memref<1x384xf32, #tpu.memory_space<vmem>>, vector<1x384xf32>
    %c0_6 = arith.constant 0 : index
    %c0_7 = arith.constant 0 : index
    %6 = vector.load %arg7[%c0_6, %c0_7] : memref<1x128xf32, #tpu.memory_space<vmem>>, vector<1x128xf32>
    %c0_8 = arith.constant 0 : index
    %c0_9 = arith.constant 0 : index
    %7 = vector.load %arg9[%c0_8, %c0_9] : memref<8x128xf32, #tpu.memory_space<vmem>>, vector<8x128xf32>
    %c1_i32 = arith.constant 1 : i32
    %8 = arith.cmpi slt, %arg1, %c1_i32 : i32
    %9 = arith.extui %8 : i1 to i32
    %c0_i32_10 = arith.constant 0 : i32
    %10 = arith.cmpi ne, %9, %c0_i32_10 : i32
    scf.if %10 {
      %c0_i32_15 = arith.constant 0 : i32
      %17 = arith.index_cast %c0_i32_15 : i32 to index
      %c0_16 = arith.constant 0 : index
      %c0_17 = arith.constant 0 : index
      %18 = vector.load %arg2[%17, %c0_16, %c0_17] : memref<16x8x128xbf16, #tpu.memory_space<vmem>>, vector<1x8x128xbf16>
      %19 = vector.shape_cast %18 : vector<1x8x128xbf16> to vector<8x128xbf16>
      %cst = arith.constant dense<0.000000e+00> : vector<8x384xf32>
      %20 = tpu.matmul %19, %3, %cst {dimension_numbers = #tpu.dot_dimension_numbers<[1], [0], [0], [1], [0, 0, 1, 1], [], []>} : vector<8x128xbf16>, vector<128x384xbf16>, vector<8x384xf32> -> vector<8x384xf32>
      %21 = vector.broadcast %5 : vector<1x384xf32> to vector<8x384xf32>
      %22 = arith.addf %20, %21 : vector<8x384xf32>
      %23 = arith.truncf %7 : vector<8x128xf32> to vector<8x128xbf16>
      %cst_18 = arith.constant dense<0.000000e+00> : vector<8x384xf32>
      %24 = tpu.matmul %23, %4, %cst_18 {dimension_numbers = #tpu.dot_dimension_numbers<[1], [0], [0], [1], [0, 0, 1, 1], [], []>} : vector<8x128xbf16>, vector<128x384xbf16>, vector<8x384xf32> -> vector<8x384xf32>
      %25 = vector.extract_strided_slice %22 {offsets = [0, 0], sizes = [8, 256], strides = [1, 1]} : vector<8x384xf32> to vector<8x256xf32>
      %26 = vector.extract_strided_slice %24 {offsets = [0, 0], sizes = [8, 256], strides = [1, 1]} : vector<8x384xf32> to vector<8x256xf32>
      %27 = arith.addf %25, %26 : vector<8x256xf32>
      %cst_19 = arith.constant 5.000000e-01 : f32
      %28 = vector.broadcast %cst_19 : f32 to vector<8x256xf32>
      %29 = arith.mulf %28, %27 : vector<8x256xf32>
      %30 = math.tanh %29 : vector<8x256xf32>
      %cst_20 = arith.constant 5.000000e-01 : f32
      %31 = vector.broadcast %cst_20 : f32 to vector<8x256xf32>
      %32 = arith.mulf %31, %30 : vector<8x256xf32>
      %cst_21 = arith.constant 5.000000e-01 : f32
      %33 = vector.broadcast %cst_21 : f32 to vector<8x256xf32>
      %34 = arith.addf %32, %33 : vector<8x256xf32>
      %35 = vector.extract_strided_slice %34 {offsets = [0, 0], sizes = [8, 128], strides = [1, 1]} : vector<8x256xf32> to vector<8x128xf32>
      %36 = vector.extract_strided_slice %34 {offsets = [0, 128], sizes = [8, 128], strides = [1, 1]} : vector<8x256xf32> to vector<8x128xf32>
      %37 = vector.extract_strided_slice %22 {offsets = [0, 256], sizes = [8, 128], strides = [1, 1]} : vector<8x384xf32> to vector<8x128xf32>
      %38 = vector.extract_strided_slice %24 {offsets = [0, 256], sizes = [8, 128], strides = [1, 1]} : vector<8x384xf32> to vector<8x128xf32>
      %39 = vector.broadcast %6 : vector<1x128xf32> to vector<8x128xf32>
      %40 = arith.addf %38, %39 : vector<8x128xf32>
      %41 = arith.mulf %35, %40 : vector<8x128xf32>
      %42 = arith.addf %37, %41 : vector<8x128xf32>
      %43 = math.tanh %42 : vector<8x128xf32>
      %44 = arith.subf %7, %43 : vector<8x128xf32>
      %45 = arith.mulf %36, %44 : vector<8x128xf32>
      %46 = arith.addf %43, %45 : vector<8x128xf32>
      %c1_i32_22 = arith.constant 1 : i32
      %47 = arith.index_cast %c1_i32_22 : i32 to index
      %c0_23 = arith.constant 0 : index
      %c0_24 = arith.constant 0 : index
      %48 = vector.load %arg2[%47, %c0_23, %c0_24] : memref<16x8x128xbf16, #tpu.memory_space<vmem>>, vector<1x8x128xbf16>
      %49 = vector.shape_cast %48 : vector<1x8x128xbf16> to vector<8x128xbf16>
      %cst_25 = arith.constant dense<0.000000e+00> : vector<8x384xf32>
      %50 = tpu.matmul %49, %3, %cst_25 {dimension_numbers = #tpu.dot_dimension_numbers<[1], [0], [0], [1], [0, 0, 1, 1], [], []>} : vector<8x128xbf16>, vector<128x384xbf16>, vector<8x384xf32> -> vector<8x384xf32>
      %51 = vector.broadcast %5 : vector<1x384xf32> to vector<8x384xf32>
      %52 = arith.addf %50, %51 : vector<8x384xf32>
      %53 = arith.truncf %46 : vector<8x128xf32> to vector<8x128xbf16>
      %cst_26 = arith.constant dense<0.000000e+00> : vector<8x384xf32>
      %54 = tpu.matmul %53, %4, %cst_26 {dimension_numbers = #tpu.dot_dimension_numbers<[1], [0], [0], [1], [0, 0, 1, 1], [], []>} : vector<8x128xbf16>, vector<128x384xbf16>, vector<8x384xf32> -> vector<8x384xf32>
      %55 = vector.extract_strided_slice %52 {offsets = [0, 0], sizes = [8, 256], strides = [1, 1]} : vector<8x384xf32> to vector<8x256xf32>
      %56 = vector.extract_strided_slice %54 {offsets = [0, 0], sizes = [8, 256], strides = [1, 1]} : vector<8x384xf32> to vector<8x256xf32>
      %57 = arith.addf %55, %56 : vector<8x256xf32>
      %cst_27 = arith.constant 5.000000e-01 : f32
      %58 = vector.broadcast %cst_27 : f32 to vector<8x256xf32>
      %59 = arith.mulf %58, %57 : vector<8x256xf32>
      %60 = math.tanh %59 : vector<8x256xf32>
      %cst_28 = arith.constant 5.000000e-01 : f32
      %61 = vector.broadcast %cst_28 : f32 to vector<8x256xf32>
      %62 = arith.mulf %61, %60 : vector<8x256xf32>
      %cst_29 = arith.constant 5.000000e-01 : f32
      %63 = vector.broadcast %cst_29 : f32 to vector<8x256xf32>
      %64 = arith.addf %62, %63 : vector<8x256xf32>
      %65 = vector.extract_strided_slice %64 {offsets = [0, 0], sizes = [8, 128], strides = [1, 1]} : vector<8x256xf32> to vector<8x128xf32>
      %66 = vector.extract_strided_slice %64 {offsets = [0, 128], sizes = [8, 128], strides = [1, 1]} : vector<8x256xf32> to vector<8x128xf32>
      %67 = vector.extract_strided_slice %52 {offsets = [0, 256], sizes = [8, 128], strides = [1, 1]} : vector<8x384xf32> to vector<8x128xf32>
      %68 = vector.extract_strided_slice %54 {offsets = [0, 256], sizes = [8, 128], strides = [1, 1]} : vector<8x384xf32> to vector<8x128xf32>
      %69 = vector.broadcast %6 : vector<1x128xf32> to vector<8x128xf32>
      %70 = arith.addf %68, %69 : vector<8x128xf32>
      %71 = arith.mulf %65, %70 : vector<8x128xf32>
      %72 = arith.addf %67, %71 : vector<8x128xf32>
      %73 = math.tanh %72 : vector<8x128xf32>
      %74 = arith.subf %46, %73 : vector<8x128xf32>
      %75 = arith.mulf %66, %74 : vector<8x128xf32>
      %76 = arith.addf %73, %75 : vector<8x128xf32>
      %c2_i32 = arith.constant 2 : i32
      %77 = arith.index_cast %c2_i32 : i32 to index
      %c0_30 = arith.constant 0 : index
      %c0_31 = arith.constant 0 : index
      %78 = vector.load %arg2[%77, %c0_30, %c0_31] : memref<16x8x128xbf16, #tpu.memory_space<vmem>>, vector<1x8x128xbf16>
      %79 = vector.shape_cast %78 : vector<1x8x128xbf16> to vector<8x128xbf16>
      %cst_32 = arith.constant dense<0.000000e+00> : vector<8x384xf32>
      %80 = tpu.matmul %79, %3, %cst_32 {dimension_numbers = #tpu.dot_dimension_numbers<[1], [0], [0], [1], [0, 0, 1, 1], [], []>} : vector<8x128xbf16>, vector<128x384xbf16>, vector<8x384xf32> -> vector<8x384xf32>
      %81 = vector.broadcast %5 : vector<1x384xf32> to vector<8x384xf32>
      %82 = arith.addf %80, %81 : vector<8x384xf32>
      %83 = arith.truncf %76 : vector<8x128xf32> to vector<8x128xbf16>
      %cst_33 = arith.constant dense<0.000000e+00> : vector<8x384xf32>
      %84 = tpu.matmul %83, %4, %cst_33 {dimension_numbers = #tpu.dot_dimension_numbers<[1], [0], [0], [1], [0, 0, 1, 1], [], []>} : vector<8x128xbf16>, vector<128x384xbf16>, vector<8x384xf32> -> vector<8x384xf32>
      %85 = vector.extract_strided_slice %82 {offsets = [0, 0], sizes = [8, 256], strides = [1, 1]} : vector<8x384xf32> to vector<8x256xf32>
      %86 = vector.extract_strided_slice %84 {offsets = [0, 0], sizes = [8, 256], strides = [1, 1]} : vector<8x384xf32> to vector<8x256xf32>
      %87 = arith.addf %85, %86 : vector<8x256xf32>
      %cst_34 = arith.constant 5.000000e-01 : f32
      %88 = vector.broadcast %cst_34 : f32 to vector<8x256xf32>
      %89 = arith.mulf %88, %87 : vector<8x256xf32>
      %90 = math.tanh %89 : vector<8x256xf32>
      %cst_35 = arith.constant 5.000000e-01 : f32
      %91 = vector.broadcast %cst_35 : f32 to vector<8x256xf32>
      %92 = arith.mulf %91, %90 : vector<8x256xf32>
      %cst_36 = arith.constant 5.000000e-01 : f32
      %93 = vector.broadcast %cst_36 : f32 to vector<8x256xf32>
      %94 = arith.addf %92, %93 : vector<8x256xf32>
      %95 = vector.extract_strided_slice %94 {offsets = [0, 0], sizes = [8, 128], strides = [1, 1]} : vector<8x256xf32> to vector<8x128xf32>
      %96 = vector.extract_strided_slice %94 {offsets = [0, 128], sizes = [8, 128], strides = [1, 1]} : vector<8x256xf32> to vector<8x128xf32>
      %97 = vector.extract_strided_slice %82 {offsets = [0, 256], sizes = [8, 128], strides = [1, 1]} : vector<8x384xf32> to vector<8x128xf32>
      %98 = vector.extract_strided_slice %84 {offsets = [0, 256], sizes = [8, 128], strides = [1, 1]} : vector<8x384xf32> to vector<8x128xf32>
      %99 = vector.broadcast %6 : vector<1x128xf32> to vector<8x128xf32>
      %100 = arith.addf %98, %99 : vector<8x128xf32>
      %101 = arith.mulf %95, %100 : vector<8x128xf32>
      %102 = arith.addf %97, %101 : vector<8x128xf32>
      %103 = math.tanh %102 : vector<8x128xf32>
      %104 = arith.subf %76, %103 : vector<8x128xf32>
      %105 = arith.mulf %96, %104 : vector<8x128xf32>
      %106 = arith.addf %103, %105 : vector<8x128xf32>
      %c3_i32 = arith.constant 3 : i32
      %107 = arith.index_cast %c3_i32 : i32 to index
      %c0_37 = arith.constant 0 : index
      %c0_38 = arith.constant 0 : index
      %108 = vector.load %arg2[%107, %c0_37, %c0_38] : memref<16x8x128xbf16, #tpu.memory_space<vmem>>, vector<1x8x128xbf16>
      %109 = vector.shape_cast %108 : vector<1x8x128xbf16> to vector<8x128xbf16>
      %cst_39 = arith.constant dense<0.000000e+00> : vector<8x384xf32>
      %110 = tpu.matmul %109, %3, %cst_39 {dimension_numbers = #tpu.dot_dimension_numbers<[1], [0], [0], [1], [0, 0, 1, 1], [], []>} : vector<8x128xbf16>, vector<128x384xbf16>, vector<8x384xf32> -> vector<8x384xf32>
      %111 = vector.broadcast %5 : vector<1x384xf32> to vector<8x384xf32>
      %112 = arith.addf %110, %111 : vector<8x384xf32>
      %113 = arith.truncf %106 : vector<8x128xf32> to vector<8x128xbf16>
      %cst_40 = arith.constant dense<0.000000e+00> : vector<8x384xf32>
      %114 = tpu.matmul %113, %4, %cst_40 {dimension_numbers = #tpu.dot_dimension_numbers<[1], [0], [0], [1], [0, 0, 1, 1], [], []>} : vector<8x128xbf16>, vector<128x384xbf16>, vector<8x384xf32> -> vector<8x384xf32>
      %115 = vector.extract_strided_slice %112 {offsets = [0, 0], sizes = [8, 256], strides = [1, 1]} : vector<8x384xf32> to vector<8x256xf32>
      %116 = vector.extract_strided_slice %114 {offsets = [0, 0], sizes = [8, 256], strides = [1, 1]} : vector<8x384xf32> to vector<8x256xf32>
      %117 = arith.addf %115, %116 : vector<8x256xf32>
      %cst_41 = arith.constant 5.000000e-01 : f32
      %118 = vector.broadcast %cst_41 : f32 to vector<8x256xf32>
      %119 = arith.mulf %118, %117 : vector<8x256xf32>
      %120 = math.tanh %119 : vector<8x256xf32>
      %cst_42 = arith.constant 5.000000e-01 : f32
      %121 = vector.broadcast %cst_42 : f32 to vector<8x256xf32>
      %122 = arith.mulf %121, %120 : vector<8x256xf32>
      %cst_43 = arith.constant 5.000000e-01 : f32
      %123 = vector.broadcast %cst_43 : f32 to vector<8x256xf32>
      %124 = arith.addf %122, %123 : vector<8x256xf32>
      %125 = vector.extract_strided_slice %124 {offsets = [0, 0], sizes = [8, 128], strides = [1, 1]} : vector<8x256xf32> to vector<8x128xf32>
      %126 = vector.extract_strided_slice %124 {offsets = [0, 128], sizes = [8, 128], strides = [1, 1]} : vector<8x256xf32> to vector<8x128xf32>
      %127 = vector.extract_strided_slice %112 {offsets = [0, 256], sizes = [8, 128], strides = [1, 1]} : vector<8x384xf32> to vector<8x128xf32>
      %128 = vector.extract_strided_slice %114 {offsets = [0, 256], sizes = [8, 128], strides = [1, 1]} : vector<8x384xf32> to vector<8x128xf32>
      %129 = vector.broadcast %6 : vector<1x128xf32> to vector<8x128xf32>
      %130 = arith.addf %128, %129 : vector<8x128xf32>
      %131 = arith.mulf %125, %130 : vector<8x128xf32>
      %132 = arith.addf %127, %131 : vector<8x128xf32>
      %133 = math.tanh %132 : vector<8x128xf32>
      %134 = arith.subf %106, %133 : vector<8x128xf32>
      %135 = arith.mulf %126, %134 : vector<8x128xf32>
      %136 = arith.addf %133, %135 : vector<8x128xf32>
      %c4_i32 = arith.constant 4 : i32
      %137 = arith.index_cast %c4_i32 : i32 to index
      %c0_44 = arith.constant 0 : index
      %c0_45 = arith.constant 0 : index
      %138 = vector.load %arg2[%137, %c0_44, %c0_45] : memref<16x8x128xbf16, #tpu.memory_space<vmem>>, vector<1x8x128xbf16>
      %139 = vector.shape_cast %138 : vector<1x8x128xbf16> to vector<8x128xbf16>
      %cst_46 = arith.constant dense<0.000000e+00> : vector<8x384xf32>
      %140 = tpu.matmul %139, %3, %cst_46 {dimension_numbers = #tpu.dot_dimension_numbers<[1], [0], [0], [1], [0, 0, 1, 1], [], []>} : vector<8x128xbf16>, vector<128x384xbf16>, vector<8x384xf32> -> vector<8x384xf32>
      %141 = vector.broadcast %5 : vector<1x384xf32> to vector<8x384xf32>
      %142 = arith.addf %140, %141 : vector<8x384xf32>
      %143 = arith.truncf %136 : vector<8x128xf32> to vector<8x128xbf16>
      %cst_47 = arith.constant dense<0.000000e+00> : vector<8x384xf32>
      %144 = tpu.matmul %143, %4, %cst_47 {dimension_numbers = #tpu.dot_dimension_numbers<[1], [0], [0], [1], [0, 0, 1, 1], [], []>} : vector<8x128xbf16>, vector<128x384xbf16>, vector<8x384xf32> -> vector<8x384xf32>
      %145 = vector.extract_strided_slice %142 {offsets = [0, 0], sizes = [8, 256], strides = [1, 1]} : vector<8x384xf32> to vector<8x256xf32>
      %146 = vector.extract_strided_slice %144 {offsets = [0, 0], sizes = [8, 256], strides = [1, 1]} : vector<8x384xf32> to vector<8x256xf32>
      %147 = arith.addf %145, %146 : vector<8x256xf32>
      %cst_48 = arith.constant 5.000000e-01 : f32
      %148 = vector.broadcast %cst_48 : f32 to vector<8x256xf32>
      %149 = arith.mulf %148, %147 : vector<8x256xf32>
      %150 = math.tanh %149 : vector<8x256xf32>
      %cst_49 = arith.constant 5.000000e-01 : f32
      %151 = vector.broadcast %cst_49 : f32 to vector<8x256xf32>
      %152 = arith.mulf %151, %150 : vector<8x256xf32>
      %cst_50 = arith.constant 5.000000e-01 : f32
      %153 = vector.broadcast %cst_50 : f32 to vector<8x256xf32>
      %154 = arith.addf %152, %153 : vector<8x256xf32>
      %155 = vector.extract_strided_slice %154 {offsets = [0, 0], sizes = [8, 128], strides = [1, 1]} : vector<8x256xf32> to vector<8x128xf32>
      %156 = vector.extract_strided_slice %154 {offsets = [0, 128], sizes = [8, 128], strides = [1, 1]} : vector<8x256xf32> to vector<8x128xf32>
      %157 = vector.extract_strided_slice %142 {offsets = [0, 256], sizes = [8, 128], strides = [1, 1]} : vector<8x384xf32> to vector<8x128xf32>
      %158 = vector.extract_strided_slice %144 {offsets = [0, 256], sizes = [8, 128], strides = [1, 1]} : vector<8x384xf32> to vector<8x128xf32>
      %159 = vector.broadcast %6 : vector<1x128xf32> to vector<8x128xf32>
      %160 = arith.addf %158, %159 : vector<8x128xf32>
      %161 = arith.mulf %155, %160 : vector<8x128xf32>
      %162 = arith.addf %157, %161 : vector<8x128xf32>
      %163 = math.tanh %162 : vector<8x128xf32>
      %164 = arith.subf %136, %163 : vector<8x128xf32>
      %165 = arith.mulf %156, %164 : vector<8x128xf32>
      %166 = arith.addf %163, %165 : vector<8x128xf32>
      %c5_i32 = arith.constant 5 : i32
      %167 = arith.index_cast %c5_i32 : i32 to index
      %c0_51 = arith.constant 0 : index
      %c0_52 = arith.constant 0 : index
      %168 = vector.load %arg2[%167, %c0_51, %c0_52] : memref<16x8x128xbf16, #tpu.memory_space<vmem>>, vector<1x8x128xbf16>
      %169 = vector.shape_cast %168 : vector<1x8x128xbf16> to vector<8x128xbf16>
      %cst_53 = arith.constant dense<0.000000e+00> : vector<8x384xf32>
      %170 = tpu.matmul %169, %3, %cst_53 {dimension_numbers = #tpu.dot_dimension_numbers<[1], [0], [0], [1], [0, 0, 1, 1], [], []>} : vector<8x128xbf16>, vector<128x384xbf16>, vector<8x384xf32> -> vector<8x384xf32>
      %171 = vector.broadcast %5 : vector<1x384xf32> to vector<8x384xf32>
      %172 = arith.addf %170, %171 : vector<8x384xf32>
      %173 = arith.truncf %166 : vector<8x128xf32> to vector<8x128xbf16>
      %cst_54 = arith.constant dense<0.000000e+00> : vector<8x384xf32>
      %174 = tpu.matmul %173, %4, %cst_54 {dimension_numbers = #tpu.dot_dimension_numbers<[1], [0], [0], [1], [0, 0, 1, 1], [], []>} : vector<8x128xbf16>, vector<128x384xbf16>, vector<8x384xf32> -> vector<8x384xf32>
      %175 = vector.extract_strided_slice %172 {offsets = [0, 0], sizes = [8, 256], strides = [1, 1]} : vector<8x384xf32> to vector<8x256xf32>
      %176 = vector.extract_strided_slice %174 {offsets = [0, 0], sizes = [8, 256], strides = [1, 1]} : vector<8x384xf32> to vector<8x256xf32>
      %177 = arith.addf %175, %176 : vector<8x256xf32>
      %cst_55 = arith.constant 5.000000e-01 : f32
      %178 = vector.broadcast %cst_55 : f32 to vector<8x256xf32>
      %179 = arith.mulf %178, %177 : vector<8x256xf32>
      %180 = math.tanh %179 : vector<8x256xf32>
      %cst_56 = arith.constant 5.000000e-01 : f32
      %181 = vector.broadcast %cst_56 : f32 to vector<8x256xf32>
      %182 = arith.mulf %181, %180 : vector<8x256xf32>
      %cst_57 = arith.constant 5.000000e-01 : f32
      %183 = vector.broadcast %cst_57 : f32 to vector<8x256xf32>
      %184 = arith.addf %182, %183 : vector<8x256xf32>
      %185 = vector.extract_strided_slice %184 {offsets = [0, 0], sizes = [8, 128], strides = [1, 1]} : vector<8x256xf32> to vector<8x128xf32>
      %186 = vector.extract_strided_slice %184 {offsets = [0, 128], sizes = [8, 128], strides = [1, 1]} : vector<8x256xf32> to vector<8x128xf32>
      %187 = vector.extract_strided_slice %172 {offsets = [0, 256], sizes = [8, 128], strides = [1, 1]} : vector<8x384xf32> to vector<8x128xf32>
      %188 = vector.extract_strided_slice %174 {offsets = [0, 256], sizes = [8, 128], strides = [1, 1]} : vector<8x384xf32> to vector<8x128xf32>
      %189 = vector.broadcast %6 : vector<1x128xf32> to vector<8x128xf32>
      %190 = arith.addf %188, %189 : vector<8x128xf32>
      %191 = arith.mulf %185, %190 : vector<8x128xf32>
      %192 = arith.addf %187, %191 : vector<8x128xf32>
      %193 = math.tanh %192 : vector<8x128xf32>
      %194 = arith.subf %166, %193 : vector<8x128xf32>
      %195 = arith.mulf %186, %194 : vector<8x128xf32>
      %196 = arith.addf %193, %195 : vector<8x128xf32>
      %c6_i32 = arith.constant 6 : i32
      %197 = arith.index_cast %c6_i32 : i32 to index
      %c0_58 = arith.constant 0 : index
      %c0_59 = arith.constant 0 : index
      %198 = vector.load %arg2[%197, %c0_58, %c0_59] : memref<16x8x128xbf16, #tpu.memory_space<vmem>>, vector<1x8x128xbf16>
      %199 = vector.shape_cast %198 : vector<1x8x128xbf16> to vector<8x128xbf16>
      %cst_60 = arith.constant dense<0.000000e+00> : vector<8x384xf32>
      %200 = tpu.matmul %199, %3, %cst_60 {dimension_numbers = #tpu.dot_dimension_numbers<[1], [0], [0], [1], [0, 0, 1, 1], [], []>} : vector<8x128xbf16>, vector<128x384xbf16>, vector<8x384xf32> -> vector<8x384xf32>
      %201 = vector.broadcast %5 : vector<1x384xf32> to vector<8x384xf32>
      %202 = arith.addf %200, %201 : vector<8x384xf32>
      %203 = arith.truncf %196 : vector<8x128xf32> to vector<8x128xbf16>
      %cst_61 = arith.constant dense<0.000000e+00> : vector<8x384xf32>
      %204 = tpu.matmul %203, %4, %cst_61 {dimension_numbers = #tpu.dot_dimension_numbers<[1], [0], [0], [1], [0, 0, 1, 1], [], []>} : vector<8x128xbf16>, vector<128x384xbf16>, vector<8x384xf32> -> vector<8x384xf32>
      %205 = vector.extract_strided_slice %202 {offsets = [0, 0], sizes = [8, 256], strides = [1, 1]} : vector<8x384xf32> to vector<8x256xf32>
      %206 = vector.extract_strided_slice %204 {offsets = [0, 0], sizes = [8, 256], strides = [1, 1]} : vector<8x384xf32> to vector<8x256xf32>
      %207 = arith.addf %205, %206 : vector<8x256xf32>
      %cst_62 = arith.constant 5.000000e-01 : f32
      %208 = vector.broadcast %cst_62 : f32 to vector<8x256xf32>
      %209 = arith.mulf %208, %207 : vector<8x256xf32>
      %210 = math.tanh %209 : vector<8x256xf32>
      %cst_63 = arith.constant 5.000000e-01 : f32
      %211 = vector.broadcast %cst_63 : f32 to vector<8x256xf32>
      %212 = arith.mulf %211, %210 : vector<8x256xf32>
      %cst_64 = arith.constant 5.000000e-01 : f32
      %213 = vector.broadcast %cst_64 : f32 to vector<8x256xf32>
      %214 = arith.addf %212, %213 : vector<8x256xf32>
      %215 = vector.extract_strided_slice %214 {offsets = [0, 0], sizes = [8, 128], strides = [1, 1]} : vector<8x256xf32> to vector<8x128xf32>
      %216 = vector.extract_strided_slice %214 {offsets = [0, 128], sizes = [8, 128], strides = [1, 1]} : vector<8x256xf32> to vector<8x128xf32>
      %217 = vector.extract_strided_slice %202 {offsets = [0, 256], sizes = [8, 128], strides = [1, 1]} : vector<8x384xf32> to vector<8x128xf32>
      %218 = vector.extract_strided_slice %204 {offsets = [0, 256], sizes = [8, 128], strides = [1, 1]} : vector<8x384xf32> to vector<8x128xf32>
      %219 = vector.broadcast %6 : vector<1x128xf32> to vector<8x128xf32>
      %220 = arith.addf %218, %219 : vector<8x128xf32>
      %221 = arith.mulf %215, %220 : vector<8x128xf32>
      %222 = arith.addf %217, %221 : vector<8x128xf32>
      %223 = math.tanh %222 : vector<8x128xf32>
      %224 = arith.subf %196, %223 : vector<8x128xf32>
      %225 = arith.mulf %216, %224 : vector<8x128xf32>
      %226 = arith.addf %223, %225 : vector<8x128xf32>
      %c7_i32 = arith.constant 7 : i32
      %227 = arith.index_cast %c7_i32 : i32 to index
      %c0_65 = arith.constant 0 : index
      %c0_66 = arith.constant 0 : index
      %228 = vector.load %arg2[%227, %c0_65, %c0_66] : memref<16x8x128xbf16, #tpu.memory_space<vmem>>, vector<1x8x128xbf16>
      %229 = vector.shape_cast %228 : vector<1x8x128xbf16> to vector<8x128xbf16>
      %cst_67 = arith.constant dense<0.000000e+00> : vector<8x384xf32>
      %230 = tpu.matmul %229, %3, %cst_67 {dimension_numbers = #tpu.dot_dimension_numbers<[1], [0], [0], [1], [0, 0, 1, 1], [], []>} : vector<8x128xbf16>, vector<128x384xbf16>, vector<8x384xf32> -> vector<8x384xf32>
      %231 = vector.broadcast %5 : vector<1x384xf32> to vector<8x384xf32>
      %232 = arith.addf %230, %231 : vector<8x384xf32>
      %233 = arith.truncf %226 : vector<8x128xf32> to vector<8x128xbf16>
      %cst_68 = arith.constant dense<0.000000e+00> : vector<8x384xf32>
      %234 = tpu.matmul %233, %4, %cst_68 {dimension_numbers = #tpu.dot_dimension_numbers<[1], [0], [0], [1], [0, 0, 1, 1], [], []>} : vector<8x128xbf16>, vector<128x384xbf16>, vector<8x384xf32> -> vector<8x384xf32>
      %235 = vector.extract_strided_slice %232 {offsets = [0, 0], sizes = [8, 256], strides = [1, 1]} : vector<8x384xf32> to vector<8x256xf32>
      %236 = vector.extract_strided_slice %234 {offsets = [0, 0], sizes = [8, 256], strides = [1, 1]} : vector<8x384xf32> to vector<8x256xf32>
      %237 = arith.addf %235, %236 : vector<8x256xf32>
      %cst_69 = arith.constant 5.000000e-01 : f32
      %238 = vector.broadcast %cst_69 : f32 to vector<8x256xf32>
      %239 = arith.mulf %238, %237 : vector<8x256xf32>
      %240 = math.tanh %239 : vector<8x256xf32>
      %cst_70 = arith.constant 5.000000e-01 : f32
      %241 = vector.broadcast %cst_70 : f32 to vector<8x256xf32>
      %242 = arith.mulf %241, %240 : vector<8x256xf32>
      %cst_71 = arith.constant 5.000000e-01 : f32
      %243 = vector.broadcast %cst_71 : f32 to vector<8x256xf32>
      %244 = arith.addf %242, %243 : vector<8x256xf32>
      %245 = vector.extract_strided_slice %244 {offsets = [0, 0], sizes = [8, 128], strides = [1, 1]} : vector<8x256xf32> to vector<8x128xf32>
      %246 = vector.extract_strided_slice %244 {offsets = [0, 128], sizes = [8, 128], strides = [1, 1]} : vector<8x256xf32> to vector<8x128xf32>
      %247 = vector.extract_strided_slice %232 {offsets = [0, 256], sizes = [8, 128], strides = [1, 1]} : vector<8x384xf32> to vector<8x128xf32>
      %248 = vector.extract_strided_slice %234 {offsets = [0, 256], sizes = [8, 128], strides = [1, 1]} : vector<8x384xf32> to vector<8x128xf32>
      %249 = vector.broadcast %6 : vector<1x128xf32> to vector<8x128xf32>
      %250 = arith.addf %248, %249 : vector<8x128xf32>
      %251 = arith.mulf %245, %250 : vector<8x128xf32>
      %252 = arith.addf %247, %251 : vector<8x128xf32>
      %253 = math.tanh %252 : vector<8x128xf32>
      %254 = arith.subf %226, %253 : vector<8x128xf32>
      %255 = arith.mulf %246, %254 : vector<8x128xf32>
      %256 = arith.addf %253, %255 : vector<8x128xf32>
      %c8_i32 = arith.constant 8 : i32
      %257 = arith.index_cast %c8_i32 : i32 to index
      %c0_72 = arith.constant 0 : index
      %c0_73 = arith.constant 0 : index
      %258 = vector.load %arg2[%257, %c0_72, %c0_73] : memref<16x8x128xbf16, #tpu.memory_space<vmem>>, vector<1x8x128xbf16>
      %259 = vector.shape_cast %258 : vector<1x8x128xbf16> to vector<8x128xbf16>
      %cst_74 = arith.constant dense<0.000000e+00> : vector<8x384xf32>
      %260 = tpu.matmul %259, %3, %cst_74 {dimension_numbers = #tpu.dot_dimension_numbers<[1], [0], [0], [1], [0, 0, 1, 1], [], []>} : vector<8x128xbf16>, vector<128x384xbf16>, vector<8x384xf32> -> vector<8x384xf32>
      %261 = vector.broadcast %5 : vector<1x384xf32> to vector<8x384xf32>
      %262 = arith.addf %260, %261 : vector<8x384xf32>
      %263 = arith.truncf %256 : vector<8x128xf32> to vector<8x128xbf16>
      %cst_75 = arith.constant dense<0.000000e+00> : vector<8x384xf32>
      %264 = tpu.matmul %263, %4, %cst_75 {dimension_numbers = #tpu.dot_dimension_numbers<[1], [0], [0], [1], [0, 0, 1, 1], [], []>} : vector<8x128xbf16>, vector<128x384xbf16>, vector<8x384xf32> -> vector<8x384xf32>
      %265 = vector.extract_strided_slice %262 {offsets = [0, 0], sizes = [8, 256], strides = [1, 1]} : vector<8x384xf32> to vector<8x256xf32>
      %266 = vector.extract_strided_slice %264 {offsets = [0, 0], sizes = [8, 256], strides = [1, 1]} : vector<8x384xf32> to vector<8x256xf32>
      %267 = arith.addf %265, %266 : vector<8x256xf32>
      %cst_76 = arith.constant 5.000000e-01 : f32
      %268 = vector.broadcast %cst_76 : f32 to vector<8x256xf32>
      %269 = arith.mulf %268, %267 : vector<8x256xf32>
      %270 = math.tanh %269 : vector<8x256xf32>
      %cst_77 = arith.constant 5.000000e-01 : f32
      %271 = vector.broadcast %cst_77 : f32 to vector<8x256xf32>
      %272 = arith.mulf %271, %270 : vector<8x256xf32>
      %cst_78 = arith.constant 5.000000e-01 : f32
      %273 = vector.broadcast %cst_78 : f32 to vector<8x256xf32>
      %274 = arith.addf %272, %273 : vector<8x256xf32>
      %275 = vector.extract_strided_slice %274 {offsets = [0, 0], sizes = [8, 128], strides = [1, 1]} : vector<8x256xf32> to vector<8x128xf32>
      %276 = vector.extract_strided_slice %274 {offsets = [0, 128], sizes = [8, 128], strides = [1, 1]} : vector<8x256xf32> to vector<8x128xf32>
      %277 = vector.extract_strided_slice %262 {offsets = [0, 256], sizes = [8, 128], strides = [1, 1]} : vector<8x384xf32> to vector<8x128xf32>
      %278 = vector.extract_strided_slice %264 {offsets = [0, 256], sizes = [8, 128], strides = [1, 1]} : vector<8x384xf32> to vector<8x128xf32>
      %279 = vector.broadcast %6 : vector<1x128xf32> to vector<8x128xf32>
      %280 = arith.addf %278, %279 : vector<8x128xf32>
      %281 = arith.mulf %275, %280 : vector<8x128xf32>
      %282 = arith.addf %277, %281 : vector<8x128xf32>
      %283 = math.tanh %282 : vector<8x128xf32>
      %284 = arith.subf %256, %283 : vector<8x128xf32>
      %285 = arith.mulf %276, %284 : vector<8x128xf32>
      %286 = arith.addf %283, %285 : vector<8x128xf32>
      %c9_i32 = arith.constant 9 : i32
      %287 = arith.index_cast %c9_i32 : i32 to index
      %c0_79 = arith.constant 0 : index
      %c0_80 = arith.constant 0 : index
      %288 = vector.load %arg2[%287, %c0_79, %c0_80] : memref<16x8x128xbf16, #tpu.memory_space<vmem>>, vector<1x8x128xbf16>
      %289 = vector.shape_cast %288 : vector<1x8x128xbf16> to vector<8x128xbf16>
      %cst_81 = arith.constant dense<0.000000e+00> : vector<8x384xf32>
      %290 = tpu.matmul %289, %3, %cst_81 {dimension_numbers = #tpu.dot_dimension_numbers<[1], [0], [0], [1], [0, 0, 1, 1], [], []>} : vector<8x128xbf16>, vector<128x384xbf16>, vector<8x384xf32> -> vector<8x384xf32>
      %291 = vector.broadcast %5 : vector<1x384xf32> to vector<8x384xf32>
      %292 = arith.addf %290, %291 : vector<8x384xf32>
      %293 = arith.truncf %286 : vector<8x128xf32> to vector<8x128xbf16>
      %cst_82 = arith.constant dense<0.000000e+00> : vector<8x384xf32>
      %294 = tpu.matmul %293, %4, %cst_82 {dimension_numbers = #tpu.dot_dimension_numbers<[1], [0], [0], [1], [0, 0, 1, 1], [], []>} : vector<8x128xbf16>, vector<128x384xbf16>, vector<8x384xf32> -> vector<8x384xf32>
      %295 = vector.extract_strided_slice %292 {offsets = [0, 0], sizes = [8, 256], strides = [1, 1]} : vector<8x384xf32> to vector<8x256xf32>
      %296 = vector.extract_strided_slice %294 {offsets = [0, 0], sizes = [8, 256], strides = [1, 1]} : vector<8x384xf32> to vector<8x256xf32>
      %297 = arith.addf %295, %296 : vector<8x256xf32>
      %cst_83 = arith.constant 5.000000e-01 : f32
      %298 = vector.broadcast %cst_83 : f32 to vector<8x256xf32>
      %299 = arith.mulf %298, %297 : vector<8x256xf32>
      %300 = math.tanh %299 : vector<8x256xf32>
      %cst_84 = arith.constant 5.000000e-01 : f32
      %301 = vector.broadcast %cst_84 : f32 to vector<8x256xf32>
      %302 = arith.mulf %301, %300 : vector<8x256xf32>
      %cst_85 = arith.constant 5.000000e-01 : f32
      %303 = vector.broadcast %cst_85 : f32 to vector<8x256xf32>
      %304 = arith.addf %302, %303 : vector<8x256xf32>
      %305 = vector.extract_strided_slice %304 {offsets = [0, 0], sizes = [8, 128], strides = [1, 1]} : vector<8x256xf32> to vector<8x128xf32>
      %306 = vector.extract_strided_slice %304 {offsets = [0, 128], sizes = [8, 128], strides = [1, 1]} : vector<8x256xf32> to vector<8x128xf32>
      %307 = vector.extract_strided_slice %292 {offsets = [0, 256], sizes = [8, 128], strides = [1, 1]} : vector<8x384xf32> to vector<8x128xf32>
      %308 = vector.extract_strided_slice %294 {offsets = [0, 256], sizes = [8, 128], strides = [1, 1]} : vector<8x384xf32> to vector<8x128xf32>
      %309 = vector.broadcast %6 : vector<1x128xf32> to vector<8x128xf32>
      %310 = arith.addf %308, %309 : vector<8x128xf32>
      %311 = arith.mulf %305, %310 : vector<8x128xf32>
      %312 = arith.addf %307, %311 : vector<8x128xf32>
      %313 = math.tanh %312 : vector<8x128xf32>
      %314 = arith.subf %286, %313 : vector<8x128xf32>
      %315 = arith.mulf %306, %314 : vector<8x128xf32>
      %316 = arith.addf %313, %315 : vector<8x128xf32>
      %c10_i32 = arith.constant 10 : i32
      %317 = arith.index_cast %c10_i32 : i32 to index
      %c0_86 = arith.constant 0 : index
      %c0_87 = arith.constant 0 : index
      %318 = vector.load %arg2[%317, %c0_86, %c0_87] : memref<16x8x128xbf16, #tpu.memory_space<vmem>>, vector<1x8x128xbf16>
      %319 = vector.shape_cast %318 : vector<1x8x128xbf16> to vector<8x128xbf16>
      %cst_88 = arith.constant dense<0.000000e+00> : vector<8x384xf32>
      %320 = tpu.matmul %319, %3, %cst_88 {dimension_numbers = #tpu.dot_dimension_numbers<[1], [0], [0], [1], [0, 0, 1, 1], [], []>} : vector<8x128xbf16>, vector<128x384xbf16>, vector<8x384xf32> -> vector<8x384xf32>
      %321 = vector.broadcast %5 : vector<1x384xf32> to vector<8x384xf32>
      %322 = arith.addf %320, %321 : vector<8x384xf32>
      %323 = arith.truncf %316 : vector<8x128xf32> to vector<8x128xbf16>
      %cst_89 = arith.constant dense<0.000000e+00> : vector<8x384xf32>
      %324 = tpu.matmul %323, %4, %cst_89 {dimension_numbers = #tpu.dot_dimension_numbers<[1], [0], [0], [1], [0, 0, 1, 1], [], []>} : vector<8x128xbf16>, vector<128x384xbf16>, vector<8x384xf32> -> vector<8x384xf32>
      %325 = vector.extract_strided_slice %322 {offsets = [0, 0], sizes = [8, 256], strides = [1, 1]} : vector<8x384xf32> to vector<8x256xf32>
      %326 = vector.extract_strided_slice %324 {offsets = [0, 0], sizes = [8, 256], strides = [1, 1]} : vector<8x384xf32> to vector<8x256xf32>
      %327 = arith.addf %325, %326 : vector<8x256xf32>
      %cst_90 = arith.constant 5.000000e-01 : f32
      %328 = vector.broadcast %cst_90 : f32 to vector<8x256xf32>
      %329 = arith.mulf %328, %327 : vector<8x256xf32>
      %330 = math.tanh %329 : vector<8x256xf32>
      %cst_91 = arith.constant 5.000000e-01 : f32
      %331 = vector.broadcast %cst_91 : f32 to vector<8x256xf32>
      %332 = arith.mulf %331, %330 : vector<8x256xf32>
      %cst_92 = arith.constant 5.000000e-01 : f32
      %333 = vector.broadcast %cst_92 : f32 to vector<8x256xf32>
      %334 = arith.addf %332, %333 : vector<8x256xf32>
      %335 = vector.extract_strided_slice %334 {offsets = [0, 0], sizes = [8, 128], strides = [1, 1]} : vector<8x256xf32> to vector<8x128xf32>
      %336 = vector.extract_strided_slice %334 {offsets = [0, 128], sizes = [8, 128], strides = [1, 1]} : vector<8x256xf32> to vector<8x128xf32>
      %337 = vector.extract_strided_slice %322 {offsets = [0, 256], sizes = [8, 128], strides = [1, 1]} : vector<8x384xf32> to vector<8x128xf32>
      %338 = vector.extract_strided_slice %324 {offsets = [0, 256], sizes = [8, 128], strides = [1, 1]} : vector<8x384xf32> to vector<8x128xf32>
      %339 = vector.broadcast %6 : vector<1x128xf32> to vector<8x128xf32>
      %340 = arith.addf %338, %339 : vector<8x128xf32>
      %341 = arith.mulf %335, %340 : vector<8x128xf32>
      %342 = arith.addf %337, %341 : vector<8x128xf32>
      %343 = math.tanh %342 : vector<8x128xf32>
      %344 = arith.subf %316, %343 : vector<8x128xf32>
      %345 = arith.mulf %336, %344 : vector<8x128xf32>
      %346 = arith.addf %343, %345 : vector<8x128xf32>
      %c11_i32 = arith.constant 11 : i32
      %347 = arith.index_cast %c11_i32 : i32 to index
      %c0_93 = arith.constant 0 : index
      %c0_94 = arith.constant 0 : index
      %348 = vector.load %arg2[%347, %c0_93, %c0_94] : memref<16x8x128xbf16, #tpu.memory_space<vmem>>, vector<1x8x128xbf16>
      %349 = vector.shape_cast %348 : vector<1x8x128xbf16> to vector<8x128xbf16>
      %cst_95 = arith.constant dense<0.000000e+00> : vector<8x384xf32>
      %350 = tpu.matmul %349, %3, %cst_95 {dimension_numbers = #tpu.dot_dimension_numbers<[1], [0], [0], [1], [0, 0, 1, 1], [], []>} : vector<8x128xbf16>, vector<128x384xbf16>, vector<8x384xf32> -> vector<8x384xf32>
      %351 = vector.broadcast %5 : vector<1x384xf32> to vector<8x384xf32>
      %352 = arith.addf %350, %351 : vector<8x384xf32>
      %353 = arith.truncf %346 : vector<8x128xf32> to vector<8x128xbf16>
      %cst_96 = arith.constant dense<0.000000e+00> : vector<8x384xf32>
      %354 = tpu.matmul %353, %4, %cst_96 {dimension_numbers = #tpu.dot_dimension_numbers<[1], [0], [0], [1], [0, 0, 1, 1], [], []>} : vector<8x128xbf16>, vector<128x384xbf16>, vector<8x384xf32> -> vector<8x384xf32>
      %355 = vector.extract_strided_slice %352 {offsets = [0, 0], sizes = [8, 256], strides = [1, 1]} : vector<8x384xf32> to vector<8x256xf32>
      %356 = vector.extract_strided_slice %354 {offsets = [0, 0], sizes = [8, 256], strides = [1, 1]} : vector<8x384xf32> to vector<8x256xf32>
      %357 = arith.addf %355, %356 : vector<8x256xf32>
      %cst_97 = arith.constant 5.000000e-01 : f32
      %358 = vector.broadcast %cst_97 : f32 to vector<8x256xf32>
      %359 = arith.mulf %358, %357 : vector<8x256xf32>
      %360 = math.tanh %359 : vector<8x256xf32>
      %cst_98 = arith.constant 5.000000e-01 : f32
      %361 = vector.broadcast %cst_98 : f32 to vector<8x256xf32>
      %362 = arith.mulf %361, %360 : vector<8x256xf32>
      %cst_99 = arith.constant 5.000000e-01 : f32
      %363 = vector.broadcast %cst_99 : f32 to vector<8x256xf32>
      %364 = arith.addf %362, %363 : vector<8x256xf32>
      %365 = vector.extract_strided_slice %364 {offsets = [0, 0], sizes = [8, 128], strides = [1, 1]} : vector<8x256xf32> to vector<8x128xf32>
      %366 = vector.extract_strided_slice %364 {offsets = [0, 128], sizes = [8, 128], strides = [1, 1]} : vector<8x256xf32> to vector<8x128xf32>
      %367 = vector.extract_strided_slice %352 {offsets = [0, 256], sizes = [8, 128], strides = [1, 1]} : vector<8x384xf32> to vector<8x128xf32>
      %368 = vector.extract_strided_slice %354 {offsets = [0, 256], sizes = [8, 128], strides = [1, 1]} : vector<8x384xf32> to vector<8x128xf32>
      %369 = vector.broadcast %6 : vector<1x128xf32> to vector<8x128xf32>
      %370 = arith.addf %368, %369 : vector<8x128xf32>
      %371 = arith.mulf %365, %370 : vector<8x128xf32>
      %372 = arith.addf %367, %371 : vector<8x128xf32>
      %373 = math.tanh %372 : vector<8x128xf32>
      %374 = arith.subf %346, %373 : vector<8x128xf32>
      %375 = arith.mulf %366, %374 : vector<8x128xf32>
      %376 = arith.addf %373, %375 : vector<8x128xf32>
      %c12_i32 = arith.constant 12 : i32
      %377 = arith.index_cast %c12_i32 : i32 to index
      %c0_100 = arith.constant 0 : index
      %c0_101 = arith.constant 0 : index
      %378 = vector.load %arg2[%377, %c0_100, %c0_101] : memref<16x8x128xbf16, #tpu.memory_space<vmem>>, vector<1x8x128xbf16>
      %379 = vector.shape_cast %378 : vector<1x8x128xbf16> to vector<8x128xbf16>
      %cst_102 = arith.constant dense<0.000000e+00> : vector<8x384xf32>
      %380 = tpu.matmul %379, %3, %cst_102 {dimension_numbers = #tpu.dot_dimension_numbers<[1], [0], [0], [1], [0, 0, 1, 1], [], []>} : vector<8x128xbf16>, vector<128x384xbf16>, vector<8x384xf32> -> vector<8x384xf32>
      %381 = vector.broadcast %5 : vector<1x384xf32> to vector<8x384xf32>
      %382 = arith.addf %380, %381 : vector<8x384xf32>
      %383 = arith.truncf %376 : vector<8x128xf32> to vector<8x128xbf16>
      %cst_103 = arith.constant dense<0.000000e+00> : vector<8x384xf32>
      %384 = tpu.matmul %383, %4, %cst_103 {dimension_numbers = #tpu.dot_dimension_numbers<[1], [0], [0], [1], [0, 0, 1, 1], [], []>} : vector<8x128xbf16>, vector<128x384xbf16>, vector<8x384xf32> -> vector<8x384xf32>
      %385 = vector.extract_strided_slice %382 {offsets = [0, 0], sizes = [8, 256], strides = [1, 1]} : vector<8x384xf32> to vector<8x256xf32>
      %386 = vector.extract_strided_slice %384 {offsets = [0, 0], sizes = [8, 256], strides = [1, 1]} : vector<8x384xf32> to vector<8x256xf32>
      %387 = arith.addf %385, %386 : vector<8x256xf32>
      %cst_104 = arith.constant 5.000000e-01 : f32
      %388 = vector.broadcast %cst_104 : f32 to vector<8x256xf32>
      %389 = arith.mulf %388, %387 : vector<8x256xf32>
      %390 = math.tanh %389 : vector<8x256xf32>
      %cst_105 = arith.constant 5.000000e-01 : f32
      %391 = vector.broadcast %cst_105 : f32 to vector<8x256xf32>
      %392 = arith.mulf %391, %390 : vector<8x256xf32>
      %cst_106 = arith.constant 5.000000e-01 : f32
      %393 = vector.broadcast %cst_106 : f32 to vector<8x256xf32>
      %394 = arith.addf %392, %393 : vector<8x256xf32>
      %395 = vector.extract_strided_slice %394 {offsets = [0, 0], sizes = [8, 128], strides = [1, 1]} : vector<8x256xf32> to vector<8x128xf32>
      %396 = vector.extract_strided_slice %394 {offsets = [0, 128], sizes = [8, 128], strides = [1, 1]} : vector<8x256xf32> to vector<8x128xf32>
      %397 = vector.extract_strided_slice %382 {offsets = [0, 256], sizes = [8, 128], strides = [1, 1]} : vector<8x384xf32> to vector<8x128xf32>
      %398 = vector.extract_strided_slice %384 {offsets = [0, 256], sizes = [8, 128], strides = [1, 1]} : vector<8x384xf32> to vector<8x128xf32>
      %399 = vector.broadcast %6 : vector<1x128xf32> to vector<8x128xf32>
      %400 = arith.addf %398, %399 : vector<8x128xf32>
      %401 = arith.mulf %395, %400 : vector<8x128xf32>
      %402 = arith.addf %397, %401 : vector<8x128xf32>
      %403 = math.tanh %402 : vector<8x128xf32>
      %404 = arith.subf %376, %403 : vector<8x128xf32>
      %405 = arith.mulf %396, %404 : vector<8x128xf32>
      %406 = arith.addf %403, %405 : vector<8x128xf32>
      %c13_i32 = arith.constant 13 : i32
      %407 = arith.index_cast %c13_i32 : i32 to index
      %c0_107 = arith.constant 0 : index
      %c0_108 = arith.constant 0 : index
      %408 = vector.load %arg2[%407, %c0_107, %c0_108] : memref<16x8x128xbf16, #tpu.memory_space<vmem>>, vector<1x8x128xbf16>
      %409 = vector.shape_cast %408 : vector<1x8x128xbf16> to vector<8x128xbf16>
      %cst_109 = arith.constant dense<0.000000e+00> : vector<8x384xf32>
      %410 = tpu.matmul %409, %3, %cst_109 {dimension_numbers = #tpu.dot_dimension_numbers<[1], [0], [0], [1], [0, 0, 1, 1], [], []>} : vector<8x128xbf16>, vector<128x384xbf16>, vector<8x384xf32> -> vector<8x384xf32>
      %411 = vector.broadcast %5 : vector<1x384xf32> to vector<8x384xf32>
      %412 = arith.addf %410, %411 : vector<8x384xf32>
      %413 = arith.truncf %406 : vector<8x128xf32> to vector<8x128xbf16>
      %cst_110 = arith.constant dense<0.000000e+00> : vector<8x384xf32>
      %414 = tpu.matmul %413, %4, %cst_110 {dimension_numbers = #tpu.dot_dimension_numbers<[1], [0], [0], [1], [0, 0, 1, 1], [], []>} : vector<8x128xbf16>, vector<128x384xbf16>, vector<8x384xf32> -> vector<8x384xf32>
      %415 = vector.extract_strided_slice %412 {offsets = [0, 0], sizes = [8, 256], strides = [1, 1]} : vector<8x384xf32> to vector<8x256xf32>
      %416 = vector.extract_strided_slice %414 {offsets = [0, 0], sizes = [8, 256], strides = [1, 1]} : vector<8x384xf32> to vector<8x256xf32>
      %417 = arith.addf %415, %416 : vector<8x256xf32>
      %cst_111 = arith.constant 5.000000e-01 : f32
      %418 = vector.broadcast %cst_111 : f32 to vector<8x256xf32>
      %419 = arith.mulf %418, %417 : vector<8x256xf32>
      %420 = math.tanh %419 : vector<8x256xf32>
      %cst_112 = arith.constant 5.000000e-01 : f32
      %421 = vector.broadcast %cst_112 : f32 to vector<8x256xf32>
      %422 = arith.mulf %421, %420 : vector<8x256xf32>
      %cst_113 = arith.constant 5.000000e-01 : f32
      %423 = vector.broadcast %cst_113 : f32 to vector<8x256xf32>
      %424 = arith.addf %422, %423 : vector<8x256xf32>
      %425 = vector.extract_strided_slice %424 {offsets = [0, 0], sizes = [8, 128], strides = [1, 1]} : vector<8x256xf32> to vector<8x128xf32>
      %426 = vector.extract_strided_slice %424 {offsets = [0, 128], sizes = [8, 128], strides = [1, 1]} : vector<8x256xf32> to vector<8x128xf32>
      %427 = vector.extract_strided_slice %412 {offsets = [0, 256], sizes = [8, 128], strides = [1, 1]} : vector<8x384xf32> to vector<8x128xf32>
      %428 = vector.extract_strided_slice %414 {offsets = [0, 256], sizes = [8, 128], strides = [1, 1]} : vector<8x384xf32> to vector<8x128xf32>
      %429 = vector.broadcast %6 : vector<1x128xf32> to vector<8x128xf32>
      %430 = arith.addf %428, %429 : vector<8x128xf32>
      %431 = arith.mulf %425, %430 : vector<8x128xf32>
      %432 = arith.addf %427, %431 : vector<8x128xf32>
      %433 = math.tanh %432 : vector<8x128xf32>
      %434 = arith.subf %406, %433 : vector<8x128xf32>
      %435 = arith.mulf %426, %434 : vector<8x128xf32>
      %436 = arith.addf %433, %435 : vector<8x128xf32>
      %c14_i32 = arith.constant 14 : i32
      %437 = arith.index_cast %c14_i32 : i32 to index
      %c0_114 = arith.constant 0 : index
      %c0_115 = arith.constant 0 : index
      %438 = vector.load %arg2[%437, %c0_114, %c0_115] : memref<16x8x128xbf16, #tpu.memory_space<vmem>>, vector<1x8x128xbf16>
      %439 = vector.shape_cast %438 : vector<1x8x128xbf16> to vector<8x128xbf16>
      %cst_116 = arith.constant dense<0.000000e+00> : vector<8x384xf32>
      %440 = tpu.matmul %439, %3, %cst_116 {dimension_numbers = #tpu.dot_dimension_numbers<[1], [0], [0], [1], [0, 0, 1, 1], [], []>} : vector<8x128xbf16>, vector<128x384xbf16>, vector<8x384xf32> -> vector<8x384xf32>
      %441 = vector.broadcast %5 : vector<1x384xf32> to vector<8x384xf32>
      %442 = arith.addf %440, %441 : vector<8x384xf32>
      %443 = arith.truncf %436 : vector<8x128xf32> to vector<8x128xbf16>
      %cst_117 = arith.constant dense<0.000000e+00> : vector<8x384xf32>
      %444 = tpu.matmul %443, %4, %cst_117 {dimension_numbers = #tpu.dot_dimension_numbers<[1], [0], [0], [1], [0, 0, 1, 1], [], []>} : vector<8x128xbf16>, vector<128x384xbf16>, vector<8x384xf32> -> vector<8x384xf32>
      %445 = vector.extract_strided_slice %442 {offsets = [0, 0], sizes = [8, 256], strides = [1, 1]} : vector<8x384xf32> to vector<8x256xf32>
      %446 = vector.extract_strided_slice %444 {offsets = [0, 0], sizes = [8, 256], strides = [1, 1]} : vector<8x384xf32> to vector<8x256xf32>
      %447 = arith.addf %445, %446 : vector<8x256xf32>
      %cst_118 = arith.constant 5.000000e-01 : f32
      %448 = vector.broadcast %cst_118 : f32 to vector<8x256xf32>
      %449 = arith.mulf %448, %447 : vector<8x256xf32>
      %450 = math.tanh %449 : vector<8x256xf32>
      %cst_119 = arith.constant 5.000000e-01 : f32
      %451 = vector.broadcast %cst_119 : f32 to vector<8x256xf32>
      %452 = arith.mulf %451, %450 : vector<8x256xf32>
      %cst_120 = arith.constant 5.000000e-01 : f32
      %453 = vector.broadcast %cst_120 : f32 to vector<8x256xf32>
      %454 = arith.addf %452, %453 : vector<8x256xf32>
      %455 = vector.extract_strided_slice %454 {offsets = [0, 0], sizes = [8, 128], strides = [1, 1]} : vector<8x256xf32> to vector<8x128xf32>
      %456 = vector.extract_strided_slice %454 {offsets = [0, 128], sizes = [8, 128], strides = [1, 1]} : vector<8x256xf32> to vector<8x128xf32>
      %457 = vector.extract_strided_slice %442 {offsets = [0, 256], sizes = [8, 128], strides = [1, 1]} : vector<8x384xf32> to vector<8x128xf32>
      %458 = vector.extract_strided_slice %444 {offsets = [0, 256], sizes = [8, 128], strides = [1, 1]} : vector<8x384xf32> to vector<8x128xf32>
      %459 = vector.broadcast %6 : vector<1x128xf32> to vector<8x128xf32>
      %460 = arith.addf %458, %459 : vector<8x128xf32>
      %461 = arith.mulf %455, %460 : vector<8x128xf32>
      %462 = arith.addf %457, %461 : vector<8x128xf32>
      %463 = math.tanh %462 : vector<8x128xf32>
      %464 = arith.subf %436, %463 : vector<8x128xf32>
      %465 = arith.mulf %456, %464 : vector<8x128xf32>
      %466 = arith.addf %463, %465 : vector<8x128xf32>
      %c15_i32 = arith.constant 15 : i32
      %467 = arith.index_cast %c15_i32 : i32 to index
      %c0_121 = arith.constant 0 : index
      %c0_122 = arith.constant 0 : index
      %468 = vector.load %arg2[%467, %c0_121, %c0_122] : memref<16x8x128xbf16, #tpu.memory_space<vmem>>, vector<1x8x128xbf16>
      %469 = vector.shape_cast %468 : vector<1x8x128xbf16> to vector<8x128xbf16>
      %cst_123 = arith.constant dense<0.000000e+00> : vector<8x384xf32>
      %470 = tpu.matmul %469, %3, %cst_123 {dimension_numbers = #tpu.dot_dimension_numbers<[1], [0], [0], [1], [0, 0, 1, 1], [], []>} : vector<8x128xbf16>, vector<128x384xbf16>, vector<8x384xf32> -> vector<8x384xf32>
      %471 = vector.broadcast %5 : vector<1x384xf32> to vector<8x384xf32>
      %472 = arith.addf %470, %471 : vector<8x384xf32>
      %473 = arith.truncf %466 : vector<8x128xf32> to vector<8x128xbf16>
      %cst_124 = arith.constant dense<0.000000e+00> : vector<8x384xf32>
      %474 = tpu.matmul %473, %4, %cst_124 {dimension_numbers = #tpu.dot_dimension_numbers<[1], [0], [0], [1], [0, 0, 1, 1], [], []>} : vector<8x128xbf16>, vector<128x384xbf16>, vector<8x384xf32> -> vector<8x384xf32>
      %475 = vector.extract_strided_slice %472 {offsets = [0, 0], sizes = [8, 256], strides = [1, 1]} : vector<8x384xf32> to vector<8x256xf32>
      %476 = vector.extract_strided_slice %474 {offsets = [0, 0], sizes = [8, 256], strides = [1, 1]} : vector<8x384xf32> to vector<8x256xf32>
      %477 = arith.addf %475, %476 : vector<8x256xf32>
      %cst_125 = arith.constant 5.000000e-01 : f32
      %478 = vector.broadcast %cst_125 : f32 to vector<8x256xf32>
      %479 = arith.mulf %478, %477 : vector<8x256xf32>
      %480 = math.tanh %479 : vector<8x256xf32>
      %cst_126 = arith.constant 5.000000e-01 : f32
      %481 = vector.broadcast %cst_126 : f32 to vector<8x256xf32>
      %482 = arith.mulf %481, %480 : vector<8x256xf32>
      %cst_127 = arith.constant 5.000000e-01 : f32
      %483 = vector.broadcast %cst_127 : f32 to vector<8x256xf32>
      %484 = arith.addf %482, %483 : vector<8x256xf32>
      %485 = vector.extract_strided_slice %484 {offsets = [0, 0], sizes = [8, 128], strides = [1, 1]} : vector<8x256xf32> to vector<8x128xf32>
      %486 = vector.extract_strided_slice %484 {offsets = [0, 128], sizes = [8, 128], strides = [1, 1]} : vector<8x256xf32> to vector<8x128xf32>
      %487 = vector.extract_strided_slice %472 {offsets = [0, 256], sizes = [8, 128], strides = [1, 1]} : vector<8x384xf32> to vector<8x128xf32>
      %488 = vector.extract_strided_slice %474 {offsets = [0, 256], sizes = [8, 128], strides = [1, 1]} : vector<8x384xf32> to vector<8x128xf32>
      %489 = vector.broadcast %6 : vector<1x128xf32> to vector<8x128xf32>
      %490 = arith.addf %488, %489 : vector<8x128xf32>
      %491 = arith.mulf %485, %490 : vector<8x128xf32>
      %492 = arith.addf %487, %491 : vector<8x128xf32>
      %493 = math.tanh %492 : vector<8x128xf32>
      %494 = arith.subf %466, %493 : vector<8x128xf32>
      %495 = arith.mulf %486, %494 : vector<8x128xf32>
      %496 = arith.addf %493, %495 : vector<8x128xf32>
      %c16_i32 = arith.constant 16 : i32
      %c0_128 = arith.constant 0 : index
      %c0_129 = arith.constant 0 : index
      %497 = vector.load %arg9[%c0_128, %c0_129] : memref<8x128xf32, #tpu.memory_space<vmem>>, vector<8x128xf32>
      tpu.vector_store %arg9[%c0_128, %c0_129], %496 {strides = array<i32>} : memref<8x128xf32, #tpu.memory_space<vmem>>, vector<8x128xf32>,
    } else {
    }
    %c1_i32_11 = arith.constant 1 : i32
    %11 = arith.cmpi eq, %arg1, %c1_i32_11 : i32
    %12 = arith.extui %11 : i1 to i32
    %c0_i32_12 = arith.constant 0 : i32
    %13 = arith.cmpi ne, %12, %c0_i32_12 : i32
    scf.if %13 {
      %c0_i32_15 = arith.constant 0 : i32
      %17 = arith.index_cast %c0_i32_15 : i32 to index
      %c0_16 = arith.constant 0 : index
      %c0_17 = arith.constant 0 : index
      %18 = vector.load %arg2[%17, %c0_16, %c0_17] : memref<16x8x128xbf16, #tpu.memory_space<vmem>>, vector<1x8x128xbf16>
      %19 = vector.shape_cast %18 : vector<1x8x128xbf16> to vector<8x128xbf16>
      %cst = arith.constant dense<0.000000e+00> : vector<8x384xf32>
      %20 = tpu.matmul %19, %3, %cst {dimension_numbers = #tpu.dot_dimension_numbers<[1], [0], [0], [1], [0, 0, 1, 1], [], []>} : vector<8x128xbf16>, vector<128x384xbf16>, vector<8x384xf32> -> vector<8x384xf32>
      %21 = vector.broadcast %5 : vector<1x384xf32> to vector<8x384xf32>
      %22 = arith.addf %20, %21 : vector<8x384xf32>
      %23 = arith.truncf %7 : vector<8x128xf32> to vector<8x128xbf16>
      %cst_18 = arith.constant dense<0.000000e+00> : vector<8x384xf32>
      %24 = tpu.matmul %23, %4, %cst_18 {dimension_numbers = #tpu.dot_dimension_numbers<[1], [0], [0], [1], [0, 0, 1, 1], [], []>} : vector<8x128xbf16>, vector<128x384xbf16>, vector<8x384xf32> -> vector<8x384xf32>
      %25 = vector.extract_strided_slice %22 {offsets = [0, 0], sizes = [8, 256], strides = [1, 1]} : vector<8x384xf32> to vector<8x256xf32>
      %26 = vector.extract_strided_slice %24 {offsets = [0, 0], sizes = [8, 256], strides = [1, 1]} : vector<8x384xf32> to vector<8x256xf32>
      %27 = arith.addf %25, %26 : vector<8x256xf32>
      %cst_19 = arith.constant 5.000000e-01 : f32
      %28 = vector.broadcast %cst_19 : f32 to vector<8x256xf32>
      %29 = arith.mulf %28, %27 : vector<8x256xf32>
      %30 = math.tanh %29 : vector<8x256xf32>
      %cst_20 = arith.constant 5.000000e-01 : f32
      %31 = vector.broadcast %cst_20 : f32 to vector<8x256xf32>
      %32 = arith.mulf %31, %30 : vector<8x256xf32>
      %cst_21 = arith.constant 5.000000e-01 : f32
      %33 = vector.broadcast %cst_21 : f32 to vector<8x256xf32>
      %34 = arith.addf %32, %33 : vector<8x256xf32>
      %35 = vector.extract_strided_slice %34 {offsets = [0, 0], sizes = [8, 128], strides = [1, 1]} : vector<8x256xf32> to vector<8x128xf32>
      %36 = vector.extract_strided_slice %34 {offsets = [0, 128], sizes = [8, 128], strides = [1, 1]} : vector<8x256xf32> to vector<8x128xf32>
      %37 = vector.extract_strided_slice %22 {offsets = [0, 256], sizes = [8, 128], strides = [1, 1]} : vector<8x384xf32> to vector<8x128xf32>
      %38 = vector.extract_strided_slice %24 {offsets = [0, 256], sizes = [8, 128], strides = [1, 1]} : vector<8x384xf32> to vector<8x128xf32>
      %39 = vector.broadcast %6 : vector<1x128xf32> to vector<8x128xf32>
      %40 = arith.addf %38, %39 : vector<8x128xf32>
      %41 = arith.mulf %35, %40 : vector<8x128xf32>
      %42 = arith.addf %37, %41 : vector<8x128xf32>
      %43 = math.tanh %42 : vector<8x128xf32>
      %44 = arith.subf %7, %43 : vector<8x128xf32>
      %45 = arith.mulf %36, %44 : vector<8x128xf32>
      %46 = arith.addf %43, %45 : vector<8x128xf32>
      %c16_i32 = arith.constant 16 : i32
      %47 = arith.muli %arg1, %c16_i32 : i32
      %48 = arith.addi %47, %c0_i32_15 : i32
      %c20_i32 = arith.constant 20 : i32
      %49 = arith.cmpi slt, %48, %c20_i32 : i32
      %50 = arith.extui %49 : i1 to i32
      %51 = arith.sitofp %50 : i32 to f32
      %52 = arith.subf %46, %7 : vector<8x128xf32>
      %53 = vector.broadcast %51 : f32 to vector<8x128xf32>
      %54 = arith.mulf %53, %52 : vector<8x128xf32>
      %55 = arith.addf %7, %54 : vector<8x128xf32>
      %c1_i32_22 = arith.constant 1 : i32
      %56 = arith.index_cast %c1_i32_22 : i32 to index
      %c0_23 = arith.constant 0 : index
      %c0_24 = arith.constant 0 : index
      %57 = vector.load %arg2[%56, %c0_23, %c0_24] : memref<16x8x128xbf16, #tpu.memory_space<vmem>>, vector<1x8x128xbf16>
      %58 = vector.shape_cast %57 : vector<1x8x128xbf16> to vector<8x128xbf16>
      %cst_25 = arith.constant dense<0.000000e+00> : vector<8x384xf32>
      %59 = tpu.matmul %58, %3, %cst_25 {dimension_numbers = #tpu.dot_dimension_numbers<[1], [0], [0], [1], [0, 0, 1, 1], [], []>} : vector<8x128xbf16>, vector<128x384xbf16>, vector<8x384xf32> -> vector<8x384xf32>
      %60 = vector.broadcast %5 : vector<1x384xf32> to vector<8x384xf32>
      %61 = arith.addf %59, %60 : vector<8x384xf32>
      %62 = arith.truncf %55 : vector<8x128xf32> to vector<8x128xbf16>
      %cst_26 = arith.constant dense<0.000000e+00> : vector<8x384xf32>
      %63 = tpu.matmul %62, %4, %cst_26 {dimension_numbers = #tpu.dot_dimension_numbers<[1], [0], [0], [1], [0, 0, 1, 1], [], []>} : vector<8x128xbf16>, vector<128x384xbf16>, vector<8x384xf32> -> vector<8x384xf32>
      %64 = vector.extract_strided_slice %61 {offsets = [0, 0], sizes = [8, 256], strides = [1, 1]} : vector<8x384xf32> to vector<8x256xf32>
      %65 = vector.extract_strided_slice %63 {offsets = [0, 0], sizes = [8, 256], strides = [1, 1]} : vector<8x384xf32> to vector<8x256xf32>
      %66 = arith.addf %64, %65 : vector<8x256xf32>
      %cst_27 = arith.constant 5.000000e-01 : f32
      %67 = vector.broadcast %cst_27 : f32 to vector<8x256xf32>
      %68 = arith.mulf %67, %66 : vector<8x256xf32>
      %69 = math.tanh %68 : vector<8x256xf32>
      %cst_28 = arith.constant 5.000000e-01 : f32
      %70 = vector.broadcast %cst_28 : f32 to vector<8x256xf32>
      %71 = arith.mulf %70, %69 : vector<8x256xf32>
      %cst_29 = arith.constant 5.000000e-01 : f32
      %72 = vector.broadcast %cst_29 : f32 to vector<8x256xf32>
      %73 = arith.addf %71, %72 : vector<8x256xf32>
      %74 = vector.extract_strided_slice %73 {offsets = [0, 0], sizes = [8, 128], strides = [1, 1]} : vector<8x256xf32> to vector<8x128xf32>
      %75 = vector.extract_strided_slice %73 {offsets = [0, 128], sizes = [8, 128], strides = [1, 1]} : vector<8x256xf32> to vector<8x128xf32>
      %76 = vector.extract_strided_slice %61 {offsets = [0, 256], sizes = [8, 128], strides = [1, 1]} : vector<8x384xf32> to vector<8x128xf32>
      %77 = vector.extract_strided_slice %63 {offsets = [0, 256], sizes = [8, 128], strides = [1, 1]} : vector<8x384xf32> to vector<8x128xf32>
      %78 = vector.broadcast %6 : vector<1x128xf32> to vector<8x128xf32>
      %79 = arith.addf %77, %78 : vector<8x128xf32>
      %80 = arith.mulf %74, %79 : vector<8x128xf32>
      %81 = arith.addf %76, %80 : vector<8x128xf32>
      %82 = math.tanh %81 : vector<8x128xf32>
      %83 = arith.subf %55, %82 : vector<8x128xf32>
      %84 = arith.mulf %75, %83 : vector<8x128xf32>
      %85 = arith.addf %82, %84 : vector<8x128xf32>
      %c16_i32_30 = arith.constant 16 : i32
      %86 = arith.muli %arg1, %c16_i32_30 : i32
      %87 = arith.addi %86, %c1_i32_22 : i32
      %c20_i32_31 = arith.constant 20 : i32
      %88 = arith.cmpi slt, %87, %c20_i32_31 : i32
      %89 = arith.extui %88 : i1 to i32
      %90 = arith.sitofp %89 : i32 to f32
      %91 = arith.subf %85, %55 : vector<8x128xf32>
      %92 = vector.broadcast %90 : f32 to vector<8x128xf32>
      %93 = arith.mulf %92, %91 : vector<8x128xf32>
      %94 = arith.addf %55, %93 : vector<8x128xf32>
      %c2_i32 = arith.constant 2 : i32
      %95 = arith.index_cast %c2_i32 : i32 to index
      %c0_32 = arith.constant 0 : index
      %c0_33 = arith.constant 0 : index
      %96 = vector.load %arg2[%95, %c0_32, %c0_33] : memref<16x8x128xbf16, #tpu.memory_space<vmem>>, vector<1x8x128xbf16>
      %97 = vector.shape_cast %96 : vector<1x8x128xbf16> to vector<8x128xbf16>
      %cst_34 = arith.constant dense<0.000000e+00> : vector<8x384xf32>
      %98 = tpu.matmul %97, %3, %cst_34 {dimension_numbers = #tpu.dot_dimension_numbers<[1], [0], [0], [1], [0, 0, 1, 1], [], []>} : vector<8x128xbf16>, vector<128x384xbf16>, vector<8x384xf32> -> vector<8x384xf32>
      %99 = vector.broadcast %5 : vector<1x384xf32> to vector<8x384xf32>
      %100 = arith.addf %98, %99 : vector<8x384xf32>
      %101 = arith.truncf %94 : vector<8x128xf32> to vector<8x128xbf16>
      %cst_35 = arith.constant dense<0.000000e+00> : vector<8x384xf32>
      %102 = tpu.matmul %101, %4, %cst_35 {dimension_numbers = #tpu.dot_dimension_numbers<[1], [0], [0], [1], [0, 0, 1, 1], [], []>} : vector<8x128xbf16>, vector<128x384xbf16>, vector<8x384xf32> -> vector<8x384xf32>
      %103 = vector.extract_strided_slice %100 {offsets = [0, 0], sizes = [8, 256], strides = [1, 1]} : vector<8x384xf32> to vector<8x256xf32>
      %104 = vector.extract_strided_slice %102 {offsets = [0, 0], sizes = [8, 256], strides = [1, 1]} : vector<8x384xf32> to vector<8x256xf32>
      %105 = arith.addf %103, %104 : vector<8x256xf32>
      %cst_36 = arith.constant 5.000000e-01 : f32
      %106 = vector.broadcast %cst_36 : f32 to vector<8x256xf32>
      %107 = arith.mulf %106, %105 : vector<8x256xf32>
      %108 = math.tanh %107 : vector<8x256xf32>
      %cst_37 = arith.constant 5.000000e-01 : f32
      %109 = vector.broadcast %cst_37 : f32 to vector<8x256xf32>
      %110 = arith.mulf %109, %108 : vector<8x256xf32>
      %cst_38 = arith.constant 5.000000e-01 : f32
      %111 = vector.broadcast %cst_38 : f32 to vector<8x256xf32>
      %112 = arith.addf %110, %111 : vector<8x256xf32>
      %113 = vector.extract_strided_slice %112 {offsets = [0, 0], sizes = [8, 128], strides = [1, 1]} : vector<8x256xf32> to vector<8x128xf32>
      %114 = vector.extract_strided_slice %112 {offsets = [0, 128], sizes = [8, 128], strides = [1, 1]} : vector<8x256xf32> to vector<8x128xf32>
      %115 = vector.extract_strided_slice %100 {offsets = [0, 256], sizes = [8, 128], strides = [1, 1]} : vector<8x384xf32> to vector<8x128xf32>
      %116 = vector.extract_strided_slice %102 {offsets = [0, 256], sizes = [8, 128], strides = [1, 1]} : vector<8x384xf32> to vector<8x128xf32>
      %117 = vector.broadcast %6 : vector<1x128xf32> to vector<8x128xf32>
      %118 = arith.addf %116, %117 : vector<8x128xf32>
      %119 = arith.mulf %113, %118 : vector<8x128xf32>
      %120 = arith.addf %115, %119 : vector<8x128xf32>
      %121 = math.tanh %120 : vector<8x128xf32>
      %122 = arith.subf %94, %121 : vector<8x128xf32>
      %123 = arith.mulf %114, %122 : vector<8x128xf32>
      %124 = arith.addf %121, %123 : vector<8x128xf32>
      %c16_i32_39 = arith.constant 16 : i32
      %125 = arith.muli %arg1, %c16_i32_39 : i32
      %126 = arith.addi %125, %c2_i32 : i32
      %c20_i32_40 = arith.constant 20 : i32
      %127 = arith.cmpi slt, %126, %c20_i32_40 : i32
      %128 = arith.extui %127 : i1 to i32
      %129 = arith.sitofp %128 : i32 to f32
      %130 = arith.subf %124, %94 : vector<8x128xf32>
      %131 = vector.broadcast %129 : f32 to vector<8x128xf32>
      %132 = arith.mulf %131, %130 : vector<8x128xf32>
      %133 = arith.addf %94, %132 : vector<8x128xf32>
      %c3_i32 = arith.constant 3 : i32
      %134 = arith.index_cast %c3_i32 : i32 to index
      %c0_41 = arith.constant 0 : index
      %c0_42 = arith.constant 0 : index
      %135 = vector.load %arg2[%134, %c0_41, %c0_42] : memref<16x8x128xbf16, #tpu.memory_space<vmem>>, vector<1x8x128xbf16>
      %136 = vector.shape_cast %135 : vector<1x8x128xbf16> to vector<8x128xbf16>
      %cst_43 = arith.constant dense<0.000000e+00> : vector<8x384xf32>
      %137 = tpu.matmul %136, %3, %cst_43 {dimension_numbers = #tpu.dot_dimension_numbers<[1], [0], [0], [1], [0, 0, 1, 1], [], []>} : vector<8x128xbf16>, vector<128x384xbf16>, vector<8x384xf32> -> vector<8x384xf32>
      %138 = vector.broadcast %5 : vector<1x384xf32> to vector<8x384xf32>
      %139 = arith.addf %137, %138 : vector<8x384xf32>
      %140 = arith.truncf %133 : vector<8x128xf32> to vector<8x128xbf16>
      %cst_44 = arith.constant dense<0.000000e+00> : vector<8x384xf32>
      %141 = tpu.matmul %140, %4, %cst_44 {dimension_numbers = #tpu.dot_dimension_numbers<[1], [0], [0], [1], [0, 0, 1, 1], [], []>} : vector<8x128xbf16>, vector<128x384xbf16>, vector<8x384xf32> -> vector<8x384xf32>
      %142 = vector.extract_strided_slice %139 {offsets = [0, 0], sizes = [8, 256], strides = [1, 1]} : vector<8x384xf32> to vector<8x256xf32>
      %143 = vector.extract_strided_slice %141 {offsets = [0, 0], sizes = [8, 256], strides = [1, 1]} : vector<8x384xf32> to vector<8x256xf32>
      %144 = arith.addf %142, %143 : vector<8x256xf32>
      %cst_45 = arith.constant 5.000000e-01 : f32
      %145 = vector.broadcast %cst_45 : f32 to vector<8x256xf32>
      %146 = arith.mulf %145, %144 : vector<8x256xf32>
      %147 = math.tanh %146 : vector<8x256xf32>
      %cst_46 = arith.constant 5.000000e-01 : f32
      %148 = vector.broadcast %cst_46 : f32 to vector<8x256xf32>
      %149 = arith.mulf %148, %147 : vector<8x256xf32>
      %cst_47 = arith.constant 5.000000e-01 : f32
      %150 = vector.broadcast %cst_47 : f32 to vector<8x256xf32>
      %151 = arith.addf %149, %150 : vector<8x256xf32>
      %152 = vector.extract_strided_slice %151 {offsets = [0, 0], sizes = [8, 128], strides = [1, 1]} : vector<8x256xf32> to vector<8x128xf32>
      %153 = vector.extract_strided_slice %151 {offsets = [0, 128], sizes = [8, 128], strides = [1, 1]} : vector<8x256xf32> to vector<8x128xf32>
      %154 = vector.extract_strided_slice %139 {offsets = [0, 256], sizes = [8, 128], strides = [1, 1]} : vector<8x384xf32> to vector<8x128xf32>
      %155 = vector.extract_strided_slice %141 {offsets = [0, 256], sizes = [8, 128], strides = [1, 1]} : vector<8x384xf32> to vector<8x128xf32>
      %156 = vector.broadcast %6 : vector<1x128xf32> to vector<8x128xf32>
      %157 = arith.addf %155, %156 : vector<8x128xf32>
      %158 = arith.mulf %152, %157 : vector<8x128xf32>
      %159 = arith.addf %154, %158 : vector<8x128xf32>
      %160 = math.tanh %159 : vector<8x128xf32>
      %161 = arith.subf %133, %160 : vector<8x128xf32>
      %162 = arith.mulf %153, %161 : vector<8x128xf32>
      %163 = arith.addf %160, %162 : vector<8x128xf32>
      %c16_i32_48 = arith.constant 16 : i32
      %164 = arith.muli %arg1, %c16_i32_48 : i32
      %165 = arith.addi %164, %c3_i32 : i32
      %c20_i32_49 = arith.constant 20 : i32
      %166 = arith.cmpi slt, %165, %c20_i32_49 : i32
      %167 = arith.extui %166 : i1 to i32
      %168 = arith.sitofp %167 : i32 to f32
      %169 = arith.subf %163, %133 : vector<8x128xf32>
      %170 = vector.broadcast %168 : f32 to vector<8x128xf32>
      %171 = arith.mulf %170, %169 : vector<8x128xf32>
      %172 = arith.addf %133, %171 : vector<8x128xf32>
      %c4_i32 = arith.constant 4 : i32
      %173 = arith.index_cast %c4_i32 : i32 to index
      %c0_50 = arith.constant 0 : index
      %c0_51 = arith.constant 0 : index
      %174 = vector.load %arg2[%173, %c0_50, %c0_51] : memref<16x8x128xbf16, #tpu.memory_space<vmem>>, vector<1x8x128xbf16>
      %175 = vector.shape_cast %174 : vector<1x8x128xbf16> to vector<8x128xbf16>
      %cst_52 = arith.constant dense<0.000000e+00> : vector<8x384xf32>
      %176 = tpu.matmul %175, %3, %cst_52 {dimension_numbers = #tpu.dot_dimension_numbers<[1], [0], [0], [1], [0, 0, 1, 1], [], []>} : vector<8x128xbf16>, vector<128x384xbf16>, vector<8x384xf32> -> vector<8x384xf32>
      %177 = vector.broadcast %5 : vector<1x384xf32> to vector<8x384xf32>
      %178 = arith.addf %176, %177 : vector<8x384xf32>
      %179 = arith.truncf %172 : vector<8x128xf32> to vector<8x128xbf16>
      %cst_53 = arith.constant dense<0.000000e+00> : vector<8x384xf32>
      %180 = tpu.matmul %179, %4, %cst_53 {dimension_numbers = #tpu.dot_dimension_numbers<[1], [0], [0], [1], [0, 0, 1, 1], [], []>} : vector<8x128xbf16>, vector<128x384xbf16>, vector<8x384xf32> -> vector<8x384xf32>
      %181 = vector.extract_strided_slice %178 {offsets = [0, 0], sizes = [8, 256], strides = [1, 1]} : vector<8x384xf32> to vector<8x256xf32>
      %182 = vector.extract_strided_slice %180 {offsets = [0, 0], sizes = [8, 256], strides = [1, 1]} : vector<8x384xf32> to vector<8x256xf32>
      %183 = arith.addf %181, %182 : vector<8x256xf32>
      %cst_54 = arith.constant 5.000000e-01 : f32
      %184 = vector.broadcast %cst_54 : f32 to vector<8x256xf32>
      %185 = arith.mulf %184, %183 : vector<8x256xf32>
      %186 = math.tanh %185 : vector<8x256xf32>
      %cst_55 = arith.constant 5.000000e-01 : f32
      %187 = vector.broadcast %cst_55 : f32 to vector<8x256xf32>
      %188 = arith.mulf %187, %186 : vector<8x256xf32>
      %cst_56 = arith.constant 5.000000e-01 : f32
      %189 = vector.broadcast %cst_56 : f32 to vector<8x256xf32>
      %190 = arith.addf %188, %189 : vector<8x256xf32>
      %191 = vector.extract_strided_slice %190 {offsets = [0, 0], sizes = [8, 128], strides = [1, 1]} : vector<8x256xf32> to vector<8x128xf32>
      %192 = vector.extract_strided_slice %190 {offsets = [0, 128], sizes = [8, 128], strides = [1, 1]} : vector<8x256xf32> to vector<8x128xf32>
      %193 = vector.extract_strided_slice %178 {offsets = [0, 256], sizes = [8, 128], strides = [1, 1]} : vector<8x384xf32> to vector<8x128xf32>
      %194 = vector.extract_strided_slice %180 {offsets = [0, 256], sizes = [8, 128], strides = [1, 1]} : vector<8x384xf32> to vector<8x128xf32>
      %195 = vector.broadcast %6 : vector<1x128xf32> to vector<8x128xf32>
      %196 = arith.addf %194, %195 : vector<8x128xf32>
      %197 = arith.mulf %191, %196 : vector<8x128xf32>
      %198 = arith.addf %193, %197 : vector<8x128xf32>
      %199 = math.tanh %198 : vector<8x128xf32>
      %200 = arith.subf %172, %199 : vector<8x128xf32>
      %201 = arith.mulf %192, %200 : vector<8x128xf32>
      %202 = arith.addf %199, %201 : vector<8x128xf32>
      %c16_i32_57 = arith.constant 16 : i32
      %203 = arith.muli %arg1, %c16_i32_57 : i32
      %204 = arith.addi %203, %c4_i32 : i32
      %c20_i32_58 = arith.constant 20 : i32
      %205 = arith.cmpi slt, %204, %c20_i32_58 : i32
      %206 = arith.extui %205 : i1 to i32
      %207 = arith.sitofp %206 : i32 to f32
      %208 = arith.subf %202, %172 : vector<8x128xf32>
      %209 = vector.broadcast %207 : f32 to vector<8x128xf32>
      %210 = arith.mulf %209, %208 : vector<8x128xf32>
      %211 = arith.addf %172, %210 : vector<8x128xf32>
      %c5_i32 = arith.constant 5 : i32
      %212 = arith.index_cast %c5_i32 : i32 to index
      %c0_59 = arith.constant 0 : index
      %c0_60 = arith.constant 0 : index
      %213 = vector.load %arg2[%212, %c0_59, %c0_60] : memref<16x8x128xbf16, #tpu.memory_space<vmem>>, vector<1x8x128xbf16>
      %214 = vector.shape_cast %213 : vector<1x8x128xbf16> to vector<8x128xbf16>
      %cst_61 = arith.constant dense<0.000000e+00> : vector<8x384xf32>
      %215 = tpu.matmul %214, %3, %cst_61 {dimension_numbers = #tpu.dot_dimension_numbers<[1], [0], [0], [1], [0, 0, 1, 1], [], []>} : vector<8x128xbf16>, vector<128x384xbf16>, vector<8x384xf32> -> vector<8x384xf32>
      %216 = vector.broadcast %5 : vector<1x384xf32> to vector<8x384xf32>
      %217 = arith.addf %215, %216 : vector<8x384xf32>
      %218 = arith.truncf %211 : vector<8x128xf32> to vector<8x128xbf16>
      %cst_62 = arith.constant dense<0.000000e+00> : vector<8x384xf32>
      %219 = tpu.matmul %218, %4, %cst_62 {dimension_numbers = #tpu.dot_dimension_numbers<[1], [0], [0], [1], [0, 0, 1, 1], [], []>} : vector<8x128xbf16>, vector<128x384xbf16>, vector<8x384xf32> -> vector<8x384xf32>
      %220 = vector.extract_strided_slice %217 {offsets = [0, 0], sizes = [8, 256], strides = [1, 1]} : vector<8x384xf32> to vector<8x256xf32>
      %221 = vector.extract_strided_slice %219 {offsets = [0, 0], sizes = [8, 256], strides = [1, 1]} : vector<8x384xf32> to vector<8x256xf32>
      %222 = arith.addf %220, %221 : vector<8x256xf32>
      %cst_63 = arith.constant 5.000000e-01 : f32
      %223 = vector.broadcast %cst_63 : f32 to vector<8x256xf32>
      %224 = arith.mulf %223, %222 : vector<8x256xf32>
      %225 = math.tanh %224 : vector<8x256xf32>
      %cst_64 = arith.constant 5.000000e-01 : f32
      %226 = vector.broadcast %cst_64 : f32 to vector<8x256xf32>
      %227 = arith.mulf %226, %225 : vector<8x256xf32>
      %cst_65 = arith.constant 5.000000e-01 : f32
      %228 = vector.broadcast %cst_65 : f32 to vector<8x256xf32>
      %229 = arith.addf %227, %228 : vector<8x256xf32>
      %230 = vector.extract_strided_slice %229 {offsets = [0, 0], sizes = [8, 128], strides = [1, 1]} : vector<8x256xf32> to vector<8x128xf32>
      %231 = vector.extract_strided_slice %229 {offsets = [0, 128], sizes = [8, 128], strides = [1, 1]} : vector<8x256xf32> to vector<8x128xf32>
      %232 = vector.extract_strided_slice %217 {offsets = [0, 256], sizes = [8, 128], strides = [1, 1]} : vector<8x384xf32> to vector<8x128xf32>
      %233 = vector.extract_strided_slice %219 {offsets = [0, 256], sizes = [8, 128], strides = [1, 1]} : vector<8x384xf32> to vector<8x128xf32>
      %234 = vector.broadcast %6 : vector<1x128xf32> to vector<8x128xf32>
      %235 = arith.addf %233, %234 : vector<8x128xf32>
      %236 = arith.mulf %230, %235 : vector<8x128xf32>
      %237 = arith.addf %232, %236 : vector<8x128xf32>
      %238 = math.tanh %237 : vector<8x128xf32>
      %239 = arith.subf %211, %238 : vector<8x128xf32>
      %240 = arith.mulf %231, %239 : vector<8x128xf32>
      %241 = arith.addf %238, %240 : vector<8x128xf32>
      %c16_i32_66 = arith.constant 16 : i32
      %242 = arith.muli %arg1, %c16_i32_66 : i32
      %243 = arith.addi %242, %c5_i32 : i32
      %c20_i32_67 = arith.constant 20 : i32
      %244 = arith.cmpi slt, %243, %c20_i32_67 : i32
      %245 = arith.extui %244 : i1 to i32
      %246 = arith.sitofp %245 : i32 to f32
      %247 = arith.subf %241, %211 : vector<8x128xf32>
      %248 = vector.broadcast %246 : f32 to vector<8x128xf32>
      %249 = arith.mulf %248, %247 : vector<8x128xf32>
      %250 = arith.addf %211, %249 : vector<8x128xf32>
      %c6_i32 = arith.constant 6 : i32
      %251 = arith.index_cast %c6_i32 : i32 to index
      %c0_68 = arith.constant 0 : index
      %c0_69 = arith.constant 0 : index
      %252 = vector.load %arg2[%251, %c0_68, %c0_69] : memref<16x8x128xbf16, #tpu.memory_space<vmem>>, vector<1x8x128xbf16>
      %253 = vector.shape_cast %252 : vector<1x8x128xbf16> to vector<8x128xbf16>
      %cst_70 = arith.constant dense<0.000000e+00> : vector<8x384xf32>
      %254 = tpu.matmul %253, %3, %cst_70 {dimension_numbers = #tpu.dot_dimension_numbers<[1], [0], [0], [1], [0, 0, 1, 1], [], []>} : vector<8x128xbf16>, vector<128x384xbf16>, vector<8x384xf32> -> vector<8x384xf32>
      %255 = vector.broadcast %5 : vector<1x384xf32> to vector<8x384xf32>
      %256 = arith.addf %254, %255 : vector<8x384xf32>
      %257 = arith.truncf %250 : vector<8x128xf32> to vector<8x128xbf16>
      %cst_71 = arith.constant dense<0.000000e+00> : vector<8x384xf32>
      %258 = tpu.matmul %257, %4, %cst_71 {dimension_numbers = #tpu.dot_dimension_numbers<[1], [0], [0], [1], [0, 0, 1, 1], [], []>} : vector<8x128xbf16>, vector<128x384xbf16>, vector<8x384xf32> -> vector<8x384xf32>
      %259 = vector.extract_strided_slice %256 {offsets = [0, 0], sizes = [8, 256], strides = [1, 1]} : vector<8x384xf32> to vector<8x256xf32>
      %260 = vector.extract_strided_slice %258 {offsets = [0, 0], sizes = [8, 256], strides = [1, 1]} : vector<8x384xf32> to vector<8x256xf32>
      %261 = arith.addf %259, %260 : vector<8x256xf32>
      %cst_72 = arith.constant 5.000000e-01 : f32
      %262 = vector.broadcast %cst_72 : f32 to vector<8x256xf32>
      %263 = arith.mulf %262, %261 : vector<8x256xf32>
      %264 = math.tanh %263 : vector<8x256xf32>
      %cst_73 = arith.constant 5.000000e-01 : f32
      %265 = vector.broadcast %cst_73 : f32 to vector<8x256xf32>
      %266 = arith.mulf %265, %264 : vector<8x256xf32>
      %cst_74 = arith.constant 5.000000e-01 : f32
      %267 = vector.broadcast %cst_74 : f32 to vector<8x256xf32>
      %268 = arith.addf %266, %267 : vector<8x256xf32>
      %269 = vector.extract_strided_slice %268 {offsets = [0, 0], sizes = [8, 128], strides = [1, 1]} : vector<8x256xf32> to vector<8x128xf32>
      %270 = vector.extract_strided_slice %268 {offsets = [0, 128], sizes = [8, 128], strides = [1, 1]} : vector<8x256xf32> to vector<8x128xf32>
      %271 = vector.extract_strided_slice %256 {offsets = [0, 256], sizes = [8, 128], strides = [1, 1]} : vector<8x384xf32> to vector<8x128xf32>
      %272 = vector.extract_strided_slice %258 {offsets = [0, 256], sizes = [8, 128], strides = [1, 1]} : vector<8x384xf32> to vector<8x128xf32>
      %273 = vector.broadcast %6 : vector<1x128xf32> to vector<8x128xf32>
      %274 = arith.addf %272, %273 : vector<8x128xf32>
      %275 = arith.mulf %269, %274 : vector<8x128xf32>
      %276 = arith.addf %271, %275 : vector<8x128xf32>
      %277 = math.tanh %276 : vector<8x128xf32>
      %278 = arith.subf %250, %277 : vector<8x128xf32>
      %279 = arith.mulf %270, %278 : vector<8x128xf32>
      %280 = arith.addf %277, %279 : vector<8x128xf32>
      %c16_i32_75 = arith.constant 16 : i32
      %281 = arith.muli %arg1, %c16_i32_75 : i32
      %282 = arith.addi %281, %c6_i32 : i32
      %c20_i32_76 = arith.constant 20 : i32
      %283 = arith.cmpi slt, %282, %c20_i32_76 : i32
      %284 = arith.extui %283 : i1 to i32
      %285 = arith.sitofp %284 : i32 to f32
      %286 = arith.subf %280, %250 : vector<8x128xf32>
      %287 = vector.broadcast %285 : f32 to vector<8x128xf32>
      %288 = arith.mulf %287, %286 : vector<8x128xf32>
      %289 = arith.addf %250, %288 : vector<8x128xf32>
      %c7_i32 = arith.constant 7 : i32
      %290 = arith.index_cast %c7_i32 : i32 to index
      %c0_77 = arith.constant 0 : index
      %c0_78 = arith.constant 0 : index
      %291 = vector.load %arg2[%290, %c0_77, %c0_78] : memref<16x8x128xbf16, #tpu.memory_space<vmem>>, vector<1x8x128xbf16>
      %292 = vector.shape_cast %291 : vector<1x8x128xbf16> to vector<8x128xbf16>
      %cst_79 = arith.constant dense<0.000000e+00> : vector<8x384xf32>
      %293 = tpu.matmul %292, %3, %cst_79 {dimension_numbers = #tpu.dot_dimension_numbers<[1], [0], [0], [1], [0, 0, 1, 1], [], []>} : vector<8x128xbf16>, vector<128x384xbf16>, vector<8x384xf32> -> vector<8x384xf32>
      %294 = vector.broadcast %5 : vector<1x384xf32> to vector<8x384xf32>
      %295 = arith.addf %293, %294 : vector<8x384xf32>
      %296 = arith.truncf %289 : vector<8x128xf32> to vector<8x128xbf16>
      %cst_80 = arith.constant dense<0.000000e+00> : vector<8x384xf32>
      %297 = tpu.matmul %296, %4, %cst_80 {dimension_numbers = #tpu.dot_dimension_numbers<[1], [0], [0], [1], [0, 0, 1, 1], [], []>} : vector<8x128xbf16>, vector<128x384xbf16>, vector<8x384xf32> -> vector<8x384xf32>
      %298 = vector.extract_strided_slice %295 {offsets = [0, 0], sizes = [8, 256], strides = [1, 1]} : vector<8x384xf32> to vector<8x256xf32>
      %299 = vector.extract_strided_slice %297 {offsets = [0, 0], sizes = [8, 256], strides = [1, 1]} : vector<8x384xf32> to vector<8x256xf32>
      %300 = arith.addf %298, %299 : vector<8x256xf32>
      %cst_81 = arith.constant 5.000000e-01 : f32
      %301 = vector.broadcast %cst_81 : f32 to vector<8x256xf32>
      %302 = arith.mulf %301, %300 : vector<8x256xf32>
      %303 = math.tanh %302 : vector<8x256xf32>
      %cst_82 = arith.constant 5.000000e-01 : f32
      %304 = vector.broadcast %cst_82 : f32 to vector<8x256xf32>
      %305 = arith.mulf %304, %303 : vector<8x256xf32>
      %cst_83 = arith.constant 5.000000e-01 : f32
      %306 = vector.broadcast %cst_83 : f32 to vector<8x256xf32>
      %307 = arith.addf %305, %306 : vector<8x256xf32>
      %308 = vector.extract_strided_slice %307 {offsets = [0, 0], sizes = [8, 128], strides = [1, 1]} : vector<8x256xf32> to vector<8x128xf32>
      %309 = vector.extract_strided_slice %307 {offsets = [0, 128], sizes = [8, 128], strides = [1, 1]} : vector<8x256xf32> to vector<8x128xf32>
      %310 = vector.extract_strided_slice %295 {offsets = [0, 256], sizes = [8, 128], strides = [1, 1]} : vector<8x384xf32> to vector<8x128xf32>
      %311 = vector.extract_strided_slice %297 {offsets = [0, 256], sizes = [8, 128], strides = [1, 1]} : vector<8x384xf32> to vector<8x128xf32>
      %312 = vector.broadcast %6 : vector<1x128xf32> to vector<8x128xf32>
      %313 = arith.addf %311, %312 : vector<8x128xf32>
      %314 = arith.mulf %308, %313 : vector<8x128xf32>
      %315 = arith.addf %310, %314 : vector<8x128xf32>
      %316 = math.tanh %315 : vector<8x128xf32>
      %317 = arith.subf %289, %316 : vector<8x128xf32>
      %318 = arith.mulf %309, %317 : vector<8x128xf32>
      %319 = arith.addf %316, %318 : vector<8x128xf32>
      %c16_i32_84 = arith.constant 16 : i32
      %320 = arith.muli %arg1, %c16_i32_84 : i32
      %321 = arith.addi %320, %c7_i32 : i32
      %c20_i32_85 = arith.constant 20 : i32
      %322 = arith.cmpi slt, %321, %c20_i32_85 : i32
      %323 = arith.extui %322 : i1 to i32
      %324 = arith.sitofp %323 : i32 to f32
      %325 = arith.subf %319, %289 : vector<8x128xf32>
      %326 = vector.broadcast %324 : f32 to vector<8x128xf32>
      %327 = arith.mulf %326, %325 : vector<8x128xf32>
      %328 = arith.addf %289, %327 : vector<8x128xf32>
      %c8_i32 = arith.constant 8 : i32
      %329 = arith.index_cast %c8_i32 : i32 to index
      %c0_86 = arith.constant 0 : index
      %c0_87 = arith.constant 0 : index
      %330 = vector.load %arg2[%329, %c0_86, %c0_87] : memref<16x8x128xbf16, #tpu.memory_space<vmem>>, vector<1x8x128xbf16>
      %331 = vector.shape_cast %330 : vector<1x8x128xbf16> to vector<8x128xbf16>
      %cst_88 = arith.constant dense<0.000000e+00> : vector<8x384xf32>
      %332 = tpu.matmul %331, %3, %cst_88 {dimension_numbers = #tpu.dot_dimension_numbers<[1], [0], [0], [1], [0, 0, 1, 1], [], []>} : vector<8x128xbf16>, vector<128x384xbf16>, vector<8x384xf32> -> vector<8x384xf32>
      %333 = vector.broadcast %5 : vector<1x384xf32> to vector<8x384xf32>
      %334 = arith.addf %332, %333 : vector<8x384xf32>
      %335 = arith.truncf %328 : vector<8x128xf32> to vector<8x128xbf16>
      %cst_89 = arith.constant dense<0.000000e+00> : vector<8x384xf32>
      %336 = tpu.matmul %335, %4, %cst_89 {dimension_numbers = #tpu.dot_dimension_numbers<[1], [0], [0], [1], [0, 0, 1, 1], [], []>} : vector<8x128xbf16>, vector<128x384xbf16>, vector<8x384xf32> -> vector<8x384xf32>
      %337 = vector.extract_strided_slice %334 {offsets = [0, 0], sizes = [8, 256], strides = [1, 1]} : vector<8x384xf32> to vector<8x256xf32>
      %338 = vector.extract_strided_slice %336 {offsets = [0, 0], sizes = [8, 256], strides = [1, 1]} : vector<8x384xf32> to vector<8x256xf32>
      %339 = arith.addf %337, %338 : vector<8x256xf32>
      %cst_90 = arith.constant 5.000000e-01 : f32
      %340 = vector.broadcast %cst_90 : f32 to vector<8x256xf32>
      %341 = arith.mulf %340, %339 : vector<8x256xf32>
      %342 = math.tanh %341 : vector<8x256xf32>
      %cst_91 = arith.constant 5.000000e-01 : f32
      %343 = vector.broadcast %cst_91 : f32 to vector<8x256xf32>
      %344 = arith.mulf %343, %342 : vector<8x256xf32>
      %cst_92 = arith.constant 5.000000e-01 : f32
      %345 = vector.broadcast %cst_92 : f32 to vector<8x256xf32>
      %346 = arith.addf %344, %345 : vector<8x256xf32>
      %347 = vector.extract_strided_slice %346 {offsets = [0, 0], sizes = [8, 128], strides = [1, 1]} : vector<8x256xf32> to vector<8x128xf32>
      %348 = vector.extract_strided_slice %346 {offsets = [0, 128], sizes = [8, 128], strides = [1, 1]} : vector<8x256xf32> to vector<8x128xf32>
      %349 = vector.extract_strided_slice %334 {offsets = [0, 256], sizes = [8, 128], strides = [1, 1]} : vector<8x384xf32> to vector<8x128xf32>
      %350 = vector.extract_strided_slice %336 {offsets = [0, 256], sizes = [8, 128], strides = [1, 1]} : vector<8x384xf32> to vector<8x128xf32>
      %351 = vector.broadcast %6 : vector<1x128xf32> to vector<8x128xf32>
      %352 = arith.addf %350, %351 : vector<8x128xf32>
      %353 = arith.mulf %347, %352 : vector<8x128xf32>
      %354 = arith.addf %349, %353 : vector<8x128xf32>
      %355 = math.tanh %354 : vector<8x128xf32>
      %356 = arith.subf %328, %355 : vector<8x128xf32>
      %357 = arith.mulf %348, %356 : vector<8x128xf32>
      %358 = arith.addf %355, %357 : vector<8x128xf32>
      %c16_i32_93 = arith.constant 16 : i32
      %359 = arith.muli %arg1, %c16_i32_93 : i32
      %360 = arith.addi %359, %c8_i32 : i32
      %c20_i32_94 = arith.constant 20 : i32
      %361 = arith.cmpi slt, %360, %c20_i32_94 : i32
      %362 = arith.extui %361 : i1 to i32
      %363 = arith.sitofp %362 : i32 to f32
      %364 = arith.subf %358, %328 : vector<8x128xf32>
      %365 = vector.broadcast %363 : f32 to vector<8x128xf32>
      %366 = arith.mulf %365, %364 : vector<8x128xf32>
      %367 = arith.addf %328, %366 : vector<8x128xf32>
      %c9_i32 = arith.constant 9 : i32
      %368 = arith.index_cast %c9_i32 : i32 to index
      %c0_95 = arith.constant 0 : index
      %c0_96 = arith.constant 0 : index
      %369 = vector.load %arg2[%368, %c0_95, %c0_96] : memref<16x8x128xbf16, #tpu.memory_space<vmem>>, vector<1x8x128xbf16>
      %370 = vector.shape_cast %369 : vector<1x8x128xbf16> to vector<8x128xbf16>
      %cst_97 = arith.constant dense<0.000000e+00> : vector<8x384xf32>
      %371 = tpu.matmul %370, %3, %cst_97 {dimension_numbers = #tpu.dot_dimension_numbers<[1], [0], [0], [1], [0, 0, 1, 1], [], []>} : vector<8x128xbf16>, vector<128x384xbf16>, vector<8x384xf32> -> vector<8x384xf32>
      %372 = vector.broadcast %5 : vector<1x384xf32> to vector<8x384xf32>
      %373 = arith.addf %371, %372 : vector<8x384xf32>
      %374 = arith.truncf %367 : vector<8x128xf32> to vector<8x128xbf16>
      %cst_98 = arith.constant dense<0.000000e+00> : vector<8x384xf32>
      %375 = tpu.matmul %374, %4, %cst_98 {dimension_numbers = #tpu.dot_dimension_numbers<[1], [0], [0], [1], [0, 0, 1, 1], [], []>} : vector<8x128xbf16>, vector<128x384xbf16>, vector<8x384xf32> -> vector<8x384xf32>
      %376 = vector.extract_strided_slice %373 {offsets = [0, 0], sizes = [8, 256], strides = [1, 1]} : vector<8x384xf32> to vector<8x256xf32>
      %377 = vector.extract_strided_slice %375 {offsets = [0, 0], sizes = [8, 256], strides = [1, 1]} : vector<8x384xf32> to vector<8x256xf32>
      %378 = arith.addf %376, %377 : vector<8x256xf32>
      %cst_99 = arith.constant 5.000000e-01 : f32
      %379 = vector.broadcast %cst_99 : f32 to vector<8x256xf32>
      %380 = arith.mulf %379, %378 : vector<8x256xf32>
      %381 = math.tanh %380 : vector<8x256xf32>
      %cst_100 = arith.constant 5.000000e-01 : f32
      %382 = vector.broadcast %cst_100 : f32 to vector<8x256xf32>
      %383 = arith.mulf %382, %381 : vector<8x256xf32>
      %cst_101 = arith.constant 5.000000e-01 : f32
      %384 = vector.broadcast %cst_101 : f32 to vector<8x256xf32>
      %385 = arith.addf %383, %384 : vector<8x256xf32>
      %386 = vector.extract_strided_slice %385 {offsets = [0, 0], sizes = [8, 128], strides = [1, 1]} : vector<8x256xf32> to vector<8x128xf32>
      %387 = vector.extract_strided_slice %385 {offsets = [0, 128], sizes = [8, 128], strides = [1, 1]} : vector<8x256xf32> to vector<8x128xf32>
      %388 = vector.extract_strided_slice %373 {offsets = [0, 256], sizes = [8, 128], strides = [1, 1]} : vector<8x384xf32> to vector<8x128xf32>
      %389 = vector.extract_strided_slice %375 {offsets = [0, 256], sizes = [8, 128], strides = [1, 1]} : vector<8x384xf32> to vector<8x128xf32>
      %390 = vector.broadcast %6 : vector<1x128xf32> to vector<8x128xf32>
      %391 = arith.addf %389, %390 : vector<8x128xf32>
      %392 = arith.mulf %386, %391 : vector<8x128xf32>
      %393 = arith.addf %388, %392 : vector<8x128xf32>
      %394 = math.tanh %393 : vector<8x128xf32>
      %395 = arith.subf %367, %394 : vector<8x128xf32>
      %396 = arith.mulf %387, %395 : vector<8x128xf32>
      %397 = arith.addf %394, %396 : vector<8x128xf32>
      %c16_i32_102 = arith.constant 16 : i32
      %398 = arith.muli %arg1, %c16_i32_102 : i32
      %399 = arith.addi %398, %c9_i32 : i32
      %c20_i32_103 = arith.constant 20 : i32
      %400 = arith.cmpi slt, %399, %c20_i32_103 : i32
      %401 = arith.extui %400 : i1 to i32
      %402 = arith.sitofp %401 : i32 to f32
      %403 = arith.subf %397, %367 : vector<8x128xf32>
      %404 = vector.broadcast %402 : f32 to vector<8x128xf32>
      %405 = arith.mulf %404, %403 : vector<8x128xf32>
      %406 = arith.addf %367, %405 : vector<8x128xf32>
      %c10_i32 = arith.constant 10 : i32
      %407 = arith.index_cast %c10_i32 : i32 to index
      %c0_104 = arith.constant 0 : index
      %c0_105 = arith.constant 0 : index
      %408 = vector.load %arg2[%407, %c0_104, %c0_105] : memref<16x8x128xbf16, #tpu.memory_space<vmem>>, vector<1x8x128xbf16>
      %409 = vector.shape_cast %408 : vector<1x8x128xbf16> to vector<8x128xbf16>
      %cst_106 = arith.constant dense<0.000000e+00> : vector<8x384xf32>
      %410 = tpu.matmul %409, %3, %cst_106 {dimension_numbers = #tpu.dot_dimension_numbers<[1], [0], [0], [1], [0, 0, 1, 1], [], []>} : vector<8x128xbf16>, vector<128x384xbf16>, vector<8x384xf32> -> vector<8x384xf32>
      %411 = vector.broadcast %5 : vector<1x384xf32> to vector<8x384xf32>
      %412 = arith.addf %410, %411 : vector<8x384xf32>
      %413 = arith.truncf %406 : vector<8x128xf32> to vector<8x128xbf16>
      %cst_107 = arith.constant dense<0.000000e+00> : vector<8x384xf32>
      %414 = tpu.matmul %413, %4, %cst_107 {dimension_numbers = #tpu.dot_dimension_numbers<[1], [0], [0], [1], [0, 0, 1, 1], [], []>} : vector<8x128xbf16>, vector<128x384xbf16>, vector<8x384xf32> -> vector<8x384xf32>
      %415 = vector.extract_strided_slice %412 {offsets = [0, 0], sizes = [8, 256], strides = [1, 1]} : vector<8x384xf32> to vector<8x256xf32>
      %416 = vector.extract_strided_slice %414 {offsets = [0, 0], sizes = [8, 256], strides = [1, 1]} : vector<8x384xf32> to vector<8x256xf32>
      %417 = arith.addf %415, %416 : vector<8x256xf32>
      %cst_108 = arith.constant 5.000000e-01 : f32
      %418 = vector.broadcast %cst_108 : f32 to vector<8x256xf32>
      %419 = arith.mulf %418, %417 : vector<8x256xf32>
      %420 = math.tanh %419 : vector<8x256xf32>
      %cst_109 = arith.constant 5.000000e-01 : f32
      %421 = vector.broadcast %cst_109 : f32 to vector<8x256xf32>
      %422 = arith.mulf %421, %420 : vector<8x256xf32>
      %cst_110 = arith.constant 5.000000e-01 : f32
      %423 = vector.broadcast %cst_110 : f32 to vector<8x256xf32>
      %424 = arith.addf %422, %423 : vector<8x256xf32>
      %425 = vector.extract_strided_slice %424 {offsets = [0, 0], sizes = [8, 128], strides = [1, 1]} : vector<8x256xf32> to vector<8x128xf32>
      %426 = vector.extract_strided_slice %424 {offsets = [0, 128], sizes = [8, 128], strides = [1, 1]} : vector<8x256xf32> to vector<8x128xf32>
      %427 = vector.extract_strided_slice %412 {offsets = [0, 256], sizes = [8, 128], strides = [1, 1]} : vector<8x384xf32> to vector<8x128xf32>
      %428 = vector.extract_strided_slice %414 {offsets = [0, 256], sizes = [8, 128], strides = [1, 1]} : vector<8x384xf32> to vector<8x128xf32>
      %429 = vector.broadcast %6 : vector<1x128xf32> to vector<8x128xf32>
      %430 = arith.addf %428, %429 : vector<8x128xf32>
      %431 = arith.mulf %425, %430 : vector<8x128xf32>
      %432 = arith.addf %427, %431 : vector<8x128xf32>
      %433 = math.tanh %432 : vector<8x128xf32>
      %434 = arith.subf %406, %433 : vector<8x128xf32>
      %435 = arith.mulf %426, %434 : vector<8x128xf32>
      %436 = arith.addf %433, %435 : vector<8x128xf32>
      %c16_i32_111 = arith.constant 16 : i32
      %437 = arith.muli %arg1, %c16_i32_111 : i32
      %438 = arith.addi %437, %c10_i32 : i32
      %c20_i32_112 = arith.constant 20 : i32
      %439 = arith.cmpi slt, %438, %c20_i32_112 : i32
      %440 = arith.extui %439 : i1 to i32
      %441 = arith.sitofp %440 : i32 to f32
      %442 = arith.subf %436, %406 : vector<8x128xf32>
      %443 = vector.broadcast %441 : f32 to vector<8x128xf32>
      %444 = arith.mulf %443, %442 : vector<8x128xf32>
      %445 = arith.addf %406, %444 : vector<8x128xf32>
      %c11_i32 = arith.constant 11 : i32
      %446 = arith.index_cast %c11_i32 : i32 to index
      %c0_113 = arith.constant 0 : index
      %c0_114 = arith.constant 0 : index
      %447 = vector.load %arg2[%446, %c0_113, %c0_114] : memref<16x8x128xbf16, #tpu.memory_space<vmem>>, vector<1x8x128xbf16>
      %448 = vector.shape_cast %447 : vector<1x8x128xbf16> to vector<8x128xbf16>
      %cst_115 = arith.constant dense<0.000000e+00> : vector<8x384xf32>
      %449 = tpu.matmul %448, %3, %cst_115 {dimension_numbers = #tpu.dot_dimension_numbers<[1], [0], [0], [1], [0, 0, 1, 1], [], []>} : vector<8x128xbf16>, vector<128x384xbf16>, vector<8x384xf32> -> vector<8x384xf32>
      %450 = vector.broadcast %5 : vector<1x384xf32> to vector<8x384xf32>
      %451 = arith.addf %449, %450 : vector<8x384xf32>
      %452 = arith.truncf %445 : vector<8x128xf32> to vector<8x128xbf16>
      %cst_116 = arith.constant dense<0.000000e+00> : vector<8x384xf32>
      %453 = tpu.matmul %452, %4, %cst_116 {dimension_numbers = #tpu.dot_dimension_numbers<[1], [0], [0], [1], [0, 0, 1, 1], [], []>} : vector<8x128xbf16>, vector<128x384xbf16>, vector<8x384xf32> -> vector<8x384xf32>
      %454 = vector.extract_strided_slice %451 {offsets = [0, 0], sizes = [8, 256], strides = [1, 1]} : vector<8x384xf32> to vector<8x256xf32>
      %455 = vector.extract_strided_slice %453 {offsets = [0, 0], sizes = [8, 256], strides = [1, 1]} : vector<8x384xf32> to vector<8x256xf32>
      %456 = arith.addf %454, %455 : vector<8x256xf32>
      %cst_117 = arith.constant 5.000000e-01 : f32
      %457 = vector.broadcast %cst_117 : f32 to vector<8x256xf32>
      %458 = arith.mulf %457, %456 : vector<8x256xf32>
      %459 = math.tanh %458 : vector<8x256xf32>
      %cst_118 = arith.constant 5.000000e-01 : f32
      %460 = vector.broadcast %cst_118 : f32 to vector<8x256xf32>
      %461 = arith.mulf %460, %459 : vector<8x256xf32>
      %cst_119 = arith.constant 5.000000e-01 : f32
      %462 = vector.broadcast %cst_119 : f32 to vector<8x256xf32>
      %463 = arith.addf %461, %462 : vector<8x256xf32>
      %464 = vector.extract_strided_slice %463 {offsets = [0, 0], sizes = [8, 128], strides = [1, 1]} : vector<8x256xf32> to vector<8x128xf32>
      %465 = vector.extract_strided_slice %463 {offsets = [0, 128], sizes = [8, 128], strides = [1, 1]} : vector<8x256xf32> to vector<8x128xf32>
      %466 = vector.extract_strided_slice %451 {offsets = [0, 256], sizes = [8, 128], strides = [1, 1]} : vector<8x384xf32> to vector<8x128xf32>
      %467 = vector.extract_strided_slice %453 {offsets = [0, 256], sizes = [8, 128], strides = [1, 1]} : vector<8x384xf32> to vector<8x128xf32>
      %468 = vector.broadcast %6 : vector<1x128xf32> to vector<8x128xf32>
      %469 = arith.addf %467, %468 : vector<8x128xf32>
      %470 = arith.mulf %464, %469 : vector<8x128xf32>
      %471 = arith.addf %466, %470 : vector<8x128xf32>
      %472 = math.tanh %471 : vector<8x128xf32>
      %473 = arith.subf %445, %472 : vector<8x128xf32>
      %474 = arith.mulf %465, %473 : vector<8x128xf32>
      %475 = arith.addf %472, %474 : vector<8x128xf32>
      %c16_i32_120 = arith.constant 16 : i32
      %476 = arith.muli %arg1, %c16_i32_120 : i32
      %477 = arith.addi %476, %c11_i32 : i32
      %c20_i32_121 = arith.constant 20 : i32
      %478 = arith.cmpi slt, %477, %c20_i32_121 : i32
      %479 = arith.extui %478 : i1 to i32
      %480 = arith.sitofp %479 : i32 to f32
      %481 = arith.subf %475, %445 : vector<8x128xf32>
      %482 = vector.broadcast %480 : f32 to vector<8x128xf32>
      %483 = arith.mulf %482, %481 : vector<8x128xf32>
      %484 = arith.addf %445, %483 : vector<8x128xf32>
      %c12_i32 = arith.constant 12 : i32
      %485 = arith.index_cast %c12_i32 : i32 to index
      %c0_122 = arith.constant 0 : index
      %c0_123 = arith.constant 0 : index
      %486 = vector.load %arg2[%485, %c0_122, %c0_123] : memref<16x8x128xbf16, #tpu.memory_space<vmem>>, vector<1x8x128xbf16>
      %487 = vector.shape_cast %486 : vector<1x8x128xbf16> to vector<8x128xbf16>
      %cst_124 = arith.constant dense<0.000000e+00> : vector<8x384xf32>
      %488 = tpu.matmul %487, %3, %cst_124 {dimension_numbers = #tpu.dot_dimension_numbers<[1], [0], [0], [1], [0, 0, 1, 1], [], []>} : vector<8x128xbf16>, vector<128x384xbf16>, vector<8x384xf32> -> vector<8x384xf32>
      %489 = vector.broadcast %5 : vector<1x384xf32> to vector<8x384xf32>
      %490 = arith.addf %488, %489 : vector<8x384xf32>
      %491 = arith.truncf %484 : vector<8x128xf32> to vector<8x128xbf16>
      %cst_125 = arith.constant dense<0.000000e+00> : vector<8x384xf32>
      %492 = tpu.matmul %491, %4, %cst_125 {dimension_numbers = #tpu.dot_dimension_numbers<[1], [0], [0], [1], [0, 0, 1, 1], [], []>} : vector<8x128xbf16>, vector<128x384xbf16>, vector<8x384xf32> -> vector<8x384xf32>
      %493 = vector.extract_strided_slice %490 {offsets = [0, 0], sizes = [8, 256], strides = [1, 1]} : vector<8x384xf32> to vector<8x256xf32>
      %494 = vector.extract_strided_slice %492 {offsets = [0, 0], sizes = [8, 256], strides = [1, 1]} : vector<8x384xf32> to vector<8x256xf32>
      %495 = arith.addf %493, %494 : vector<8x256xf32>
      %cst_126 = arith.constant 5.000000e-01 : f32
      %496 = vector.broadcast %cst_126 : f32 to vector<8x256xf32>
      %497 = arith.mulf %496, %495 : vector<8x256xf32>
      %498 = math.tanh %497 : vector<8x256xf32>
      %cst_127 = arith.constant 5.000000e-01 : f32
      %499 = vector.broadcast %cst_127 : f32 to vector<8x256xf32>
      %500 = arith.mulf %499, %498 : vector<8x256xf32>
      %cst_128 = arith.constant 5.000000e-01 : f32
      %501 = vector.broadcast %cst_128 : f32 to vector<8x256xf32>
      %502 = arith.addf %500, %501 : vector<8x256xf32>
      %503 = vector.extract_strided_slice %502 {offsets = [0, 0], sizes = [8, 128], strides = [1, 1]} : vector<8x256xf32> to vector<8x128xf32>
      %504 = vector.extract_strided_slice %502 {offsets = [0, 128], sizes = [8, 128], strides = [1, 1]} : vector<8x256xf32> to vector<8x128xf32>
      %505 = vector.extract_strided_slice %490 {offsets = [0, 256], sizes = [8, 128], strides = [1, 1]} : vector<8x384xf32> to vector<8x128xf32>
      %506 = vector.extract_strided_slice %492 {offsets = [0, 256], sizes = [8, 128], strides = [1, 1]} : vector<8x384xf32> to vector<8x128xf32>
      %507 = vector.broadcast %6 : vector<1x128xf32> to vector<8x128xf32>
      %508 = arith.addf %506, %507 : vector<8x128xf32>
      %509 = arith.mulf %503, %508 : vector<8x128xf32>
      %510 = arith.addf %505, %509 : vector<8x128xf32>
      %511 = math.tanh %510 : vector<8x128xf32>
      %512 = arith.subf %484, %511 : vector<8x128xf32>
      %513 = arith.mulf %504, %512 : vector<8x128xf32>
      %514 = arith.addf %511, %513 : vector<8x128xf32>
      %c16_i32_129 = arith.constant 16 : i32
      %515 = arith.muli %arg1, %c16_i32_129 : i32
      %516 = arith.addi %515, %c12_i32 : i32
      %c20_i32_130 = arith.constant 20 : i32
      %517 = arith.cmpi slt, %516, %c20_i32_130 : i32
      %518 = arith.extui %517 : i1 to i32
      %519 = arith.sitofp %518 : i32 to f32
      %520 = arith.subf %514, %484 : vector<8x128xf32>
      %521 = vector.broadcast %519 : f32 to vector<8x128xf32>
      %522 = arith.mulf %521, %520 : vector<8x128xf32>
      %523 = arith.addf %484, %522 : vector<8x128xf32>
      %c13_i32 = arith.constant 13 : i32
      %524 = arith.index_cast %c13_i32 : i32 to index
      %c0_131 = arith.constant 0 : index
      %c0_132 = arith.constant 0 : index
      %525 = vector.load %arg2[%524, %c0_131, %c0_132] : memref<16x8x128xbf16, #tpu.memory_space<vmem>>, vector<1x8x128xbf16>
      %526 = vector.shape_cast %525 : vector<1x8x128xbf16> to vector<8x128xbf16>
      %cst_133 = arith.constant dense<0.000000e+00> : vector<8x384xf32>
      %527 = tpu.matmul %526, %3, %cst_133 {dimension_numbers = #tpu.dot_dimension_numbers<[1], [0], [0], [1], [0, 0, 1, 1], [], []>} : vector<8x128xbf16>, vector<128x384xbf16>, vector<8x384xf32> -> vector<8x384xf32>
      %528 = vector.broadcast %5 : vector<1x384xf32> to vector<8x384xf32>
      %529 = arith.addf %527, %528 : vector<8x384xf32>
      %530 = arith.truncf %523 : vector<8x128xf32> to vector<8x128xbf16>
      %cst_134 = arith.constant dense<0.000000e+00> : vector<8x384xf32>
      %531 = tpu.matmul %530, %4, %cst_134 {dimension_numbers = #tpu.dot_dimension_numbers<[1], [0], [0], [1], [0, 0, 1, 1], [], []>} : vector<8x128xbf16>, vector<128x384xbf16>, vector<8x384xf32> -> vector<8x384xf32>
      %532 = vector.extract_strided_slice %529 {offsets = [0, 0], sizes = [8, 256], strides = [1, 1]} : vector<8x384xf32> to vector<8x256xf32>
      %533 = vector.extract_strided_slice %531 {offsets = [0, 0], sizes = [8, 256], strides = [1, 1]} : vector<8x384xf32> to vector<8x256xf32>
      %534 = arith.addf %532, %533 : vector<8x256xf32>
      %cst_135 = arith.constant 5.000000e-01 : f32
      %535 = vector.broadcast %cst_135 : f32 to vector<8x256xf32>
      %536 = arith.mulf %535, %534 : vector<8x256xf32>
      %537 = math.tanh %536 : vector<8x256xf32>
      %cst_136 = arith.constant 5.000000e-01 : f32
      %538 = vector.broadcast %cst_136 : f32 to vector<8x256xf32>
      %539 = arith.mulf %538, %537 : vector<8x256xf32>
      %cst_137 = arith.constant 5.000000e-01 : f32
      %540 = vector.broadcast %cst_137 : f32 to vector<8x256xf32>
      %541 = arith.addf %539, %540 : vector<8x256xf32>
      %542 = vector.extract_strided_slice %541 {offsets = [0, 0], sizes = [8, 128], strides = [1, 1]} : vector<8x256xf32> to vector<8x128xf32>
      %543 = vector.extract_strided_slice %541 {offsets = [0, 128], sizes = [8, 128], strides = [1, 1]} : vector<8x256xf32> to vector<8x128xf32>
      %544 = vector.extract_strided_slice %529 {offsets = [0, 256], sizes = [8, 128], strides = [1, 1]} : vector<8x384xf32> to vector<8x128xf32>
      %545 = vector.extract_strided_slice %531 {offsets = [0, 256], sizes = [8, 128], strides = [1, 1]} : vector<8x384xf32> to vector<8x128xf32>
      %546 = vector.broadcast %6 : vector<1x128xf32> to vector<8x128xf32>
      %547 = arith.addf %545, %546 : vector<8x128xf32>
      %548 = arith.mulf %542, %547 : vector<8x128xf32>
      %549 = arith.addf %544, %548 : vector<8x128xf32>
      %550 = math.tanh %549 : vector<8x128xf32>
      %551 = arith.subf %523, %550 : vector<8x128xf32>
      %552 = arith.mulf %543, %551 : vector<8x128xf32>
      %553 = arith.addf %550, %552 : vector<8x128xf32>
      %c16_i32_138 = arith.constant 16 : i32
      %554 = arith.muli %arg1, %c16_i32_138 : i32
      %555 = arith.addi %554, %c13_i32 : i32
      %c20_i32_139 = arith.constant 20 : i32
      %556 = arith.cmpi slt, %555, %c20_i32_139 : i32
      %557 = arith.extui %556 : i1 to i32
      %558 = arith.sitofp %557 : i32 to f32
      %559 = arith.subf %553, %523 : vector<8x128xf32>
      %560 = vector.broadcast %558 : f32 to vector<8x128xf32>
      %561 = arith.mulf %560, %559 : vector<8x128xf32>
      %562 = arith.addf %523, %561 : vector<8x128xf32>
      %c14_i32 = arith.constant 14 : i32
      %563 = arith.index_cast %c14_i32 : i32 to index
      %c0_140 = arith.constant 0 : index
      %c0_141 = arith.constant 0 : index
      %564 = vector.load %arg2[%563, %c0_140, %c0_141] : memref<16x8x128xbf16, #tpu.memory_space<vmem>>, vector<1x8x128xbf16>
      %565 = vector.shape_cast %564 : vector<1x8x128xbf16> to vector<8x128xbf16>
      %cst_142 = arith.constant dense<0.000000e+00> : vector<8x384xf32>
      %566 = tpu.matmul %565, %3, %cst_142 {dimension_numbers = #tpu.dot_dimension_numbers<[1], [0], [0], [1], [0, 0, 1, 1], [], []>} : vector<8x128xbf16>, vector<128x384xbf16>, vector<8x384xf32> -> vector<8x384xf32>
      %567 = vector.broadcast %5 : vector<1x384xf32> to vector<8x384xf32>
      %568 = arith.addf %566, %567 : vector<8x384xf32>
      %569 = arith.truncf %562 : vector<8x128xf32> to vector<8x128xbf16>
      %cst_143 = arith.constant dense<0.000000e+00> : vector<8x384xf32>
      %570 = tpu.matmul %569, %4, %cst_143 {dimension_numbers = #tpu.dot_dimension_numbers<[1], [0], [0], [1], [0, 0, 1, 1], [], []>} : vector<8x128xbf16>, vector<128x384xbf16>, vector<8x384xf32> -> vector<8x384xf32>
      %571 = vector.extract_strided_slice %568 {offsets = [0, 0], sizes = [8, 256], strides = [1, 1]} : vector<8x384xf32> to vector<8x256xf32>
      %572 = vector.extract_strided_slice %570 {offsets = [0, 0], sizes = [8, 256], strides = [1, 1]} : vector<8x384xf32> to vector<8x256xf32>
      %573 = arith.addf %571, %572 : vector<8x256xf32>
      %cst_144 = arith.constant 5.000000e-01 : f32
      %574 = vector.broadcast %cst_144 : f32 to vector<8x256xf32>
      %575 = arith.mulf %574, %573 : vector<8x256xf32>
      %576 = math.tanh %575 : vector<8x256xf32>
      %cst_145 = arith.constant 5.000000e-01 : f32
      %577 = vector.broadcast %cst_145 : f32 to vector<8x256xf32>
      %578 = arith.mulf %577, %576 : vector<8x256xf32>
      %cst_146 = arith.constant 5.000000e-01 : f32
      %579 = vector.broadcast %cst_146 : f32 to vector<8x256xf32>
      %580 = arith.addf %578, %579 : vector<8x256xf32>
      %581 = vector.extract_strided_slice %580 {offsets = [0, 0], sizes = [8, 128], strides = [1, 1]} : vector<8x256xf32> to vector<8x128xf32>
      %582 = vector.extract_strided_slice %580 {offsets = [0, 128], sizes = [8, 128], strides = [1, 1]} : vector<8x256xf32> to vector<8x128xf32>
      %583 = vector.extract_strided_slice %568 {offsets = [0, 256], sizes = [8, 128], strides = [1, 1]} : vector<8x384xf32> to vector<8x128xf32>
      %584 = vector.extract_strided_slice %570 {offsets = [0, 256], sizes = [8, 128], strides = [1, 1]} : vector<8x384xf32> to vector<8x128xf32>
      %585 = vector.broadcast %6 : vector<1x128xf32> to vector<8x128xf32>
      %586 = arith.addf %584, %585 : vector<8x128xf32>
      %587 = arith.mulf %581, %586 : vector<8x128xf32>
      %588 = arith.addf %583, %587 : vector<8x128xf32>
      %589 = math.tanh %588 : vector<8x128xf32>
      %590 = arith.subf %562, %589 : vector<8x128xf32>
      %591 = arith.mulf %582, %590 : vector<8x128xf32>
      %592 = arith.addf %589, %591 : vector<8x128xf32>
      %c16_i32_147 = arith.constant 16 : i32
      %593 = arith.muli %arg1, %c16_i32_147 : i32
      %594 = arith.addi %593, %c14_i32 : i32
      %c20_i32_148 = arith.constant 20 : i32
      %595 = arith.cmpi slt, %594, %c20_i32_148 : i32
      %596 = arith.extui %595 : i1 to i32
      %597 = arith.sitofp %596 : i32 to f32
      %598 = arith.subf %592, %562 : vector<8x128xf32>
      %599 = vector.broadcast %597 : f32 to vector<8x128xf32>
      %600 = arith.mulf %599, %598 : vector<8x128xf32>
      %601 = arith.addf %562, %600 : vector<8x128xf32>
      %c15_i32 = arith.constant 15 : i32
      %602 = arith.index_cast %c15_i32 : i32 to index
      %c0_149 = arith.constant 0 : index
      %c0_150 = arith.constant 0 : index
      %603 = vector.load %arg2[%602, %c0_149, %c0_150] : memref<16x8x128xbf16, #tpu.memory_space<vmem>>, vector<1x8x128xbf16>
      %604 = vector.shape_cast %603 : vector<1x8x128xbf16> to vector<8x128xbf16>
      %cst_151 = arith.constant dense<0.000000e+00> : vector<8x384xf32>
      %605 = tpu.matmul %604, %3, %cst_151 {dimension_numbers = #tpu.dot_dimension_numbers<[1], [0], [0], [1], [0, 0, 1, 1], [], []>} : vector<8x128xbf16>, vector<128x384xbf16>, vector<8x384xf32> -> vector<8x384xf32>
      %606 = vector.broadcast %5 : vector<1x384xf32> to vector<8x384xf32>
      %607 = arith.addf %605, %606 : vector<8x384xf32>
      %608 = arith.truncf %601 : vector<8x128xf32> to vector<8x128xbf16>
      %cst_152 = arith.constant dense<0.000000e+00> : vector<8x384xf32>
      %609 = tpu.matmul %608, %4, %cst_152 {dimension_numbers = #tpu.dot_dimension_numbers<[1], [0], [0], [1], [0, 0, 1, 1], [], []>} : vector<8x128xbf16>, vector<128x384xbf16>, vector<8x384xf32> -> vector<8x384xf32>
      %610 = vector.extract_strided_slice %607 {offsets = [0, 0], sizes = [8, 256], strides = [1, 1]} : vector<8x384xf32> to vector<8x256xf32>
      %611 = vector.extract_strided_slice %609 {offsets = [0, 0], sizes = [8, 256], strides = [1, 1]} : vector<8x384xf32> to vector<8x256xf32>
      %612 = arith.addf %610, %611 : vector<8x256xf32>
      %cst_153 = arith.constant 5.000000e-01 : f32
      %613 = vector.broadcast %cst_153 : f32 to vector<8x256xf32>
      %614 = arith.mulf %613, %612 : vector<8x256xf32>
      %615 = math.tanh %614 : vector<8x256xf32>
      %cst_154 = arith.constant 5.000000e-01 : f32
      %616 = vector.broadcast %cst_154 : f32 to vector<8x256xf32>
      %617 = arith.mulf %616, %615 : vector<8x256xf32>
      %cst_155 = arith.constant 5.000000e-01 : f32
      %618 = vector.broadcast %cst_155 : f32 to vector<8x256xf32>
      %619 = arith.addf %617, %618 : vector<8x256xf32>
      %620 = vector.extract_strided_slice %619 {offsets = [0, 0], sizes = [8, 128], strides = [1, 1]} : vector<8x256xf32> to vector<8x128xf32>
      %621 = vector.extract_strided_slice %619 {offsets = [0, 128], sizes = [8, 128], strides = [1, 1]} : vector<8x256xf32> to vector<8x128xf32>
      %622 = vector.extract_strided_slice %607 {offsets = [0, 256], sizes = [8, 128], strides = [1, 1]} : vector<8x384xf32> to vector<8x128xf32>
      %623 = vector.extract_strided_slice %609 {offsets = [0, 256], sizes = [8, 128], strides = [1, 1]} : vector<8x384xf32> to vector<8x128xf32>
      %624 = vector.broadcast %6 : vector<1x128xf32> to vector<8x128xf32>
      %625 = arith.addf %623, %624 : vector<8x128xf32>
      %626 = arith.mulf %620, %625 : vector<8x128xf32>
      %627 = arith.addf %622, %626 : vector<8x128xf32>
      %628 = math.tanh %627 : vector<8x128xf32>
      %629 = arith.subf %601, %628 : vector<8x128xf32>
      %630 = arith.mulf %621, %629 : vector<8x128xf32>
      %631 = arith.addf %628, %630 : vector<8x128xf32>
      %c16_i32_156 = arith.constant 16 : i32
      %632 = arith.muli %arg1, %c16_i32_156 : i32
      %633 = arith.addi %632, %c15_i32 : i32
      %c20_i32_157 = arith.constant 20 : i32
      %634 = arith.cmpi slt, %633, %c20_i32_157 : i32
      %635 = arith.extui %634 : i1 to i32
      %636 = arith.sitofp %635 : i32 to f32
      %637 = arith.subf %631, %601 : vector<8x128xf32>
      %638 = vector.broadcast %636 : f32 to vector<8x128xf32>
      %639 = arith.mulf %638, %637 : vector<8x128xf32>
      %640 = arith.addf %601, %639 : vector<8x128xf32>
      %c16_i32_158 = arith.constant 16 : i32
      %c0_159 = arith.constant 0 : index
      %c0_160 = arith.constant 0 : index
      %641 = vector.load %arg9[%c0_159, %c0_160] : memref<8x128xf32, #tpu.memory_space<vmem>>, vector<8x128xf32>
      tpu.vector_store %arg9[%c0_159, %c0_160], %640 {strides = array<i32>} : memref<8x128xf32, #tpu.memory_space<vmem>>, vector<8x128xf32>,
    } else {
    }
    %c1_i32_13 = arith.constant 1 : i32
    %14 = arith.cmpi eq, %arg1, %c1_i32_13 : i32
    %15 = arith.extui %14 : i1 to i32
    %c0_i32_14 = arith.constant 0 : i32
    %16 = arith.cmpi ne, %15, %c0_i32_14 : i32
    scf.if %16 {
      %c0_15 = arith.constant 0 : index
      %c0_16 = arith.constant 0 : index
      %17 = vector.load %arg9[%c0_15, %c0_16] : memref<8x128xf32, #tpu.memory_space<vmem>>, vector<8x128xf32>
      %c0_17 = arith.constant 0 : index
      %c0_18 = arith.constant 0 : index
      %18 = vector.load %arg8[%c0_17, %c0_18] : memref<8x128xf32, #tpu.memory_space<vmem>>, vector<8x128xf32>
      tpu.vector_store %arg8[%c0_17, %c0_18], %17 {strides = array<i32>} : memref<8x128xf32, #tpu.memory_space<vmem>>, vector<8x128xf32>,
    } else {
    }
    return
  }
  func.func @transform_0(%arg0: i32, %arg1: i32) -> (i32, i32, i32) {
    %c0_i32 = arith.constant 0 : i32
    %c0_i32_0 = arith.constant 0 : i32
    return %arg1, %arg0, %c0_i32 : i32, i32, i32
  }
  func.func @transform_1(%arg0: i32, %arg1: i32) -> (i32, i32) {
    %c0_i32 = arith.constant 0 : i32
    %c0_i32_0 = arith.constant 0 : i32
    return %arg0, %c0_i32 : i32, i32
  }
  func.func @transform_2(%arg0: i32, %arg1: i32) -> (i32, i32) {
    %c0_i32 = arith.constant 0 : i32
    %c0_i32_0 = arith.constant 0 : i32
    %c0_i32_1 = arith.constant 0 : i32
    return %c0_i32, %c0_i32_0 : i32, i32
  }
  func.func @transform_3(%arg0: i32, %arg1: i32) -> (i32, i32) {
    %c0_i32 = arith.constant 0 : i32
    %c0_i32_0 = arith.constant 0 : i32
    %c0_i32_1 = arith.constant 0 : i32
    return %c0_i32, %c0_i32_0 : i32, i32
  }
  func.func @transform_4(%arg0: i32, %arg1: i32) -> (i32, i32) {
    %c0_i32 = arith.constant 0 : i32
    %c0_i32_0 = arith.constant 0 : i32
    %c0_i32_1 = arith.constant 0 : i32
    return %c0_i32, %c0_i32_0 : i32, i32
  }
  func.func @transform_5(%arg0: i32, %arg1: i32) -> (i32, i32) {
    %c0_i32 = arith.constant 0 : i32
    %c0_i32_0 = arith.constant 0 : i32
    %c0_i32_1 = arith.constant 0 : i32
    return %c0_i32, %c0_i32_0 : i32, i32
  }
  func.func @transform_6(%arg0: i32, %arg1: i32) -> (i32, i32) {
    %c0_i32 = arith.constant 0 : i32
    %c0_i32_0 = arith.constant 0 : i32
    return %arg0, %c0_i32 : i32, i32
  }
}

</mosaic_0001>

<bundles_post_ra>
// kernel: gru_net_forward.1
= control target key start
LH: loop header
LB: loop body
LE: loop exit
PB: predicated region body
PF: predicated region fallthrough
CT: control target
= control target key end

     0   :  { %s9610_s21 = smov 0   ;;  %s9612_s22 = smov 0   ;;  %s13063_s0 = inlined_call_operand.vmem [shape: bf16[32,16,128], index: 0, kind: input, shape index: {}]   ;;  %s13064_s1 = inlined_call_operand.vmem [shape: f32[16,128], index: 1, kind: input, shape index: {}]   ;;  %s13065_s2 = inlined_call_operand.vmem [shape: bf16[128,384], index: 2, kind: input, shape index: {}]   ;;  %s13066_s3 = inlined_call_operand.vmem [shape: bf16[128,384], index: 3, kind: input, shape index: {}]   ;;  %s13067_s4 = inlined_call_operand.vmem [shape: f32[1,384], index: 4, kind: input, shape index: {}]   ;;  %s13068_s5 = inlined_call_operand.vmem [shape: f32[1,128], index: 5, kind: input, shape index: {}]   ;;  %s13069_s6 = inlined_call_operand.vmem [shape: f32[16,128], index: 6, kind: output, shape index: {}]  }
   0x1   :  { %s9614_s23 = smov 0   ;;  %s9616_s24 = smov 0  }
   0x2   :  { %s9618_s25 = smov 0   ;;  %s9620_s26 = smov 0  }
   0x3   :  { %s9622_s27 = smov 0  }
   0x4 LB: > { %s25_s28 = sadd.s32 1, %s9559_s25  ;;  %s28_s29 = sadd.s32 1, %s9563_s26  ;;  %s9567_s27 = sphi %s9622_s27, %s16_s27   ;;  %s9563_s26 = sphi %s9620_s26, %s13645_s26   ;;  %s9559_s25 = sphi %s9618_s25, %s13644_s25   ;;  %s9555_s24 = sphi %s9616_s24, %s13643_s24   ;;  %s9551_s23 = sphi %s9614_s23, %s13642_s23   ;;  %s9547_s22 = sphi %s9612_s22, %s13641_s22   ;;  %s9543_s21 = sphi %s9610_s21, %s13640_s21  }
   0x5   : > { %p26_p0 = scmp.ge.s32.totalorder %s25_s28, 2  ;;  %p44_p1 = scmp.ne.s32.totalorder %s9547_s22, %s9543_s21 }
   0x6   : > { %p45_p2 = scmp.eq.s32.totalorder %s9567_s27, 0  ;;  %s37_s9 = sadd.s32 1, %s9547_s22 }
   0x7   : > { %s13647_s28 = smov (%p26_p0, %s25_s28), 0  ;;  %s13649_s29 = smov (!%p26_p0, %s28_s29), %s9563_s26 }
   0x8   : > { %p46_p3 = por %p45_p2, %p44_p1  ;;  %p30_p4 = scmp.ge.s32.totalorder %s13649_s29, 2 }
   0x9   : > { %s32_s30 = ssub.s32 %s9559_s25, %s13647_s28  ;;  %p7069_p6 = scmp.ge.s32.totalorder %s9567_s27, 4 }
   0xa   : > { %s13651_s29 = smov (%p30_p4, %s13649_s29), 0 }
   0xb   : > { %s33_s7 = ssub.s32 %s9563_s26, %s13651_s29  ;;  %218 = sbr.rel (%p7069_p6) target bundleno = 34 (0x22), region = 32 }
   0xc   : > { %s34_s8 = sor.u32 %s33_s7, %s32_s30 }
   0xd   : > { %p35_p5 = scmp.eq.s32.totalorder %s34_s8, 0 }
   0xf   : > { %s9661_s10 = scalar_select %p35_p5, %s9547_s22, %s37_s9  }
  0x12   : > { %221 = sbr.rel (!%p46_p3) target bundleno = 34 (0x22), region = 36  ;;  %s223_s11 = sand.u32 (%p46_p3), 1, %s9547_s22  }
  0x13   : > { %s7210_s12 = sshll.u32 (%p46_p3), %s9559_s25, 5  ;;  %s7070_s13 = sshll.u32 (%p46_p3), %s223_s11, 6 }
  0x14   : > { %s228_s14 = sadd.s32 (%p46_p3), %s9563_s26, %s7210_s12  ;;  %s225_s19 = scalar_lea.vmem (%p46_p3), [#allocation3], %s7070_s13 }
  0x15   : > { %s7073_s15 = sshll.u32 (%p46_p3), %s228_s14, 2 }
  0x16   : > { %s9670_s18 = scalar_lea.vmem (%p46_p3), %s13063_s0, %s7073_s15 }
  0x17   : > { %v246_v0 = vld [vmem:[%s9670_s18] sm:$0xf] (%p46_p3)  ;;  %v248_v1 = vld [vmem:[%s9670_s18 + $0x8] sm:$0xf] (%p46_p3)  ;;  %v250_v2 = vld [vmem:[%s9670_s18 + $0x10] sm:$0xf] (%p46_p3) }
  0x18   : > { %247 = vst [vmem:[%s225_s19] sm:$0xf] (%p46_p3), %v246_v0  ;;  %249 = vst [vmem:[%s225_s19 + $0x4] sm:$0xf] (%p46_p3), %v248_v1  ;;  %v252_v3 = vld [vmem:[%s9670_s18 + $0x18] sm:$0xf] (%p46_p3) }
  0x19   : > { %251 = vst [vmem:[%s225_s19 + $0x8] sm:$0xf] %v250_v2  ;;  %v254_v4 = vld [vmem:[%s9670_s18 + $0x20] sm:$0xf]  ;;  %v256_v5 = vld [vmem:[%s9670_s18 + $0x28] sm:$0xf] }
  0x1a   : > { %253 = vst [vmem:[%s225_s19 + $0xc] sm:$0xf] %v252_v3  ;;  %255 = vst [vmem:[%s225_s19 + $0x10] sm:$0xf] %v254_v4  ;;  %v258_v6 = vld [vmem:[%s9670_s18 + $0x30] sm:$0xf] }
  0x1b   : > { %257 = vst [vmem:[%s225_s19 + $0x14] sm:$0xf] %v256_v5  ;;  %v260_v7 = vld [vmem:[%s9670_s18 + $0x38] sm:$0xf]  ;;  %v262_v8 = vld [vmem:[%s9670_s18 + $0x40] sm:$0xf] }
  0x1c   : > { %259 = vst [vmem:[%s225_s19 + $0x18] sm:$0xf] %v258_v6  ;;  %261 = vst [vmem:[%s225_s19 + $0x1c] sm:$0xf] %v260_v7  ;;  %v264_v9 = vld [vmem:[%s9670_s18 + $0x48] sm:$0xf] }
  0x1d   : > { %263 = vst [vmem:[%s225_s19 + $0x20] sm:$0xf] %v262_v8  ;;  %v266_v10 = vld [vmem:[%s9670_s18 + $0x50] sm:$0xf]  ;;  %v268_v11 = vld [vmem:[%s9670_s18 + $0x58] sm:$0xf] }
  0x1e   : > { %265 = vst [vmem:[%s225_s19 + $0x24] sm:$0xf] %v264_v9  ;;  %267 = vst [vmem:[%s225_s19 + $0x28] sm:$0xf] %v266_v10  ;;  %v270_v12 = vld [vmem:[%s9670_s18 + $0x60] sm:$0xf] }
  0x1f   : > { %269 = vst [vmem:[%s225_s19 + $0x2c] sm:$0xf] %v268_v11  ;;  %v272_v13 = vld [vmem:[%s9670_s18 + $0x68] sm:$0xf]  ;;  %v274_v14 = vld [vmem:[%s9670_s18 + $0x70] sm:$0xf] }
  0x20   : > { %271 = vst [vmem:[%s225_s19 + $0x30] sm:$0xf] %v270_v12  ;;  %273 = vst [vmem:[%s225_s19 + $0x34] sm:$0xf] %v272_v13  ;;  %v276_v15 = vld [vmem:[%s9670_s18 + $0x78] sm:$0xf] }
  0x21   : > { %275 = vst [vmem:[%s225_s19 + $0x38] sm:$0xf] %v274_v14  ;;  %277 = vst [vmem:[%s225_s19 + $0x3c] sm:$0xf] %v276_v15 }
  0x22 PF: > { %p7074_p7 = scmp.ge.s32.totalorder %s9567_s27, 1  ;;  %p338_p8 = scmp.lt.s32.totalorder %s9567_s27, 5 }
  0x24   : > { %p339_p9 = pnand %p7074_p7, %p338_p8 }
  0x26   : > { %342 = sbr.rel (%p339_p9) target bundleno = 8454 (0x2106), region = 81 }
  0x2d   : > { %s345_s20 = sand.u32 1, %s9543_s21   ;;  %p378_p10 = scmp.lt.s32.totalorder %s9555_s24, 1 }
  0x2e   : > { %s7075_s30 = sshll.u32 %s345_s20, 6  ;;  %p7078_p11 = scmp.ne.s32.totalorder %s9551_s23, 0 }
  0x2f   : > { %s13653_s24 = smov (!%p378_p10, %s9555_s24), 1  ;;  %s9701_s15 = scalar_lea.vmem [#allocation3], %s7075_s30  ;;  %v391_v16 = vlaneseq (!%p7078_p11) }
  0x30   : > { %s7076_s7 = sshll.u32 %s13653_s24, 3  ;;  %390 = sbr.rel (%p7078_p11) target bundleno = 55 (0x37), region = 89 }
  0x31   : > { %s381_s11 = scalar_lea.vmem %s13064_s1, %s7076_s7  ;;  %s9699_s14 = scalar_lea.vmem %s13069_s6, %s7076_s7  ;;  %v392_v17 = vand.u32 (!%p7078_p11), 127, %v391_v16 }
  0x32   : > { %v394_v18 = vld [vmem:[%s381_s11] sm:$0xff] (!%p7078_p11) }
  0x33   : > { %vm393_vm0 = vcmp.lt.s32.totalorder (!%p7078_p11), %v392_v17, 48 }
  0x34   : > { %v395_v19 = vsel (!%p7078_p11), %vm393_vm0, %v394_v18, 0.0 }
  0x35   : > { %396 = vst [vmem:[#allocation2] sm:$0xff] (!%p7078_p11), %v395_v19 }
  0x37 PF: > { %v9707_v20 = vld [vmem:[%s13065_s2] sm:$0xff]  ;;  %v9712_v21 = vld [vmem:[%s13065_s2 + $0x8] sm:$0xf]  ;;  %v9717_v22 = vld [vmem:[%s13065_s2 + $0xc] sm:$0xff]  ;;  %p7079_p12 = scmp.ge.s32.totalorder %s9551_s23, 1 }
  0x38   : > { %13212 = vst [vmem:[#allocation4_spill] sm:$0xff] %v9707_v20  ;;  %13213 = vst [vmem:[#allocation5_spill] sm:$0xff] %v9712_v21  ;;  %v9722_v23 = vld [vmem:[%s13065_s2 + $0x14] sm:$0xf]  ;;  %v9727_v24 = vld [vmem:[%s13065_s2 + $0x18] sm:$0xff] }
  0x39   : > { %13214 = vst [vmem:[#allocation6_spill] sm:$0xff] %v9717_v22  ;;  %13215 = vst [vmem:[#allocation7_spill] sm:$0xff] %v9722_v23  ;;  %v9732_v25 = vld [vmem:[%s13065_s2 + $0x20] sm:$0xf]  ;;  %v9737_v26 = vld [vmem:[%s13065_s2 + $0x24] sm:$0xff] }
  0x3a   : > { %13216 = vst [vmem:[#allocation8_spill] sm:$0xff] %v9727_v24  ;;  %13217 = vst [vmem:[#allocation9_spill] sm:$0xff] %v9732_v25  ;;  %v9742_v27 = vld [vmem:[%s13065_s2 + $0x2c] sm:$0xf]  ;;  %v9747_v28 = vld [vmem:[%s13065_s2 + $0x30] sm:$0xff] }
  0x3b   : > { %13218 = vst [vmem:[#allocation10_spill] sm:$0xff] %v9737_v26  ;;  %13219 = vst [vmem:[#allocation11_spill] sm:$0xff] %v9742_v27  ;;  %v9752_v29 = vld [vmem:[%s13065_s2 + $0x38] sm:$0xf]  ;;  %v9757_v30 = vld [vmem:[%s13065_s2 + $0x3c] sm:$0xff] }
  0x3c   : > { %13220 = vst [vmem:[#allocation12_spill] sm:$0xff] %v9747_v28  ;;  %13221 = vst [vmem:[#allocation13_spill] sm:$0xff] %v9752_v29  ;;  %v9762_v31 = vld [vmem:[%s13065_s2 + $0x44] sm:$0xf]  ;;  %v9767_v32 = vld [vmem:[%s13065_s2 + $0x48] sm:$0xff] }
  0x3d   : > { %13222 = vst [vmem:[#allocation14_spill] sm:$0xff] %v9757_v30  ;;  %13223 = vst [vmem:[#allocation15_spill] sm:$0xff] %v9762_v31  ;;  %v9772_v33 = vld [vmem:[%s13065_s2 + $0x50] sm:$0xf]  ;;  %v9777_v34 = vld [vmem:[%s13065_s2 + $0x54] sm:$0xff] }
  0x3e   : > { %13224 = vst [vmem:[#allocation16_spill] sm:$0xff] %v9767_v32  ;;  %13225 = vst [vmem:[#allocation17_spill] sm:$0xff] %v9772_v33  ;;  %v9782_v35 = vld [vmem:[%s13065_s2 + $0x5c] sm:$0xf]  ;;  %v9787_v36 = vld [vmem:[%s13065_s2 + $0x60] sm:$0xff] }
  0x3f   : > { %13226 = vst [vmem:[#allocation18_spill] sm:$0xff] %v9777_v34  ;;  %13227 = vst [vmem:[#allocation19_spill] sm:$0xff] %v9782_v35  ;;  %v9792_v37 = vld [vmem:[%s13065_s2 + $0x68] sm:$0xf]  ;;  %v9797_v38 = vld [vmem:[%s13065_s2 + $0x6c] sm:$0xff] }
  0x40   : > { %13228 = vst [vmem:[#allocation20_spill] sm:$0xff] %v9787_v36  ;;  %13229 = vst [vmem:[#allocation21_spill] sm:$0xff] %v9792_v37  ;;  %v9802_v39 = vld [vmem:[%s13065_s2 + $0x74] sm:$0xf]  ;;  %v9807_v40 = vld [vmem:[%s13065_s2 + $0x78] sm:$0xff] }
  0x41   : > { %13230 = vst [vmem:[#allocation22_spill] sm:$0xff] %v9797_v38  ;;  %13231 = vst [vmem:[#allocation23_spill] sm:$0xff] %v9802_v39  ;;  %v9812_v41 = vld [vmem:[%s13065_s2 + $0x80] sm:$0xf]  ;;  %v9817_v42 = vld [vmem:[%s13065_s2 + $0x84] sm:$0xff] }
  0x42   : > { %13232 = vst [vmem:[#allocation24_spill] sm:$0xff] %v9807_v40  ;;  %13233 = vst [vmem:[#allocation25_spill] sm:$0xff] %v9812_v41  ;;  %v9822_v43 = vld [vmem:[%s13065_s2 + $0x8c] sm:$0xf]  ;;  %v9827_v44 = vld [vmem:[%s13065_s2 + $0x90] sm:$0xff] }
  0x43   : > { %13234 = vst [vmem:[#allocation26_spill] sm:$0xff] %v9817_v42  ;;  %13235 = vst [vmem:[#allocation27_spill] sm:$0xff] %v9822_v43  ;;  %v9832_v45 = vld [vmem:[%s13065_s2 + $0x98] sm:$0xf]  ;;  %v9837_v46 = vld [vmem:[%s13065_s2 + $0x9c] sm:$0xff] }
  0x44   : > { %13236 = vst [vmem:[#allocation28_spill] sm:$0xff] %v9827_v44  ;;  %13237 = vst [vmem:[#allocation29_spill] sm:$0xff] %v9832_v45  ;;  %v9842_v47 = vld [vmem:[%s13065_s2 + $0xa4] sm:$0xf]  ;;  %v9847_v48 = vld [vmem:[%s13065_s2 + $0xa8] sm:$0xff] }
  0x45   : > { %13238 = vst [vmem:[#allocation30_spill] sm:$0xff] %v9837_v46  ;;  %13239 = vst [vmem:[#allocation31_spill] sm:$0xff] %v9842_v47  ;;  %v9852_v49 = vld [vmem:[%s13065_s2 + $0xb0] sm:$0xf]  ;;  %v9857_v50 = vld [vmem:[%s13065_s2 + $0xb4] sm:$0xff] }
  0x46   : > { %13240 = vst [vmem:[#allocation32_spill] sm:$0xff] %v9847_v48  ;;  %13241 = vst [vmem:[#allocation33_spill] sm:$0xff] %v9852_v49  ;;  %v9862_v51 = vld [vmem:[%s13065_s2 + $0xbc] sm:$0xf]  ;;  %v9867_v52 = vld [vmem:[%s13066_s3] sm:$0xff] }
  0x47   : > { %13242 = vst [vmem:[#allocation34_spill] sm:$0xff] %v9857_v50  ;;  %13243 = vst [vmem:[#allocation35_spill] sm:$0xff] %v9862_v51  ;;  %v9872_v53 = vld [vmem:[%s13066_s3 + $0x8] sm:$0xf]  ;;  %v9877_v54 = vld [vmem:[%s13066_s3 + $0xc] sm:$0xff] }
  0x48   : > { %13244 = vst [vmem:[#allocation36_spill] sm:$0xff] %v9867_v52  ;;  %13245 = vst [vmem:[#allocation37_spill] sm:$0xff] %v9872_v53  ;;  %v9882_v55 = vld [vmem:[%s13066_s3 + $0x14] sm:$0xf]  ;;  %v9887_v56 = vld [vmem:[%s13066_s3 + $0x18] sm:$0xff] }
  0x49   : > { %13246 = vst [vmem:[#allocation38_spill] sm:$0xff] %v9877_v54  ;;  %13247 = vst [vmem:[#allocation39_spill] sm:$0xff] %v9882_v55  ;;  %v9892_v57 = vld [vmem:[%s13066_s3 + $0x20] sm:$0xf]  ;;  %v9897_v58 = vld [vmem:[%s13066_s3 + $0x24] sm:$0xff] }
  0x4a   : > { %13248 = vst [vmem:[#allocation40_spill] sm:$0xff] %v9887_v56  ;;  %13249 = vst [vmem:[#allocation41_spill] sm:$0xff] %v9892_v57  ;;  %v9902_v59 = vld [vmem:[%s13066_s3 + $0x2c] sm:$0xf]  ;;  %v9907_v60 = vld [vmem:[%s13066_s3 + $0x30] sm:$0xff] }
  0x4b   : > { %13250 = vst [vmem:[#allocation42_spill] sm:$0xff] %v9897_v58  ;;  %13251 = vst [vmem:[#allocation43_spill] sm:$0xff] %v9902_v59  ;;  %v9912_v61 = vld [vmem:[%s13066_s3 + $0x38] sm:$0xf]  ;;  %v9917_v62 = vld [vmem:[%s13066_s3 + $0x3c] sm:$0xff] }
  0x4c   : > { %13252 = vst [vmem:[#allocation44_spill] sm:$0xff] %v9907_v60  ;;  %13253 = vst [vmem:[#allocation45_spill] sm:$0xff] %v9912_v61  ;;  %v9922_v63 = vld [vmem:[%s13066_s3 + $0x44] sm:$0xf]  ;;  %v9927_v0 = vld [vmem:[%s13066_s3 + $0x48] sm:$0xff] }
  0x4d   : > { %13254 = vst [vmem:[#allocation46_spill] sm:$0xff] %v9917_v62  ;;  %13255 = vst [vmem:[#allocation47_spill] sm:$0xff] %v9922_v63  ;;  %v9932_v1 = vld [vmem:[%s13066_s3 + $0x50] sm:$0xf]  ;;  %v9937_v2 = vld [vmem:[%s13066_s3 + $0x54] sm:$0xff] }
  0x4e   : > { %13256 = vst [vmem:[#allocation48_spill] sm:$0xff] %v9927_v0  ;;  %13257 = vst [vmem:[#allocation49_spill] sm:$0xff] %v9932_v1  ;;  %v9942_v3 = vld [vmem:[%s13066_s3 + $0x5c] sm:$0xf]  ;;  %v9947_v4 = vld [vmem:[%s13066_s3 + $0x60] sm:$0xff] }
  0x4f   : > { %13258 = vst [vmem:[#allocation50_spill] sm:$0xff] %v9937_v2  ;;  %13259 = vst [vmem:[#allocation51_spill] sm:$0xff] %v9942_v3  ;;  %v9952_v5 = vld [vmem:[%s13066_s3 + $0x68] sm:$0xf]  ;;  %v9957_v6 = vld [vmem:[%s13066_s3 + $0x6c] sm:$0xff] }
  0x50   : > { %13260 = vst [vmem:[#allocation52_spill] sm:$0xff] %v9947_v4  ;;  %13261 = vst [vmem:[#allocation53_spill] sm:$0xff] %v9952_v5  ;;  %v9962_v7 = vld [vmem:[%s13066_s3 + $0x74] sm:$0xf]  ;;  %v9967_v8 = vld [vmem:[%s13066_s3 + $0x78] sm:$0xff] }
  0x51   : > { %13262 = vst [vmem:[#allocation54_spill] sm:$0xff] %v9957_v6  ;;  %13263 = vst [vmem:[#allocation55_spill] sm:$0xff] %v9962_v7  ;;  %v9972_v9 = vld [vmem:[%s13066_s3 + $0x80] sm:$0xf]  ;;  %v9977_v10 = vld [vmem:[%s13066_s3 + $0x84] sm:$0xff] }
  0x52   : > { %13264 = vst [vmem:[#allocation56_spill] sm:$0xff] %v9967_v8  ;;  %13265 = vst [vmem:[#allocation57_spill] sm:$0xff] %v9972_v9  ;;  %v9982_v11 = vld [vmem:[%s13066_s3 + $0x8c] sm:$0xf]  ;;  %v9987_v12 = vld [vmem:[%s13066_s3 + $0x90] sm:$0xff] }
  0x53   : > { %13266 = vst [vmem:[#allocation58_spill] sm:$0xff] %v9977_v10  ;;  %13267 = vst [vmem:[#allocation59_spill] sm:$0xff] %v9982_v11  ;;  %v9992_v13 = vld [vmem:[%s13066_s3 + $0x98] sm:$0xf]  ;;  %v9997_v14 = vld [vmem:[%s13066_s3 + $0x9c] sm:$0xff]  ;;  %467 = sbr.rel (%p7079_p12) target bundleno = 4219 (0x107b), region = 93 }
  0x54   : > { %13268 = vst [vmem:[#allocation60_spill] sm:$0xff] %v9987_v12  ;;  %13269 = vst [vmem:[#allocation61_spill] sm:$0xff] %v9992_v13  ;;  %v10002_v15 = vld [vmem:[%s13066_s3 + $0xa4] sm:$0xf]  ;;  %v10007_v16 = vld [vmem:[%s13066_s3 + $0xa8] sm:$0xff] }
  0x55   : > { %13270 = vst [vmem:[#allocation62_spill] sm:$0xff] %v9997_v14  ;;  %13271 = vst [vmem:[#allocation63_spill] sm:$0xff] %v10002_v15  ;;  %v10012_v17 = vld [vmem:[%s13066_s3 + $0xb0] sm:$0xf]  ;;  %v10017_v18 = vld [vmem:[%s13066_s3 + $0xb4] sm:$0xff] }
  0x56   : > { %13272 = vst [vmem:[#allocation64_spill] sm:$0xff] %v10007_v16  ;;  %13273 = vst [vmem:[#allocation65_spill] sm:$0xff] %v10012_v17  ;;  %v10022_v19 = vld [vmem:[%s13066_s3 + $0xbc] sm:$0xf]  ;;  %v10027_v13 = vld [vmem:[%s13067_s4] sm:$0x7] }
  0x57   : > { %13274 = vst [vmem:[#allocation66_spill] sm:$0xff] %v10017_v18  ;;  %13275 = vst [vmem:[#allocation67_spill] sm:$0xff] %v10022_v19  ;;  %v10032_v15 = vld [vmem:[%s13068_s5] sm:$0x1] }
  0x58   : > { %13276 = vst [vmem:[#allocation68_spill] sm:$0xff] %v10027_v13  ;;  %13277 = vst [vmem:[#allocation69_spill] sm:$0xff] %v10032_v15  ;;  %v10034_v17 = vld [vmem:[#allocation2] sm:$0xff] }
  0x59   : > { %13278 = vst [vmem:[#allocation70_spill] sm:$0xff] %v10034_v17 }
  0x5a   : > { %v10039_v16 = vcombine.high %v9707_v20, %v9717_v22  ;;  %v10043_v19 = vcombine.low %v9707_v20, %v9717_v22  ;;  %v10047_v13 = vcombine.high %v9727_v24, %v9737_v26  ;;  %v10052_v15 = vcombine.low %v9712_v21, %v9722_v23 }
  0x5b   : > { %v10057_v17 = vcombine.low %v9727_v24, %v9737_v26  ;;  %v13086_v18 = vmov 0.0   ;;  %v10063_v20 = vcombine.high %v9747_v28, %v9757_v30  ;;  %v10068_v21 = vcombine.low %v9732_v25, %v9742_v27 }
  0x5c   : > { %13279 = vst [vmem:[#allocation71_spill] sm:$0xff] %v10039_v16  ;;  %613 = vmatprep.subr.bf16.mxu0 %v10039_v16  ;;  %7787 = vmatprep.subr.bf16.mxu1 %v13086_v18  ;;  %v13089_v23 = vmov 0   ;;  %v10075_v24 = vcombine.low %v9747_v28, %v9757_v30  ;;  %v10080_v26 = vcombine.high %v9767_v32, %v9777_v34  ;;  %v13280_v25 = vmov 0.0  }
  0x5d   : > { %614 = vmatpush1.bf16.msra.mxu0 %v10043_v19  ;;  %7788 = vmatpush3.bf16.msra.mxu1 %v10052_v15  ;;  %vm9571_vm1 = vmmov 0   ;;  %v10098_v27 = vcombine.high %v9787_v36, %v9797_v38 }
  0x5e   : > { %615 = vmatprep.subr.bf16.mxu0 %v10047_v13  ;;  %7789 = vmatprep.subr.bf16.mxu1 %v13086_v18  ;;  %v10085_v18 = vcombine.low %v9752_v29, %v9762_v31  ;;  %v10103_v29 = vcombine.low %v9772_v33, %v9782_v35  ;;  %v10109_v31 = vcombine.low %v9787_v36, %v9797_v38 }
  0x5f   : > { %645 = vmatprep.mubr.bf16.mxu0 %v13089_v23  ;;  %7803 = vmatprep.mubr.msk.bf16.mxu1 %vm9571_vm1, %v13280_v25  ;;  %v10093_v23 = vcombine.low %v9767_v32, %v9777_v34  ;;  %v10114_v32 = vcombine.high %v9807_v40, %v9817_v42  ;;  %v10119_v33 = vcombine.low %v9792_v37, %v9802_v39 }
  0x60   : > { %v10125_v35 = vcombine.low %v9807_v40, %v9817_v42  ;;  %v10130_v36 = vcombine.high %v9827_v44, %v9837_v46  ;;  %v10135_v37 = vcombine.low %v9812_v41, %v9822_v43  ;;  %v10141_v39 = vcombine.low %v9827_v44, %v9837_v46  ;;  %v13297_v42 = vld [vmem:[#allocation68_spill] sm:$0xff] }
  0x61   : > { %616 = vmatpush1.bf16.msra.mxu0 %v10057_v17  ;;  %7790 = vmatpush3.bf16.msra.mxu1 %v10068_v21  ;;  %v10146_v40 = vcombine.high %v9847_v48, %v9857_v50  ;;  %v10151_v41 = vcombine.low %v9832_v45, %v9842_v47  ;;  %v10157_v43 = vcombine.low %v9847_v48, %v9857_v50  ;;  %v468_v47 = vld [vmem:[%s9701_s15] sm:$0xf] }
  0x62   : > { %617 = vmatprep.subr.bf16.mxu0 %v10063_v20  ;;  %7791 = vmatprep.subr.bf16.mxu1 %v13280_v25  ;;  %v10162_v44 = vcombine.high %v9867_v52, %v9877_v54  ;;  %v10167_v45 = vcombine.low %v9852_v49, %v9862_v51  ;;  %v10174_v48 = vcombine.low %v9867_v52, %v9877_v54 }
  0x63   : > { %v10179_v50 = vcombine.high %v9887_v56, %v9897_v58  ;;  %v10184_v49 = vcombine.low %v9872_v53, %v9882_v55  ;;  %v10190_v51 = vcombine.low %v9887_v56, %v9897_v58  ;;  %v10195_v52 = vcombine.high %v9907_v60, %v9917_v62 }
  0x64   : > { %v10200_v53 = vcombine.low %v9892_v57, %v9902_v59  ;;  %v13281_v55 = vmov 0   ;;  %v10214_v56 = vcombine.high %v9927_v0, %v9937_v2  ;;  %v10219_v57 = vcombine.low %v9912_v61, %v9922_v63 }
  0x65   : > { %618 = vmatpush1.bf16.msra.mxu0 %v10075_v24  ;;  %7792 = vmatpush3.bf16.msra.mxu1 %v10085_v18  ;;  %v10225_v59 = vcombine.low %v9927_v0, %v9937_v2  ;;  %v10235_v61 = vcombine.low %v9932_v1, %v9942_v3  ;;  %v10241_v63 = vcombine.low %v9947_v4, %v9957_v6  ;;  %v13289_v2 = vld [vmem:[#allocation63_spill] sm:$0xff] }
  0x66   : > { %619 = vmatprep.subr.bf16.mxu0 %v10080_v26  ;;  %7793 = vmatprep.subr.bf16.mxu1 %v13280_v25  ;;  %v10246_v0 = vcombine.high %v9967_v8, %v9977_v10  ;;  %v10251_v1 = vcombine.low %v9952_v5, %v9962_v7  ;;  %v10257_v3 = vcombine.low %v9967_v8, %v9977_v10  ;;  %v13286_v8 = vld [vmem:[#allocation66_spill] sm:$0xff]  ;;  %v13287_v10 = vld [vmem:[#allocation64_spill] sm:$0xff] }
  0x67   : > { %v10267_v5 = vcombine.low %v9972_v9, %v9982_v11  ;;  %v10273_v7 = vcombine.low %v9987_v12, %v9997_v14  ;;  %v10289_v11 = vcombine.low %v13287_v10, %v13286_v8 }
  0x68   : > { %13282 = vst [vmem:[#allocation72_spill] sm:$0xff] %v10257_v3 }
  0x69   : > { %620 = vmatpush1.bf16.msra.mxu0 %v10093_v23  ;;  %7794 = vmatpush3.bf16.msra.mxu1 %v10103_v29  ;;  %13284 = vst [vmem:[#allocation74_spill] sm:$0xff] %v10267_v5  ;;  %13285 = vst [vmem:[#allocation75_spill] sm:$0xff] %v10273_v7 }
  0x6a   : > { %621 = vmatprep.subr.bf16.mxu0 %v10098_v27  ;;  %7795 = vmatprep.subr.bf16.mxu1 %v13280_v25  ;;  %13292 = vst [vmem:[#allocation78_spill] sm:$0xff] %v10289_v11 }
  0x6d   : > { %622 = vmatpush1.bf16.msra.mxu0 %v10109_v31  ;;  %7796 = vmatpush3.bf16.msra.mxu1 %v10119_v33 }
  0x6e   : > { %623 = vmatprep.subr.bf16.mxu0 %v10114_v32  ;;  %7797 = vmatprep.subr.bf16.mxu1 %v13280_v25 }
  0x71   : > { %624 = vmatpush1.bf16.msra.mxu0 %v10125_v35  ;;  %7798 = vmatpush3.bf16.msra.mxu1 %v10135_v37 }
  0x72   : > { %625 = vmatprep.subr.bf16.mxu0 %v10130_v36  ;;  %7799 = vmatprep.subr.bf16.mxu1 %v13280_v25 }
  0x75   : > { %626 = vmatpush1.bf16.msra.mxu0 %v10141_v39  ;;  %7800 = vmatpush3.bf16.msra.mxu1 %v10151_v41 }
  0x76   : > { %627 = vmatprep.subr.bf16.mxu0 %v10146_v40  ;;  %7801 = vmatprep.subr.bf16.mxu1 %v13280_v25 }
  0x79   : > { %628 = vmatpush1.bf16.msra.mxu0 %v10157_v43  ;;  %7802 = vmatpush3.bf16.msra.mxu1 %v10167_v45 }
  0x7a   : > { %823 = vmatprep.subr.bf16.mxu0 %v10162_v44  ;;  %7807 = vmatprep.subr.bf16.mxu1 %v13280_v25 }
  0x7c   : > { %646 = vmatmul.mubr.bf16.vlgmr.msra.gmra.mrb[0].mxu0 %v468_v47  ;;  %7804 = vmatmul.mubr.bf16.vlgmr.msra.gmra.mrb[0].mxu1 %v468_v47  ;;  %v10209_v47 = vcombine.low %v9907_v60, %v9917_v62  ;;  %v10230_v60 = vcombine.high %v9947_v4, %v9957_v6  ;;  %v10262_v4 = vcombine.high %v9987_v12, %v9997_v14  ;;  %v13290_v62 = vld [vmem:[#allocation61_spill] sm:$0xff]  ;;  %v13293_v12 = vld [vmem:[#allocation67_spill] sm:$0xff] }
  0x7d   : > { %824 = vmatpush1.bf16.msra.mxu0 %v10174_v48  ;;  %7808 = vmatpush3.bf16.msra.mxu1 %v10184_v49  ;;  %v10278_v6 = vcombine.high %v13287_v10, %v13286_v8  ;;  %v10283_v9 = vcombine.low %v13290_v62, %v13289_v2  ;;  %v13294_v14 = vld [vmem:[#allocation65_spill] sm:$0xff]  ;;  %v13296_v62 = vld [vmem:[#allocation70_spill] sm:$0xff]  ;;  %v7128_v8 = vld [vmem:[%s9701_s15 + $0x4] sm:$0xf] }
  0x7e   : > { %825 = vmatprep.subr.bf16.mxu0 %v10179_v50  ;;  %7809 = vmatprep.subr.bf16.mxu1 %v13280_v25  ;;  %13283 = vst [vmem:[#allocation73_spill] sm:$0xff] %v10262_v4  ;;  %v10295_v58 = vcombine.low %v13294_v14, %v13293_v12  ;;  %v694_v2 = vpack.c.bf16 %v13296_v62, %v13296_v62 }
  0x7f   : > { %855 = vmatprep.mubr.bf16.mxu0 %v13281_v55  ;;  %7823 = vmatprep.mubr.msk.bf16.mxu1 %vm9571_vm1, %v13280_v25  ;;  %13288 = vst [vmem:[#allocation76_spill] sm:$0xff] %v10278_v6  ;;  %13291 = vst [vmem:[#allocation77_spill] sm:$0xff] %v10283_v9 }
  0x80   : > { %13295 = vst [vmem:[#allocation79_spill] sm:$0xff] %v10295_v58 }
  0x81   : > { %826 = vmatpush1.bf16.msra.mxu0 %v10190_v51  ;;  %7810 = vmatpush3.bf16.msra.mxu1 %v10200_v53 }
  0x82   : > { %827 = vmatprep.subr.bf16.mxu0 %v10195_v52  ;;  %7811 = vmatprep.subr.bf16.mxu1 %v13280_v25 }
  0x85   : > { %828 = vmatpush1.bf16.msra.mxu0 %v10209_v47  ;;  %7812 = vmatpush3.bf16.msra.mxu1 %v10219_v57 }
  0x86   : > { %829 = vmatprep.subr.bf16.mxu0 %v10214_v56  ;;  %7813 = vmatprep.subr.bf16.mxu1 %v13280_v25 }
  0x89   : > { %830 = vmatpush1.bf16.msra.mxu0 %v10225_v59  ;;  %7814 = vmatpush3.bf16.msra.mxu1 %v10235_v61 }
  0x8a   : > { %831 = vmatprep.subr.bf16.mxu0 %v10230_v60  ;;  %7815 = vmatprep.subr.bf16.mxu1 %v13280_v25 }
  0x8d   : > { %832 = vmatpush1.bf16.msra.mxu0 %v10241_v63  ;;  %7816 = vmatpush3.bf16.msra.mxu1 %v10251_v1 }
  0x8e   : > { %833 = vmatprep.subr.bf16.mxu0 %v10246_v0  ;;  %7817 = vmatprep.subr.bf16.mxu1 %v13280_v25 }
  0x91   : > { %834 = vmatpush1.bf16.msra.mxu0 %v10257_v3  ;;  %7818 = vmatpush3.bf16.msra.mxu1 %v10267_v5 }
  0x92   : > { %835 = vmatprep.subr.bf16.mxu0 %v10262_v4  ;;  %7819 = vmatprep.subr.bf16.mxu1 %v13280_v25 }
  0x95   : > { %836 = vmatpush1.bf16.msra.mxu0 %v10273_v7  ;;  %7820 = vmatpush3.bf16.msra.mxu1 %v10283_v9 }
  0x96   : > { %837 = vmatprep.subr.bf16.mxu0 %v10278_v6  ;;  %7821 = vmatprep.subr.bf16.mxu1 %v13280_v25 }
  0x99   : > { %838 = vmatpush1.bf16.msra.mxu0 %v10289_v11  ;;  %7822 = vmatpush3.bf16.msra.mxu1 %v10295_v58 }
  0x9a   : > { %929 = vmatprep.subr.bf16.mxu0 %v10039_v16  ;;  %7827 = vmatprep.subr.bf16.mxu1 %v13280_v25 }
  0x9c   : > { %856 = vmatmul.mubr.bf16.vlgmr.msra.gmra.mrb[0].mxu0 %v694_v2  ;;  %7824 = vmatmul.mubr.bf16.vlgmr.msra.gmra.mrb[4].mxu1 %v694_v2 }
  0x9d   : > { %930 = vmatpush1.bf16.msra.mxu0 %v10043_v19  ;;  %7828 = vmatpush3.bf16.msra.mxu1 %v10052_v15 }
  0x9e   : > { %931 = vmatprep.subr.bf16.mxu0 %v10047_v13  ;;  %7829 = vmatprep.subr.bf16.mxu1 %v13280_v25 }
  0x9f   : > { %961 = vmatprep.mubr.bf16.mxu0 %v13281_v55  ;;  %7843 = vmatprep.mubr.msk.bf16.mxu1 %vm9571_vm1, %v13280_v25 }
  0xa1   : > { %932 = vmatpush1.bf16.msra.mxu0 %v10057_v17  ;;  %7830 = vmatpush3.bf16.msra.mxu1 %v10068_v21 }
  0xa2   : > { %933 = vmatprep.subr.bf16.mxu0 %v10063_v20  ;;  %7831 = vmatprep.subr.bf16.mxu1 %v13280_v25 }
  0xa5   : > { %934 = vmatpush1.bf16.msra.mxu0 %v10075_v24  ;;  %7832 = vmatpush3.bf16.msra.mxu1 %v10085_v18 }
  0xa6   : > { %935 = vmatprep.subr.bf16.mxu0 %v10080_v26  ;;  %7833 = vmatprep.subr.bf16.mxu1 %v13280_v25 }
  0xa9   : > { %936 = vmatpush1.bf16.msra.mxu0 %v10093_v23  ;;  %7834 = vmatpush3.bf16.msra.mxu1 %v10103_v29 }
  0xaa   : > { %937 = vmatprep.subr.bf16.mxu0 %v10098_v27  ;;  %7835 = vmatprep.subr.bf16.mxu1 %v13280_v25 }
  0xad   : > { %938 = vmatpush1.bf16.msra.mxu0 %v10109_v31  ;;  %7836 = vmatpush3.bf16.msra.mxu1 %v10119_v33 }
  0xae   : > { %939 = vmatprep.subr.bf16.mxu0 %v10114_v32  ;;  %7837 = vmatprep.subr.bf16.mxu1 %v13280_v25 }
  0xb1   : > { %940 = vmatpush1.bf16.msra.mxu0 %v10125_v35  ;;  %7838 = vmatpush3.bf16.msra.mxu1 %v10135_v37 }
  0xb2   : > { %941 = vmatprep.subr.bf16.mxu0 %v10130_v36  ;;  %7839 = vmatprep.subr.bf16.mxu1 %v13280_v25 }
  0xb5   : > { %942 = vmatpush1.bf16.msra.mxu0 %v10141_v39  ;;  %7840 = vmatpush3.bf16.msra.mxu1 %v10151_v41 }
  0xb6   : > { %943 = vmatprep.subr.bf16.mxu0 %v10146_v40  ;;  %7841 = vmatprep.subr.bf16.mxu1 %v13280_v25 }
  0xb9   : > { %944 = vmatpush1.bf16.msra.mxu0 %v10157_v43  ;;  %7842 = vmatpush3.bf16.msra.mxu1 %v10167_v45 }
  0xba   : > { %1011 = vmatprep.subr.bf16.mxu0 %v10162_v44  ;;  %7847 = vmatprep.subr.bf16.mxu1 %v13280_v25 }
  0xbc   : > { %962 = vmatmul.mubr.bf16.vlgmr.msra.gmra.mrb[4].mxu0 %v7128_v8  ;;  %7844 = vmatmul.mubr.bf16.vlgmr.msra.gmra.mrb[8].mxu1 %v7128_v8  ;;  %v470_v8 = vlaneseq }
  0xbd   : > { %1012 = vmatpush1.bf16.msra.mxu0 %v10174_v48  ;;  %7848 = vmatpush3.bf16.msra.mxu1 %v10184_v49 }
  0xbe   : > { %1013 = vmatprep.subr.bf16.mxu0 %v10179_v50  ;;  %7849 = vmatprep.subr.bf16.mxu1 %v13280_v25  ;;  %v471_v54 = vshrl.u32 %v470_v8, 7 }
  0xbf   : > { %1043 = vmatprep.mubr.bf16.mxu0 %v13281_v55  ;;  %7863 = vmatprep.mubr.msk.bf16.mxu1 %vm9571_vm1, %v13280_v25 }
  0xc0   : > { %v472_v46 = vsub.s32 0, %v471_v54  ;;  %v480_v8 = vsub.s32 2, %v471_v54 }
  0xc1   : > { %1014 = vmatpush1.bf16.msra.mxu0 %v10190_v51  ;;  %7850 = vmatpush3.bf16.msra.mxu1 %v10200_v53 }
  0xc2   : > { %1015 = vmatprep.subr.bf16.mxu0 %v10195_v52  ;;  %7851 = vmatprep.subr.bf16.mxu1 %v13280_v25  ;;  %v10376_v38 = vrot.slane %v13297_v42, %v472_v46 }
  0xc4   : > { %13298 = vst [vmem:[#allocation80_spill] sm:$0xff] %v10376_v38 }
  0xc5   : > { %1016 = vmatpush1.bf16.msra.mxu0 %v10209_v47  ;;  %7852 = vmatpush3.bf16.msra.mxu1 %v10219_v57 }
  0xc6   : > { %1017 = vmatprep.subr.bf16.mxu0 %v10214_v56  ;;  %7853 = vmatprep.subr.bf16.mxu1 %v13280_v25 }
  0xc9   : > { %1018 = vmatpush1.bf16.msra.mxu0 %v10225_v59  ;;  %7854 = vmatpush3.bf16.msra.mxu1 %v10235_v61 }
  0xca   : > { %1019 = vmatprep.subr.bf16.mxu0 %v10230_v60  ;;  %7855 = vmatprep.subr.bf16.mxu1 %v13280_v25 }
  0xcd   : > { %1020 = vmatpush1.bf16.msra.mxu0 %v10241_v63  ;;  %7856 = vmatpush3.bf16.msra.mxu1 %v10251_v1 }
  0xce   : > { %1021 = vmatprep.subr.bf16.mxu0 %v10246_v0  ;;  %7857 = vmatprep.subr.bf16.mxu1 %v13280_v25 }
  0xd1   : > { %1022 = vmatpush1.bf16.msra.mxu0 %v10257_v3  ;;  %7858 = vmatpush3.bf16.msra.mxu1 %v10267_v5  ;;  %v10387_v3 = vrot.slane %v13297_v42, %v480_v8  ;;  %v7129_v8 = vld [vmem:[%s9701_s15 + $0x8] sm:$0xf] }
  0xd2   : > { %1023 = vmatprep.subr.bf16.mxu0 %v10262_v4  ;;  %7859 = vmatprep.subr.bf16.mxu1 %v13280_v25  ;;  %v13299_v4 = vld [vmem:[#allocation69_spill] sm:$0xff] }
  0xd3   : > { %v10384_v5 = vrot.slane %v13299_v4, %v472_v46 }
  0xd5   : > { %1024 = vmatpush1.bf16.msra.mxu0 %v10273_v7  ;;  %7860 = vmatpush3.bf16.msra.mxu1 %v10283_v9 }
  0xd6   : > { %1025 = vmatprep.subr.bf16.mxu0 %v10278_v6  ;;  %7861 = vmatprep.subr.bf16.mxu1 %v13280_v25 }
  0xd9   : > { %1026 = vmatpush1.bf16.msra.mxu0 %v10289_v11  ;;  %7862 = vmatpush3.bf16.msra.mxu1 %v10295_v58  ;;  %v476_v58 = vsub.s32 1, %v471_v54 }
  0xda   : > { %1111 = vmatprep.subr.bf16.mxu0 %v10039_v16  ;;  %7867 = vmatprep.subr.bf16.mxu1 %v13280_v25 }
 0x14f   : > { %v688_v10 = vpop.f32.mrb[0].mxu1 }
 0x150   : > { %v7805_v12 = vpop.f32.mrb[1].mxu1 }
 0x151   : > { %v691_v14 = vpop.f32.mrb[2].mxu1 }
 0x152   : > { %v7806_v2 = vpop.f32.mrb[3].mxu1  ;;  %v10380_v14 = vrot.slane %v13297_v42, %v476_v58 }
 0x16f   : > { %v857_v34 = vpop.f32.mrb[0].mxu0  ;;  %v898_v22 = vpop.f32.mrb[4].mxu1 }
 0x170   : > { %v9067_v28 = vadd.f32 %v857_v34, %v10376_v38  ;;  %v859_v30 = vpop.f32.mrb[1].mxu0  ;;  %v7825_v16 = vpop.f32.mrb[5].mxu1 }
 0x171   : > { %v861_v11 = vpop.f32.mrb[2].mxu0  ;;  %v901_v7 = vpop.f32.mrb[6].mxu1  ;;  %v9068_v2 = vadd.f32 %v859_v30, %v10380_v14 }
 0x172   : > { %v906_v6 = vmul.f32 0.5, %v9067_v28  ;;  %v862_v9 = vpop.f32.mrb[3].mxu0  ;;  %v7826_v12 = vpop.f32.mrb[7].mxu1  ;;  %v920_v28 = vadd.f32 %v10384_v5, %v898_v22 }
 0x173   : > { %v907_v34 = vmul.f32 0.5, %v9068_v2 }
 0x174   : > { %9321 = vtanh.f32 %v906_v6  ;;  %v689_v6 = vadd.f32 %v688_v10, %v10387_v3 }
 0x175   : > { %9323 = vtanh.f32 %v907_v34  ;;  %v13300_v34 = vld [vmem:[#allocation72_spill] sm:$0xff] }
 0x17e   : > { %v9322_v38 = vpop.eup %9321 }
 0x17f   : > { %v910_v11 = vmul.f32 0.5, %v9322_v38  ;;  %v9324_v30 = vpop.eup %9323 }
 0x180   : > { %v911_v54 = vmul.f32 0.5, %v9324_v30  ;;  %v13307_v30 = vld [vmem:[#allocation79_spill] sm:$0xff] }
 0x181   : > { %v912_v7 = vadd.f32 0.5, %v910_v11  ;;  %v13301_v11 = vld [vmem:[#allocation74_spill] sm:$0xff] }
 0x182   : > { %v913_v46 = vadd.f32 0.5, %v911_v54  ;;  %v13308_v54 = vld [vmem:[#allocation71_spill] sm:$0xff] }
 0x183   : > { %v921_v58 = vmul.f32 %v920_v28, %v912_v7  ;;  %v13302_v28 = vld [vmem:[#allocation73_spill] sm:$0xff]  ;;  %v13303_v7 = vld [vmem:[#allocation75_spill] sm:$0xff] }
 0x185   : > { %v922_v9 = vadd.f32 %v921_v58, %v689_v6  ;;  %v13304_v6 = vld [vmem:[#allocation77_spill] sm:$0xff]  ;;  %v13305_v58 = vld [vmem:[#allocation76_spill] sm:$0xff] }
 0x187   : > { %9325 = vtanh.f32 %v922_v9  ;;  %v13306_v9 = vld [vmem:[#allocation78_spill] sm:$0xff] }
 0x18f   : > { %v1004_v22 = vpop.f32.mrb[8].mxu1 }
 0x190   : > { %v7845_v42 = vpop.f32.mrb[9].mxu1 }
 0x191   : > { %v9326_v16 = vpop.eup %9325 }
 0x192   : > { %v924_v4 = vsub.f32 %v13296_v62, %v9326_v16  ;;  %v1007_v62 = vpop.f32.mrb[10].mxu1 }
 0x193   : > { %v7846_v10 = vpop.f32.mrb[11].mxu1 }
 0x194   : > { %v925_v12 = vmul.f32 %v924_v4, %v913_v46  ;;  %v13309_v4 = vld [vmem:[#allocation80_spill] sm:$0xff] }
 0x196   : > { %v10392_v2 = vadd.f32 %v9326_v16, %v925_v12 }
 0x198   : > { %v1010_v38 = vpack.c.bf16 %v10392_v2, %v10392_v2 }
 0x19a   : > { %1044 = vmatmul.mubr.bf16.vlgmr.msra.gmra.mrb[4].mxu0 %v1010_v38  ;;  %7864 = vmatmul.mubr.bf16.vlgmr.msra.gmra.mrb[12].mxu1 %v1010_v38 }
 0x19b   : > { %1112 = vmatpush1.bf16.msra.mxu0 %v10043_v19  ;;  %7868 = vmatpush3.bf16.msra.mxu1 %v10052_v15 }
 0x19c   : > { %1113 = vmatprep.subr.bf16.mxu0 %v10047_v13  ;;  %7869 = vmatprep.subr.bf16.mxu1 %v13280_v25 }
 0x19d   : > { %1143 = vmatprep.mubr.bf16.mxu0 %v13281_v55  ;;  %7883 = vmatprep.mubr.msk.bf16.mxu1 %vm9571_vm1, %v13280_v25 }
 0x19f   : > { %1114 = vmatpush1.bf16.msra.mxu0 %v10057_v17  ;;  %7870 = vmatpush3.bf16.msra.mxu1 %v10068_v21 }
 0x1a0   : > { %1115 = vmatprep.subr.bf16.mxu0 %v10063_v20  ;;  %7871 = vmatprep.subr.bf16.mxu1 %v13280_v25 }
 0x1a3   : > { %1116 = vmatpush1.bf16.msra.mxu0 %v10075_v24  ;;  %7872 = vmatpush3.bf16.msra.mxu1 %v10085_v18 }
 0x1a4   : > { %1117 = vmatprep.subr.bf16.mxu0 %v10080_v26  ;;  %7873 = vmatprep.subr.bf16.mxu1 %v13280_v25 }
 0x1a7   : > { %1118 = vmatpush1.bf16.msra.mxu0 %v10093_v23  ;;  %7874 = vmatpush3.bf16.msra.mxu1 %v10103_v29 }
 0x1a8   : > { %1119 = vmatprep.subr.bf16.mxu0 %v10098_v27  ;;  %7875 = vmatprep.subr.bf16.mxu1 %v13280_v25 }
 0x1ab   : > { %1120 = vmatpush1.bf16.msra.mxu0 %v10109_v31  ;;  %7876 = vmatpush3.bf16.msra.mxu1 %v10119_v33 }
 0x1ac   : > { %1121 = vmatprep.subr.bf16.mxu0 %v10114_v32  ;;  %7877 = vmatprep.subr.bf16.mxu1 %v13280_v25 }
 0x1af   : > { %1122 = vmatpush1.bf16.msra.mxu0 %v10125_v35  ;;  %7878 = vmatpush3.bf16.msra.mxu1 %v10135_v37 }
 0x1b0   : > { %1123 = vmatprep.subr.bf16.mxu0 %v10130_v36  ;;  %7879 = vmatprep.subr.bf16.mxu1 %v13280_v25 }
 0x1b3   : > { %1124 = vmatpush1.bf16.msra.mxu0 %v10141_v39  ;;  %7880 = vmatpush3.bf16.msra.mxu1 %v10151_v41 }
 0x1b4   : > { %1125 = vmatprep.subr.bf16.mxu0 %v10146_v40  ;;  %7881 = vmatprep.subr.bf16.mxu1 %v13280_v25 }
 0x1b7   : > { %1126 = vmatpush1.bf16.msra.mxu0 %v10157_v43  ;;  %7882 = vmatpush3.bf16.msra.mxu1 %v10167_v45 }
 0x1b8   : > { %1193 = vmatprep.subr.bf16.mxu0 %v10162_v44  ;;  %7887 = vmatprep.subr.bf16.mxu1 %v13280_v25 }
 0x1ba   : > { %1144 = vmatmul.mubr.bf16.vlgmr.msra.gmra.mrb[8].mxu0 %v7129_v8  ;;  %7884 = vmatmul.mubr.bf16.vlgmr.msra.gmra.mrb[16].mxu1 %v7129_v8 }
 0x1bb   : > { %1194 = vmatpush1.bf16.msra.mxu0 %v10174_v48  ;;  %7888 = vmatpush3.bf16.msra.mxu1 %v10184_v49 }
 0x1bc   : > { %1195 = vmatprep.subr.bf16.mxu0 %v10179_v50  ;;  %7889 = vmatprep.subr.bf16.mxu1 %v13280_v25 }
 0x1bd   : > { %1225 = vmatprep.mubr.bf16.mxu0 %v13281_v55  ;;  %7903 = vmatprep.mubr.msk.bf16.mxu1 %vm9571_vm1, %v13280_v25 }
 0x1bf   : > { %1196 = vmatpush1.bf16.msra.mxu0 %v10190_v51  ;;  %7890 = vmatpush3.bf16.msra.mxu1 %v10200_v53 }
 0x1c0   : > { %1197 = vmatprep.subr.bf16.mxu0 %v10195_v52  ;;  %7891 = vmatprep.subr.bf16.mxu1 %v13280_v25 }
 0x1c3   : > { %1198 = vmatpush1.bf16.msra.mxu0 %v10209_v47  ;;  %7892 = vmatpush3.bf16.msra.mxu1 %v10219_v57 }
 0x1c4   : > { %1199 = vmatprep.subr.bf16.mxu0 %v10214_v56  ;;  %7893 = vmatprep.subr.bf16.mxu1 %v13280_v25 }
 0x1c7   : > { %1200 = vmatpush1.bf16.msra.mxu0 %v10225_v59  ;;  %7894 = vmatpush3.bf16.msra.mxu1 %v10235_v61 }
 0x1c8   : > { %1201 = vmatprep.subr.bf16.mxu0 %v10230_v60  ;;  %7895 = vmatprep.subr.bf16.mxu1 %v13280_v25 }
 0x1cb   : > { %1202 = vmatpush1.bf16.msra.mxu0 %v10241_v63  ;;  %7896 = vmatpush3.bf16.msra.mxu1 %v10251_v1 }
 0x1cc   : > { %1203 = vmatprep.subr.bf16.mxu0 %v10246_v0  ;;  %7897 = vmatprep.subr.bf16.mxu1 %v13280_v25 }
 0x1cf   : > { %1204 = vmatpush1.bf16.msra.mxu0 %v13300_v34  ;;  %7898 = vmatpush3.bf16.msra.mxu1 %v13301_v11  ;;  %v1005_v34 = vadd.f32 %v1004_v22, %v10387_v3 }
 0x1d0   : > { %1205 = vmatprep.subr.bf16.mxu0 %v13302_v28  ;;  %7899 = vmatprep.subr.bf16.mxu1 %v13280_v25 }
 0x1d3   : > { %1206 = vmatpush1.bf16.msra.mxu0 %v13303_v7  ;;  %7900 = vmatpush3.bf16.msra.mxu1 %v13304_v6 }
 0x1d4   : > { %1207 = vmatprep.subr.bf16.mxu0 %v13305_v58  ;;  %7901 = vmatprep.subr.bf16.mxu1 %v13280_v25 }
 0x1d7   : > { %1208 = vmatpush1.bf16.msra.mxu0 %v13306_v9  ;;  %7902 = vmatpush3.bf16.msra.mxu1 %v13307_v30 }
 0x1d8   : > { %1293 = vmatprep.subr.bf16.mxu0 %v13308_v54  ;;  %7907 = vmatprep.subr.bf16.mxu1 %v13280_v25 }
 0x26d   : > { %v1045_v16 = vpop.f32.mrb[4].mxu0  ;;  %v1086_v46 = vpop.f32.mrb[12].mxu1 }
 0x26e   : > { %v9069_v12 = vadd.f32 %v1045_v16, %v13309_v4  ;;  %v1047_v38 = vpop.f32.mrb[5].mxu0  ;;  %v7865_v42 = vpop.f32.mrb[13].mxu1  ;;  %v1102_v11 = vadd.f32 %v1086_v46, %v10384_v5  ;;  %v13313_v46 = vld [vmem:[#allocation75_spill] sm:$0xff] }
 0x26f   : > { %v1049_v62 = vpop.f32.mrb[6].mxu0  ;;  %v1089_v10 = vpop.f32.mrb[14].mxu1  ;;  %v9070_v9 = vadd.f32 %v1047_v38, %v10380_v14 }
 0x270   : > { %v1094_v8 = vmul.f32 0.5, %v9069_v12  ;;  %v1050_v58 = vpop.f32.mrb[7].mxu0  ;;  %v7866_v6 = vpop.f32.mrb[15].mxu1 }
 0x271   : > { %v1095_v7 = vmul.f32 0.5, %v9070_v9  ;;  %v13310_v9 = vld [vmem:[#allocation72_spill] sm:$0xff] }
 0x272   : > { %9327 = vtanh.f32 %v1094_v8  ;;  %v13315_v8 = vld [vmem:[#allocation76_spill] sm:$0xff] }
 0x273   : > { %9329 = vtanh.f32 %v1095_v7  ;;  %v7130_v7 = vld [vmem:[%s9701_s15 + $0xc] sm:$0xf] }
 0x27c   : > { %v9328_v30 = vpop.eup %9327 }
 0x27d   : > { %v1098_v28 = vmul.f32 0.5, %v9328_v30  ;;  %v9330_v42 = vpop.eup %9329  ;;  %v13311_v30 = vld [vmem:[#allocation74_spill] sm:$0xff] }
 0x27e   : > { %v1099_v62 = vmul.f32 0.5, %v9330_v42  ;;  %v13317_v42 = vld [vmem:[#allocation79_spill] sm:$0xff] }
 0x27f   : > { %v1100_v54 = vadd.f32 0.5, %v1098_v28 }
 0x280   : > { %v1101_v58 = vadd.f32 0.5, %v1099_v62  ;;  %v13318_v62 = vld [vmem:[#allocation71_spill] sm:$0xff] }
 0x281   : > { %v1103_v16 = vmul.f32 %v1102_v11, %v1100_v54  ;;  %v13312_v54 = vld [vmem:[#allocation73_spill] sm:$0xff] }
 0x283   : > { %v1104_v4 = vadd.f32 %v1103_v16, %v1005_v34  ;;  %v13316_v16 = vld [vmem:[#allocation78_spill] sm:$0xff] }
 0x285   : > { %9331 = vtanh.f32 %v1104_v4  ;;  %v13314_v4 = vld [vmem:[#allocation77_spill] sm:$0xff] }
 0x28f   : > { %v9332_v12 = vpop.eup %9331 }
 0x290   : > { %v1106_v6 = vsub.f32 %v10392_v2, %v9332_v12  ;;  %v1186_v2 = vpop.f32.mrb[16].mxu1 }
 0x291   : > { %v7885_v22 = vpop.f32.mrb[17].mxu1 }
 0x292   : > { %v1107_v10 = vmul.f32 %v1106_v6, %v1101_v58  ;;  %v1189_v34 = vpop.f32.mrb[18].mxu1  ;;  %v13319_v6 = vld [vmem:[#allocation80_spill] sm:$0xff] }
 0x293   : > { %v7886_v11 = vpop.f32.mrb[19].mxu1 }
 0x294   : > { %v10472_v38 = vadd.f32 %v9332_v12, %v1107_v10 }
 0x296   : > { %v1192_v28 = vpack.c.bf16 %v10472_v38, %v10472_v38 }
 0x298   : > { %1226 = vmatmul.mubr.bf16.vlgmr.msra.gmra.mrb[8].mxu0 %v1192_v28  ;;  %7904 = vmatmul.mubr.bf16.vlgmr.msra.gmra.mrb[20].mxu1 %v1192_v28 }
 0x299   : > { %1294 = vmatpush1.bf16.msra.mxu0 %v10043_v19  ;;  %7908 = vmatpush3.bf16.msra.mxu1 %v10052_v15 }
 0x29a   : > { %1295 = vmatprep.subr.bf16.mxu0 %v10047_v13  ;;  %7909 = vmatprep.subr.bf16.mxu1 %v13280_v25 }
 0x29b   : > { %1325 = vmatprep.mubr.bf16.mxu0 %v13281_v55  ;;  %7923 = vmatprep.mubr.msk.bf16.mxu1 %vm9571_vm1, %v13280_v25 }
 0x29d   : > { %1296 = vmatpush1.bf16.msra.mxu0 %v10057_v17  ;;  %7910 = vmatpush3.bf16.msra.mxu1 %v10068_v21 }
 0x29e   : > { %1297 = vmatprep.subr.bf16.mxu0 %v10063_v20  ;;  %7911 = vmatprep.subr.bf16.mxu1 %v13280_v25 }
 0x2a1   : > { %1298 = vmatpush1.bf16.msra.mxu0 %v10075_v24  ;;  %7912 = vmatpush3.bf16.msra.mxu1 %v10085_v18 }
 0x2a2   : > { %1299 = vmatprep.subr.bf16.mxu0 %v10080_v26  ;;  %7913 = vmatprep.subr.bf16.mxu1 %v13280_v25 }
 0x2a5   : > { %1300 = vmatpush1.bf16.msra.mxu0 %v10093_v23  ;;  %7914 = vmatpush3.bf16.msra.mxu1 %v10103_v29 }
 0x2a6   : > { %1301 = vmatprep.subr.bf16.mxu0 %v10098_v27  ;;  %7915 = vmatprep.subr.bf16.mxu1 %v13280_v25 }
 0x2a9   : > { %1302 = vmatpush1.bf16.msra.mxu0 %v10109_v31  ;;  %7916 = vmatpush3.bf16.msra.mxu1 %v10119_v33 }
 0x2aa   : > { %1303 = vmatprep.subr.bf16.mxu0 %v10114_v32  ;;  %7917 = vmatprep.subr.bf16.mxu1 %v13280_v25 }
 0x2ad   : > { %1304 = vmatpush1.bf16.msra.mxu0 %v10125_v35  ;;  %7918 = vmatpush3.bf16.msra.mxu1 %v10135_v37 }
 0x2ae   : > { %1305 = vmatprep.subr.bf16.mxu0 %v10130_v36  ;;  %7919 = vmatprep.subr.bf16.mxu1 %v13280_v25 }
 0x2b1   : > { %1306 = vmatpush1.bf16.msra.mxu0 %v10141_v39  ;;  %7920 = vmatpush3.bf16.msra.mxu1 %v10151_v41 }
 0x2b2   : > { %1307 = vmatprep.subr.bf16.mxu0 %v10146_v40  ;;  %7921 = vmatprep.subr.bf16.mxu1 %v13280_v25 }
 0x2b5   : > { %1308 = vmatpush1.bf16.msra.mxu0 %v10157_v43  ;;  %7922 = vmatpush3.bf16.msra.mxu1 %v10167_v45 }
 0x2b6   : > { %1375 = vmatprep.subr.bf16.mxu0 %v10162_v44  ;;  %7927 = vmatprep.subr.bf16.mxu1 %v13280_v25 }
 0x2b8   : > { %1326 = vmatmul.mubr.bf16.vlgmr.msra.gmra.mrb[12].mxu0 %v7130_v7  ;;  %7924 = vmatmul.mubr.bf16.vlgmr.msra.gmra.mrb[24].mxu1 %v7130_v7 }
 0x2b9   : > { %1376 = vmatpush1.bf16.msra.mxu0 %v10174_v48  ;;  %7928 = vmatpush3.bf16.msra.mxu1 %v10184_v49 }
 0x2ba   : > { %1377 = vmatprep.subr.bf16.mxu0 %v10179_v50  ;;  %7929 = vmatprep.subr.bf16.mxu1 %v13280_v25 }
 0x2bb   : > { %1407 = vmatprep.mubr.bf16.mxu0 %v13281_v55  ;;  %7943 = vmatprep.mubr.msk.bf16.mxu1 %vm9571_vm1, %v13280_v25 }
 0x2bd   : > { %1378 = vmatpush1.bf16.msra.mxu0 %v10190_v51  ;;  %7930 = vmatpush3.bf16.msra.mxu1 %v10200_v53 }
 0x2be   : > { %1379 = vmatprep.subr.bf16.mxu0 %v10195_v52  ;;  %7931 = vmatprep.subr.bf16.mxu1 %v13280_v25 }
 0x2c1   : > { %1380 = vmatpush1.bf16.msra.mxu0 %v10209_v47  ;;  %7932 = vmatpush3.bf16.msra.mxu1 %v10219_v57 }
 0x2c2   : > { %1381 = vmatprep.subr.bf16.mxu0 %v10214_v56  ;;  %7933 = vmatprep.subr.bf16.mxu1 %v13280_v25 }
 0x2c5   : > { %1382 = vmatpush1.bf16.msra.mxu0 %v10225_v59  ;;  %7934 = vmatpush3.bf16.msra.mxu1 %v10235_v61 }
 0x2c6   : > { %1383 = vmatprep.subr.bf16.mxu0 %v10230_v60  ;;  %7935 = vmatprep.subr.bf16.mxu1 %v13280_v25 }
 0x2c9   : > { %1384 = vmatpush1.bf16.msra.mxu0 %v10241_v63  ;;  %7936 = vmatpush3.bf16.msra.mxu1 %v10251_v1 }
 0x2ca   : > { %1385 = vmatprep.subr.bf16.mxu0 %v10246_v0  ;;  %7937 = vmatprep.subr.bf16.mxu1 %v13280_v25 }
 0x2cd   : > { %1386 = vmatpush1.bf16.msra.mxu0 %v13310_v9  ;;  %7938 = vmatpush3.bf16.msra.mxu1 %v13311_v30  ;;  %v1187_v9 = vadd.f32 %v1186_v2, %v10387_v3 }
 0x2ce   : > { %1387 = vmatprep.subr.bf16.mxu0 %v13312_v54  ;;  %7939 = vmatprep.subr.bf16.mxu1 %v13280_v25 }
 0x2d1   : > { %1388 = vmatpush1.bf16.msra.mxu0 %v13313_v46  ;;  %7940 = vmatpush3.bf16.msra.mxu1 %v13314_v4 }
 0x2d2   : > { %1389 = vmatprep.subr.bf16.mxu0 %v13315_v8  ;;  %7941 = vmatprep.subr.bf16.mxu1 %v13280_v25 }
 0x2d5   : > { %1390 = vmatpush1.bf16.msra.mxu0 %v13316_v16  ;;  %7942 = vmatpush3.bf16.msra.mxu1 %v13317_v42 }
 0x2d6   : > { %1475 = vmatprep.subr.bf16.mxu0 %v13318_v62  ;;  %7947 = vmatprep.subr.bf16.mxu1 %v13280_v25 }
 0x36b   : > { %v1227_v12 = vpop.f32.mrb[8].mxu0  ;;  %v1268_v58 = vpop.f32.mrb[20].mxu1 }
 0x36c   : > { %v9071_v10 = vadd.f32 %v1227_v12, %v13319_v6  ;;  %v1229_v28 = vpop.f32.mrb[9].mxu0  ;;  %v7905_v22 = vpop.f32.mrb[21].mxu1  ;;  %v1284_v30 = vadd.f32 %v1268_v58, %v10384_v5  ;;  %v13323_v58 = vld [vmem:[#allocation75_spill] sm:$0xff] }
 0x36d   : > { %v1231_v34 = vpop.f32.mrb[10].mxu0  ;;  %v1271_v11 = vpop.f32.mrb[22].mxu1  ;;  %v9072_v16 = vadd.f32 %v1229_v28, %v10380_v14 }
 0x36e   : > { %v1276_v7 = vmul.f32 0.5, %v9071_v10  ;;  %v1232_v8 = vpop.f32.mrb[11].mxu0  ;;  %v7906_v4 = vpop.f32.mrb[23].mxu1 }
 0x36f   : > { %v1277_v46 = vmul.f32 0.5, %v9072_v16  ;;  %v13320_v16 = vld [vmem:[#allocation72_spill] sm:$0xff] }
 0x370   : > { %9333 = vtanh.f32 %v1276_v7  ;;  %v13325_v7 = vld [vmem:[#allocation76_spill] sm:$0xff] }
 0x371   : > { %9335 = vtanh.f32 %v1277_v46  ;;  %v7131_v46 = vld [vmem:[%s9701_s15 + $0x10] sm:$0xf] }
 0x37a   : > { %v9334_v42 = vpop.eup %9333 }
 0x37b   : > { %v1280_v54 = vmul.f32 0.5, %v9334_v42  ;;  %v9336_v22 = vpop.eup %9335  ;;  %v13321_v42 = vld [vmem:[#allocation74_spill] sm:$0xff] }
 0x37c   : > { %v1281_v34 = vmul.f32 0.5, %v9336_v22  ;;  %v13327_v22 = vld [vmem:[#allocation79_spill] sm:$0xff] }
 0x37d   : > { %v1282_v62 = vadd.f32 0.5, %v1280_v54 }
 0x37e   : > { %v1283_v8 = vadd.f32 0.5, %v1281_v34  ;;  %v13328_v34 = vld [vmem:[#allocation71_spill] sm:$0xff] }
 0x37f   : > { %v1285_v12 = vmul.f32 %v1284_v30, %v1282_v62  ;;  %v13322_v62 = vld [vmem:[#allocation73_spill] sm:$0xff] }
 0x381   : > { %v1286_v6 = vadd.f32 %v1285_v12, %v1187_v9  ;;  %v13326_v12 = vld [vmem:[#allocation78_spill] sm:$0xff] }
 0x383   : > { %9337 = vtanh.f32 %v1286_v6  ;;  %v13324_v6 = vld [vmem:[#allocation77_spill] sm:$0xff] }
 0x38d   : > { %v9338_v10 = vpop.eup %9337 }
 0x38e   : > { %v1288_v4 = vsub.f32 %v10472_v38, %v9338_v10  ;;  %v1368_v38 = vpop.f32.mrb[24].mxu1 }
 0x38f   : > { %v7925_v2 = vpop.f32.mrb[25].mxu1 }
 0x390   : > { %v1289_v11 = vmul.f32 %v1288_v4, %v1283_v8  ;;  %v1371_v9 = vpop.f32.mrb[26].mxu1  ;;  %v13329_v4 = vld [vmem:[#allocation80_spill] sm:$0xff] }
 0x391   : > { %v7926_v30 = vpop.f32.mrb[27].mxu1 }
 0x392   : > { %v10552_v28 = vadd.f32 %v9338_v10, %v1289_v11 }
 0x394   : > { %v1374_v54 = vpack.c.bf16 %v10552_v28, %v10552_v28 }
 0x396   : > { %1408 = vmatmul.mubr.bf16.vlgmr.msra.gmra.mrb[12].mxu0 %v1374_v54  ;;  %7944 = vmatmul.mubr.bf16.vlgmr.msra.gmra.mrb[28].mxu1 %v1374_v54 }
 0x397   : > { %1476 = vmatpush1.bf16.msra.mxu0 %v10043_v19  ;;  %7948 = vmatpush3.bf16.msra.mxu1 %v10052_v15 }
 0x398   : > { %1477 = vmatprep.subr.bf16.mxu0 %v10047_v13  ;;  %7949 = vmatprep.subr.bf16.mxu1 %v13280_v25 }
 0x399   : > { %1507 = vmatprep.mubr.bf16.mxu0 %v13281_v55  ;;  %7963 = vmatprep.mubr.msk.bf16.mxu1 %vm9571_vm1, %v13280_v25 }
 0x39b   : > { %1478 = vmatpush1.bf16.msra.mxu0 %v10057_v17  ;;  %7950 = vmatpush3.bf16.msra.mxu1 %v10068_v21 }
 0x39c   : > { %1479 = vmatprep.subr.bf16.mxu0 %v10063_v20  ;;  %7951 = vmatprep.subr.bf16.mxu1 %v13280_v25 }
 0x39f   : > { %1480 = vmatpush1.bf16.msra.mxu0 %v10075_v24  ;;  %7952 = vmatpush3.bf16.msra.mxu1 %v10085_v18 }
 0x3a0   : > { %1481 = vmatprep.subr.bf16.mxu0 %v10080_v26  ;;  %7953 = vmatprep.subr.bf16.mxu1 %v13280_v25 }
 0x3a3   : > { %1482 = vmatpush1.bf16.msra.mxu0 %v10093_v23  ;;  %7954 = vmatpush3.bf16.msra.mxu1 %v10103_v29 }
 0x3a4   : > { %1483 = vmatprep.subr.bf16.mxu0 %v10098_v27  ;;  %7955 = vmatprep.subr.bf16.mxu1 %v13280_v25 }
 0x3a7   : > { %1484 = vmatpush1.bf16.msra.mxu0 %v10109_v31  ;;  %7956 = vmatpush3.bf16.msra.mxu1 %v10119_v33 }
 0x3a8   : > { %1485 = vmatprep.subr.bf16.mxu0 %v10114_v32  ;;  %7957 = vmatprep.subr.bf16.mxu1 %v13280_v25 }
 0x3ab   : > { %1486 = vmatpush1.bf16.msra.mxu0 %v10125_v35  ;;  %7958 = vmatpush3.bf16.msra.mxu1 %v10135_v37 }
 0x3ac   : > { %1487 = vmatprep.subr.bf16.mxu0 %v10130_v36  ;;  %7959 = vmatprep.subr.bf16.mxu1 %v13280_v25 }
 0x3af   : > { %1488 = vmatpush1.bf16.msra.mxu0 %v10141_v39  ;;  %7960 = vmatpush3.bf16.msra.mxu1 %v10151_v41 }
 0x3b0   : > { %1489 = vmatprep.subr.bf16.mxu0 %v10146_v40  ;;  %7961 = vmatprep.subr.bf16.mxu1 %v13280_v25 }
 0x3b3   : > { %1490 = vmatpush1.bf16.msra.mxu0 %v10157_v43  ;;  %7962 = vmatpush3.bf16.msra.mxu1 %v10167_v45 }
 0x3b4   : > { %1557 = vmatprep.subr.bf16.mxu0 %v10162_v44  ;;  %7967 = vmatprep.subr.bf16.mxu1 %v13280_v25 }
 0x3b6   : > { %1508 = vmatmul.mubr.bf16.vlgmr.msra.gmra.mrb[16].mxu0 %v7131_v46  ;;  %7964 = vmatmul.mubr.bf16.vlgmr.msra.gmra.mrb[32].mxu1 %v7131_v46 }
 0x3b7   : > { %1558 = vmatpush1.bf16.msra.mxu0 %v10174_v48  ;;  %7968 = vmatpush3.bf16.msra.mxu1 %v10184_v49 }
 0x3b8   : > { %1559 = vmatprep.subr.bf16.mxu0 %v10179_v50  ;;  %7969 = vmatprep.subr.bf16.mxu1 %v13280_v25 }
 0x3b9   : > { %1589 = vmatprep.mubr.bf16.mxu0 %v13281_v55  ;;  %7983 = vmatprep.mubr.msk.bf16.mxu1 %vm9571_vm1, %v13280_v25 }
 0x3bb   : > { %1560 = vmatpush1.bf16.msra.mxu0 %v10190_v51  ;;  %7970 = vmatpush3.bf16.msra.mxu1 %v10200_v53 }
 0x3bc   : > { %1561 = vmatprep.subr.bf16.mxu0 %v10195_v52  ;;  %7971 = vmatprep.subr.bf16.mxu1 %v13280_v25 }
 0x3bf   : > { %1562 = vmatpush1.bf16.msra.mxu0 %v10209_v47  ;;  %7972 = vmatpush3.bf16.msra.mxu1 %v10219_v57 }
 0x3c0   : > { %1563 = vmatprep.subr.bf16.mxu0 %v10214_v56  ;;  %7973 = vmatprep.subr.bf16.mxu1 %v13280_v25 }
 0x3c3   : > { %1564 = vmatpush1.bf16.msra.mxu0 %v10225_v59  ;;  %7974 = vmatpush3.bf16.msra.mxu1 %v10235_v61 }
 0x3c4   : > { %1565 = vmatprep.subr.bf16.mxu0 %v10230_v60  ;;  %7975 = vmatprep.subr.bf16.mxu1 %v13280_v25 }
 0x3c7   : > { %1566 = vmatpush1.bf16.msra.mxu0 %v10241_v63  ;;  %7976 = vmatpush3.bf16.msra.mxu1 %v10251_v1 }
 0x3c8   : > { %1567 = vmatprep.subr.bf16.mxu0 %v10246_v0  ;;  %7977 = vmatprep.subr.bf16.mxu1 %v13280_v25 }
 0x3cb   : > { %1568 = vmatpush1.bf16.msra.mxu0 %v13320_v16  ;;  %7978 = vmatpush3.bf16.msra.mxu1 %v13321_v42  ;;  %v1369_v16 = vadd.f32 %v1368_v38, %v10387_v3 }
 0x3cc   : > { %1569 = vmatprep.subr.bf16.mxu0 %v13322_v62  ;;  %7979 = vmatprep.subr.bf16.mxu1 %v13280_v25 }
 0x3cf   : > { %1570 = vmatpush1.bf16.msra.mxu0 %v13323_v58  ;;  %7980 = vmatpush3.bf16.msra.mxu1 %v13324_v6 }
 0x3d0   : > { %1571 = vmatprep.subr.bf16.mxu0 %v13325_v7  ;;  %7981 = vmatprep.subr.bf16.mxu1 %v13280_v25 }
 0x3d3   : > { %1572 = vmatpush1.bf16.msra.mxu0 %v13326_v12  ;;  %7982 = vmatpush3.bf16.msra.mxu1 %v13327_v22 }
 0x3d4   : > { %1657 = vmatprep.subr.bf16.mxu0 %v13328_v34  ;;  %7987 = vmatprep.subr.bf16.mxu1 %v13280_v25 }
 0x469   : > { %v1409_v10 = vpop.f32.mrb[12].mxu0  ;;  %v1450_v8 = vpop.f32.mrb[28].mxu1 }
 0x46a   : > { %v9073_v11 = vadd.f32 %v1409_v10, %v13329_v4  ;;  %v1411_v54 = vpop.f32.mrb[13].mxu0  ;;  %v7945_v2 = vpop.f32.mrb[29].mxu1  ;;  %v1466_v42 = vadd.f32 %v1450_v8, %v10384_v5  ;;  %v13333_v8 = vld [vmem:[#allocation75_spill] sm:$0xff] }
 0x46b   : > { %v1413_v9 = vpop.f32.mrb[14].mxu0  ;;  %v1453_v30 = vpop.f32.mrb[30].mxu1  ;;  %v9074_v12 = vadd.f32 %v1411_v54, %v10380_v14 }
 0x46c   : > { %v1458_v46 = vmul.f32 0.5, %v9073_v11  ;;  %v1414_v7 = vpop.f32.mrb[15].mxu0  ;;  %v7946_v6 = vpop.f32.mrb[31].mxu1 }
 0x46d   : > { %v1459_v58 = vmul.f32 0.5, %v9074_v12  ;;  %v13330_v12 = vld [vmem:[#allocation72_spill] sm:$0xff] }
 0x46e   : > { %9339 = vtanh.f32 %v1458_v46  ;;  %v13335_v46 = vld [vmem:[#allocation76_spill] sm:$0xff] }
 0x46f   : > { %9341 = vtanh.f32 %v1459_v58  ;;  %v7132_v58 = vld [vmem:[%s9701_s15 + $0x14] sm:$0xf] }
 0x478   : > { %v9340_v22 = vpop.eup %9339 }
 0x479   : > { %v1462_v62 = vmul.f32 0.5, %v9340_v22  ;;  %v9342_v2 = vpop.eup %9341  ;;  %v13331_v22 = vld [vmem:[#allocation74_spill] sm:$0xff] }
 0x47a   : > { %v1463_v9 = vmul.f32 0.5, %v9342_v2  ;;  %v13337_v2 = vld [vmem:[#allocation79_spill] sm:$0xff] }
 0x47b   : > { %v1464_v34 = vadd.f32 0.5, %v1462_v62 }
 0x47c   : > { %v1465_v7 = vadd.f32 0.5, %v1463_v9  ;;  %v13338_v9 = vld [vmem:[#allocation71_spill] sm:$0xff] }
 0x47d   : > { %v1467_v10 = vmul.f32 %v1466_v42, %v1464_v34  ;;  %v13332_v34 = vld [vmem:[#allocation73_spill] sm:$0xff] }
 0x47f   : > { %v1468_v4 = vadd.f32 %v1467_v10, %v1369_v16  ;;  %v13336_v10 = vld [vmem:[#allocation78_spill] sm:$0xff] }
 0x481   : > { %9343 = vtanh.f32 %v1468_v4  ;;  %v13334_v4 = vld [vmem:[#allocation77_spill] sm:$0xff] }
 0x48b   : > { %v9344_v11 = vpop.eup %9343 }
 0x48c   : > { %v1470_v6 = vsub.f32 %v10552_v28, %v9344_v11  ;;  %v1550_v28 = vpop.f32.mrb[32].mxu1 }
 0x48d   : > { %v7965_v38 = vpop.f32.mrb[33].mxu1 }
 0x48e   : > { %v1471_v30 = vmul.f32 %v1470_v6, %v1465_v7  ;;  %v1553_v16 = vpop.f32.mrb[34].mxu1  ;;  %v13339_v6 = vld [vmem:[#allocation80_spill] sm:$0xff] }
 0x48f   : > { %v7966_v42 = vpop.f32.mrb[35].mxu1 }
 0x490   : > { %v10632_v54 = vadd.f32 %v9344_v11, %v1471_v30 }
 0x492   : > { %v1556_v62 = vpack.c.bf16 %v10632_v54, %v10632_v54 }
 0x494   : > { %1590 = vmatmul.mubr.bf16.vlgmr.msra.gmra.mrb[16].mxu0 %v1556_v62  ;;  %7984 = vmatmul.mubr.bf16.vlgmr.msra.gmra.mrb[36].mxu1 %v1556_v62 }
 0x495   : > { %1658 = vmatpush1.bf16.msra.mxu0 %v10043_v19  ;;  %7988 = vmatpush3.bf16.msra.mxu1 %v10052_v15 }
 0x496   : > { %1659 = vmatprep.subr.bf16.mxu0 %v10047_v13  ;;  %7989 = vmatprep.subr.bf16.mxu1 %v13280_v25 }
 0x497   : > { %1689 = vmatprep.mubr.bf16.mxu0 %v13281_v55  ;;  %8003 = vmatprep.mubr.msk.bf16.mxu1 %vm9571_vm1, %v13280_v25 }
 0x499   : > { %1660 = vmatpush1.bf16.msra.mxu0 %v10057_v17  ;;  %7990 = vmatpush3.bf16.msra.mxu1 %v10068_v21 }
 0x49a   : > { %1661 = vmatprep.subr.bf16.mxu0 %v10063_v20  ;;  %7991 = vmatprep.subr.bf16.mxu1 %v13280_v25 }
 0x49d   : > { %1662 = vmatpush1.bf16.msra.mxu0 %v10075_v24  ;;  %7992 = vmatpush3.bf16.msra.mxu1 %v10085_v18 }
 0x49e   : > { %1663 = vmatprep.subr.bf16.mxu0 %v10080_v26  ;;  %7993 = vmatprep.subr.bf16.mxu1 %v13280_v25 }
 0x4a1   : > { %1664 = vmatpush1.bf16.msra.mxu0 %v10093_v23  ;;  %7994 = vmatpush3.bf16.msra.mxu1 %v10103_v29 }
 0x4a2   : > { %1665 = vmatprep.subr.bf16.mxu0 %v10098_v27  ;;  %7995 = vmatprep.subr.bf16.mxu1 %v13280_v25 }
 0x4a5   : > { %1666 = vmatpush1.bf16.msra.mxu0 %v10109_v31  ;;  %7996 = vmatpush3.bf16.msra.mxu1 %v10119_v33 }
 0x4a6   : > { %1667 = vmatprep.subr.bf16.mxu0 %v10114_v32  ;;  %7997 = vmatprep.subr.bf16.mxu1 %v13280_v25 }
 0x4a9   : > { %1668 = vmatpush1.bf16.msra.mxu0 %v10125_v35  ;;  %7998 = vmatpush3.bf16.msra.mxu1 %v10135_v37 }
 0x4aa   : > { %1669 = vmatprep.subr.bf16.mxu0 %v10130_v36  ;;  %7999 = vmatprep.subr.bf16.mxu1 %v13280_v25 }
 0x4ad   : > { %1670 = vmatpush1.bf16.msra.mxu0 %v10141_v39  ;;  %8000 = vmatpush3.bf16.msra.mxu1 %v10151_v41 }
 0x4ae   : > { %1671 = vmatprep.subr.bf16.mxu0 %v10146_v40  ;;  %8001 = vmatprep.subr.bf16.mxu1 %v13280_v25 }
 0x4b1   : > { %1672 = vmatpush1.bf16.msra.mxu0 %v10157_v43  ;;  %8002 = vmatpush3.bf16.msra.mxu1 %v10167_v45 }
 0x4b2   : > { %1739 = vmatprep.subr.bf16.mxu0 %v10162_v44  ;;  %8007 = vmatprep.subr.bf16.mxu1 %v13280_v25 }
 0x4b4   : > { %1690 = vmatmul.mubr.bf16.vlgmr.msra.gmra.mrb[20].mxu0 %v7132_v58  ;;  %8004 = vmatmul.mubr.bf16.vlgmr.msra.gmra.mrb[40].mxu1 %v7132_v58 }
 0x4b5   : > { %1740 = vmatpush1.bf16.msra.mxu0 %v10174_v48  ;;  %8008 = vmatpush3.bf16.msra.mxu1 %v10184_v49 }
 0x4b6   : > { %1741 = vmatprep.subr.bf16.mxu0 %v10179_v50  ;;  %8009 = vmatprep.subr.bf16.mxu1 %v13280_v25 }
 0x4b7   : > { %1771 = vmatprep.mubr.bf16.mxu0 %v13281_v55  ;;  %8023 = vmatprep.mubr.msk.bf16.mxu1 %vm9571_vm1, %v13280_v25 }
 0x4b9   : > { %1742 = vmatpush1.bf16.msra.mxu0 %v10190_v51  ;;  %8010 = vmatpush3.bf16.msra.mxu1 %v10200_v53 }
 0x4ba   : > { %1743 = vmatprep.subr.bf16.mxu0 %v10195_v52  ;;  %8011 = vmatprep.subr.bf16.mxu1 %v13280_v25 }
 0x4bd   : > { %1744 = vmatpush1.bf16.msra.mxu0 %v10209_v47  ;;  %8012 = vmatpush3.bf16.msra.mxu1 %v10219_v57 }
 0x4be   : > { %1745 = vmatprep.subr.bf16.mxu0 %v10214_v56  ;;  %8013 = vmatprep.subr.bf16.mxu1 %v13280_v25 }
 0x4c1   : > { %1746 = vmatpush1.bf16.msra.mxu0 %v10225_v59  ;;  %8014 = vmatpush3.bf16.msra.mxu1 %v10235_v61 }
 0x4c2   : > { %1747 = vmatprep.subr.bf16.mxu0 %v10230_v60  ;;  %8015 = vmatprep.subr.bf16.mxu1 %v13280_v25 }
 0x4c5   : > { %1748 = vmatpush1.bf16.msra.mxu0 %v10241_v63  ;;  %8016 = vmatpush3.bf16.msra.mxu1 %v10251_v1 }
 0x4c6   : > { %1749 = vmatprep.subr.bf16.mxu0 %v10246_v0  ;;  %8017 = vmatprep.subr.bf16.mxu1 %v13280_v25 }
 0x4c9   : > { %1750 = vmatpush1.bf16.msra.mxu0 %v13330_v12  ;;  %8018 = vmatpush3.bf16.msra.mxu1 %v13331_v22  ;;  %v1551_v12 = vadd.f32 %v1550_v28, %v10387_v3 }
 0x4ca   : > { %1751 = vmatprep.subr.bf16.mxu0 %v13332_v34  ;;  %8019 = vmatprep.subr.bf16.mxu1 %v13280_v25 }
 0x4cd   : > { %1752 = vmatpush1.bf16.msra.mxu0 %v13333_v8  ;;  %8020 = vmatpush3.bf16.msra.mxu1 %v13334_v4 }
 0x4ce   : > { %1753 = vmatprep.subr.bf16.mxu0 %v13335_v46  ;;  %8021 = vmatprep.subr.bf16.mxu1 %v13280_v25 }
 0x4d1   : > { %1754 = vmatpush1.bf16.msra.mxu0 %v13336_v10  ;;  %8022 = vmatpush3.bf16.msra.mxu1 %v13337_v2 }
 0x4d2   : > { %1839 = vmatprep.subr.bf16.mxu0 %v13338_v9  ;;  %8027 = vmatprep.subr.bf16.mxu1 %v13280_v25 }
 0x567   : > { %v1591_v11 = vpop.f32.mrb[16].mxu0  ;;  %v1632_v7 = vpop.f32.mrb[36].mxu1 }
 0x568   : > { %v9075_v30 = vadd.f32 %v1591_v11, %v13339_v6  ;;  %v1593_v62 = vpop.f32.mrb[17].mxu0  ;;  %v7985_v38 = vpop.f32.mrb[37].mxu1  ;;  %v1648_v22 = vadd.f32 %v1632_v7, %v10384_v5  ;;  %v13343_v7 = vld [vmem:[#allocation75_spill] sm:$0xff] }
 0x569   : > { %v1595_v16 = vpop.f32.mrb[18].mxu0  ;;  %v1635_v42 = vpop.f32.mrb[38].mxu1  ;;  %v9076_v10 = vadd.f32 %v1593_v62, %v10380_v14 }
 0x56a   : > { %v1640_v58 = vmul.f32 0.5, %v9075_v30  ;;  %v1596_v46 = vpop.f32.mrb[19].mxu0  ;;  %v7986_v4 = vpop.f32.mrb[39].mxu1 }
 0x56b   : > { %v1641_v8 = vmul.f32 0.5, %v9076_v10  ;;  %v13340_v10 = vld [vmem:[#allocation72_spill] sm:$0xff] }
 0x56c   : > { %9345 = vtanh.f32 %v1640_v58  ;;  %v13345_v58 = vld [vmem:[#allocation76_spill] sm:$0xff] }
 0x56d   : > { %9347 = vtanh.f32 %v1641_v8  ;;  %v7133_v8 = vld [vmem:[%s9701_s15 + $0x18] sm:$0xf] }
 0x576   : > { %v9346_v2 = vpop.eup %9345 }
 0x577   : > { %v1644_v34 = vmul.f32 0.5, %v9346_v2  ;;  %v9348_v38 = vpop.eup %9347  ;;  %v13341_v2 = vld [vmem:[#allocation74_spill] sm:$0xff] }
 0x578   : > { %v1645_v16 = vmul.f32 0.5, %v9348_v38  ;;  %v13347_v38 = vld [vmem:[#allocation79_spill] sm:$0xff] }
 0x579   : > { %v1646_v9 = vadd.f32 0.5, %v1644_v34 }
 0x57a   : > { %v1647_v46 = vadd.f32 0.5, %v1645_v16  ;;  %v13348_v16 = vld [vmem:[#allocation71_spill] sm:$0xff] }
 0x57b   : > { %v1649_v11 = vmul.f32 %v1648_v22, %v1646_v9  ;;  %v13342_v9 = vld [vmem:[#allocation73_spill] sm:$0xff] }
 0x57d   : > { %v1650_v6 = vadd.f32 %v1649_v11, %v1551_v12  ;;  %v13346_v11 = vld [vmem:[#allocation78_spill] sm:$0xff] }
 0x57f   : > { %9349 = vtanh.f32 %v1650_v6  ;;  %v13344_v6 = vld [vmem:[#allocation77_spill] sm:$0xff] }
 0x589   : > { %v9350_v30 = vpop.eup %9349 }
 0x58a   : > { %v1652_v4 = vsub.f32 %v10632_v54, %v9350_v30  ;;  %v1732_v54 = vpop.f32.mrb[40].mxu1 }
 0x58b   : > { %v8005_v28 = vpop.f32.mrb[41].mxu1 }
 0x58c   : > { %v1653_v42 = vmul.f32 %v1652_v4, %v1647_v46  ;;  %v1735_v12 = vpop.f32.mrb[42].mxu1  ;;  %v13349_v4 = vld [vmem:[#allocation80_spill] sm:$0xff] }
 0x58d   : > { %v8006_v22 = vpop.f32.mrb[43].mxu1 }
 0x58e   : > { %v10712_v62 = vadd.f32 %v9350_v30, %v1653_v42 }
 0x590   : > { %v1738_v34 = vpack.c.bf16 %v10712_v62, %v10712_v62 }
 0x592   : > { %1772 = vmatmul.mubr.bf16.vlgmr.msra.gmra.mrb[20].mxu0 %v1738_v34  ;;  %8024 = vmatmul.mubr.bf16.vlgmr.msra.gmra.mrb[44].mxu1 %v1738_v34 }
 0x593   : > { %1840 = vmatpush1.bf16.msra.mxu0 %v10043_v19  ;;  %8028 = vmatpush3.bf16.msra.mxu1 %v10052_v15 }
 0x594   : > { %1841 = vmatprep.subr.bf16.mxu0 %v10047_v13  ;;  %8029 = vmatprep.subr.bf16.mxu1 %v13280_v25 }
 0x595   : > { %1871 = vmatprep.mubr.bf16.mxu0 %v13281_v55  ;;  %8043 = vmatprep.mubr.msk.bf16.mxu1 %vm9571_vm1, %v13280_v25 }
 0x597   : > { %1842 = vmatpush1.bf16.msra.mxu0 %v10057_v17  ;;  %8030 = vmatpush3.bf16.msra.mxu1 %v10068_v21 }
 0x598   : > { %1843 = vmatprep.subr.bf16.mxu0 %v10063_v20  ;;  %8031 = vmatprep.subr.bf16.mxu1 %v13280_v25 }
 0x59b   : > { %1844 = vmatpush1.bf16.msra.mxu0 %v10075_v24  ;;  %8032 = vmatpush3.bf16.msra.mxu1 %v10085_v18 }
 0x59c   : > { %1845 = vmatprep.subr.bf16.mxu0 %v10080_v26  ;;  %8033 = vmatprep.subr.bf16.mxu1 %v13280_v25 }
 0x59f   : > { %1846 = vmatpush1.bf16.msra.mxu0 %v10093_v23  ;;  %8034 = vmatpush3.bf16.msra.mxu1 %v10103_v29 }
 0x5a0   : > { %1847 = vmatprep.subr.bf16.mxu0 %v10098_v27  ;;  %8035 = vmatprep.subr.bf16.mxu1 %v13280_v25 }
 0x5a3   : > { %1848 = vmatpush1.bf16.msra.mxu0 %v10109_v31  ;;  %8036 = vmatpush3.bf16.msra.mxu1 %v10119_v33 }
 0x5a4   : > { %1849 = vmatprep.subr.bf16.mxu0 %v10114_v32  ;;  %8037 = vmatprep.subr.bf16.mxu1 %v13280_v25 }
 0x5a7   : > { %1850 = vmatpush1.bf16.msra.mxu0 %v10125_v35  ;;  %8038 = vmatpush3.bf16.msra.mxu1 %v10135_v37 }
 0x5a8   : > { %1851 = vmatprep.subr.bf16.mxu0 %v10130_v36  ;;  %8039 = vmatprep.subr.bf16.mxu1 %v13280_v25 }
 0x5ab   : > { %1852 = vmatpush1.bf16.msra.mxu0 %v10141_v39  ;;  %8040 = vmatpush3.bf16.msra.mxu1 %v10151_v41 }
 0x5ac   : > { %1853 = vmatprep.subr.bf16.mxu0 %v10146_v40  ;;  %8041 = vmatprep.subr.bf16.mxu1 %v13280_v25 }
 0x5af   : > { %1854 = vmatpush1.bf16.msra.mxu0 %v10157_v43  ;;  %8042 = vmatpush3.bf16.msra.mxu1 %v10167_v45 }
 0x5b0   : > { %1921 = vmatprep.subr.bf16.mxu0 %v10162_v44  ;;  %8047 = vmatprep.subr.bf16.mxu1 %v13280_v25 }
 0x5b2   : > { %1872 = vmatmul.mubr.bf16.vlgmr.msra.gmra.mrb[24].mxu0 %v7133_v8  ;;  %8044 = vmatmul.mubr.bf16.vlgmr.msra.gmra.mrb[48].mxu1 %v7133_v8 }
 0x5b3   : > { %1922 = vmatpush1.bf16.msra.mxu0 %v10174_v48  ;;  %8048 = vmatpush3.bf16.msra.mxu1 %v10184_v49 }
 0x5b4   : > { %1923 = vmatprep.subr.bf16.mxu0 %v10179_v50  ;;  %8049 = vmatprep.subr.bf16.mxu1 %v13280_v25 }
 0x5b5   : > { %1953 = vmatprep.mubr.bf16.mxu0 %v13281_v55  ;;  %8063 = vmatprep.mubr.msk.bf16.mxu1 %vm9571_vm1, %v13280_v25 }
 0x5b7   : > { %1924 = vmatpush1.bf16.msra.mxu0 %v10190_v51  ;;  %8050 = vmatpush3.bf16.msra.mxu1 %v10200_v53 }
 0x5b8   : > { %1925 = vmatprep.subr.bf16.mxu0 %v10195_v52  ;;  %8051 = vmatprep.subr.bf16.mxu1 %v13280_v25 }
 0x5bb   : > { %1926 = vmatpush1.bf16.msra.mxu0 %v10209_v47  ;;  %8052 = vmatpush3.bf16.msra.mxu1 %v10219_v57 }
 0x5bc   : > { %1927 = vmatprep.subr.bf16.mxu0 %v10214_v56  ;;  %8053 = vmatprep.subr.bf16.mxu1 %v13280_v25 }
 0x5bf   : > { %1928 = vmatpush1.bf16.msra.mxu0 %v10225_v59  ;;  %8054 = vmatpush3.bf16.msra.mxu1 %v10235_v61 }
 0x5c0   : > { %1929 = vmatprep.subr.bf16.mxu0 %v10230_v60  ;;  %8055 = vmatprep.subr.bf16.mxu1 %v13280_v25 }
 0x5c3   : > { %1930 = vmatpush1.bf16.msra.mxu0 %v10241_v63  ;;  %8056 = vmatpush3.bf16.msra.mxu1 %v10251_v1 }
 0x5c4   : > { %1931 = vmatprep.subr.bf16.mxu0 %v10246_v0  ;;  %8057 = vmatprep.subr.bf16.mxu1 %v13280_v25 }
 0x5c7   : > { %1932 = vmatpush1.bf16.msra.mxu0 %v13340_v10  ;;  %8058 = vmatpush3.bf16.msra.mxu1 %v13341_v2  ;;  %v1733_v10 = vadd.f32 %v1732_v54, %v10387_v3 }
 0x5c8   : > { %1933 = vmatprep.subr.bf16.mxu0 %v13342_v9  ;;  %8059 = vmatprep.subr.bf16.mxu1 %v13280_v25 }
 0x5cb   : > { %1934 = vmatpush1.bf16.msra.mxu0 %v13343_v7  ;;  %8060 = vmatpush3.bf16.msra.mxu1 %v13344_v6 }
 0x5cc   : > { %1935 = vmatprep.subr.bf16.mxu0 %v13345_v58  ;;  %8061 = vmatprep.subr.bf16.mxu1 %v13280_v25 }
 0x5cf   : > { %1936 = vmatpush1.bf16.msra.mxu0 %v13346_v11  ;;  %8062 = vmatpush3.bf16.msra.mxu1 %v13347_v38 }
 0x5d0   : > { %2021 = vmatprep.subr.bf16.mxu0 %v13348_v16  ;;  %8067 = vmatprep.subr.bf16.mxu1 %v13280_v25 }
 0x665   : > { %v1773_v30 = vpop.f32.mrb[20].mxu0  ;;  %v1814_v46 = vpop.f32.mrb[44].mxu1 }
 0x666   : > { %v9077_v42 = vadd.f32 %v1773_v30, %v13349_v4  ;;  %v1775_v34 = vpop.f32.mrb[21].mxu0  ;;  %v8025_v28 = vpop.f32.mrb[45].mxu1  ;;  %v1830_v2 = vadd.f32 %v1814_v46, %v10384_v5  ;;  %v13353_v46 = vld [vmem:[#allocation75_spill] sm:$0xff] }
 0x667   : > { %v1777_v12 = vpop.f32.mrb[22].mxu0  ;;  %v1817_v22 = vpop.f32.mrb[46].mxu1  ;;  %v9078_v11 = vadd.f32 %v1775_v34, %v10380_v14 }
 0x668   : > { %v1822_v8 = vmul.f32 0.5, %v9077_v42  ;;  %v1778_v58 = vpop.f32.mrb[23].mxu0  ;;  %v8026_v6 = vpop.f32.mrb[47].mxu1 }
 0x669   : > { %v1823_v7 = vmul.f32 0.5, %v9078_v11  ;;  %v13350_v11 = vld [vmem:[#allocation72_spill] sm:$0xff] }
 0x66a   : > { %9351 = vtanh.f32 %v1822_v8  ;;  %v13355_v8 = vld [vmem:[#allocation76_spill] sm:$0xff] }
 0x66b   : > { %9353 = vtanh.f32 %v1823_v7  ;;  %v7134_v7 = vld [vmem:[%s9701_s15 + $0x1c] sm:$0xf] }
 0x674   : > { %v9352_v38 = vpop.eup %9351 }
 0x675   : > { %v1826_v9 = vmul.f32 0.5, %v9352_v38  ;;  %v9354_v28 = vpop.eup %9353  ;;  %v13351_v38 = vld [vmem:[#allocation74_spill] sm:$0xff] }
 0x676   : > { %v1827_v12 = vmul.f32 0.5, %v9354_v28  ;;  %v13357_v28 = vld [vmem:[#allocation79_spill] sm:$0xff] }
 0x677   : > { %v1828_v16 = vadd.f32 0.5, %v1826_v9 }
 0x678   : > { %v1829_v58 = vadd.f32 0.5, %v1827_v12  ;;  %v13358_v12 = vld [vmem:[#allocation71_spill] sm:$0xff] }
 0x679   : > { %v1831_v30 = vmul.f32 %v1830_v2, %v1828_v16  ;;  %v13352_v16 = vld [vmem:[#allocation73_spill] sm:$0xff] }
 0x67b   : > { %v1832_v4 = vadd.f32 %v1831_v30, %v1733_v10  ;;  %v13356_v30 = vld [vmem:[#allocation78_spill] sm:$0xff] }
 0x67d   : > { %9355 = vtanh.f32 %v1832_v4  ;;  %v13354_v4 = vld [vmem:[#allocation77_spill] sm:$0xff] }
 0x687   : > { %v9356_v42 = vpop.eup %9355 }
 0x688   : > { %v1834_v6 = vsub.f32 %v10712_v62, %v9356_v42  ;;  %v1914_v62 = vpop.f32.mrb[48].mxu1 }
 0x689   : > { %v8045_v54 = vpop.f32.mrb[49].mxu1 }
 0x68a   : > { %v1835_v22 = vmul.f32 %v1834_v6, %v1829_v58  ;;  %v1917_v10 = vpop.f32.mrb[50].mxu1  ;;  %v13359_v6 = vld [vmem:[#allocation80_spill] sm:$0xff] }
 0x68b   : > { %v8046_v2 = vpop.f32.mrb[51].mxu1 }
 0x68c   : > { %v10792_v34 = vadd.f32 %v9356_v42, %v1835_v22 }
 0x68e   : > { %v1920_v9 = vpack.c.bf16 %v10792_v34, %v10792_v34 }
 0x690   : > { %1954 = vmatmul.mubr.bf16.vlgmr.msra.gmra.mrb[24].mxu0 %v1920_v9  ;;  %8064 = vmatmul.mubr.bf16.vlgmr.msra.gmra.mrb[52].mxu1 %v1920_v9 }
 0x691   : > { %2022 = vmatpush1.bf16.msra.mxu0 %v10043_v19  ;;  %8068 = vmatpush3.bf16.msra.mxu1 %v10052_v15 }
 0x692   : > { %2023 = vmatprep.subr.bf16.mxu0 %v10047_v13  ;;  %8069 = vmatprep.subr.bf16.mxu1 %v13280_v25 }
 0x693   : > { %2053 = vmatprep.mubr.bf16.mxu0 %v13281_v55  ;;  %8083 = vmatprep.mubr.msk.bf16.mxu1 %vm9571_vm1, %v13280_v25 }
 0x695   : > { %2024 = vmatpush1.bf16.msra.mxu0 %v10057_v17  ;;  %8070 = vmatpush3.bf16.msra.mxu1 %v10068_v21 }
 0x696   : > { %2025 = vmatprep.subr.bf16.mxu0 %v10063_v20  ;;  %8071 = vmatprep.subr.bf16.mxu1 %v13280_v25 }
 0x699   : > { %2026 = vmatpush1.bf16.msra.mxu0 %v10075_v24  ;;  %8072 = vmatpush3.bf16.msra.mxu1 %v10085_v18 }
 0x69a   : > { %2027 = vmatprep.subr.bf16.mxu0 %v10080_v26  ;;  %8073 = vmatprep.subr.bf16.mxu1 %v13280_v25 }
 0x69d   : > { %2028 = vmatpush1.bf16.msra.mxu0 %v10093_v23  ;;  %8074 = vmatpush3.bf16.msra.mxu1 %v10103_v29 }
 0x69e   : > { %2029 = vmatprep.subr.bf16.mxu0 %v10098_v27  ;;  %8075 = vmatprep.subr.bf16.mxu1 %v13280_v25 }
 0x6a1   : > { %2030 = vmatpush1.bf16.msra.mxu0 %v10109_v31  ;;  %8076 = vmatpush3.bf16.msra.mxu1 %v10119_v33 }
 0x6a2   : > { %2031 = vmatprep.subr.bf16.mxu0 %v10114_v32  ;;  %8077 = vmatprep.subr.bf16.mxu1 %v13280_v25 }
 0x6a5   : > { %2032 = vmatpush1.bf16.msra.mxu0 %v10125_v35  ;;  %8078 = vmatpush3.bf16.msra.mxu1 %v10135_v37 }
 0x6a6   : > { %2033 = vmatprep.subr.bf16.mxu0 %v10130_v36  ;;  %8079 = vmatprep.subr.bf16.mxu1 %v13280_v25 }
 0x6a9   : > { %2034 = vmatpush1.bf16.msra.mxu0 %v10141_v39  ;;  %8080 = vmatpush3.bf16.msra.mxu1 %v10151_v41 }
 0x6aa   : > { %2035 = vmatprep.subr.bf16.mxu0 %v10146_v40  ;;  %8081 = vmatprep.subr.bf16.mxu1 %v13280_v25 }
 0x6ad   : > { %2036 = vmatpush1.bf16.msra.mxu0 %v10157_v43  ;;  %8082 = vmatpush3.bf16.msra.mxu1 %v10167_v45 }
 0x6ae   : > { %2103 = vmatprep.subr.bf16.mxu0 %v10162_v44  ;;  %8087 = vmatprep.subr.bf16.mxu1 %v13280_v25 }
 0x6b0   : > { %2054 = vmatmul.mubr.bf16.vlgmr.msra.gmra.mrb[28].mxu0 %v7134_v7  ;;  %8084 = vmatmul.mubr.bf16.vlgmr.msra.gmra.mrb[56].mxu1 %v7134_v7 }
 0x6b1   : > { %2104 = vmatpush1.bf16.msra.mxu0 %v10174_v48  ;;  %8088 = vmatpush3.bf16.msra.mxu1 %v10184_v49 }
 0x6b2   : > { %2105 = vmatprep.subr.bf16.mxu0 %v10179_v50  ;;  %8089 = vmatprep.subr.bf16.mxu1 %v13280_v25 }
 0x6b3   : > { %2135 = vmatprep.mubr.bf16.mxu0 %v13281_v55  ;;  %8103 = vmatprep.mubr.msk.bf16.mxu1 %vm9571_vm1, %v13280_v25 }
 0x6b5   : > { %2106 = vmatpush1.bf16.msra.mxu0 %v10190_v51  ;;  %8090 = vmatpush3.bf16.msra.mxu1 %v10200_v53 }
 0x6b6   : > { %2107 = vmatprep.subr.bf16.mxu0 %v10195_v52  ;;  %8091 = vmatprep.subr.bf16.mxu1 %v13280_v25 }
 0x6b9   : > { %2108 = vmatpush1.bf16.msra.mxu0 %v10209_v47  ;;  %8092 = vmatpush3.bf16.msra.mxu1 %v10219_v57 }
 0x6ba   : > { %2109 = vmatprep.subr.bf16.mxu0 %v10214_v56  ;;  %8093 = vmatprep.subr.bf16.mxu1 %v13280_v25 }
 0x6bd   : > { %2110 = vmatpush1.bf16.msra.mxu0 %v10225_v59  ;;  %8094 = vmatpush3.bf16.msra.mxu1 %v10235_v61 }
 0x6be   : > { %2111 = vmatprep.subr.bf16.mxu0 %v10230_v60  ;;  %8095 = vmatprep.subr.bf16.mxu1 %v13280_v25 }
 0x6c1   : > { %2112 = vmatpush1.bf16.msra.mxu0 %v10241_v63  ;;  %8096 = vmatpush3.bf16.msra.mxu1 %v10251_v1 }
 0x6c2   : > { %2113 = vmatprep.subr.bf16.mxu0 %v10246_v0  ;;  %8097 = vmatprep.subr.bf16.mxu1 %v13280_v25 }
 0x6c5   : > { %2114 = vmatpush1.bf16.msra.mxu0 %v13350_v11  ;;  %8098 = vmatpush3.bf16.msra.mxu1 %v13351_v38  ;;  %v1915_v11 = vadd.f32 %v1914_v62, %v10387_v3 }
 0x6c6   : > { %2115 = vmatprep.subr.bf16.mxu0 %v13352_v16  ;;  %8099 = vmatprep.subr.bf16.mxu1 %v13280_v25 }
 0x6c9   : > { %2116 = vmatpush1.bf16.msra.mxu0 %v13353_v46  ;;  %8100 = vmatpush3.bf16.msra.mxu1 %v13354_v4 }
 0x6ca   : > { %2117 = vmatprep.subr.bf16.mxu0 %v13355_v8  ;;  %8101 = vmatprep.subr.bf16.mxu1 %v13280_v25 }
 0x6cd   : > { %2118 = vmatpush1.bf16.msra.mxu0 %v13356_v30  ;;  %8102 = vmatpush3.bf16.msra.mxu1 %v13357_v28 }
 0x6ce   : > { %2203 = vmatprep.subr.bf16.mxu0 %v13358_v12  ;;  %8107 = vmatprep.subr.bf16.mxu1 %v13280_v25 }
 0x763   : > { %v1955_v42 = vpop.f32.mrb[24].mxu0  ;;  %v1996_v58 = vpop.f32.mrb[52].mxu1 }
 0x764   : > { %v9079_v22 = vadd.f32 %v1955_v42, %v13359_v6  ;;  %v1957_v9 = vpop.f32.mrb[25].mxu0  ;;  %v8065_v54 = vpop.f32.mrb[53].mxu1  ;;  %v2012_v38 = vadd.f32 %v1996_v58, %v10384_v5  ;;  %v13363_v58 = vld [vmem:[#allocation75_spill] sm:$0xff] }
 0x765   : > { %v1959_v10 = vpop.f32.mrb[26].mxu0  ;;  %v1999_v2 = vpop.f32.mrb[54].mxu1  ;;  %v9080_v30 = vadd.f32 %v1957_v9, %v10380_v14 }
 0x766   : > { %v2004_v7 = vmul.f32 0.5, %v9079_v22  ;;  %v1960_v8 = vpop.f32.mrb[27].mxu0  ;;  %v8066_v4 = vpop.f32.mrb[55].mxu1 }
 0x767   : > { %v2005_v46 = vmul.f32 0.5, %v9080_v30  ;;  %v13360_v30 = vld [vmem:[#allocation72_spill] sm:$0xff] }
 0x768   : > { %9357 = vtanh.f32 %v2004_v7  ;;  %v13365_v7 = vld [vmem:[#allocation76_spill] sm:$0xff] }
 0x769   : > { %9359 = vtanh.f32 %v2005_v46  ;;  %v7135_v46 = vld [vmem:[%s9701_s15 + $0x20] sm:$0xf] }
 0x772   : > { %v9358_v28 = vpop.eup %9357 }
 0x773   : > { %v2008_v16 = vmul.f32 0.5, %v9358_v28  ;;  %v9360_v54 = vpop.eup %9359  ;;  %v13361_v28 = vld [vmem:[#allocation74_spill] sm:$0xff] }
 0x774   : > { %v2009_v10 = vmul.f32 0.5, %v9360_v54  ;;  %v13367_v54 = vld [vmem:[#allocation79_spill] sm:$0xff] }
 0x775   : > { %v2010_v12 = vadd.f32 0.5, %v2008_v16 }
 0x776   : > { %v2011_v8 = vadd.f32 0.5, %v2009_v10  ;;  %v13368_v10 = vld [vmem:[#allocation71_spill] sm:$0xff] }
 0x777   : > { %v2013_v42 = vmul.f32 %v2012_v38, %v2010_v12  ;;  %v13362_v12 = vld [vmem:[#allocation73_spill] sm:$0xff] }
 0x779   : > { %v2014_v6 = vadd.f32 %v2013_v42, %v1915_v11  ;;  %v13366_v42 = vld [vmem:[#allocation78_spill] sm:$0xff] }
 0x77b   : > { %9361 = vtanh.f32 %v2014_v6  ;;  %v13364_v6 = vld [vmem:[#allocation77_spill] sm:$0xff] }
 0x785   : > { %v9362_v22 = vpop.eup %9361 }
 0x786   : > { %v2016_v4 = vsub.f32 %v10792_v34, %v9362_v22  ;;  %v2096_v34 = vpop.f32.mrb[56].mxu1 }
 0x787   : > { %v8085_v62 = vpop.f32.mrb[57].mxu1 }
 0x788   : > { %v2017_v2 = vmul.f32 %v2016_v4, %v2011_v8  ;;  %v2099_v11 = vpop.f32.mrb[58].mxu1  ;;  %v13369_v4 = vld [vmem:[#allocation80_spill] sm:$0xff] }
 0x789   : > { %v8086_v38 = vpop.f32.mrb[59].mxu1 }
 0x78a   : > { %v10872_v9 = vadd.f32 %v9362_v22, %v2017_v2 }
 0x78c   : > { %v2102_v16 = vpack.c.bf16 %v10872_v9, %v10872_v9 }
 0x78e   : > { %2136 = vmatmul.mubr.bf16.vlgmr.msra.gmra.mrb[28].mxu0 %v2102_v16  ;;  %8104 = vmatmul.mubr.bf16.vlgmr.msra.gmra.mrb[60].mxu1 %v2102_v16 }
 0x78f   : > { %2204 = vmatpush1.bf16.msra.mxu0 %v10043_v19  ;;  %8108 = vmatpush3.bf16.msra.mxu1 %v10052_v15 }
 0x790   : > { %2205 = vmatprep.subr.bf16.mxu0 %v10047_v13  ;;  %8109 = vmatprep.subr.bf16.mxu1 %v13280_v25 }
 0x791   : > { %2235 = vmatprep.mubr.bf16.mxu0 %v13281_v55  ;;  %8123 = vmatprep.mubr.msk.bf16.mxu1 %vm9571_vm1, %v13280_v25 }
 0x793   : > { %2206 = vmatpush1.bf16.msra.mxu0 %v10057_v17  ;;  %8110 = vmatpush3.bf16.msra.mxu1 %v10068_v21 }
 0x794   : > { %2207 = vmatprep.subr.bf16.mxu0 %v10063_v20  ;;  %8111 = vmatprep.subr.bf16.mxu1 %v13280_v25 }
 0x797   : > { %2208 = vmatpush1.bf16.msra.mxu0 %v10075_v24  ;;  %8112 = vmatpush3.bf16.msra.mxu1 %v10085_v18 }
 0x798   : > { %2209 = vmatprep.subr.bf16.mxu0 %v10080_v26  ;;  %8113 = vmatprep.subr.bf16.mxu1 %v13280_v25 }
 0x79b   : > { %2210 = vmatpush1.bf16.msra.mxu0 %v10093_v23  ;;  %8114 = vmatpush3.bf16.msra.mxu1 %v10103_v29 }
 0x79c   : > { %2211 = vmatprep.subr.bf16.mxu0 %v10098_v27  ;;  %8115 = vmatprep.subr.bf16.mxu1 %v13280_v25 }
 0x79f   : > { %2212 = vmatpush1.bf16.msra.mxu0 %v10109_v31  ;;  %8116 = vmatpush3.bf16.msra.mxu1 %v10119_v33 }
 0x7a0   : > { %2213 = vmatprep.subr.bf16.mxu0 %v10114_v32  ;;  %8117 = vmatprep.subr.bf16.mxu1 %v13280_v25 }
 0x7a3   : > { %2214 = vmatpush1.bf16.msra.mxu0 %v10125_v35  ;;  %8118 = vmatpush3.bf16.msra.mxu1 %v10135_v37 }
 0x7a4   : > { %2215 = vmatprep.subr.bf16.mxu0 %v10130_v36  ;;  %8119 = vmatprep.subr.bf16.mxu1 %v13280_v25 }
 0x7a7   : > { %2216 = vmatpush1.bf16.msra.mxu0 %v10141_v39  ;;  %8120 = vmatpush3.bf16.msra.mxu1 %v10151_v41 }
 0x7a8   : > { %2217 = vmatprep.subr.bf16.mxu0 %v10146_v40  ;;  %8121 = vmatprep.subr.bf16.mxu1 %v13280_v25 }
 0x7ab   : > { %2218 = vmatpush1.bf16.msra.mxu0 %v10157_v43  ;;  %8122 = vmatpush3.bf16.msra.mxu1 %v10167_v45 }
 0x7ac   : > { %2285 = vmatprep.subr.bf16.mxu0 %v10162_v44  ;;  %8127 = vmatprep.subr.bf16.mxu1 %v13280_v25 }
 0x7ae   : > { %2236 = vmatmul.mubr.bf16.vlgmr.msra.gmra.mrb[32].mxu0 %v7135_v46  ;;  %8124 = vmatmul.mubr.bf16.vlgmr.msra.gmra.mrb[64].mxu1 %v7135_v46 }
 0x7af   : > { %2286 = vmatpush1.bf16.msra.mxu0 %v10174_v48  ;;  %8128 = vmatpush3.bf16.msra.mxu1 %v10184_v49 }
 0x7b0   : > { %2287 = vmatprep.subr.bf16.mxu0 %v10179_v50  ;;  %8129 = vmatprep.subr.bf16.mxu1 %v13280_v25 }
 0x7b1   : > { %2317 = vmatprep.mubr.bf16.mxu0 %v13281_v55  ;;  %8143 = vmatprep.mubr.msk.bf16.mxu1 %vm9571_vm1, %v13280_v25 }
 0x7b3   : > { %2288 = vmatpush1.bf16.msra.mxu0 %v10190_v51  ;;  %8130 = vmatpush3.bf16.msra.mxu1 %v10200_v53 }
 0x7b4   : > { %2289 = vmatprep.subr.bf16.mxu0 %v10195_v52  ;;  %8131 = vmatprep.subr.bf16.mxu1 %v13280_v25 }
 0x7b7   : > { %2290 = vmatpush1.bf16.msra.mxu0 %v10209_v47  ;;  %8132 = vmatpush3.bf16.msra.mxu1 %v10219_v57 }
 0x7b8   : > { %2291 = vmatprep.subr.bf16.mxu0 %v10214_v56  ;;  %8133 = vmatprep.subr.bf16.mxu1 %v13280_v25 }
 0x7bb   : > { %2292 = vmatpush1.bf16.msra.mxu0 %v10225_v59  ;;  %8134 = vmatpush3.bf16.msra.mxu1 %v10235_v61 }
 0x7bc   : > { %2293 = vmatprep.subr.bf16.mxu0 %v10230_v60  ;;  %8135 = vmatprep.subr.bf16.mxu1 %v13280_v25 }
 0x7bf   : > { %2294 = vmatpush1.bf16.msra.mxu0 %v10241_v63  ;;  %8136 = vmatpush3.bf16.msra.mxu1 %v10251_v1 }
 0x7c0   : > { %2295 = vmatprep.subr.bf16.mxu0 %v10246_v0  ;;  %8137 = vmatprep.subr.bf16.mxu1 %v13280_v25 }
 0x7c3   : > { %2296 = vmatpush1.bf16.msra.mxu0 %v13360_v30  ;;  %8138 = vmatpush3.bf16.msra.mxu1 %v13361_v28  ;;  %v2097_v30 = vadd.f32 %v2096_v34, %v10387_v3 }
 0x7c4   : > { %2297 = vmatprep.subr.bf16.mxu0 %v13362_v12  ;;  %8139 = vmatprep.subr.bf16.mxu1 %v13280_v25 }
 0x7c7   : > { %2298 = vmatpush1.bf16.msra.mxu0 %v13363_v58  ;;  %8140 = vmatpush3.bf16.msra.mxu1 %v13364_v6 }
 0x7c8   : > { %2299 = vmatprep.subr.bf16.mxu0 %v13365_v7  ;;  %8141 = vmatprep.subr.bf16.mxu1 %v13280_v25 }
 0x7cb   : > { %2300 = vmatpush1.bf16.msra.mxu0 %v13366_v42  ;;  %8142 = vmatpush3.bf16.msra.mxu1 %v13367_v54 }
 0x7cc   : > { %2385 = vmatprep.subr.bf16.mxu0 %v13368_v10  ;;  %8147 = vmatprep.subr.bf16.mxu1 %v13280_v25 }
 0x861   : > { %v2137_v22 = vpop.f32.mrb[28].mxu0  ;;  %v2178_v8 = vpop.f32.mrb[60].mxu1 }
 0x862   : > { %v9081_v2 = vadd.f32 %v2137_v22, %v13369_v4  ;;  %v2139_v16 = vpop.f32.mrb[29].mxu0  ;;  %v8105_v62 = vpop.f32.mrb[61].mxu1  ;;  %v2194_v28 = vadd.f32 %v2178_v8, %v10384_v5  ;;  %v13373_v8 = vld [vmem:[#allocation75_spill] sm:$0xff] }
 0x863   : > { %v2141_v11 = vpop.f32.mrb[30].mxu0  ;;  %v2181_v38 = vpop.f32.mrb[62].mxu1  ;;  %v9082_v42 = vadd.f32 %v2139_v16, %v10380_v14 }
 0x864   : > { %v2186_v46 = vmul.f32 0.5, %v9081_v2  ;;  %v2142_v7 = vpop.f32.mrb[31].mxu0  ;;  %v8106_v6 = vpop.f32.mrb[63].mxu1 }
 0x865   : > { %v2187_v58 = vmul.f32 0.5, %v9082_v42  ;;  %v13370_v42 = vld [vmem:[#allocation72_spill] sm:$0xff] }
 0x866   : > { %9363 = vtanh.f32 %v2186_v46  ;;  %v13375_v46 = vld [vmem:[#allocation76_spill] sm:$0xff] }
 0x867   : > { %9365 = vtanh.f32 %v2187_v58  ;;  %v7136_v58 = vld [vmem:[%s9701_s15 + $0x24] sm:$0xf] }
 0x870   : > { %v9364_v54 = vpop.eup %9363 }
 0x871   : > { %v2190_v12 = vmul.f32 0.5, %v9364_v54  ;;  %v9366_v62 = vpop.eup %9365  ;;  %v13371_v54 = vld [vmem:[#allocation74_spill] sm:$0xff] }
 0x872   : > { %v2191_v11 = vmul.f32 0.5, %v9366_v62  ;;  %v13377_v62 = vld [vmem:[#allocation79_spill] sm:$0xff] }
 0x873   : > { %v2192_v10 = vadd.f32 0.5, %v2190_v12 }
 0x874   : > { %v2193_v7 = vadd.f32 0.5, %v2191_v11  ;;  %v13378_v11 = vld [vmem:[#allocation71_spill] sm:$0xff] }
 0x875   : > { %v2195_v22 = vmul.f32 %v2194_v28, %v2192_v10  ;;  %v13372_v10 = vld [vmem:[#allocation73_spill] sm:$0xff] }
 0x877   : > { %v2196_v4 = vadd.f32 %v2195_v22, %v2097_v30  ;;  %v13376_v22 = vld [vmem:[#allocation78_spill] sm:$0xff] }
 0x879   : > { %9367 = vtanh.f32 %v2196_v4  ;;  %v13374_v4 = vld [vmem:[#allocation77_spill] sm:$0xff] }
 0x883   : > { %v9368_v2 = vpop.eup %9367 }
 0x884   : > { %v2198_v6 = vsub.f32 %v10872_v9, %v9368_v2  ;;  %v2278_v9 = vpop.f32.mrb[64].mxu1 }
 0x885   : > { %v8125_v34 = vpop.f32.mrb[65].mxu1 }
 0x886   : > { %v2199_v38 = vmul.f32 %v2198_v6, %v2193_v7  ;;  %v2281_v30 = vpop.f32.mrb[66].mxu1  ;;  %v13379_v6 = vld [vmem:[#allocation80_spill] sm:$0xff] }
 0x887   : > { %v8126_v28 = vpop.f32.mrb[67].mxu1 }
 0x888   : > { %v10952_v16 = vadd.f32 %v9368_v2, %v2199_v38 }
 0x88a   : > { %v2284_v12 = vpack.c.bf16 %v10952_v16, %v10952_v16 }
 0x88c   : > { %2318 = vmatmul.mubr.bf16.vlgmr.msra.gmra.mrb[32].mxu0 %v2284_v12  ;;  %8144 = vmatmul.mubr.bf16.vlgmr.msra.gmra.mrb[68].mxu1 %v2284_v12 }
 0x88d   : > { %2386 = vmatpush1.bf16.msra.mxu0 %v10043_v19  ;;  %8148 = vmatpush3.bf16.msra.mxu1 %v10052_v15 }
 0x88e   : > { %2387 = vmatprep.subr.bf16.mxu0 %v10047_v13  ;;  %8149 = vmatprep.subr.bf16.mxu1 %v13280_v25 }
 0x88f   : > { %2417 = vmatprep.mubr.bf16.mxu0 %v13281_v55  ;;  %8163 = vmatprep.mubr.msk.bf16.mxu1 %vm9571_vm1, %v13280_v25 }
 0x891   : > { %2388 = vmatpush1.bf16.msra.mxu0 %v10057_v17  ;;  %8150 = vmatpush3.bf16.msra.mxu1 %v10068_v21 }
 0x892   : > { %2389 = vmatprep.subr.bf16.mxu0 %v10063_v20  ;;  %8151 = vmatprep.subr.bf16.mxu1 %v13280_v25 }
 0x895   : > { %2390 = vmatpush1.bf16.msra.mxu0 %v10075_v24  ;;  %8152 = vmatpush3.bf16.msra.mxu1 %v10085_v18 }
 0x896   : > { %2391 = vmatprep.subr.bf16.mxu0 %v10080_v26  ;;  %8153 = vmatprep.subr.bf16.mxu1 %v13280_v25 }
 0x899   : > { %2392 = vmatpush1.bf16.msra.mxu0 %v10093_v23  ;;  %8154 = vmatpush3.bf16.msra.mxu1 %v10103_v29 }
 0x89a   : > { %2393 = vmatprep.subr.bf16.mxu0 %v10098_v27  ;;  %8155 = vmatprep.subr.bf16.mxu1 %v13280_v25 }
 0x89d   : > { %2394 = vmatpush1.bf16.msra.mxu0 %v10109_v31  ;;  %8156 = vmatpush3.bf16.msra.mxu1 %v10119_v33 }
 0x89e   : > { %2395 = vmatprep.subr.bf16.mxu0 %v10114_v32  ;;  %8157 = vmatprep.subr.bf16.mxu1 %v13280_v25 }
 0x8a1   : > { %2396 = vmatpush1.bf16.msra.mxu0 %v10125_v35  ;;  %8158 = vmatpush3.bf16.msra.mxu1 %v10135_v37 }
 0x8a2   : > { %2397 = vmatprep.subr.bf16.mxu0 %v10130_v36  ;;  %8159 = vmatprep.subr.bf16.mxu1 %v13280_v25 }
 0x8a5   : > { %2398 = vmatpush1.bf16.msra.mxu0 %v10141_v39  ;;  %8160 = vmatpush3.bf16.msra.mxu1 %v10151_v41 }
 0x8a6   : > { %2399 = vmatprep.subr.bf16.mxu0 %v10146_v40  ;;  %8161 = vmatprep.subr.bf16.mxu1 %v13280_v25 }
 0x8a9   : > { %2400 = vmatpush1.bf16.msra.mxu0 %v10157_v43  ;;  %8162 = vmatpush3.bf16.msra.mxu1 %v10167_v45 }
 0x8aa   : > { %2467 = vmatprep.subr.bf16.mxu0 %v10162_v44  ;;  %8167 = vmatprep.subr.bf16.mxu1 %v13280_v25 }
 0x8ac   : > { %2418 = vmatmul.mubr.bf16.vlgmr.msra.gmra.mrb[36].mxu0 %v7136_v58  ;;  %8164 = vmatmul.mubr.bf16.vlgmr.msra.gmra.mrb[72].mxu1 %v7136_v58 }
 0x8ad   : > { %2468 = vmatpush1.bf16.msra.mxu0 %v10174_v48  ;;  %8168 = vmatpush3.bf16.msra.mxu1 %v10184_v49 }
 0x8ae   : > { %2469 = vmatprep.subr.bf16.mxu0 %v10179_v50  ;;  %8169 = vmatprep.subr.bf16.mxu1 %v13280_v25 }
 0x8af   : > { %2499 = vmatprep.mubr.bf16.mxu0 %v13281_v55  ;;  %8183 = vmatprep.mubr.msk.bf16.mxu1 %vm9571_vm1, %v13280_v25 }
 0x8b1   : > { %2470 = vmatpush1.bf16.msra.mxu0 %v10190_v51  ;;  %8170 = vmatpush3.bf16.msra.mxu1 %v10200_v53 }
 0x8b2   : > { %2471 = vmatprep.subr.bf16.mxu0 %v10195_v52  ;;  %8171 = vmatprep.subr.bf16.mxu1 %v13280_v25 }
 0x8b5   : > { %2472 = vmatpush1.bf16.msra.mxu0 %v10209_v47  ;;  %8172 = vmatpush3.bf16.msra.mxu1 %v10219_v57 }
 0x8b6   : > { %2473 = vmatprep.subr.bf16.mxu0 %v10214_v56  ;;  %8173 = vmatprep.subr.bf16.mxu1 %v13280_v25 }
 0x8b9   : > { %2474 = vmatpush1.bf16.msra.mxu0 %v10225_v59  ;;  %8174 = vmatpush3.bf16.msra.mxu1 %v10235_v61 }
 0x8ba   : > { %2475 = vmatprep.subr.bf16.mxu0 %v10230_v60  ;;  %8175 = vmatprep.subr.bf16.mxu1 %v13280_v25 }
 0x8bd   : > { %2476 = vmatpush1.bf16.msra.mxu0 %v10241_v63  ;;  %8176 = vmatpush3.bf16.msra.mxu1 %v10251_v1 }
 0x8be   : > { %2477 = vmatprep.subr.bf16.mxu0 %v10246_v0  ;;  %8177 = vmatprep.subr.bf16.mxu1 %v13280_v25 }
 0x8c1   : > { %2478 = vmatpush1.bf16.msra.mxu0 %v13370_v42  ;;  %8178 = vmatpush3.bf16.msra.mxu1 %v13371_v54  ;;  %v2279_v42 = vadd.f32 %v2278_v9, %v10387_v3 }
 0x8c2   : > { %2479 = vmatprep.subr.bf16.mxu0 %v13372_v10  ;;  %8179 = vmatprep.subr.bf16.mxu1 %v13280_v25 }
 0x8c5   : > { %2480 = vmatpush1.bf16.msra.mxu0 %v13373_v8  ;;  %8180 = vmatpush3.bf16.msra.mxu1 %v13374_v4 }
 0x8c6   : > { %2481 = vmatprep.subr.bf16.mxu0 %v13375_v46  ;;  %8181 = vmatprep.subr.bf16.mxu1 %v13280_v25 }
 0x8c9   : > { %2482 = vmatpush1.bf16.msra.mxu0 %v13376_v22  ;;  %8182 = vmatpush3.bf16.msra.mxu1 %v13377_v62 }
 0x8ca   : > { %2567 = vmatprep.subr.bf16.mxu0 %v13378_v11  ;;  %8187 = vmatprep.subr.bf16.mxu1 %v13280_v25 }
 0x95f   : > { %v2319_v2 = vpop.f32.mrb[32].mxu0  ;;  %v2360_v7 = vpop.f32.mrb[68].mxu1 }
 0x960   : > { %v9083_v38 = vadd.f32 %v2319_v2, %v13379_v6  ;;  %v2321_v12 = vpop.f32.mrb[33].mxu0  ;;  %v8145_v34 = vpop.f32.mrb[69].mxu1  ;;  %v2376_v54 = vadd.f32 %v2360_v7, %v10384_v5  ;;  %v13383_v7 = vld [vmem:[#allocation75_spill] sm:$0xff] }
 0x961   : > { %v2323_v30 = vpop.f32.mrb[34].mxu0  ;;  %v2363_v28 = vpop.f32.mrb[70].mxu1  ;;  %v9084_v22 = vadd.f32 %v2321_v12, %v10380_v14 }
 0x962   : > { %v2368_v58 = vmul.f32 0.5, %v9083_v38  ;;  %v2324_v46 = vpop.f32.mrb[35].mxu0  ;;  %v8146_v4 = vpop.f32.mrb[71].mxu1 }
 0x963   : > { %v2369_v8 = vmul.f32 0.5, %v9084_v22  ;;  %v13380_v22 = vld [vmem:[#allocation72_spill] sm:$0xff] }
 0x964   : > { %9369 = vtanh.f32 %v2368_v58  ;;  %v13385_v58 = vld [vmem:[#allocation76_spill] sm:$0xff] }
 0x965   : > { %9371 = vtanh.f32 %v2369_v8  ;;  %v7137_v8 = vld [vmem:[%s9701_s15 + $0x28] sm:$0xf] }
 0x96e   : > { %v9370_v62 = vpop.eup %9369 }
 0x96f   : > { %v2372_v10 = vmul.f32 0.5, %v9370_v62  ;;  %v9372_v34 = vpop.eup %9371  ;;  %v13381_v62 = vld [vmem:[#allocation74_spill] sm:$0xff] }
 0x970   : > { %v2373_v30 = vmul.f32 0.5, %v9372_v34  ;;  %v13387_v34 = vld [vmem:[#allocation79_spill] sm:$0xff] }
 0x971   : > { %v2374_v11 = vadd.f32 0.5, %v2372_v10 }
 0x972   : > { %v2375_v46 = vadd.f32 0.5, %v2373_v30  ;;  %v13388_v30 = vld [vmem:[#allocation71_spill] sm:$0xff] }
 0x973   : > { %v2377_v2 = vmul.f32 %v2376_v54, %v2374_v11  ;;  %v13382_v11 = vld [vmem:[#allocation73_spill] sm:$0xff] }
 0x975   : > { %v2378_v6 = vadd.f32 %v2377_v2, %v2279_v42  ;;  %v13386_v2 = vld [vmem:[#allocation78_spill] sm:$0xff] }
 0x977   : > { %9373 = vtanh.f32 %v2378_v6  ;;  %v13384_v6 = vld [vmem:[#allocation77_spill] sm:$0xff] }
 0x981   : > { %v9374_v38 = vpop.eup %9373 }
 0x982   : > { %v2380_v4 = vsub.f32 %v10952_v16, %v9374_v38  ;;  %v2460_v16 = vpop.f32.mrb[72].mxu1 }
 0x983   : > { %v8165_v9 = vpop.f32.mrb[73].mxu1 }
 0x984   : > { %v2381_v28 = vmul.f32 %v2380_v4, %v2375_v46  ;;  %v2463_v42 = vpop.f32.mrb[74].mxu1  ;;  %v13389_v4 = vld [vmem:[#allocation80_spill] sm:$0xff] }
 0x985   : > { %v8166_v54 = vpop.f32.mrb[75].mxu1 }
 0x986   : > { %v11032_v12 = vadd.f32 %v9374_v38, %v2381_v28 }
 0x988   : > { %v2466_v10 = vpack.c.bf16 %v11032_v12, %v11032_v12 }
 0x98a   : > { %2500 = vmatmul.mubr.bf16.vlgmr.msra.gmra.mrb[36].mxu0 %v2466_v10  ;;  %8184 = vmatmul.mubr.bf16.vlgmr.msra.gmra.mrb[76].mxu1 %v2466_v10 }
 0x98b   : > { %2568 = vmatpush1.bf16.msra.mxu0 %v10043_v19  ;;  %8188 = vmatpush3.bf16.msra.mxu1 %v10052_v15 }
 0x98c   : > { %2569 = vmatprep.subr.bf16.mxu0 %v10047_v13  ;;  %8189 = vmatprep.subr.bf16.mxu1 %v13280_v25 }
 0x98d   : > { %2599 = vmatprep.mubr.bf16.mxu0 %v13281_v55  ;;  %8203 = vmatprep.mubr.msk.bf16.mxu1 %vm9571_vm1, %v13280_v25 }
 0x98f   : > { %2570 = vmatpush1.bf16.msra.mxu0 %v10057_v17  ;;  %8190 = vmatpush3.bf16.msra.mxu1 %v10068_v21 }
 0x990   : > { %2571 = vmatprep.subr.bf16.mxu0 %v10063_v20  ;;  %8191 = vmatprep.subr.bf16.mxu1 %v13280_v25 }
 0x993   : > { %2572 = vmatpush1.bf16.msra.mxu0 %v10075_v24  ;;  %8192 = vmatpush3.bf16.msra.mxu1 %v10085_v18 }
 0x994   : > { %2573 = vmatprep.subr.bf16.mxu0 %v10080_v26  ;;  %8193 = vmatprep.subr.bf16.mxu1 %v13280_v25 }
 0x997   : > { %2574 = vmatpush1.bf16.msra.mxu0 %v10093_v23  ;;  %8194 = vmatpush3.bf16.msra.mxu1 %v10103_v29 }
 0x998   : > { %2575 = vmatprep.subr.bf16.mxu0 %v10098_v27  ;;  %8195 = vmatprep.subr.bf16.mxu1 %v13280_v25 }
 0x99b   : > { %2576 = vmatpush1.bf16.msra.mxu0 %v10109_v31  ;;  %8196 = vmatpush3.bf16.msra.mxu1 %v10119_v33 }
 0x99c   : > { %2577 = vmatprep.subr.bf16.mxu0 %v10114_v32  ;;  %8197 = vmatprep.subr.bf16.mxu1 %v13280_v25 }
 0x99f   : > { %2578 = vmatpush1.bf16.msra.mxu0 %v10125_v35  ;;  %8198 = vmatpush3.bf16.msra.mxu1 %v10135_v37 }
 0x9a0   : > { %2579 = vmatprep.subr.bf16.mxu0 %v10130_v36  ;;  %8199 = vmatprep.subr.bf16.mxu1 %v13280_v25 }
 0x9a3   : > { %2580 = vmatpush1.bf16.msra.mxu0 %v10141_v39  ;;  %8200 = vmatpush3.bf16.msra.mxu1 %v10151_v41 }
 0x9a4   : > { %2581 = vmatprep.subr.bf16.mxu0 %v10146_v40  ;;  %8201 = vmatprep.subr.bf16.mxu1 %v13280_v25 }
 0x9a7   : > { %2582 = vmatpush1.bf16.msra.mxu0 %v10157_v43  ;;  %8202 = vmatpush3.bf16.msra.mxu1 %v10167_v45 }
 0x9a8   : > { %2649 = vmatprep.subr.bf16.mxu0 %v10162_v44  ;;  %8207 = vmatprep.subr.bf16.mxu1 %v13280_v25 }
 0x9aa   : > { %2600 = vmatmul.mubr.bf16.vlgmr.msra.gmra.mrb[40].mxu0 %v7137_v8  ;;  %8204 = vmatmul.mubr.bf16.vlgmr.msra.gmra.mrb[80].mxu1 %v7137_v8 }
 0x9ab   : > { %2650 = vmatpush1.bf16.msra.mxu0 %v10174_v48  ;;  %8208 = vmatpush3.bf16.msra.mxu1 %v10184_v49 }
 0x9ac   : > { %2651 = vmatprep.subr.bf16.mxu0 %v10179_v50  ;;  %8209 = vmatprep.subr.bf16.mxu1 %v13280_v25 }
 0x9ad   : > { %2681 = vmatprep.mubr.bf16.mxu0 %v13281_v55  ;;  %8223 = vmatprep.mubr.msk.bf16.mxu1 %vm9571_vm1, %v13280_v25 }
 0x9af   : > { %2652 = vmatpush1.bf16.msra.mxu0 %v10190_v51  ;;  %8210 = vmatpush3.bf16.msra.mxu1 %v10200_v53 }
 0x9b0   : > { %2653 = vmatprep.subr.bf16.mxu0 %v10195_v52  ;;  %8211 = vmatprep.subr.bf16.mxu1 %v13280_v25 }
 0x9b3   : > { %2654 = vmatpush1.bf16.msra.mxu0 %v10209_v47  ;;  %8212 = vmatpush3.bf16.msra.mxu1 %v10219_v57 }
 0x9b4   : > { %2655 = vmatprep.subr.bf16.mxu0 %v10214_v56  ;;  %8213 = vmatprep.subr.bf16.mxu1 %v13280_v25 }
 0x9b7   : > { %2656 = vmatpush1.bf16.msra.mxu0 %v10225_v59  ;;  %8214 = vmatpush3.bf16.msra.mxu1 %v10235_v61 }
 0x9b8   : > { %2657 = vmatprep.subr.bf16.mxu0 %v10230_v60  ;;  %8215 = vmatprep.subr.bf16.mxu1 %v13280_v25 }
 0x9bb   : > { %2658 = vmatpush1.bf16.msra.mxu0 %v10241_v63  ;;  %8216 = vmatpush3.bf16.msra.mxu1 %v10251_v1 }
 0x9bc   : > { %2659 = vmatprep.subr.bf16.mxu0 %v10246_v0  ;;  %8217 = vmatprep.subr.bf16.mxu1 %v13280_v25 }
 0x9bf   : > { %2660 = vmatpush1.bf16.msra.mxu0 %v13380_v22  ;;  %8218 = vmatpush3.bf16.msra.mxu1 %v13381_v62  ;;  %v2461_v22 = vadd.f32 %v2460_v16, %v10387_v3 }
 0x9c0   : > { %2661 = vmatprep.subr.bf16.mxu0 %v13382_v11  ;;  %8219 = vmatprep.subr.bf16.mxu1 %v13280_v25 }
 0x9c3   : > { %2662 = vmatpush1.bf16.msra.mxu0 %v13383_v7  ;;  %8220 = vmatpush3.bf16.msra.mxu1 %v13384_v6 }
 0x9c4   : > { %2663 = vmatprep.subr.bf16.mxu0 %v13385_v58  ;;  %8221 = vmatprep.subr.bf16.mxu1 %v13280_v25 }
 0x9c7   : > { %2664 = vmatpush1.bf16.msra.mxu0 %v13386_v2  ;;  %8222 = vmatpush3.bf16.msra.mxu1 %v13387_v34 }
 0x9c8   : > { %2749 = vmatprep.subr.bf16.mxu0 %v13388_v30  ;;  %8227 = vmatprep.subr.bf16.mxu1 %v13280_v25 }
 0xa5d   : > { %v2501_v38 = vpop.f32.mrb[36].mxu0  ;;  %v2542_v46 = vpop.f32.mrb[76].mxu1 }
 0xa5e   : > { %v9085_v28 = vadd.f32 %v2501_v38, %v13389_v4  ;;  %v2503_v10 = vpop.f32.mrb[37].mxu0  ;;  %v8185_v9 = vpop.f32.mrb[77].mxu1  ;;  %v2558_v62 = vadd.f32 %v2542_v46, %v10384_v5  ;;  %v13393_v46 = vld [vmem:[#allocation75_spill] sm:$0xff] }
 0xa5f   : > { %v2505_v42 = vpop.f32.mrb[38].mxu0  ;;  %v2545_v54 = vpop.f32.mrb[78].mxu1  ;;  %v9086_v2 = vadd.f32 %v2503_v10, %v10380_v14 }
 0xa60   : > { %v2550_v8 = vmul.f32 0.5, %v9085_v28  ;;  %v2506_v58 = vpop.f32.mrb[39].mxu0  ;;  %v8186_v6 = vpop.f32.mrb[79].mxu1 }
 0xa61   : > { %v2551_v7 = vmul.f32 0.5, %v9086_v2  ;;  %v13390_v2 = vld [vmem:[#allocation72_spill] sm:$0xff] }
 0xa62   : > { %9375 = vtanh.f32 %v2550_v8  ;;  %v13395_v8 = vld [vmem:[#allocation76_spill] sm:$0xff] }
 0xa63   : > { %9377 = vtanh.f32 %v2551_v7  ;;  %v7138_v7 = vld [vmem:[%s9701_s15 + $0x2c] sm:$0xf] }
 0xa6c   : > { %v9376_v34 = vpop.eup %9375 }
 0xa6d   : > { %v2554_v11 = vmul.f32 0.5, %v9376_v34  ;;  %v9378_v9 = vpop.eup %9377  ;;  %v13391_v34 = vld [vmem:[#allocation74_spill] sm:$0xff] }
 0xa6e   : > { %v2555_v42 = vmul.f32 0.5, %v9378_v9  ;;  %v13397_v9 = vld [vmem:[#allocation79_spill] sm:$0xff] }
 0xa6f   : > { %v2556_v30 = vadd.f32 0.5, %v2554_v11 }
 0xa70   : > { %v2557_v58 = vadd.f32 0.5, %v2555_v42  ;;  %v13398_v42 = vld [vmem:[#allocation71_spill] sm:$0xff] }
 0xa71   : > { %v2559_v38 = vmul.f32 %v2558_v62, %v2556_v30  ;;  %v13392_v30 = vld [vmem:[#allocation73_spill] sm:$0xff] }
 0xa73   : > { %v2560_v4 = vadd.f32 %v2559_v38, %v2461_v22  ;;  %v13396_v38 = vld [vmem:[#allocation78_spill] sm:$0xff] }
 0xa75   : > { %9379 = vtanh.f32 %v2560_v4  ;;  %v13394_v4 = vld [vmem:[#allocation77_spill] sm:$0xff] }
 0xa7f   : > { %v9380_v28 = vpop.eup %9379 }
 0xa80   : > { %v2562_v6 = vsub.f32 %v11032_v12, %v9380_v28  ;;  %v2642_v12 = vpop.f32.mrb[80].mxu1 }
 0xa81   : > { %v8205_v16 = vpop.f32.mrb[81].mxu1 }
 0xa82   : > { %v2563_v54 = vmul.f32 %v2562_v6, %v2557_v58  ;;  %v2645_v22 = vpop.f32.mrb[82].mxu1  ;;  %v13399_v6 = vld [vmem:[#allocation80_spill] sm:$0xff] }
 0xa83   : > { %v8206_v62 = vpop.f32.mrb[83].mxu1 }
 0xa84   : > { %v11112_v10 = vadd.f32 %v9380_v28, %v2563_v54 }
 0xa86   : > { %v2648_v11 = vpack.c.bf16 %v11112_v10, %v11112_v10 }
 0xa88   : > { %2682 = vmatmul.mubr.bf16.vlgmr.msra.gmra.mrb[40].mxu0 %v2648_v11  ;;  %8224 = vmatmul.mubr.bf16.vlgmr.msra.gmra.mrb[84].mxu1 %v2648_v11 }
 0xa89   : > { %2750 = vmatpush1.bf16.msra.mxu0 %v10043_v19  ;;  %8228 = vmatpush3.bf16.msra.mxu1 %v10052_v15 }
 0xa8a   : > { %2751 = vmatprep.subr.bf16.mxu0 %v10047_v13  ;;  %8229 = vmatprep.subr.bf16.mxu1 %v13280_v25 }
 0xa8b   : > { %2781 = vmatprep.mubr.bf16.mxu0 %v13281_v55  ;;  %8243 = vmatprep.mubr.msk.bf16.mxu1 %vm9571_vm1, %v13280_v25 }
 0xa8d   : > { %2752 = vmatpush1.bf16.msra.mxu0 %v10057_v17  ;;  %8230 = vmatpush3.bf16.msra.mxu1 %v10068_v21 }
 0xa8e   : > { %2753 = vmatprep.subr.bf16.mxu0 %v10063_v20  ;;  %8231 = vmatprep.subr.bf16.mxu1 %v13280_v25 }
 0xa91   : > { %2754 = vmatpush1.bf16.msra.mxu0 %v10075_v24  ;;  %8232 = vmatpush3.bf16.msra.mxu1 %v10085_v18 }
 0xa92   : > { %2755 = vmatprep.subr.bf16.mxu0 %v10080_v26  ;;  %8233 = vmatprep.subr.bf16.mxu1 %v13280_v25 }
 0xa95   : > { %2756 = vmatpush1.bf16.msra.mxu0 %v10093_v23  ;;  %8234 = vmatpush3.bf16.msra.mxu1 %v10103_v29 }
 0xa96   : > { %2757 = vmatprep.subr.bf16.mxu0 %v10098_v27  ;;  %8235 = vmatprep.subr.bf16.mxu1 %v13280_v25 }
 0xa99   : > { %2758 = vmatpush1.bf16.msra.mxu0 %v10109_v31  ;;  %8236 = vmatpush3.bf16.msra.mxu1 %v10119_v33 }
 0xa9a   : > { %2759 = vmatprep.subr.bf16.mxu0 %v10114_v32  ;;  %8237 = vmatprep.subr.bf16.mxu1 %v13280_v25 }
 0xa9d   : > { %2760 = vmatpush1.bf16.msra.mxu0 %v10125_v35  ;;  %8238 = vmatpush3.bf16.msra.mxu1 %v10135_v37 }
 0xa9e   : > { %2761 = vmatprep.subr.bf16.mxu0 %v10130_v36  ;;  %8239 = vmatprep.subr.bf16.mxu1 %v13280_v25 }
 0xaa1   : > { %2762 = vmatpush1.bf16.msra.mxu0 %v10141_v39  ;;  %8240 = vmatpush3.bf16.msra.mxu1 %v10151_v41 }
 0xaa2   : > { %2763 = vmatprep.subr.bf16.mxu0 %v10146_v40  ;;  %8241 = vmatprep.subr.bf16.mxu1 %v13280_v25 }
 0xaa5   : > { %2764 = vmatpush1.bf16.msra.mxu0 %v10157_v43  ;;  %8242 = vmatpush3.bf16.msra.mxu1 %v10167_v45 }
 0xaa6   : > { %2831 = vmatprep.subr.bf16.mxu0 %v10162_v44  ;;  %8247 = vmatprep.subr.bf16.mxu1 %v13280_v25 }
 0xaa8   : > { %2782 = vmatmul.mubr.bf16.vlgmr.msra.gmra.mrb[44].mxu0 %v7138_v7  ;;  %8244 = vmatmul.mubr.bf16.vlgmr.msra.gmra.mrb[88].mxu1 %v7138_v7 }
 0xaa9   : > { %2832 = vmatpush1.bf16.msra.mxu0 %v10174_v48  ;;  %8248 = vmatpush3.bf16.msra.mxu1 %v10184_v49 }
 0xaaa   : > { %2833 = vmatprep.subr.bf16.mxu0 %v10179_v50  ;;  %8249 = vmatprep.subr.bf16.mxu1 %v13280_v25 }
 0xaab   : > { %2863 = vmatprep.mubr.bf16.mxu0 %v13281_v55  ;;  %8263 = vmatprep.mubr.msk.bf16.mxu1 %vm9571_vm1, %v13280_v25 }
 0xaad   : > { %2834 = vmatpush1.bf16.msra.mxu0 %v10190_v51  ;;  %8250 = vmatpush3.bf16.msra.mxu1 %v10200_v53 }
 0xaae   : > { %2835 = vmatprep.subr.bf16.mxu0 %v10195_v52  ;;  %8251 = vmatprep.subr.bf16.mxu1 %v13280_v25 }
 0xab1   : > { %2836 = vmatpush1.bf16.msra.mxu0 %v10209_v47  ;;  %8252 = vmatpush3.bf16.msra.mxu1 %v10219_v57 }
 0xab2   : > { %2837 = vmatprep.subr.bf16.mxu0 %v10214_v56  ;;  %8253 = vmatprep.subr.bf16.mxu1 %v13280_v25 }
 0xab5   : > { %2838 = vmatpush1.bf16.msra.mxu0 %v10225_v59  ;;  %8254 = vmatpush3.bf16.msra.mxu1 %v10235_v61 }
 0xab6   : > { %2839 = vmatprep.subr.bf16.mxu0 %v10230_v60  ;;  %8255 = vmatprep.subr.bf16.mxu1 %v13280_v25 }
 0xab9   : > { %2840 = vmatpush1.bf16.msra.mxu0 %v10241_v63  ;;  %8256 = vmatpush3.bf16.msra.mxu1 %v10251_v1 }
 0xaba   : > { %2841 = vmatprep.subr.bf16.mxu0 %v10246_v0  ;;  %8257 = vmatprep.subr.bf16.mxu1 %v13280_v25 }
 0xabd   : > { %2842 = vmatpush1.bf16.msra.mxu0 %v13390_v2  ;;  %8258 = vmatpush3.bf16.msra.mxu1 %v13391_v34  ;;  %v2643_v2 = vadd.f32 %v2642_v12, %v10387_v3 }
 0xabe   : > { %2843 = vmatprep.subr.bf16.mxu0 %v13392_v30  ;;  %8259 = vmatprep.subr.bf16.mxu1 %v13280_v25 }
 0xac1   : > { %2844 = vmatpush1.bf16.msra.mxu0 %v13393_v46  ;;  %8260 = vmatpush3.bf16.msra.mxu1 %v13394_v4 }
 0xac2   : > { %2845 = vmatprep.subr.bf16.mxu0 %v13395_v8  ;;  %8261 = vmatprep.subr.bf16.mxu1 %v13280_v25 }
 0xac5   : > { %2846 = vmatpush1.bf16.msra.mxu0 %v13396_v38  ;;  %8262 = vmatpush3.bf16.msra.mxu1 %v13397_v9 }
 0xac6   : > { %2931 = vmatprep.subr.bf16.mxu0 %v13398_v42  ;;  %8267 = vmatprep.subr.bf16.mxu1 %v13280_v25 }
 0xb5b   : > { %v2683_v28 = vpop.f32.mrb[40].mxu0  ;;  %v2724_v58 = vpop.f32.mrb[84].mxu1 }
 0xb5c   : > { %v9087_v54 = vadd.f32 %v2683_v28, %v13399_v6  ;;  %v2685_v11 = vpop.f32.mrb[41].mxu0  ;;  %v8225_v16 = vpop.f32.mrb[85].mxu1  ;;  %v2740_v34 = vadd.f32 %v2724_v58, %v10384_v5  ;;  %v13403_v58 = vld [vmem:[#allocation75_spill] sm:$0xff] }
 0xb5d   : > { %v2687_v22 = vpop.f32.mrb[42].mxu0  ;;  %v2727_v62 = vpop.f32.mrb[86].mxu1  ;;  %v9088_v38 = vadd.f32 %v2685_v11, %v10380_v14 }
 0xb5e   : > { %v2732_v7 = vmul.f32 0.5, %v9087_v54  ;;  %v2688_v8 = vpop.f32.mrb[43].mxu0  ;;  %v8226_v4 = vpop.f32.mrb[87].mxu1 }
 0xb5f   : > { %v2733_v46 = vmul.f32 0.5, %v9088_v38  ;;  %v13400_v38 = vld [vmem:[#allocation72_spill] sm:$0xff] }
 0xb60   : > { %9381 = vtanh.f32 %v2732_v7  ;;  %v13405_v7 = vld [vmem:[#allocation76_spill] sm:$0xff] }
 0xb61   : > { %9383 = vtanh.f32 %v2733_v46  ;;  %v7139_v46 = vld [vmem:[%s9701_s15 + $0x30] sm:$0xf] }
 0xb6a   : > { %v9382_v9 = vpop.eup %9381 }
 0xb6b   : > { %v2736_v30 = vmul.f32 0.5, %v9382_v9  ;;  %v9384_v16 = vpop.eup %9383  ;;  %v13401_v9 = vld [vmem:[#allocation74_spill] sm:$0xff] }
 0xb6c   : > { %v2737_v22 = vmul.f32 0.5, %v9384_v16  ;;  %v13407_v16 = vld [vmem:[#allocation79_spill] sm:$0xff] }
 0xb6d   : > { %v2738_v42 = vadd.f32 0.5, %v2736_v30 }
 0xb6e   : > { %v2739_v8 = vadd.f32 0.5, %v2737_v22  ;;  %v13408_v22 = vld [vmem:[#allocation71_spill] sm:$0xff] }
 0xb6f   : > { %v2741_v28 = vmul.f32 %v2740_v34, %v2738_v42  ;;  %v13402_v42 = vld [vmem:[#allocation73_spill] sm:$0xff] }
 0xb71   : > { %v2742_v6 = vadd.f32 %v2741_v28, %v2643_v2  ;;  %v13406_v28 = vld [vmem:[#allocation78_spill] sm:$0xff] }
 0xb73   : > { %9385 = vtanh.f32 %v2742_v6  ;;  %v13404_v6 = vld [vmem:[#allocation77_spill] sm:$0xff] }
 0xb7d   : > { %v9386_v54 = vpop.eup %9385 }
 0xb7e   : > { %v2744_v4 = vsub.f32 %v11112_v10, %v9386_v54  ;;  %v2824_v10 = vpop.f32.mrb[88].mxu1 }
 0xb7f   : > { %v8245_v12 = vpop.f32.mrb[89].mxu1 }
 0xb80   : > { %v2745_v62 = vmul.f32 %v2744_v4, %v2739_v8  ;;  %v2827_v2 = vpop.f32.mrb[90].mxu1  ;;  %v13409_v4 = vld [vmem:[#allocation80_spill] sm:$0xff] }
 0xb81   : > { %v8246_v34 = vpop.f32.mrb[91].mxu1 }
 0xb82   : > { %v11192_v11 = vadd.f32 %v9386_v54, %v2745_v62 }
 0xb84   : > { %v2830_v30 = vpack.c.bf16 %v11192_v11, %v11192_v11 }
 0xb86   : > { %2864 = vmatmul.mubr.bf16.vlgmr.msra.gmra.mrb[44].mxu0 %v2830_v30  ;;  %8264 = vmatmul.mubr.bf16.vlgmr.msra.gmra.mrb[92].mxu1 %v2830_v30 }
 0xb87   : > { %2932 = vmatpush1.bf16.msra.mxu0 %v10043_v19  ;;  %8268 = vmatpush3.bf16.msra.mxu1 %v10052_v15 }
 0xb88   : > { %2933 = vmatprep.subr.bf16.mxu0 %v10047_v13  ;;  %8269 = vmatprep.subr.bf16.mxu1 %v13280_v25 }
 0xb89   : > { %2963 = vmatprep.mubr.bf16.mxu0 %v13281_v55  ;;  %8283 = vmatprep.mubr.msk.bf16.mxu1 %vm9571_vm1, %v13280_v25 }
 0xb8b   : > { %2934 = vmatpush1.bf16.msra.mxu0 %v10057_v17  ;;  %8270 = vmatpush3.bf16.msra.mxu1 %v10068_v21 }
 0xb8c   : > { %2935 = vmatprep.subr.bf16.mxu0 %v10063_v20  ;;  %8271 = vmatprep.subr.bf16.mxu1 %v13280_v25 }
 0xb8f   : > { %2936 = vmatpush1.bf16.msra.mxu0 %v10075_v24  ;;  %8272 = vmatpush3.bf16.msra.mxu1 %v10085_v18 }
 0xb90   : > { %2937 = vmatprep.subr.bf16.mxu0 %v10080_v26  ;;  %8273 = vmatprep.subr.bf16.mxu1 %v13280_v25 }
 0xb93   : > { %2938 = vmatpush1.bf16.msra.mxu0 %v10093_v23  ;;  %8274 = vmatpush3.bf16.msra.mxu1 %v10103_v29 }
 0xb94   : > { %2939 = vmatprep.subr.bf16.mxu0 %v10098_v27  ;;  %8275 = vmatprep.subr.bf16.mxu1 %v13280_v25 }
 0xb97   : > { %2940 = vmatpush1.bf16.msra.mxu0 %v10109_v31  ;;  %8276 = vmatpush3.bf16.msra.mxu1 %v10119_v33 }
 0xb98   : > { %2941 = vmatprep.subr.bf16.mxu0 %v10114_v32  ;;  %8277 = vmatprep.subr.bf16.mxu1 %v13280_v25 }
 0xb9b   : > { %2942 = vmatpush1.bf16.msra.mxu0 %v10125_v35  ;;  %8278 = vmatpush3.bf16.msra.mxu1 %v10135_v37 }
 0xb9c   : > { %2943 = vmatprep.subr.bf16.mxu0 %v10130_v36  ;;  %8279 = vmatprep.subr.bf16.mxu1 %v13280_v25 }
 0xb9f   : > { %2944 = vmatpush1.bf16.msra.mxu0 %v10141_v39  ;;  %8280 = vmatpush3.bf16.msra.mxu1 %v10151_v41 }
 0xba0   : > { %2945 = vmatprep.subr.bf16.mxu0 %v10146_v40  ;;  %8281 = vmatprep.subr.bf16.mxu1 %v13280_v25 }
 0xba3   : > { %2946 = vmatpush1.bf16.msra.mxu0 %v10157_v43  ;;  %8282 = vmatpush3.bf16.msra.mxu1 %v10167_v45 }
 0xba4   : > { %3013 = vmatprep.subr.bf16.mxu0 %v10162_v44  ;;  %8287 = vmatprep.subr.bf16.mxu1 %v13280_v25 }
 0xba6   : > { %2964 = vmatmul.mubr.bf16.vlgmr.msra.gmra.mrb[48].mxu0 %v7139_v46  ;;  %8284 = vmatmul.mubr.bf16.vlgmr.msra.gmra.mrb[96].mxu1 %v7139_v46 }
 0xba7   : > { %3014 = vmatpush1.bf16.msra.mxu0 %v10174_v48  ;;  %8288 = vmatpush3.bf16.msra.mxu1 %v10184_v49 }
 0xba8   : > { %3015 = vmatprep.subr.bf16.mxu0 %v10179_v50  ;;  %8289 = vmatprep.subr.bf16.mxu1 %v13280_v25 }
 0xba9   : > { %3045 = vmatprep.mubr.bf16.mxu0 %v13281_v55  ;;  %8303 = vmatprep.mubr.msk.bf16.mxu1 %vm9571_vm1, %v13280_v25 }
 0xbab   : > { %3016 = vmatpush1.bf16.msra.mxu0 %v10190_v51  ;;  %8290 = vmatpush3.bf16.msra.mxu1 %v10200_v53 }
 0xbac   : > { %3017 = vmatprep.subr.bf16.mxu0 %v10195_v52  ;;  %8291 = vmatprep.subr.bf16.mxu1 %v13280_v25 }
 0xbaf   : > { %3018 = vmatpush1.bf16.msra.mxu0 %v10209_v47  ;;  %8292 = vmatpush3.bf16.msra.mxu1 %v10219_v57 }
 0xbb0   : > { %3019 = vmatprep.subr.bf16.mxu0 %v10214_v56  ;;  %8293 = vmatprep.subr.bf16.mxu1 %v13280_v25 }
 0xbb3   : > { %3020 = vmatpush1.bf16.msra.mxu0 %v10225_v59  ;;  %8294 = vmatpush3.bf16.msra.mxu1 %v10235_v61 }
 0xbb4   : > { %3021 = vmatprep.subr.bf16.mxu0 %v10230_v60  ;;  %8295 = vmatprep.subr.bf16.mxu1 %v13280_v25 }
 0xbb7   : > { %3022 = vmatpush1.bf16.msra.mxu0 %v10241_v63  ;;  %8296 = vmatpush3.bf16.msra.mxu1 %v10251_v1 }
 0xbb8   : > { %3023 = vmatprep.subr.bf16.mxu0 %v10246_v0  ;;  %8297 = vmatprep.subr.bf16.mxu1 %v13280_v25 }
 0xbbb   : > { %3024 = vmatpush1.bf16.msra.mxu0 %v13400_v38  ;;  %8298 = vmatpush3.bf16.msra.mxu1 %v13401_v9  ;;  %v2825_v38 = vadd.f32 %v2824_v10, %v10387_v3 }
 0xbbc   : > { %3025 = vmatprep.subr.bf16.mxu0 %v13402_v42  ;;  %8299 = vmatprep.subr.bf16.mxu1 %v13280_v25 }
 0xbbf   : > { %3026 = vmatpush1.bf16.msra.mxu0 %v13403_v58  ;;  %8300 = vmatpush3.bf16.msra.mxu1 %v13404_v6 }
 0xbc0   : > { %3027 = vmatprep.subr.bf16.mxu0 %v13405_v7  ;;  %8301 = vmatprep.subr.bf16.mxu1 %v13280_v25 }
 0xbc3   : > { %3028 = vmatpush1.bf16.msra.mxu0 %v13406_v28  ;;  %8302 = vmatpush3.bf16.msra.mxu1 %v13407_v16 }
 0xbc4   : > { %3113 = vmatprep.subr.bf16.mxu0 %v13408_v22  ;;  %8307 = vmatprep.subr.bf16.mxu1 %v13280_v25 }
 0xc59   : > { %v2865_v54 = vpop.f32.mrb[44].mxu0  ;;  %v2906_v8 = vpop.f32.mrb[92].mxu1 }
 0xc5a   : > { %v9089_v62 = vadd.f32 %v2865_v54, %v13409_v4  ;;  %v2867_v30 = vpop.f32.mrb[45].mxu0  ;;  %v8265_v12 = vpop.f32.mrb[93].mxu1  ;;  %v2922_v9 = vadd.f32 %v2906_v8, %v10384_v5  ;;  %v13413_v8 = vld [vmem:[#allocation75_spill] sm:$0xff] }
 0xc5b   : > { %v2869_v2 = vpop.f32.mrb[46].mxu0  ;;  %v2909_v34 = vpop.f32.mrb[94].mxu1  ;;  %v9090_v28 = vadd.f32 %v2867_v30, %v10380_v14 }
 0xc5c   : > { %v2914_v46 = vmul.f32 0.5, %v9089_v62  ;;  %v2870_v7 = vpop.f32.mrb[47].mxu0  ;;  %v8266_v6 = vpop.f32.mrb[95].mxu1 }
 0xc5d   : > { %v2915_v58 = vmul.f32 0.5, %v9090_v28  ;;  %v13410_v28 = vld [vmem:[#allocation72_spill] sm:$0xff] }
 0xc5e   : > { %9387 = vtanh.f32 %v2914_v46  ;;  %v13415_v46 = vld [vmem:[#allocation76_spill] sm:$0xff] }
 0xc5f   : > { %9389 = vtanh.f32 %v2915_v58  ;;  %v7140_v58 = vld [vmem:[%s9701_s15 + $0x34] sm:$0xf] }
 0xc68   : > { %v9388_v16 = vpop.eup %9387 }
 0xc69   : > { %v2918_v42 = vmul.f32 0.5, %v9388_v16  ;;  %v9390_v12 = vpop.eup %9389  ;;  %v13411_v16 = vld [vmem:[#allocation74_spill] sm:$0xff] }
 0xc6a   : > { %v2919_v2 = vmul.f32 0.5, %v9390_v12  ;;  %v13417_v12 = vld [vmem:[#allocation79_spill] sm:$0xff] }
 0xc6b   : > { %v2920_v22 = vadd.f32 0.5, %v2918_v42 }
 0xc6c   : > { %v2921_v7 = vadd.f32 0.5, %v2919_v2  ;;  %v13418_v2 = vld [vmem:[#allocation71_spill] sm:$0xff] }
 0xc6d   : > { %v2923_v54 = vmul.f32 %v2922_v9, %v2920_v22  ;;  %v13412_v22 = vld [vmem:[#allocation73_spill] sm:$0xff] }
 0xc6f   : > { %v2924_v4 = vadd.f32 %v2923_v54, %v2825_v38  ;;  %v13416_v54 = vld [vmem:[#allocation78_spill] sm:$0xff] }
 0xc71   : > { %9391 = vtanh.f32 %v2924_v4  ;;  %v13414_v4 = vld [vmem:[#allocation77_spill] sm:$0xff] }
 0xc7b   : > { %v9392_v62 = vpop.eup %9391 }
 0xc7c   : > { %v2926_v6 = vsub.f32 %v11192_v11, %v9392_v62  ;;  %v3006_v11 = vpop.f32.mrb[96].mxu1 }
 0xc7d   : > { %v8285_v10 = vpop.f32.mrb[97].mxu1 }
 0xc7e   : > { %v2927_v34 = vmul.f32 %v2926_v6, %v2921_v7  ;;  %v3009_v38 = vpop.f32.mrb[98].mxu1  ;;  %v13419_v6 = vld [vmem:[#allocation80_spill] sm:$0xff] }
 0xc7f   : > { %v8286_v9 = vpop.f32.mrb[99].mxu1 }
 0xc80   : > { %v11272_v30 = vadd.f32 %v9392_v62, %v2927_v34 }
 0xc82   : > { %v3012_v42 = vpack.c.bf16 %v11272_v30, %v11272_v30 }
 0xc84   : > { %3046 = vmatmul.mubr.bf16.vlgmr.msra.gmra.mrb[48].mxu0 %v3012_v42  ;;  %8304 = vmatmul.mubr.bf16.vlgmr.msra.gmra.mrb[100].mxu1 %v3012_v42 }
 0xc85   : > { %3114 = vmatpush1.bf16.msra.mxu0 %v10043_v19  ;;  %8308 = vmatpush3.bf16.msra.mxu1 %v10052_v15 }
 0xc86   : > { %3115 = vmatprep.subr.bf16.mxu0 %v10047_v13  ;;  %8309 = vmatprep.subr.bf16.mxu1 %v13280_v25 }
 0xc87   : > { %3145 = vmatprep.mubr.bf16.mxu0 %v13281_v55  ;;  %8323 = vmatprep.mubr.msk.bf16.mxu1 %vm9571_vm1, %v13280_v25 }
 0xc89   : > { %3116 = vmatpush1.bf16.msra.mxu0 %v10057_v17  ;;  %8310 = vmatpush3.bf16.msra.mxu1 %v10068_v21 }
 0xc8a   : > { %3117 = vmatprep.subr.bf16.mxu0 %v10063_v20  ;;  %8311 = vmatprep.subr.bf16.mxu1 %v13280_v25 }
 0xc8d   : > { %3118 = vmatpush1.bf16.msra.mxu0 %v10075_v24  ;;  %8312 = vmatpush3.bf16.msra.mxu1 %v10085_v18 }
 0xc8e   : > { %3119 = vmatprep.subr.bf16.mxu0 %v10080_v26  ;;  %8313 = vmatprep.subr.bf16.mxu1 %v13280_v25 }
 0xc91   : > { %3120 = vmatpush1.bf16.msra.mxu0 %v10093_v23  ;;  %8314 = vmatpush3.bf16.msra.mxu1 %v10103_v29 }
 0xc92   : > { %3121 = vmatprep.subr.bf16.mxu0 %v10098_v27  ;;  %8315 = vmatprep.subr.bf16.mxu1 %v13280_v25 }
 0xc95   : > { %3122 = vmatpush1.bf16.msra.mxu0 %v10109_v31  ;;  %8316 = vmatpush3.bf16.msra.mxu1 %v10119_v33 }
 0xc96   : > { %3123 = vmatprep.subr.bf16.mxu0 %v10114_v32  ;;  %8317 = vmatprep.subr.bf16.mxu1 %v13280_v25 }
 0xc99   : > { %3124 = vmatpush1.bf16.msra.mxu0 %v10125_v35  ;;  %8318 = vmatpush3.bf16.msra.mxu1 %v10135_v37 }
 0xc9a   : > { %3125 = vmatprep.subr.bf16.mxu0 %v10130_v36  ;;  %8319 = vmatprep.subr.bf16.mxu1 %v13280_v25 }
 0xc9d   : > { %3126 = vmatpush1.bf16.msra.mxu0 %v10141_v39  ;;  %8320 = vmatpush3.bf16.msra.mxu1 %v10151_v41 }
 0xc9e   : > { %3127 = vmatprep.subr.bf16.mxu0 %v10146_v40  ;;  %8321 = vmatprep.subr.bf16.mxu1 %v13280_v25 }
 0xca1   : > { %3128 = vmatpush1.bf16.msra.mxu0 %v10157_v43  ;;  %8322 = vmatpush3.bf16.msra.mxu1 %v10167_v45 }
 0xca2   : > { %3195 = vmatprep.subr.bf16.mxu0 %v10162_v44  ;;  %8327 = vmatprep.subr.bf16.mxu1 %v13280_v25 }
 0xca4   : > { %3146 = vmatmul.mubr.bf16.vlgmr.msra.gmra.mrb[52].mxu0 %v7140_v58  ;;  %8324 = vmatmul.mubr.bf16.vlgmr.msra.gmra.mrb[104].mxu1 %v7140_v58 }
 0xca5   : > { %3196 = vmatpush1.bf16.msra.mxu0 %v10174_v48  ;;  %8328 = vmatpush3.bf16.msra.mxu1 %v10184_v49 }
 0xca6   : > { %3197 = vmatprep.subr.bf16.mxu0 %v10179_v50  ;;  %8329 = vmatprep.subr.bf16.mxu1 %v13280_v25 }
 0xca7   : > { %3227 = vmatprep.mubr.bf16.mxu0 %v13281_v55  ;;  %8343 = vmatprep.mubr.msk.bf16.mxu1 %vm9571_vm1, %v13280_v25 }
 0xca9   : > { %3198 = vmatpush1.bf16.msra.mxu0 %v10190_v51  ;;  %8330 = vmatpush3.bf16.msra.mxu1 %v10200_v53 }
 0xcaa   : > { %3199 = vmatprep.subr.bf16.mxu0 %v10195_v52  ;;  %8331 = vmatprep.subr.bf16.mxu1 %v13280_v25 }
 0xcad   : > { %3200 = vmatpush1.bf16.msra.mxu0 %v10209_v47  ;;  %8332 = vmatpush3.bf16.msra.mxu1 %v10219_v57 }
 0xcae   : > { %3201 = vmatprep.subr.bf16.mxu0 %v10214_v56  ;;  %8333 = vmatprep.subr.bf16.mxu1 %v13280_v25 }
 0xcb1   : > { %3202 = vmatpush1.bf16.msra.mxu0 %v10225_v59  ;;  %8334 = vmatpush3.bf16.msra.mxu1 %v10235_v61 }
 0xcb2   : > { %3203 = vmatprep.subr.bf16.mxu0 %v10230_v60  ;;  %8335 = vmatprep.subr.bf16.mxu1 %v13280_v25 }
 0xcb5   : > { %3204 = vmatpush1.bf16.msra.mxu0 %v10241_v63  ;;  %8336 = vmatpush3.bf16.msra.mxu1 %v10251_v1 }
 0xcb6   : > { %3205 = vmatprep.subr.bf16.mxu0 %v10246_v0  ;;  %8337 = vmatprep.subr.bf16.mxu1 %v13280_v25 }
 0xcb9   : > { %3206 = vmatpush1.bf16.msra.mxu0 %v13410_v28  ;;  %8338 = vmatpush3.bf16.msra.mxu1 %v13411_v16  ;;  %v3007_v28 = vadd.f32 %v3006_v11, %v10387_v3 }
 0xcba   : > { %3207 = vmatprep.subr.bf16.mxu0 %v13412_v22  ;;  %8339 = vmatprep.subr.bf16.mxu1 %v13280_v25 }
 0xcbd   : > { %3208 = vmatpush1.bf16.msra.mxu0 %v13413_v8  ;;  %8340 = vmatpush3.bf16.msra.mxu1 %v13414_v4 }
 0xcbe   : > { %3209 = vmatprep.subr.bf16.mxu0 %v13415_v46  ;;  %8341 = vmatprep.subr.bf16.mxu1 %v13280_v25 }
 0xcc1   : > { %3210 = vmatpush1.bf16.msra.mxu0 %v13416_v54  ;;  %8342 = vmatpush3.bf16.msra.mxu1 %v13417_v12 }
 0xcc2   : > { %3295 = vmatprep.subr.bf16.mxu0 %v13418_v2  ;;  %8347 = vmatprep.subr.bf16.mxu1 %v13280_v25 }
 0xd57   : > { %v3047_v62 = vpop.f32.mrb[48].mxu0  ;;  %v3088_v7 = vpop.f32.mrb[100].mxu1 }
 0xd58   : > { %v9091_v34 = vadd.f32 %v3047_v62, %v13419_v6  ;;  %v3049_v42 = vpop.f32.mrb[49].mxu0  ;;  %v8305_v10 = vpop.f32.mrb[101].mxu1  ;;  %v3104_v16 = vadd.f32 %v3088_v7, %v10384_v5  ;;  %v13423_v7 = vld [vmem:[#allocation75_spill] sm:$0xff] }
 0xd59   : > { %v3051_v38 = vpop.f32.mrb[50].mxu0  ;;  %v3091_v9 = vpop.f32.mrb[102].mxu1  ;;  %v9092_v54 = vadd.f32 %v3049_v42, %v10380_v14 }
 0xd5a   : > { %v3096_v58 = vmul.f32 0.5, %v9091_v34  ;;  %v3052_v46 = vpop.f32.mrb[51].mxu0  ;;  %v8306_v4 = vpop.f32.mrb[103].mxu1 }
 0xd5b   : > { %v3097_v8 = vmul.f32 0.5, %v9092_v54  ;;  %v13420_v54 = vld [vmem:[#allocation72_spill] sm:$0xff] }
 0xd5c   : > { %9393 = vtanh.f32 %v3096_v58  ;;  %v13425_v58 = vld [vmem:[#allocation76_spill] sm:$0xff] }
 0xd5d   : > { %9395 = vtanh.f32 %v3097_v8  ;;  %v7141_v8 = vld [vmem:[%s9701_s15 + $0x38] sm:$0xf] }
 0xd66   : > { %v9394_v12 = vpop.eup %9393 }
 0xd67   : > { %v3100_v22 = vmul.f32 0.5, %v9394_v12  ;;  %v9396_v10 = vpop.eup %9395  ;;  %v13421_v12 = vld [vmem:[#allocation74_spill] sm:$0xff] }
 0xd68   : > { %v3101_v38 = vmul.f32 0.5, %v9396_v10  ;;  %v13427_v10 = vld [vmem:[#allocation79_spill] sm:$0xff] }
 0xd69   : > { %v3102_v2 = vadd.f32 0.5, %v3100_v22 }
 0xd6a   : > { %v3103_v46 = vadd.f32 0.5, %v3101_v38  ;;  %v13428_v38 = vld [vmem:[#allocation71_spill] sm:$0xff] }
 0xd6b   : > { %v3105_v62 = vmul.f32 %v3104_v16, %v3102_v2  ;;  %v13422_v2 = vld [vmem:[#allocation73_spill] sm:$0xff] }
 0xd6d   : > { %v3106_v6 = vadd.f32 %v3105_v62, %v3007_v28  ;;  %v13426_v62 = vld [vmem:[#allocation78_spill] sm:$0xff] }
 0xd6f   : > { %9397 = vtanh.f32 %v3106_v6  ;;  %v13424_v6 = vld [vmem:[#allocation77_spill] sm:$0xff] }
 0xd79   : > { %v9398_v34 = vpop.eup %9397 }
 0xd7a   : > { %v3108_v4 = vsub.f32 %v11272_v30, %v9398_v34  ;;  %v3188_v30 = vpop.f32.mrb[104].mxu1 }
 0xd7b   : > { %v8325_v11 = vpop.f32.mrb[105].mxu1 }
 0xd7c   : > { %v3109_v9 = vmul.f32 %v3108_v4, %v3103_v46  ;;  %v3191_v28 = vpop.f32.mrb[106].mxu1  ;;  %v13429_v4 = vld [vmem:[#allocation80_spill] sm:$0xff] }
 0xd7d   : > { %v8326_v16 = vpop.f32.mrb[107].mxu1 }
 0xd7e   : > { %v11352_v42 = vadd.f32 %v9398_v34, %v3109_v9 }
 0xd80   : > { %v3194_v22 = vpack.c.bf16 %v11352_v42, %v11352_v42 }
 0xd82   : > { %3228 = vmatmul.mubr.bf16.vlgmr.msra.gmra.mrb[52].mxu0 %v3194_v22  ;;  %8344 = vmatmul.mubr.bf16.vlgmr.msra.gmra.mrb[108].mxu1 %v3194_v22 }
 0xd83   : > { %3296 = vmatpush1.bf16.msra.mxu0 %v10043_v19  ;;  %8348 = vmatpush3.bf16.msra.mxu1 %v10052_v15 }
 0xd84   : > { %3297 = vmatprep.subr.bf16.mxu0 %v10047_v13  ;;  %8349 = vmatprep.subr.bf16.mxu1 %v13280_v25 }
 0xd85   : > { %3327 = vmatprep.mubr.bf16.mxu0 %v13281_v55  ;;  %8363 = vmatprep.mubr.msk.bf16.mxu1 %vm9571_vm1, %v13280_v25 }
 0xd87   : > { %3298 = vmatpush1.bf16.msra.mxu0 %v10057_v17  ;;  %8350 = vmatpush3.bf16.msra.mxu1 %v10068_v21 }
 0xd88   : > { %3299 = vmatprep.subr.bf16.mxu0 %v10063_v20  ;;  %8351 = vmatprep.subr.bf16.mxu1 %v13280_v25 }
 0xd8b   : > { %3300 = vmatpush1.bf16.msra.mxu0 %v10075_v24  ;;  %8352 = vmatpush3.bf16.msra.mxu1 %v10085_v18 }
 0xd8c   : > { %3301 = vmatprep.subr.bf16.mxu0 %v10080_v26  ;;  %8353 = vmatprep.subr.bf16.mxu1 %v13280_v25 }
 0xd8f   : > { %3302 = vmatpush1.bf16.msra.mxu0 %v10093_v23  ;;  %8354 = vmatpush3.bf16.msra.mxu1 %v10103_v29 }
 0xd90   : > { %3303 = vmatprep.subr.bf16.mxu0 %v10098_v27  ;;  %8355 = vmatprep.subr.bf16.mxu1 %v13280_v25 }
 0xd93   : > { %3304 = vmatpush1.bf16.msra.mxu0 %v10109_v31  ;;  %8356 = vmatpush3.bf16.msra.mxu1 %v10119_v33 }
 0xd94   : > { %3305 = vmatprep.subr.bf16.mxu0 %v10114_v32  ;;  %8357 = vmatprep.subr.bf16.mxu1 %v13280_v25 }
 0xd97   : > { %3306 = vmatpush1.bf16.msra.mxu0 %v10125_v35  ;;  %8358 = vmatpush3.bf16.msra.mxu1 %v10135_v37 }
 0xd98   : > { %3307 = vmatprep.subr.bf16.mxu0 %v10130_v36  ;;  %8359 = vmatprep.subr.bf16.mxu1 %v13280_v25 }
 0xd9b   : > { %3308 = vmatpush1.bf16.msra.mxu0 %v10141_v39  ;;  %8360 = vmatpush3.bf16.msra.mxu1 %v10151_v41 }
 0xd9c   : > { %3309 = vmatprep.subr.bf16.mxu0 %v10146_v40  ;;  %8361 = vmatprep.subr.bf16.mxu1 %v13280_v25 }
 0xd9f   : > { %3310 = vmatpush1.bf16.msra.mxu0 %v10157_v43  ;;  %8362 = vmatpush3.bf16.msra.mxu1 %v10167_v45 }
 0xda0   : > { %3377 = vmatprep.subr.bf16.mxu0 %v10162_v44  ;;  %8367 = vmatprep.subr.bf16.mxu1 %v13280_v25 }
 0xda2   : > { %3328 = vmatmul.mubr.bf16.vlgmr.msra.gmra.mrb[56].mxu0 %v7141_v8  ;;  %8364 = vmatmul.mubr.bf16.vlgmr.msra.gmra.mrb[112].mxu1 %v7141_v8 }
 0xda3   : > { %3378 = vmatpush1.bf16.msra.mxu0 %v10174_v48  ;;  %8368 = vmatpush3.bf16.msra.mxu1 %v10184_v49 }
 0xda4   : > { %3379 = vmatprep.subr.bf16.mxu0 %v10179_v50  ;;  %8369 = vmatprep.subr.bf16.mxu1 %v13280_v25 }
 0xda5   : > { %3409 = vmatprep.mubr.bf16.mxu0 %v13281_v55  ;;  %8383 = vmatprep.mubr.msk.bf16.mxu1 %vm9571_vm1, %v13280_v25 }
 0xda7   : > { %3380 = vmatpush1.bf16.msra.mxu0 %v10190_v51  ;;  %8370 = vmatpush3.bf16.msra.mxu1 %v10200_v53 }
 0xda8   : > { %3381 = vmatprep.subr.bf16.mxu0 %v10195_v52  ;;  %8371 = vmatprep.subr.bf16.mxu1 %v13280_v25 }
 0xdab   : > { %3382 = vmatpush1.bf16.msra.mxu0 %v10209_v47  ;;  %8372 = vmatpush3.bf16.msra.mxu1 %v10219_v57 }
 0xdac   : > { %3383 = vmatprep.subr.bf16.mxu0 %v10214_v56  ;;  %8373 = vmatprep.subr.bf16.mxu1 %v13280_v25 }
 0xdaf   : > { %3384 = vmatpush1.bf16.msra.mxu0 %v10225_v59  ;;  %8374 = vmatpush3.bf16.msra.mxu1 %v10235_v61 }
 0xdb0   : > { %3385 = vmatprep.subr.bf16.mxu0 %v10230_v60  ;;  %8375 = vmatprep.subr.bf16.mxu1 %v13280_v25 }
 0xdb3   : > { %3386 = vmatpush1.bf16.msra.mxu0 %v10241_v63  ;;  %8376 = vmatpush3.bf16.msra.mxu1 %v10251_v1 }
 0xdb4   : > { %3387 = vmatprep.subr.bf16.mxu0 %v10246_v0  ;;  %8377 = vmatprep.subr.bf16.mxu1 %v13280_v25 }
 0xdb7   : > { %3388 = vmatpush1.bf16.msra.mxu0 %v13420_v54  ;;  %8378 = vmatpush3.bf16.msra.mxu1 %v13421_v12  ;;  %v3189_v54 = vadd.f32 %v3188_v30, %v10387_v3 }
 0xdb8   : > { %3389 = vmatprep.subr.bf16.mxu0 %v13422_v2  ;;  %8379 = vmatprep.subr.bf16.mxu1 %v13280_v25 }
 0xdbb   : > { %3390 = vmatpush1.bf16.msra.mxu0 %v13423_v7  ;;  %8380 = vmatpush3.bf16.msra.mxu1 %v13424_v6 }
 0xdbc   : > { %3391 = vmatprep.subr.bf16.mxu0 %v13425_v58  ;;  %8381 = vmatprep.subr.bf16.mxu1 %v13280_v25 }
 0xdbf   : > { %3392 = vmatpush1.bf16.msra.mxu0 %v13426_v62  ;;  %8382 = vmatpush3.bf16.msra.mxu1 %v13427_v10 }
 0xdc0   : > { %3477 = vmatprep.subr.bf16.mxu0 %v13428_v38  ;;  %8387 = vmatprep.subr.bf16.mxu1 %v13280_v25 }
 0xe55   : > { %v3229_v34 = vpop.f32.mrb[52].mxu0  ;;  %v3270_v46 = vpop.f32.mrb[108].mxu1 }
 0xe56   : > { %v9093_v9 = vadd.f32 %v3229_v34, %v13429_v4  ;;  %v3231_v22 = vpop.f32.mrb[53].mxu0  ;;  %v8345_v11 = vpop.f32.mrb[109].mxu1  ;;  %v3286_v12 = vadd.f32 %v3270_v46, %v10384_v5 }
 0xe57   : > { %v3233_v28 = vpop.f32.mrb[54].mxu0  ;;  %v3273_v16 = vpop.f32.mrb[110].mxu1  ;;  %v9094_v62 = vadd.f32 %v3231_v22, %v10380_v14 }
 0xe58   : > { %v3278_v8 = vmul.f32 0.5, %v9093_v9  ;;  %v3234_v58 = vpop.f32.mrb[55].mxu0  ;;  %v8346_v6 = vpop.f32.mrb[111].mxu1 }
 0xe59   : > { %v3279_v7 = vmul.f32 0.5, %v9094_v62 }
 0xe5a   : > { %9399 = vtanh.f32 %v3278_v8 }
 0xe5b   : > { %9401 = vtanh.f32 %v3279_v7 }
 0xe64   : > { %v9400_v10 = vpop.eup %9399 }
 0xe65   : > { %v3282_v2 = vmul.f32 0.5, %v9400_v10  ;;  %v9402_v11 = vpop.eup %9401 }
 0xe66   : > { %v3283_v28 = vmul.f32 0.5, %v9402_v11 }
 0xe67   : > { %v3284_v38 = vadd.f32 0.5, %v3282_v2 }
 0xe68   : > { %v3285_v58 = vadd.f32 0.5, %v3283_v28 }
 0xe69   : > { %v3287_v34 = vmul.f32 %v3286_v12, %v3284_v38 }
 0xe6b   : > { %v3288_v4 = vadd.f32 %v3287_v34, %v3189_v54 }
 0xe6d   : > { %9403 = vtanh.f32 %v3288_v4 }
 0xe77   : > { %v9404_v9 = vpop.eup %9403 }
 0xe78   : > { %v3290_v6 = vsub.f32 %v11352_v42, %v9404_v9 }
 0xe7a   : > { %v3291_v16 = vmul.f32 %v3290_v6, %v3285_v58 }
 0xe7c   : > { %v11432_v22 = vadd.f32 %v9404_v9, %v3291_v16 }
 0xe7e   : > { %v3376_v2 = vpack.c.bf16 %v11432_v22, %v11432_v22 }
 0xe80   : > { %3410 = vmatmul.mubr.bf16.vlgmr.msra.gmra.mrb[56].mxu0 %v3376_v2  ;;  %8384 = vmatmul.mubr.bf16.vlgmr.msra.gmra.mrb[116].mxu1 %v3376_v2 }
 0xe81   : > { %3478 = vmatpush1.bf16.msra.mxu0 %v10043_v19  ;;  %8388 = vmatpush3.bf16.msra.mxu1 %v10052_v15 }
 0xe82   : > { %3479 = vmatprep.subr.bf16.mxu0 %v10047_v13  ;;  %8389 = vmatprep.subr.bf16.mxu1 %v13280_v25 }
 0xe83   : > { %3509 = vmatprep.mubr.bf16.mxu0 %v13281_v55  ;;  %8403 = vmatprep.mubr.msk.bf16.mxu1 %vm9571_vm1, %v13280_v25 }
 0xe85   : > { %3480 = vmatpush1.bf16.msra.mxu0 %v10057_v17  ;;  %8390 = vmatpush3.bf16.msra.mxu1 %v10068_v21 }
 0xe86   : > { %3481 = vmatprep.subr.bf16.mxu0 %v10063_v20  ;;  %8391 = vmatprep.subr.bf16.mxu1 %v13280_v25  ;;  %v3370_v20 = vpop.f32.mrb[112].mxu1 }
 0xe87   : > { %v8365_v21 = vpop.f32.mrb[113].mxu1 }
 0xe89   : > { %3482 = vmatpush1.bf16.msra.mxu0 %v10075_v24  ;;  %8392 = vmatpush3.bf16.msra.mxu1 %v10085_v18 }
 0xe8a   : > { %3483 = vmatprep.subr.bf16.mxu0 %v10080_v26  ;;  %8393 = vmatprep.subr.bf16.mxu1 %v13280_v25  ;;  %v7142_v26 = vld [vmem:[%s9701_s15 + $0x3c] sm:$0xf] }
 0xe8d   : > { %3484 = vmatpush1.bf16.msra.mxu0 %v10093_v23  ;;  %8394 = vmatpush3.bf16.msra.mxu1 %v10103_v29  ;;  %v3373_v23 = vpop.f32.mrb[114].mxu1  ;;  %v13431_v29 = vld [vmem:[#allocation74_spill] sm:$0xff] }
 0xe8e   : > { %3485 = vmatprep.subr.bf16.mxu0 %v10098_v27  ;;  %8395 = vmatprep.subr.bf16.mxu1 %v13280_v25  ;;  %v8366_v24 = vpop.f32.mrb[115].mxu1  ;;  %v13430_v27 = vld [vmem:[#allocation72_spill] sm:$0xff] }
 0xe91   : > { %3486 = vmatpush1.bf16.msra.mxu0 %v10109_v31  ;;  %8396 = vmatpush3.bf16.msra.mxu1 %v10119_v33  ;;  %v13432_v31 = vld [vmem:[#allocation73_spill] sm:$0xff] }
 0xe92   : > { %3487 = vmatprep.subr.bf16.mxu0 %v10114_v32  ;;  %8397 = vmatprep.subr.bf16.mxu1 %v13280_v25  ;;  %v13433_v32 = vld [vmem:[#allocation75_spill] sm:$0xff]  ;;  %v13434_v33 = vld [vmem:[#allocation77_spill] sm:$0xff] }
 0xe95   : > { %3488 = vmatpush1.bf16.msra.mxu0 %v10125_v35  ;;  %8398 = vmatpush3.bf16.msra.mxu1 %v10135_v37  ;;  %v13435_v35 = vld [vmem:[#allocation76_spill] sm:$0xff]  ;;  %v13437_v37 = vld [vmem:[#allocation79_spill] sm:$0xff] }
 0xe96   : > { %3489 = vmatprep.subr.bf16.mxu0 %v10130_v36  ;;  %8399 = vmatprep.subr.bf16.mxu1 %v13280_v25  ;;  %v13436_v36 = vld [vmem:[#allocation78_spill] sm:$0xff] }
 0xe99   : > { %3490 = vmatpush1.bf16.msra.mxu0 %v10141_v39  ;;  %8400 = vmatpush3.bf16.msra.mxu1 %v10151_v41  ;;  %v13438_v41 = vld [vmem:[#allocation80_spill] sm:$0xff] }
 0xe9a   : > { %3491 = vmatprep.subr.bf16.mxu0 %v10146_v40  ;;  %8401 = vmatprep.subr.bf16.mxu1 %v13280_v25 }
 0xe9d   : > { %3492 = vmatpush1.bf16.msra.mxu0 %v10157_v43  ;;  %8402 = vmatpush3.bf16.msra.mxu1 %v10167_v45 }
 0xe9e   : > { %3559 = vmatprep.subr.bf16.mxu0 %v10162_v44  ;;  %8407 = vmatprep.subr.bf16.mxu1 %v13280_v25 }
 0xea0   : > { %3510 = vmatmul.mubr.bf16.vlgmr.msra.gmra.mrb[60].mxu0 %v7142_v26  ;;  %8404 = vmatmul.mubr.bf16.vlgmr.msra.gmra.mrb[120].mxu1 %v7142_v26 }
 0xea1   : > { %3560 = vmatpush1.bf16.msra.mxu0 %v10174_v48  ;;  %8408 = vmatpush3.bf16.msra.mxu1 %v10184_v49 }
 0xea2   : > { %3561 = vmatprep.subr.bf16.mxu0 %v10179_v50  ;;  %8409 = vmatprep.subr.bf16.mxu1 %v13280_v25 }
 0xea3   : > { %3591 = vmatprep.mubr.bf16.mxu0 %v13281_v55  ;;  %8423 = vmatprep.mubr.msk.bf16.mxu1 %vm9571_vm1, %v13280_v25 }
 0xea5   : > { %3562 = vmatpush1.bf16.msra.mxu0 %v10190_v51  ;;  %8410 = vmatpush3.bf16.msra.mxu1 %v10200_v53 }
 0xea6   : > { %3563 = vmatprep.subr.bf16.mxu0 %v10195_v52  ;;  %8411 = vmatprep.subr.bf16.mxu1 %v13280_v25 }
 0xea9   : > { %3564 = vmatpush1.bf16.msra.mxu0 %v10209_v47  ;;  %8412 = vmatpush3.bf16.msra.mxu1 %v10219_v57 }
 0xeaa   : > { %3565 = vmatprep.subr.bf16.mxu0 %v10214_v56  ;;  %8413 = vmatprep.subr.bf16.mxu1 %v13280_v25 }
 0xead   : > { %3566 = vmatpush1.bf16.msra.mxu0 %v10225_v59  ;;  %8414 = vmatpush3.bf16.msra.mxu1 %v10235_v61 }
 0xeae   : > { %3567 = vmatprep.subr.bf16.mxu0 %v10230_v60  ;;  %8415 = vmatprep.subr.bf16.mxu1 %v13280_v25  ;;  %v3371_v60 = vadd.f32 %v3370_v20, %v10387_v3 }
 0xeb1   : > { %3568 = vmatpush1.bf16.msra.mxu0 %v10241_v63  ;;  %8416 = vmatpush3.bf16.msra.mxu1 %v10251_v1 }
 0xeb2   : > { %3569 = vmatprep.subr.bf16.mxu0 %v10246_v0  ;;  %8417 = vmatprep.subr.bf16.mxu1 %v13280_v25 }
 0xeb5   : > { %3570 = vmatpush1.bf16.msra.mxu0 %v13430_v27  ;;  %8418 = vmatpush3.bf16.msra.mxu1 %v13431_v29 }
 0xeb6   : > { %3571 = vmatprep.subr.bf16.mxu0 %v13432_v31  ;;  %8419 = vmatprep.subr.bf16.mxu1 %v13280_v25 }
 0xeb9   : > { %3572 = vmatpush1.bf16.msra.mxu0 %v13433_v32  ;;  %8420 = vmatpush3.bf16.msra.mxu1 %v13434_v33 }
 0xeba   : > { %3573 = vmatprep.subr.bf16.mxu0 %v13435_v35  ;;  %8421 = vmatprep.subr.bf16.mxu1 %v13280_v25 }
 0xebd   : > { %3574 = vmatpush1.bf16.msra.mxu0 %v13436_v36  ;;  %8422 = vmatpush3.bf16.msra.mxu1 %v13437_v37 }
 0xf53   : > { %v3411_v39 = vpop.f32.mrb[56].mxu0  ;;  %v3452_v40 = vpop.f32.mrb[116].mxu1 }
 0xf54   : > { %v9095_v43 = vadd.f32 %v3411_v39, %v13438_v41  ;;  %v3413_v44 = vpop.f32.mrb[57].mxu0  ;;  %v8385_v45 = vpop.f32.mrb[117].mxu1  ;;  %v3468_v59 = vadd.f32 %v3452_v40, %v10384_v5 }
 0xf55   : > { %v3415_v48 = vpop.f32.mrb[58].mxu0  ;;  %v3455_v49 = vpop.f32.mrb[118].mxu1  ;;  %v9096_v53 = vadd.f32 %v3413_v44, %v10380_v14 }
 0xf56   : > { %v3460_v50 = vmul.f32 0.5, %v9095_v43  ;;  %v3416_v51 = vpop.f32.mrb[59].mxu0  ;;  %v8386_v52 = vpop.f32.mrb[119].mxu1 }
 0xf57   : > { %v3461_v55 = vmul.f32 0.5, %v9096_v53 }
 0xf58   : > { %9405 = vtanh.f32 %v3460_v50 }
 0xf59   : > { %9407 = vtanh.f32 %v3461_v55 }
 0xf62   : > { %v9406_v25 = vpop.eup %9405 }
 0xf63   : > { %v3464_v56 = vmul.f32 0.5, %v9406_v25  ;;  %v9408_v0 = vpop.eup %9407 }
 0xf64   : > { %v3465_v1 = vmul.f32 0.5, %v9408_v0 }
 0xf65   : > { %v3466_v57 = vadd.f32 0.5, %v3464_v56 }
 0xf66   : > { %v3467_v15 = vadd.f32 0.5, %v3465_v1 }
 0xf67   : > { %v3469_v61 = vmul.f32 %v3468_v59, %v3466_v57 }
 0xf69   : > { %v3470_v63 = vadd.f32 %v3469_v61, %v3371_v60 }
 0xf6b   : > { %9409 = vtanh.f32 %v3470_v63 }
 0xf73   : > { %v3552_v42 = vpop.f32.mrb[120].mxu1 }
 0xf74   : > { %v8405_v30 = vpop.f32.mrb[121].mxu1  ;;  %v3553_v20 = vadd.f32 %v3552_v42, %v10387_v3 }
 0xf75   : > { %v9410_v13 = vpop.eup %9409  ;;  %v3555_v54 = vpop.f32.mrb[122].mxu1 }
 0xf76   : > { %v3472_v17 = vsub.f32 %v11432_v22, %v9410_v13  ;;  %v8406_v12 = vpop.f32.mrb[123].mxu1 }
 0xf78   : > { %v3473_v18 = vmul.f32 %v3472_v17, %v3467_v15 }
 0xf7a   : > { %v3474_v19 = vadd.f32 %v9410_v13, %v3473_v18 }
 0xf7c   : > { %v3558_v47 = vpack.c.bf16 %v3474_v19, %v3474_v19 }
 0xf7e   : > { %3592 = vmatmul.mubr.bf16.vlgmr.msra.gmra.mrb[60].mxu0 %v3558_v47  ;;  %8424 = vmatmul.mubr.bf16.vlgmr.msra.gmra.mrb[124].mxu1 %v3558_v47 }
0x1051   : > { %v3593_v7 = vpop.f32.mrb[60].mxu0  ;;  %v3634_v62 = vpop.f32.mrb[124].mxu1 }
0x1052   : > { %v9097_v10 = vadd.f32 %v3593_v7, %v13438_v41  ;;  %v3595_v46 = vpop.f32.mrb[61].mxu0  ;;  %v8425_v4 = vpop.f32.mrb[125].mxu1  ;;  %v3650_v2 = vadd.f32 %v3634_v62, %v10384_v5 }
0x1053   : > { %v3597_v8 = vpop.f32.mrb[62].mxu0  ;;  %v3637_v38 = vpop.f32.mrb[126].mxu1  ;;  %v9098_v9 = vadd.f32 %v3595_v46, %v10380_v14 }
0x1054   : > { %v3642_v34 = vmul.f32 0.5, %v9097_v10  ;;  %v3598_v11 = vpop.f32.mrb[63].mxu0  ;;  %v8426_v28 = vpop.f32.mrb[127].mxu1 }
0x1055   : > { %v3643_v58 = vmul.f32 0.5, %v9098_v9 }
0x1056   : > { %9411 = vtanh.f32 %v3642_v34 }
0x1057   : > { %9413 = vtanh.f32 %v3643_v58 }
0x1060   : > { %v9412_v6 = vpop.eup %9411 }
0x1061   : > { %v3646_v16 = vmul.f32 0.5, %v9412_v6  ;;  %v9414_v24 = vpop.eup %9413 }
0x1062   : > { %v3647_v26 = vmul.f32 0.5, %v9414_v24 }
0x1063   : > { %v3648_v22 = vadd.f32 0.5, %v3646_v16 }
0x1064   : > { %v3649_v29 = vadd.f32 0.5, %v3647_v26 }
0x1065   : > { %v3651_v21 = vmul.f32 %v3650_v2, %v3648_v22 }
0x1067   : > { %v3652_v23 = vadd.f32 %v3651_v21, %v3553_v20 }
0x1069   : > { %9415 = vtanh.f32 %v3652_v23 }
0x1073   : > { %v9416_v27 = vpop.eup %9415 }
0x1074   : > { %v3654_v31 = vsub.f32 %v3474_v19, %v9416_v27 }
0x1076   : > { %v3655_v32 = vmul.f32 %v3654_v31, %v3649_v29 }
0x1078   : > { %v3656_v33 = vadd.f32 %v9416_v27, %v3655_v32 }
0x107a   : > { %3657 = vst [vmem:[#allocation2] sm:$0xff] %v3656_v33 }
0x107b PF: > { %p7143_p13 = scmp.ne.s32.totalorder %s9551_s23, 1 }
0x107d   : > { %3661 = sbr.rel (%p7143_p13) target bundleno = 8454 (0x2106), region = 97 }
0x1084   : > { %v13439_v14 = vld [vmem:[#allocation6_spill] sm:$0xff]  ;;  %v13440_v5 = vld [vmem:[#allocation4_spill] sm:$0xff]  ;;  %v13444_v40 = vld [vmem:[#allocation7_spill] sm:$0xff]  ;;  %v13198_v45 = vmov 0.0   ;;  %v13190_v55 = vmov 0   ;;  %vm9574_vm2 = vmmov 0  }
0x1085   : > { %v11517_v35 = vcombine.high %v13440_v5, %v13439_v14  ;;  %v11521_v3 = vcombine.low %v13440_v5, %v13439_v14  ;;  %v13442_v36 = vld [vmem:[#allocation10_spill] sm:$0xff]  ;;  %v13443_v37 = vld [vmem:[#allocation8_spill] sm:$0xff]  ;;  %v13445_v41 = vld [vmem:[#allocation5_spill] sm:$0xff]  ;;  %8427 = vmatprep.subr.bf16.mxu1 %v13198_v45  ;;  %3839 = vmatprep.mubr.bf16.mxu0 %v13190_v55  ;;  %s11870_s20 = sshll.u32 %s9551_s23, 4 }
0x1086   : > { %v11525_v39 = vcombine.high %v13443_v37, %v13442_v36  ;;  %v11530_v43 = vcombine.low %v13445_v41, %v13444_v40  ;;  %v11535_v44 = vcombine.low %v13443_v37, %v13442_v36  ;;  %v13446_v48 = vld [vmem:[#allocation14_spill] sm:$0xff]  ;;  %v13447_v49 = vld [vmem:[#allocation12_spill] sm:$0xff]  ;;  %v13448_v51 = vld [vmem:[#allocation11_spill] sm:$0xff]  ;;  %8443 = vmatprep.mubr.msk.bf16.mxu1 %vm9574_vm2, %v13198_v45  ;;  %p4122_p0 = scmp.lt.s32.totalorder %s11870_s20, 20  ;;  %s4311_s23 = sadd.s32 1, %s11870_s20 }
0x1087   : > { %13441 = vst [vmem:[#allocation81_spill] sm:$0xff] %v11517_v35  ;;  %3807 = vmatprep.subr.bf16.mxu0 %v11517_v35  ;;  %v11541_v50 = vcombine.high %v13447_v49, %v13446_v48  ;;  %v13449_v52 = vld [vmem:[#allocation9_spill] sm:$0xff]  ;;  %v11553_v25 = vcombine.low %v13447_v49, %v13446_v48  ;;  %v13450_v56 = vld [vmem:[#allocation18_spill] sm:$0xff]  ;;  %v13451_v57 = vld [vmem:[#allocation16_spill] sm:$0xff]  ;;  %p4312_p1 = scmp.lt.s32.totalorder %s4311_s23, 20  ;;  %s4501_s11 = sadd.s32 2, %s11870_s20 }
0x1088   : > { %3808 = vmatpush1.bf16.msra.mxu0 %v11521_v3  ;;  %8428 = vmatpush3.bf16.msra.mxu1 %v11530_v43  ;;  %v11546_v53 = vcombine.low %v13449_v52, %v13448_v51  ;;  %v11558_v59 = vcombine.high %v13451_v57, %v13450_v56  ;;  %v13452_v60 = vld [vmem:[#allocation15_spill] sm:$0xff]  ;;  %v13453_v61 = vld [vmem:[#allocation13_spill] sm:$0xff]  ;;  %v11571_v0 = vcombine.low %v13451_v57, %v13450_v56  ;;  %v13454_v1 = vld [vmem:[#allocation22_spill] sm:$0xff]  ;;  %s4123_s30 = scalar_select %p4122_p0, 1, 0 }
0x1089   : > { %3809 = vmatprep.subr.bf16.mxu0 %v11525_v39  ;;  %8429 = vmatprep.subr.bf16.mxu1 %v13198_v45  ;;  %v11563_v63 = vcombine.low %v13453_v61, %v13452_v60  ;;  %v13455_v13 = vld [vmem:[#allocation20_spill] sm:$0xff]  ;;  %v13456_v17 = vld [vmem:[#allocation19_spill] sm:$0xff]  ;;  %v13457_v18 = vld [vmem:[#allocation17_spill] sm:$0xff]  ;;  %s4313_s8 = scalar_select %p4312_p1, 1, 0 }
0x108a   : > { %v11576_v15 = vcombine.high %v13455_v13, %v13454_v1  ;;  %v11581_v19 = vcombine.low %v13457_v18, %v13456_v17  ;;  %v11587_v47 = vcombine.low %v13455_v13, %v13454_v1  ;;  %v13458_v42 = vld [vmem:[#allocation26_spill] sm:$0xff]  ;;  %v13459_v30 = vld [vmem:[#allocation24_spill] sm:$0xff]  ;;  %v13460_v12 = vld [vmem:[#allocation23_spill] sm:$0xff]  ;;  %s4124_s7 = scvt.s32.f32 %s4123_s30  ;;  %p4502_p2 = scmp.lt.s32.totalorder %s4501_s11, 20 }
0x108b   : > { %v11592_v54 = vcombine.high %v13459_v30, %v13458_v42  ;;  %v13461_v7 = vld [vmem:[#allocation21_spill] sm:$0xff]  ;;  %v11603_v10 = vcombine.low %v13459_v30, %v13458_v42  ;;  %v13462_v46 = vld [vmem:[#allocation30_spill] sm:$0xff]  ;;  %v13463_v4 = vld [vmem:[#allocation28_spill] sm:$0xff]  ;;  %s4314_s9 = scvt.s32.f32 %s4313_s8  ;;  %s4691_s21 = sadd.s32 3, %s11870_s20 }
0x108c   : > { %3810 = vmatpush1.bf16.msra.mxu0 %v11535_v44  ;;  %8430 = vmatpush3.bf16.msra.mxu1 %v11546_v53  ;;  %v11597_v62 = vcombine.low %v13461_v7, %v13460_v12  ;;  %v11608_v8 = vcombine.high %v13463_v4, %v13462_v46  ;;  %v13464_v38 = vld [vmem:[#allocation27_spill] sm:$0xff]  ;;  %v13465_v34 = vld [vmem:[#allocation25_spill] sm:$0xff]  ;;  %v11619_v28 = vcombine.low %v13463_v4, %v13462_v46  ;;  %v13466_v9 = vld [vmem:[#allocation34_spill] sm:$0xff]  ;;  %s4503_s12 = scalar_select %p4502_p2, 1, 0 }
0x108d   : > { %3811 = vmatprep.subr.bf16.mxu0 %v11541_v50  ;;  %8431 = vmatprep.subr.bf16.mxu1 %v13198_v45  ;;  %v11613_v11 = vcombine.low %v13465_v34, %v13464_v38  ;;  %v13467_v58 = vld [vmem:[#allocation32_spill] sm:$0xff]  ;;  %v13468_v16 = vld [vmem:[#allocation31_spill] sm:$0xff]  ;;  %v13469_v22 = vld [vmem:[#allocation29_spill] sm:$0xff]  ;;  %p4692_p3 = scmp.lt.s32.totalorder %s4691_s21, 20  ;;  %s4881_s17 = sadd.s32 4, %s11870_s20 }
0x108e   : > { %v11624_v6 = vcombine.high %v13467_v58, %v13466_v9  ;;  %v11629_v2 = vcombine.low %v13469_v22, %v13468_v16  ;;  %v11635_v20 = vcombine.low %v13467_v58, %v13466_v9  ;;  %v13470_v21 = vld [vmem:[#allocation38_spill] sm:$0xff]  ;;  %v13471_v23 = vld [vmem:[#allocation36_spill] sm:$0xff]  ;;  %v13472_v26 = vld [vmem:[#allocation35_spill] sm:$0xff]  ;;  %s4504_s13 = scvt.s32.f32 %s4503_s12  ;;  %p4882_p4 = scmp.lt.s32.totalorder %s4881_s17, 20 }
0x108f   : > { %v11640_v24 = vcombine.high %v13471_v23, %v13470_v21  ;;  %v13473_v27 = vld [vmem:[#allocation33_spill] sm:$0xff]  ;;  %v3662_v31 = vld [vmem:[%s9701_s15] sm:$0xf]  ;;  %v11652_v32 = vcombine.low %v13471_v23, %v13470_v21  ;;  %v13474_v33 = vld [vmem:[#allocation42_spill] sm:$0xff]  ;;  %s4693_s24 = scalar_select %p4692_p3, 1, 0 }
0x1090   : > { %3812 = vmatpush1.bf16.msra.mxu0 %v11553_v25  ;;  %8432 = vmatpush3.bf16.msra.mxu1 %v11563_v63  ;;  %v11645_v29 = vcombine.low %v13473_v27, %v13472_v26  ;;  %v13475_v14 = vld [vmem:[#allocation40_spill] sm:$0xff]  ;;  %v13476_v36 = vld [vmem:[#allocation39_spill] sm:$0xff]  ;;  %v13477_v37 = vld [vmem:[#allocation37_spill] sm:$0xff]  ;;  %s4883_s18 = scalar_select %p4882_p4, 1, 0 }
0x1091   : > { %3813 = vmatprep.subr.bf16.mxu0 %v11558_v59  ;;  %8433 = vmatprep.subr.bf16.mxu1 %v13198_v45  ;;  %v11657_v5 = vcombine.high %v13475_v14, %v13474_v33  ;;  %v11662_v40 = vcombine.low %v13477_v37, %v13476_v36  ;;  %v11668_v41 = vcombine.low %v13475_v14, %v13474_v33  ;;  %v13478_v48 = vld [vmem:[#allocation46_spill] sm:$0xff]  ;;  %v13479_v49 = vld [vmem:[#allocation44_spill] sm:$0xff]  ;;  %v13480_v52 = vld [vmem:[#allocation43_spill] sm:$0xff]  ;;  %s4694_s16 = scvt.s32.f32 %s4693_s24  ;;  %s5071_s30 = sadd.s32 5, %s11870_s20 }
0x1092   : > { %v11673_v51 = vcombine.high %v13479_v49, %v13478_v48  ;;  %v13481_v56 = vld [vmem:[#allocation41_spill] sm:$0xff]  ;;  %v11687_v60 = vcombine.low %v13479_v49, %v13478_v48  ;;  %v13482_v61 = vld [vmem:[#allocation50_spill] sm:$0xff]  ;;  %v13483_v1 = vld [vmem:[#allocation48_spill] sm:$0xff]  ;;  %s4884_s19 = scvt.s32.f32 %s4883_s18  ;;  %p5072_p5 = scmp.lt.s32.totalorder %s5071_s30, 20 }
0x1093   : > { %v11678_v57 = vcombine.low %v13481_v56, %v13480_v52  ;;  %v11692_v13 = vcombine.high %v13483_v1, %v13482_v61  ;;  %v13484_v17 = vld [vmem:[#allocation47_spill] sm:$0xff]  ;;  %v13485_v18 = vld [vmem:[#allocation45_spill] sm:$0xff]  ;;  %v11703_v30 = vcombine.low %v13483_v1, %v13482_v61  ;;  %v13486_v12 = vld [vmem:[#allocation54_spill] sm:$0xff]  ;;  %s5261_s8 = sadd.s32 6, %s11870_s20  ;;  %s5451_s12 = sadd.s32 7, %s11870_s20 }
0x1094   : > { %3814 = vmatpush1.bf16.msra.mxu0 %v11571_v0  ;;  %8434 = vmatpush3.bf16.msra.mxu1 %v11581_v19  ;;  %v11697_v42 = vcombine.low %v13485_v18, %v13484_v17  ;;  %v13487_v7 = vld [vmem:[#allocation52_spill] sm:$0xff]  ;;  %v13488_v4 = vld [vmem:[#allocation51_spill] sm:$0xff]  ;;  %v13489_v38 = vld [vmem:[#allocation49_spill] sm:$0xff]  ;;  %p5262_p6 = scmp.lt.s32.totalorder %s5261_s8, 20  ;;  %p5452_p7 = scmp.lt.s32.totalorder %s5451_s12, 20 }
0x1095   : > { %3815 = vmatprep.subr.bf16.mxu0 %v11576_v15  ;;  %8435 = vmatprep.subr.bf16.mxu1 %v13198_v45  ;;  %v11708_v46 = vcombine.high %v13487_v7, %v13486_v12  ;;  %v11713_v34 = vcombine.low %v13489_v38, %v13488_v4  ;;  %v11719_v9 = vcombine.low %v13487_v7, %v13486_v12  ;;  %v13490_v58 = vld [vmem:[#allocation58_spill] sm:$0xff]  ;;  %v13491_v16 = vld [vmem:[#allocation56_spill] sm:$0xff]  ;;  %v13492_v21 = vld [vmem:[#allocation55_spill] sm:$0xff]  ;;  %s5641_s24 = sadd.s32 8, %s11870_s20  ;;  %s5831_s18 = sadd.s32 9, %s11870_s20 }
0x1096   : > { %v11724_v22 = vcombine.high %v13491_v16, %v13490_v58  ;;  %v13493_v23 = vld [vmem:[#allocation53_spill] sm:$0xff]  ;;  %v11735_v27 = vcombine.low %v13491_v16, %v13490_v58  ;;  %v13495_v33 = vld [vmem:[#allocation60_spill] sm:$0xff]  ;;  %v13497_v36 = vld [vmem:[#allocation59_spill] sm:$0xff]  ;;  %p5642_p8 = scmp.lt.s32.totalorder %s5641_s24, 20  ;;  %p5832_p9 = scmp.lt.s32.totalorder %s5831_s18, 20 }
0x1097   : > { %v11729_v26 = vcombine.low %v13493_v23, %v13492_v21  ;;  %v13498_v37 = vld [vmem:[#allocation57_spill] sm:$0xff]  ;;  %v13501_v52 = vld [vmem:[#allocation66_spill] sm:$0xff]  ;;  %v13502_v56 = vld [vmem:[#allocation64_spill] sm:$0xff] }
0x1098   : > { %3816 = vmatpush1.bf16.msra.mxu0 %v11587_v47  ;;  %8436 = vmatpush3.bf16.msra.mxu1 %v11597_v62  ;;  %v11745_v48 = vcombine.low %v13498_v37, %v13497_v36  ;;  %v11756_v61 = vcombine.high %v13502_v56, %v13501_v52  ;;  %v13504_v1 = vld [vmem:[#allocation63_spill] sm:$0xff]  ;;  %v13505_v17 = vld [vmem:[#allocation61_spill] sm:$0xff]  ;;  %v11767_v12 = vcombine.low %v13502_v56, %v13501_v52  ;;  %v13511_v58 = vld [vmem:[#allocation70_spill] sm:$0xff]  ;;  %v3664_v37 = vlaneseq }
0x1099   : > { %3817 = vmatprep.subr.bf16.mxu0 %v11592_v54  ;;  %8437 = vmatprep.subr.bf16.mxu1 %v13198_v45  ;;  %v11761_v18 = vcombine.low %v13505_v17, %v13504_v1  ;;  %v13508_v7 = vld [vmem:[#allocation67_spill] sm:$0xff]  ;;  %v13509_v4 = vld [vmem:[#allocation65_spill] sm:$0xff]  ;;  %v3888_v16 = vpack.c.bf16 %v13511_v58, %v13511_v58  ;;  %v7193_v21 = vld [vmem:[%s9701_s15 + $0x4] sm:$0xf] }
0x109a   : > { %13499 = vst [vmem:[#allocation83_spill] sm:$0xff] %v11745_v48  ;;  %13503 = vst [vmem:[#allocation85_spill] sm:$0xff] %v11756_v61  ;;  %v11773_v38 = vcombine.low %v13509_v4, %v13508_v7  ;;  %v3665_v52 = vshrl.u32 %v3664_v37, 7  ;;  %v13512_v1 = vld [vmem:[#allocation68_spill] sm:$0xff] }
0x109b   : > { %13506 = vst [vmem:[#allocation86_spill] sm:$0xff] %v11761_v18  ;;  %13507 = vst [vmem:[#allocation87_spill] sm:$0xff] %v11767_v12 }
0x109c   : > { %3818 = vmatpush1.bf16.msra.mxu0 %v11603_v10  ;;  %8438 = vmatpush3.bf16.msra.mxu1 %v11613_v11  ;;  %13510 = vst [vmem:[#allocation88_spill] sm:$0xff] %v11773_v38  ;;  %v3666_v56 = vsub.s32 0, %v3665_v52  ;;  %v3674_v37 = vsub.s32 2, %v3665_v52 }
0x109d   : > { %3819 = vmatprep.subr.bf16.mxu0 %v11608_v8  ;;  %8439 = vmatprep.subr.bf16.mxu1 %v13198_v45 }
0x109e   : > { %v11854_v17 = vrot.slane %v13512_v1, %v3666_v56 }
0x10a0   : > { %3820 = vmatpush1.bf16.msra.mxu0 %v11619_v28  ;;  %8440 = vmatpush3.bf16.msra.mxu1 %v11629_v2  ;;  %13513 = vst [vmem:[#allocation89_spill] sm:$0xff] %v11854_v17 }
0x10a1   : > { %3821 = vmatprep.subr.bf16.mxu0 %v11624_v6  ;;  %8441 = vmatprep.subr.bf16.mxu1 %v13198_v45 }
0x10a4   : > { %3822 = vmatpush1.bf16.msra.mxu0 %v11635_v20  ;;  %8442 = vmatpush3.bf16.msra.mxu1 %v11645_v29 }
0x10a5   : > { %4017 = vmatprep.subr.bf16.mxu0 %v11640_v24  ;;  %8447 = vmatprep.subr.bf16.mxu1 %v13198_v45 }
0x10a7   : > { %3840 = vmatmul.mubr.bf16.vlgmr.msra.gmra.mrb[0].mxu0 %v3662_v31  ;;  %8444 = vmatmul.mubr.bf16.vlgmr.msra.gmra.mrb[0].mxu1 %v3662_v31  ;;  %v13494_v31 = vld [vmem:[#allocation62_spill] sm:$0xff] }
0x10a8   : > { %4018 = vmatpush1.bf16.msra.mxu0 %v11652_v32  ;;  %8448 = vmatpush3.bf16.msra.mxu1 %v11662_v40  ;;  %v11740_v14 = vcombine.high %v13495_v33, %v13494_v31  ;;  %v11751_v49 = vcombine.low %v13495_v33, %v13494_v31 }
0x10a9   : > { %4019 = vmatprep.subr.bf16.mxu0 %v11657_v5  ;;  %8449 = vmatprep.subr.bf16.mxu1 %v13198_v45 }
0x10aa   : > { %4049 = vmatprep.mubr.bf16.mxu0 %v13190_v55  ;;  %8463 = vmatprep.mubr.msk.bf16.mxu1 %vm9574_vm2, %v13198_v45  ;;  %13496 = vst [vmem:[#allocation82_spill] sm:$0xff] %v11740_v14  ;;  %13500 = vst [vmem:[#allocation84_spill] sm:$0xff] %v11751_v49 }
0x10ac   : > { %4020 = vmatpush1.bf16.msra.mxu0 %v11668_v41  ;;  %8450 = vmatpush3.bf16.msra.mxu1 %v11678_v57 }
0x10ad   : > { %4021 = vmatprep.subr.bf16.mxu0 %v11673_v51  ;;  %8451 = vmatprep.subr.bf16.mxu1 %v13198_v45 }
0x10b0   : > { %4022 = vmatpush1.bf16.msra.mxu0 %v11687_v60  ;;  %8452 = vmatpush3.bf16.msra.mxu1 %v11697_v42 }
0x10b1   : > { %4023 = vmatprep.subr.bf16.mxu0 %v11692_v13  ;;  %8453 = vmatprep.subr.bf16.mxu1 %v13198_v45 }
0x10b4   : > { %4024 = vmatpush1.bf16.msra.mxu0 %v11703_v30  ;;  %8454 = vmatpush3.bf16.msra.mxu1 %v11713_v34 }
0x10b5   : > { %4025 = vmatprep.subr.bf16.mxu0 %v11708_v46  ;;  %8455 = vmatprep.subr.bf16.mxu1 %v13198_v45 }
0x10b8   : > { %4026 = vmatpush1.bf16.msra.mxu0 %v11719_v9  ;;  %8456 = vmatpush3.bf16.msra.mxu1 %v11729_v26 }
0x10b9   : > { %4027 = vmatprep.subr.bf16.mxu0 %v11724_v22  ;;  %8457 = vmatprep.subr.bf16.mxu1 %v13198_v45 }
0x10bc   : > { %4028 = vmatpush1.bf16.msra.mxu0 %v11735_v27  ;;  %8458 = vmatpush3.bf16.msra.mxu1 %v11745_v48 }
0x10bd   : > { %4029 = vmatprep.subr.bf16.mxu0 %v11740_v14  ;;  %8459 = vmatprep.subr.bf16.mxu1 %v13198_v45 }
0x10c0   : > { %4030 = vmatpush1.bf16.msra.mxu0 %v11751_v49  ;;  %8460 = vmatpush3.bf16.msra.mxu1 %v11761_v18 }
0x10c1   : > { %4031 = vmatprep.subr.bf16.mxu0 %v11756_v61  ;;  %8461 = vmatprep.subr.bf16.mxu1 %v13198_v45 }
0x10c4   : > { %4032 = vmatpush1.bf16.msra.mxu0 %v11767_v12  ;;  %8462 = vmatpush3.bf16.msra.mxu1 %v11773_v38 }
0x10c5   : > { %4131 = vmatprep.subr.bf16.mxu0 %v11517_v35  ;;  %8467 = vmatprep.subr.bf16.mxu1 %v13198_v45 }
0x10c7   : > { %4050 = vmatmul.mubr.bf16.vlgmr.msra.gmra.mrb[0].mxu0 %v3888_v16  ;;  %8464 = vmatmul.mubr.bf16.vlgmr.msra.gmra.mrb[4].mxu1 %v3888_v16 }
0x10c8   : > { %4132 = vmatpush1.bf16.msra.mxu0 %v11521_v3  ;;  %8468 = vmatpush3.bf16.msra.mxu1 %v11530_v43 }
0x10c9   : > { %4133 = vmatprep.subr.bf16.mxu0 %v11525_v39  ;;  %8469 = vmatprep.subr.bf16.mxu1 %v13198_v45 }
0x10ca   : > { %4163 = vmatprep.mubr.bf16.mxu0 %v13190_v55  ;;  %8483 = vmatprep.mubr.msk.bf16.mxu1 %vm9574_vm2, %v13198_v45 }
0x10cc   : > { %4134 = vmatpush1.bf16.msra.mxu0 %v11535_v44  ;;  %8470 = vmatpush3.bf16.msra.mxu1 %v11546_v53 }
0x10cd   : > { %4135 = vmatprep.subr.bf16.mxu0 %v11541_v50  ;;  %8471 = vmatprep.subr.bf16.mxu1 %v13198_v45 }
0x10d0   : > { %4136 = vmatpush1.bf16.msra.mxu0 %v11553_v25  ;;  %8472 = vmatpush3.bf16.msra.mxu1 %v11563_v63 }
0x10d1   : > { %4137 = vmatprep.subr.bf16.mxu0 %v11558_v59  ;;  %8473 = vmatprep.subr.bf16.mxu1 %v13198_v45 }
0x10d4   : > { %4138 = vmatpush1.bf16.msra.mxu0 %v11571_v0  ;;  %8474 = vmatpush3.bf16.msra.mxu1 %v11581_v19 }
0x10d5   : > { %4139 = vmatprep.subr.bf16.mxu0 %v11576_v15  ;;  %8475 = vmatprep.subr.bf16.mxu1 %v13198_v45 }
0x10d8   : > { %4140 = vmatpush1.bf16.msra.mxu0 %v11587_v47  ;;  %8476 = vmatpush3.bf16.msra.mxu1 %v11597_v62 }
0x10d9   : > { %4141 = vmatprep.subr.bf16.mxu0 %v11592_v54  ;;  %8477 = vmatprep.subr.bf16.mxu1 %v13198_v45 }
0x10dc   : > { %4142 = vmatpush1.bf16.msra.mxu0 %v11603_v10  ;;  %8478 = vmatpush3.bf16.msra.mxu1 %v11613_v11 }
0x10dd   : > { %4143 = vmatprep.subr.bf16.mxu0 %v11608_v8  ;;  %8479 = vmatprep.subr.bf16.mxu1 %v13198_v45 }
0x10e0   : > { %4144 = vmatpush1.bf16.msra.mxu0 %v11619_v28  ;;  %8480 = vmatpush3.bf16.msra.mxu1 %v11629_v2 }
0x10e1   : > { %4145 = vmatprep.subr.bf16.mxu0 %v11624_v6  ;;  %8481 = vmatprep.subr.bf16.mxu1 %v13198_v45 }
0x10e4   : > { %4146 = vmatpush1.bf16.msra.mxu0 %v11635_v20  ;;  %8482 = vmatpush3.bf16.msra.mxu1 %v11645_v29 }
0x10e5   : > { %4213 = vmatprep.subr.bf16.mxu0 %v11640_v24  ;;  %8487 = vmatprep.subr.bf16.mxu1 %v13198_v45 }
0x10e7   : > { %4164 = vmatmul.mubr.bf16.vlgmr.msra.gmra.mrb[4].mxu0 %v7193_v21  ;;  %8484 = vmatmul.mubr.bf16.vlgmr.msra.gmra.mrb[8].mxu1 %v7193_v21 }
0x10e8   : > { %4214 = vmatpush1.bf16.msra.mxu0 %v11652_v32  ;;  %8488 = vmatpush3.bf16.msra.mxu1 %v11662_v40 }
0x10e9   : > { %4215 = vmatprep.subr.bf16.mxu0 %v11657_v5  ;;  %8489 = vmatprep.subr.bf16.mxu1 %v13198_v45 }
0x10ea   : > { %4245 = vmatprep.mubr.bf16.mxu0 %v13190_v55  ;;  %8503 = vmatprep.mubr.msk.bf16.mxu1 %vm9574_vm2, %v13198_v45  ;;  %v3670_v55 = vsub.s32 1, %v3665_v52 }
0x10ec   : > { %4216 = vmatpush1.bf16.msra.mxu0 %v11668_v41  ;;  %8490 = vmatpush3.bf16.msra.mxu1 %v11678_v57 }
0x10ed   : > { %4217 = vmatprep.subr.bf16.mxu0 %v11673_v51  ;;  %8491 = vmatprep.subr.bf16.mxu1 %v13198_v45 }
0x10f0   : > { %4218 = vmatpush1.bf16.msra.mxu0 %v11687_v60  ;;  %8492 = vmatpush3.bf16.msra.mxu1 %v11697_v42 }
0x10f1   : > { %4219 = vmatprep.subr.bf16.mxu0 %v11692_v13  ;;  %8493 = vmatprep.subr.bf16.mxu1 %v13198_v45 }
0x10f4   : > { %4220 = vmatpush1.bf16.msra.mxu0 %v11703_v30  ;;  %8494 = vmatpush3.bf16.msra.mxu1 %v11713_v34 }
0x10f5   : > { %4221 = vmatprep.subr.bf16.mxu0 %v11708_v46  ;;  %8495 = vmatprep.subr.bf16.mxu1 %v13198_v45 }
0x10f8   : > { %4222 = vmatpush1.bf16.msra.mxu0 %v11719_v9  ;;  %8496 = vmatpush3.bf16.msra.mxu1 %v11729_v26 }
0x10f9   : > { %4223 = vmatprep.subr.bf16.mxu0 %v11724_v22  ;;  %8497 = vmatprep.subr.bf16.mxu1 %v13198_v45 }
0x10fc   : > { %4224 = vmatpush1.bf16.msra.mxu0 %v11735_v27  ;;  %8498 = vmatpush3.bf16.msra.mxu1 %v11745_v48 }
0x10fd   : > { %4225 = vmatprep.subr.bf16.mxu0 %v11740_v14  ;;  %8499 = vmatprep.subr.bf16.mxu1 %v13198_v45 }
0x1100   : > { %4226 = vmatpush1.bf16.msra.mxu0 %v11751_v49  ;;  %8500 = vmatpush3.bf16.msra.mxu1 %v11761_v18  ;;  %v13514_v18 = vld [vmem:[#allocation69_spill] sm:$0xff] }
0x1101   : > { %4227 = vmatprep.subr.bf16.mxu0 %v11756_v61  ;;  %8501 = vmatprep.subr.bf16.mxu1 %v13198_v45  ;;  %v11862_v49 = vrot.slane %v13514_v18, %v3666_v56 }
0x1104   : > { %4228 = vmatpush1.bf16.msra.mxu0 %v11767_v12  ;;  %8502 = vmatpush3.bf16.msra.mxu1 %v11773_v38 }
0x1105   : > { %4321 = vmatprep.subr.bf16.mxu0 %v11517_v35  ;;  %8507 = vmatprep.subr.bf16.mxu1 %v13198_v45 }
0x117a   : > { %v3882_v23 = vpop.f32.mrb[0].mxu1 }
0x117b   : > { %v8445_v31 = vpop.f32.mrb[1].mxu1 }
0x117c   : > { %v3885_v33 = vpop.f32.mrb[2].mxu1 }
0x117d   : > { %v8446_v36 = vpop.f32.mrb[3].mxu1  ;;  %v11858_v33 = vrot.slane %v13512_v1, %v3670_v55 }
0x119a   : > { %v4051_v7 = vpop.f32.mrb[0].mxu0  ;;  %v4092_v21 = vpop.f32.mrb[4].mxu1 }
0x119b   : > { %v9163_v4 = vadd.f32 %v4051_v7, %v11854_v17  ;;  %v4053_v16 = vpop.f32.mrb[1].mxu0  ;;  %v8465_v35 = vpop.f32.mrb[5].mxu1 }
0x119c   : > { %v4055_v38 = vpop.f32.mrb[2].mxu0  ;;  %v4095_v61 = vpop.f32.mrb[6].mxu1  ;;  %v9164_v36 = vadd.f32 %v4053_v16, %v11858_v33 }
0x119d   : > { %v4100_v12 = vmul.f32 0.5, %v9163_v4  ;;  %v4056_v45 = vpop.f32.mrb[3].mxu0  ;;  %v8466_v31 = vpop.f32.mrb[7].mxu1  ;;  %v11865_v38 = vrot.slane %v13512_v1, %v3674_v37 }
0x119e   : > { %v4101_v7 = vmul.f32 0.5, %v9164_v36  ;;  %v4114_v45 = vadd.f32 %v11862_v49, %v4092_v21  ;;  %v4126_v31 = vstv %s4124_s7  ;;  %s5073_s7 = scalar_select %p5072_p5, 1, 0 }
0x119f   : > { %9417 = vtanh.f32 %v4100_v12  ;;  %v3883_v12 = vadd.f32 %v3882_v23, %v11865_v38 }
0x11a0   : > { %9419 = vtanh.f32 %v4101_v7  ;;  %s5074_s23 = scvt.s32.f32 %s5073_s7  ;;  %s6021_s7 = sadd.s32 10, %s11870_s20 }
0x11a1   : > { %p6022_p10 = scmp.lt.s32.totalorder %s6021_s7, 20  ;;  %s6971_s7 = sadd.s32 15, %s11870_s20 }
0x11a2   : > { %p6972_p1 = scmp.lt.s32.totalorder %s6971_s7, 20 }
0x11a9   : > { %v9418_v17 = vpop.eup %9417 }
0x11aa   : > { %v4104_v35 = vmul.f32 0.5, %v9418_v17  ;;  %v9420_v18 = vpop.eup %9419 }
0x11ab   : > { %v4105_v52 = vmul.f32 0.5, %v9420_v18  ;;  %v13517_v18 = vld [vmem:[#allocation84_spill] sm:$0xff] }
0x11ac   : > { %v4106_v61 = vadd.f32 0.5, %v4104_v35  ;;  %v13515_v35 = vmov 0.0  }
0x11ad   : > { %v4107_v1 = vadd.f32 0.5, %v4105_v52  ;;  %v13518_v52 = vld [vmem:[#allocation86_spill] sm:$0xff] }
0x11ae   : > { %v4115_v55 = vmul.f32 %v4114_v45, %v4106_v61  ;;  %v13516_v45 = vmov 0  }
0x11b0   : > { %v4116_v4 = vadd.f32 %v4115_v55, %v3883_v12 }
0x11b2   : > { %9421 = vtanh.f32 %v4116_v4  ;;  %v7194_v4 = vld [vmem:[%s9701_s15 + $0x8] sm:$0xf] }
0x11bc   : > { %v9422_v56 = vpop.eup %9421 }
0x11bd   : > { %v4118_v17 = vsub.f32 %v13511_v58, %v9422_v56 }
0x11bf   : > { %v4119_v16 = vmul.f32 %v4118_v17, %v4107_v1  ;;  %v13520_v1 = vld [vmem:[#allocation87_spill] sm:$0xff]  ;;  %v13521_v17 = vld [vmem:[#allocation88_spill] sm:$0xff] }
0x11c1   : > { %v4120_v21 = vadd.f32 %v9422_v56, %v4119_v16  ;;  %v13519_v56 = vld [vmem:[#allocation85_spill] sm:$0xff] }
0x11c2   : > { %v13522_v16 = vld [vmem:[#allocation81_spill] sm:$0xff] }
0x11c3   : > { %v4125_v23 = vsub.f32 %v4120_v21, %v13511_v58 }
0x11c5   : > { %v4127_v36 = vmul.f32 %v4126_v31, %v4125_v23  ;;  %v13523_v23 = vld [vmem:[#allocation89_spill] sm:$0xff] }
0x11c7   : > { %v11876_v37 = vadd.f32 %v4127_v36, %v13511_v58  ;;  %v4206_v58 = vpop.f32.mrb[8].mxu1 }
0x11c8   : > { %v8485_v61 = vpop.f32.mrb[9].mxu1 }
0x11c9   : > { %v4212_v7 = vpack.c.bf16 %v11876_v37, %v11876_v37  ;;  %v4209_v12 = vpop.f32.mrb[10].mxu1 }
0x11ca   : > { %v8486_v55 = vpop.f32.mrb[11].mxu1 }
0x11cb   : > { %4246 = vmatmul.mubr.bf16.vlgmr.msra.gmra.mrb[4].mxu0 %v4212_v7  ;;  %8504 = vmatmul.mubr.bf16.vlgmr.msra.gmra.mrb[12].mxu1 %v4212_v7 }
0x11cc   : > { %4322 = vmatpush1.bf16.msra.mxu0 %v11521_v3  ;;  %8508 = vmatpush3.bf16.msra.mxu1 %v11530_v43 }
0x11cd   : > { %4323 = vmatprep.subr.bf16.mxu0 %v11525_v39  ;;  %8509 = vmatprep.subr.bf16.mxu1 %v13515_v35 }
0x11ce   : > { %4353 = vmatprep.mubr.bf16.mxu0 %v13516_v45  ;;  %8523 = vmatprep.mubr.msk.bf16.mxu1 %vm9574_vm2, %v13515_v35 }
0x11d0   : > { %4324 = vmatpush1.bf16.msra.mxu0 %v11535_v44  ;;  %8510 = vmatpush3.bf16.msra.mxu1 %v11546_v53 }
0x11d1   : > { %4325 = vmatprep.subr.bf16.mxu0 %v11541_v50  ;;  %8511 = vmatprep.subr.bf16.mxu1 %v13515_v35 }
0x11d4   : > { %4326 = vmatpush1.bf16.msra.mxu0 %v11553_v25  ;;  %8512 = vmatpush3.bf16.msra.mxu1 %v11563_v63 }
0x11d5   : > { %4327 = vmatprep.subr.bf16.mxu0 %v11558_v59  ;;  %8513 = vmatprep.subr.bf16.mxu1 %v13515_v35 }
0x11d8   : > { %4328 = vmatpush1.bf16.msra.mxu0 %v11571_v0  ;;  %8514 = vmatpush3.bf16.msra.mxu1 %v11581_v19 }
0x11d9   : > { %4329 = vmatprep.subr.bf16.mxu0 %v11576_v15  ;;  %8515 = vmatprep.subr.bf16.mxu1 %v13515_v35 }
0x11dc   : > { %4330 = vmatpush1.bf16.msra.mxu0 %v11587_v47  ;;  %8516 = vmatpush3.bf16.msra.mxu1 %v11597_v62 }
0x11dd   : > { %4331 = vmatprep.subr.bf16.mxu0 %v11592_v54  ;;  %8517 = vmatprep.subr.bf16.mxu1 %v13515_v35 }
0x11e0   : > { %4332 = vmatpush1.bf16.msra.mxu0 %v11603_v10  ;;  %8518 = vmatpush3.bf16.msra.mxu1 %v11613_v11 }
0x11e1   : > { %4333 = vmatprep.subr.bf16.mxu0 %v11608_v8  ;;  %8519 = vmatprep.subr.bf16.mxu1 %v13515_v35 }
0x11e4   : > { %4334 = vmatpush1.bf16.msra.mxu0 %v11619_v28  ;;  %8520 = vmatpush3.bf16.msra.mxu1 %v11629_v2 }
0x11e5   : > { %4335 = vmatprep.subr.bf16.mxu0 %v11624_v6  ;;  %8521 = vmatprep.subr.bf16.mxu1 %v13515_v35 }
0x11e8   : > { %4336 = vmatpush1.bf16.msra.mxu0 %v11635_v20  ;;  %8522 = vmatpush3.bf16.msra.mxu1 %v11645_v29 }
0x11e9   : > { %4403 = vmatprep.subr.bf16.mxu0 %v11640_v24  ;;  %8527 = vmatprep.subr.bf16.mxu1 %v13515_v35 }
0x11eb   : > { %4354 = vmatmul.mubr.bf16.vlgmr.msra.gmra.mrb[8].mxu0 %v7194_v4  ;;  %8524 = vmatmul.mubr.bf16.vlgmr.msra.gmra.mrb[16].mxu1 %v7194_v4 }
0x11ec   : > { %4404 = vmatpush1.bf16.msra.mxu0 %v11652_v32  ;;  %8528 = vmatpush3.bf16.msra.mxu1 %v11662_v40 }
0x11ed   : > { %4405 = vmatprep.subr.bf16.mxu0 %v11657_v5  ;;  %8529 = vmatprep.subr.bf16.mxu1 %v13515_v35 }
0x11ee   : > { %4435 = vmatprep.mubr.bf16.mxu0 %v13516_v45  ;;  %8543 = vmatprep.mubr.msk.bf16.mxu1 %vm9574_vm2, %v13515_v35 }
0x11f0   : > { %4406 = vmatpush1.bf16.msra.mxu0 %v11668_v41  ;;  %8530 = vmatpush3.bf16.msra.mxu1 %v11678_v57 }
0x11f1   : > { %4407 = vmatprep.subr.bf16.mxu0 %v11673_v51  ;;  %8531 = vmatprep.subr.bf16.mxu1 %v13515_v35 }
0x11f4   : > { %4408 = vmatpush1.bf16.msra.mxu0 %v11687_v60  ;;  %8532 = vmatpush3.bf16.msra.mxu1 %v11697_v42 }
0x11f5   : > { %4409 = vmatprep.subr.bf16.mxu0 %v11692_v13  ;;  %8533 = vmatprep.subr.bf16.mxu1 %v13515_v35 }
0x11f8   : > { %4410 = vmatpush1.bf16.msra.mxu0 %v11703_v30  ;;  %8534 = vmatpush3.bf16.msra.mxu1 %v11713_v34 }
0x11f9   : > { %4411 = vmatprep.subr.bf16.mxu0 %v11708_v46  ;;  %8535 = vmatprep.subr.bf16.mxu1 %v13515_v35 }
0x11fc   : > { %4412 = vmatpush1.bf16.msra.mxu0 %v11719_v9  ;;  %8536 = vmatpush3.bf16.msra.mxu1 %v11729_v26 }
0x11fd   : > { %4413 = vmatprep.subr.bf16.mxu0 %v11724_v22  ;;  %8537 = vmatprep.subr.bf16.mxu1 %v13515_v35 }
0x1200   : > { %4414 = vmatpush1.bf16.msra.mxu0 %v11735_v27  ;;  %8538 = vmatpush3.bf16.msra.mxu1 %v11745_v48 }
0x1201   : > { %4415 = vmatprep.subr.bf16.mxu0 %v11740_v14  ;;  %8539 = vmatprep.subr.bf16.mxu1 %v13515_v35 }
0x1204   : > { %4416 = vmatpush1.bf16.msra.mxu0 %v13517_v18  ;;  %8540 = vmatpush3.bf16.msra.mxu1 %v13518_v52 }
0x1205   : > { %4417 = vmatprep.subr.bf16.mxu0 %v13519_v56  ;;  %8541 = vmatprep.subr.bf16.mxu1 %v13515_v35 }
0x1208   : > { %4418 = vmatpush1.bf16.msra.mxu0 %v13520_v1  ;;  %8542 = vmatpush3.bf16.msra.mxu1 %v13521_v17 }
0x1209   : > { %4511 = vmatprep.subr.bf16.mxu0 %v13522_v16  ;;  %8547 = vmatprep.subr.bf16.mxu1 %v13515_v35 }
0x129e   : > { %v4247_v21 = vpop.f32.mrb[4].mxu0  ;;  %v4288_v31 = vpop.f32.mrb[12].mxu1 }
0x129f   : > { %v9165_v36 = vadd.f32 %v4247_v21, %v13523_v23  ;;  %v4249_v7 = vpop.f32.mrb[5].mxu0  ;;  %v8505_v61 = vpop.f32.mrb[13].mxu1  ;;  %v4304_v48 = vadd.f32 %v4288_v31, %v11862_v49  ;;  %v4207_v21 = vadd.f32 %v4206_v58, %v11865_v38 }
0x12a0   : > { %v4251_v12 = vpop.f32.mrb[6].mxu0  ;;  %v4291_v55 = vpop.f32.mrb[14].mxu1  ;;  %v9166_v1 = vadd.f32 %v4249_v7, %v11858_v33  ;;  %v4316_v7 = vstv %s4314_s9  ;;  %s5263_s9 = scalar_select %p5262_p6, 1, 0 }
0x12a1   : > { %v4296_v4 = vmul.f32 0.5, %v9165_v36  ;;  %v4252_v56 = vpop.f32.mrb[7].mxu0  ;;  %v8506_v52 = vpop.f32.mrb[15].mxu1 }
0x12a2   : > { %v4297_v17 = vmul.f32 0.5, %v9166_v1  ;;  %s5264_s11 = scvt.s32.f32 %s5263_s9  ;;  %s6211_s9 = sadd.s32 11, %s11870_s20 }
0x12a3   : > { %9423 = vtanh.f32 %v4296_v4  ;;  %v7195_v4 = vld [vmem:[%s9701_s15 + $0xc] sm:$0xf]  ;;  %p6212_p11 = scmp.lt.s32.totalorder %s6211_s9, 20 }
0x12a4   : > { %9425 = vtanh.f32 %v4297_v17 }
0x12ad   : > { %v9424_v18 = vpop.eup %9423 }
0x12ae   : > { %v4300_v16 = vmul.f32 0.5, %v9424_v18  ;;  %v9426_v12 = vpop.eup %9425 }
0x12af   : > { %v4301_v56 = vmul.f32 0.5, %v9426_v12  ;;  %v13526_v12 = vld [vmem:[#allocation84_spill] sm:$0xff] }
0x12b0   : > { %v4302_v14 = vadd.f32 0.5, %v4300_v16 }
0x12b1   : > { %v4303_v36 = vadd.f32 0.5, %v4301_v56  ;;  %v13527_v56 = vld [vmem:[#allocation86_spill] sm:$0xff] }
0x12b2   : > { %v4305_v23 = vmul.f32 %v4304_v48, %v4302_v14 }
0x12b4   : > { %v4306_v61 = vadd.f32 %v4305_v23, %v4207_v21  ;;  %v13524_v21 = vld [vmem:[#allocation83_spill] sm:$0xff] }
0x12b6   : > { %9427 = vtanh.f32 %v4306_v61  ;;  %v13525_v61 = vld [vmem:[#allocation82_spill] sm:$0xff] }
0x12c0   : > { %v9428_v52 = vpop.eup %9427 }
0x12c1   : > { %v4308_v1 = vsub.f32 %v11876_v37, %v9428_v52 }
0x12c3   : > { %v4309_v18 = vmul.f32 %v4308_v1, %v4303_v36  ;;  %v13529_v36 = vld [vmem:[#allocation87_spill] sm:$0xff]  ;;  %v13530_v1 = vld [vmem:[#allocation88_spill] sm:$0xff] }
0x12c5   : > { %v4310_v16 = vadd.f32 %v9428_v52, %v4309_v18  ;;  %v13528_v52 = vld [vmem:[#allocation85_spill] sm:$0xff] }
0x12c6   : > { %v13531_v18 = vld [vmem:[#allocation81_spill] sm:$0xff] }
0x12c7   : > { %v4315_v17 = vsub.f32 %v4310_v16, %v11876_v37 }
0x12c9   : > { %v4317_v31 = vmul.f32 %v4316_v7, %v4315_v17  ;;  %v13532_v17 = vld [vmem:[#allocation89_spill] sm:$0xff] }
0x12cb   : > { %v11959_v14 = vadd.f32 %v4317_v31, %v11876_v37  ;;  %v4396_v37 = vpop.f32.mrb[16].mxu1 }
0x12cc   : > { %v8525_v58 = vpop.f32.mrb[17].mxu1 }
0x12cd   : > { %v4402_v48 = vpack.c.bf16 %v11959_v14, %v11959_v14  ;;  %v4399_v23 = vpop.f32.mrb[18].mxu1 }
0x12ce   : > { %v8526_v55 = vpop.f32.mrb[19].mxu1 }
0x12cf   : > { %4436 = vmatmul.mubr.bf16.vlgmr.msra.gmra.mrb[8].mxu0 %v4402_v48  ;;  %8544 = vmatmul.mubr.bf16.vlgmr.msra.gmra.mrb[20].mxu1 %v4402_v48 }
0x12d0   : > { %4512 = vmatpush1.bf16.msra.mxu0 %v11521_v3  ;;  %8548 = vmatpush3.bf16.msra.mxu1 %v11530_v43 }
0x12d1   : > { %4513 = vmatprep.subr.bf16.mxu0 %v11525_v39  ;;  %8549 = vmatprep.subr.bf16.mxu1 %v13515_v35 }
0x12d2   : > { %4543 = vmatprep.mubr.bf16.mxu0 %v13516_v45  ;;  %8563 = vmatprep.mubr.msk.bf16.mxu1 %vm9574_vm2, %v13515_v35 }
0x12d4   : > { %4514 = vmatpush1.bf16.msra.mxu0 %v11535_v44  ;;  %8550 = vmatpush3.bf16.msra.mxu1 %v11546_v53 }
0x12d5   : > { %4515 = vmatprep.subr.bf16.mxu0 %v11541_v50  ;;  %8551 = vmatprep.subr.bf16.mxu1 %v13515_v35 }
0x12d8   : > { %4516 = vmatpush1.bf16.msra.mxu0 %v11553_v25  ;;  %8552 = vmatpush3.bf16.msra.mxu1 %v11563_v63 }
0x12d9   : > { %4517 = vmatprep.subr.bf16.mxu0 %v11558_v59  ;;  %8553 = vmatprep.subr.bf16.mxu1 %v13515_v35 }
0x12dc   : > { %4518 = vmatpush1.bf16.msra.mxu0 %v11571_v0  ;;  %8554 = vmatpush3.bf16.msra.mxu1 %v11581_v19 }
0x12dd   : > { %4519 = vmatprep.subr.bf16.mxu0 %v11576_v15  ;;  %8555 = vmatprep.subr.bf16.mxu1 %v13515_v35 }
0x12e0   : > { %4520 = vmatpush1.bf16.msra.mxu0 %v11587_v47  ;;  %8556 = vmatpush3.bf16.msra.mxu1 %v11597_v62 }
0x12e1   : > { %4521 = vmatprep.subr.bf16.mxu0 %v11592_v54  ;;  %8557 = vmatprep.subr.bf16.mxu1 %v13515_v35 }
0x12e4   : > { %4522 = vmatpush1.bf16.msra.mxu0 %v11603_v10  ;;  %8558 = vmatpush3.bf16.msra.mxu1 %v11613_v11 }
0x12e5   : > { %4523 = vmatprep.subr.bf16.mxu0 %v11608_v8  ;;  %8559 = vmatprep.subr.bf16.mxu1 %v13515_v35 }
0x12e8   : > { %4524 = vmatpush1.bf16.msra.mxu0 %v11619_v28  ;;  %8560 = vmatpush3.bf16.msra.mxu1 %v11629_v2 }
0x12e9   : > { %4525 = vmatprep.subr.bf16.mxu0 %v11624_v6  ;;  %8561 = vmatprep.subr.bf16.mxu1 %v13515_v35 }
0x12ec   : > { %4526 = vmatpush1.bf16.msra.mxu0 %v11635_v20  ;;  %8562 = vmatpush3.bf16.msra.mxu1 %v11645_v29 }
0x12ed   : > { %4593 = vmatprep.subr.bf16.mxu0 %v11640_v24  ;;  %8567 = vmatprep.subr.bf16.mxu1 %v13515_v35 }
0x12ef   : > { %4544 = vmatmul.mubr.bf16.vlgmr.msra.gmra.mrb[12].mxu0 %v7195_v4  ;;  %8564 = vmatmul.mubr.bf16.vlgmr.msra.gmra.mrb[24].mxu1 %v7195_v4 }
0x12f0   : > { %4594 = vmatpush1.bf16.msra.mxu0 %v11652_v32  ;;  %8568 = vmatpush3.bf16.msra.mxu1 %v11662_v40 }
0x12f1   : > { %4595 = vmatprep.subr.bf16.mxu0 %v11657_v5  ;;  %8569 = vmatprep.subr.bf16.mxu1 %v13515_v35 }
0x12f2   : > { %4625 = vmatprep.mubr.bf16.mxu0 %v13516_v45  ;;  %8583 = vmatprep.mubr.msk.bf16.mxu1 %vm9574_vm2, %v13515_v35 }
0x12f4   : > { %4596 = vmatpush1.bf16.msra.mxu0 %v11668_v41  ;;  %8570 = vmatpush3.bf16.msra.mxu1 %v11678_v57 }
0x12f5   : > { %4597 = vmatprep.subr.bf16.mxu0 %v11673_v51  ;;  %8571 = vmatprep.subr.bf16.mxu1 %v13515_v35 }
0x12f8   : > { %4598 = vmatpush1.bf16.msra.mxu0 %v11687_v60  ;;  %8572 = vmatpush3.bf16.msra.mxu1 %v11697_v42 }
0x12f9   : > { %4599 = vmatprep.subr.bf16.mxu0 %v11692_v13  ;;  %8573 = vmatprep.subr.bf16.mxu1 %v13515_v35 }
0x12fc   : > { %4600 = vmatpush1.bf16.msra.mxu0 %v11703_v30  ;;  %8574 = vmatpush3.bf16.msra.mxu1 %v11713_v34 }
0x12fd   : > { %4601 = vmatprep.subr.bf16.mxu0 %v11708_v46  ;;  %8575 = vmatprep.subr.bf16.mxu1 %v13515_v35 }
0x1300   : > { %4602 = vmatpush1.bf16.msra.mxu0 %v11719_v9  ;;  %8576 = vmatpush3.bf16.msra.mxu1 %v11729_v26 }
0x1301   : > { %4603 = vmatprep.subr.bf16.mxu0 %v11724_v22  ;;  %8577 = vmatprep.subr.bf16.mxu1 %v13515_v35 }
0x1304   : > { %4604 = vmatpush1.bf16.msra.mxu0 %v11735_v27  ;;  %8578 = vmatpush3.bf16.msra.mxu1 %v13524_v21 }
0x1305   : > { %4605 = vmatprep.subr.bf16.mxu0 %v13525_v61  ;;  %8579 = vmatprep.subr.bf16.mxu1 %v13515_v35 }
0x1308   : > { %4606 = vmatpush1.bf16.msra.mxu0 %v13526_v12  ;;  %8580 = vmatpush3.bf16.msra.mxu1 %v13527_v56 }
0x1309   : > { %4607 = vmatprep.subr.bf16.mxu0 %v13528_v52  ;;  %8581 = vmatprep.subr.bf16.mxu1 %v13515_v35 }
0x130c   : > { %4608 = vmatpush1.bf16.msra.mxu0 %v13529_v36  ;;  %8582 = vmatpush3.bf16.msra.mxu1 %v13530_v1 }
0x130d   : > { %4701 = vmatprep.subr.bf16.mxu0 %v13531_v18  ;;  %8587 = vmatprep.subr.bf16.mxu1 %v13515_v35 }
0x13a2   : > { %v4437_v16 = vpop.f32.mrb[8].mxu0  ;;  %v4478_v7 = vpop.f32.mrb[20].mxu1 }
0x13a3   : > { %v9167_v31 = vadd.f32 %v4437_v16, %v13532_v17  ;;  %v4439_v48 = vpop.f32.mrb[9].mxu0  ;;  %v8545_v58 = vpop.f32.mrb[21].mxu1  ;;  %v4494_v21 = vadd.f32 %v4478_v7, %v11862_v49  ;;  %v4397_v16 = vadd.f32 %v4396_v37, %v11865_v38 }
0x13a4   : > { %v4441_v23 = vpop.f32.mrb[10].mxu0  ;;  %v4481_v55 = vpop.f32.mrb[22].mxu1  ;;  %v9168_v36 = vadd.f32 %v4439_v48, %v11858_v33  ;;  %v4506_v48 = vstv %s4504_s13  ;;  %s5453_s13 = scalar_select %p5452_p7, 1, 0 }
0x13a5   : > { %v4486_v4 = vmul.f32 0.5, %v9167_v31  ;;  %v4442_v52 = vpop.f32.mrb[11].mxu0  ;;  %v8546_v56 = vpop.f32.mrb[23].mxu1 }
0x13a6   : > { %v4487_v1 = vmul.f32 0.5, %v9168_v36  ;;  %s5454_s21 = scvt.s32.f32 %s5453_s13  ;;  %s6401_s13 = sadd.s32 12, %s11870_s20 }
0x13a7   : > { %9429 = vtanh.f32 %v4486_v4  ;;  %v7196_v4 = vld [vmem:[%s9701_s15 + $0x10] sm:$0xf]  ;;  %p6402_p12 = scmp.lt.s32.totalorder %s6401_s13, 20 }
0x13a8   : > { %9431 = vtanh.f32 %v4487_v1 }
0x13b1   : > { %v9430_v12 = vpop.eup %9429 }
0x13b2   : > { %v4490_v18 = vmul.f32 0.5, %v9430_v12  ;;  %v9432_v23 = vpop.eup %9431 }
0x13b3   : > { %v4491_v52 = vmul.f32 0.5, %v9432_v23  ;;  %v13535_v23 = vld [vmem:[#allocation84_spill] sm:$0xff] }
0x13b4   : > { %v4492_v61 = vadd.f32 0.5, %v4490_v18 }
0x13b5   : > { %v4493_v31 = vadd.f32 0.5, %v4491_v52  ;;  %v13536_v52 = vld [vmem:[#allocation86_spill] sm:$0xff] }
0x13b6   : > { %v4495_v17 = vmul.f32 %v4494_v21, %v4492_v61 }
0x13b8   : > { %v4496_v58 = vadd.f32 %v4495_v17, %v4397_v16  ;;  %v13533_v16 = vld [vmem:[#allocation83_spill] sm:$0xff] }
0x13ba   : > { %9433 = vtanh.f32 %v4496_v58  ;;  %v13534_v58 = vld [vmem:[#allocation82_spill] sm:$0xff] }
0x13c4   : > { %v9434_v56 = vpop.eup %9433 }
0x13c5   : > { %v4498_v36 = vsub.f32 %v11959_v14, %v9434_v56 }
0x13c7   : > { %v4499_v12 = vmul.f32 %v4498_v36, %v4493_v31  ;;  %v13538_v31 = vld [vmem:[#allocation87_spill] sm:$0xff]  ;;  %v13539_v36 = vld [vmem:[#allocation88_spill] sm:$0xff] }
0x13c9   : > { %v4500_v18 = vadd.f32 %v9434_v56, %v4499_v12  ;;  %v13537_v56 = vld [vmem:[#allocation85_spill] sm:$0xff] }
0x13ca   : > { %v13540_v12 = vld [vmem:[#allocation81_spill] sm:$0xff] }
0x13cb   : > { %v4505_v1 = vsub.f32 %v4500_v18, %v11959_v14 }
0x13cd   : > { %v4507_v7 = vmul.f32 %v4506_v48, %v4505_v1  ;;  %v13541_v1 = vld [vmem:[#allocation89_spill] sm:$0xff] }
0x13cf   : > { %v12042_v37 = vadd.f32 %v4507_v7, %v11959_v14  ;;  %v4586_v14 = vpop.f32.mrb[24].mxu1 }
0x13d0   : > { %v8565_v61 = vpop.f32.mrb[25].mxu1 }
0x13d1   : > { %v4592_v21 = vpack.c.bf16 %v12042_v37, %v12042_v37  ;;  %v4589_v17 = vpop.f32.mrb[26].mxu1 }
0x13d2   : > { %v8566_v55 = vpop.f32.mrb[27].mxu1 }
0x13d3   : > { %4626 = vmatmul.mubr.bf16.vlgmr.msra.gmra.mrb[12].mxu0 %v4592_v21  ;;  %8584 = vmatmul.mubr.bf16.vlgmr.msra.gmra.mrb[28].mxu1 %v4592_v21 }
0x13d4   : > { %4702 = vmatpush1.bf16.msra.mxu0 %v11521_v3  ;;  %8588 = vmatpush3.bf16.msra.mxu1 %v11530_v43 }
0x13d5   : > { %4703 = vmatprep.subr.bf16.mxu0 %v11525_v39  ;;  %8589 = vmatprep.subr.bf16.mxu1 %v13515_v35 }
0x13d6   : > { %4733 = vmatprep.mubr.bf16.mxu0 %v13516_v45  ;;  %8603 = vmatprep.mubr.msk.bf16.mxu1 %vm9574_vm2, %v13515_v35 }
0x13d8   : > { %4704 = vmatpush1.bf16.msra.mxu0 %v11535_v44  ;;  %8590 = vmatpush3.bf16.msra.mxu1 %v11546_v53 }
0x13d9   : > { %4705 = vmatprep.subr.bf16.mxu0 %v11541_v50  ;;  %8591 = vmatprep.subr.bf16.mxu1 %v13515_v35 }
0x13dc   : > { %4706 = vmatpush1.bf16.msra.mxu0 %v11553_v25  ;;  %8592 = vmatpush3.bf16.msra.mxu1 %v11563_v63 }
0x13dd   : > { %4707 = vmatprep.subr.bf16.mxu0 %v11558_v59  ;;  %8593 = vmatprep.subr.bf16.mxu1 %v13515_v35 }
0x13e0   : > { %4708 = vmatpush1.bf16.msra.mxu0 %v11571_v0  ;;  %8594 = vmatpush3.bf16.msra.mxu1 %v11581_v19 }
0x13e1   : > { %4709 = vmatprep.subr.bf16.mxu0 %v11576_v15  ;;  %8595 = vmatprep.subr.bf16.mxu1 %v13515_v35 }
0x13e4   : > { %4710 = vmatpush1.bf16.msra.mxu0 %v11587_v47  ;;  %8596 = vmatpush3.bf16.msra.mxu1 %v11597_v62 }
0x13e5   : > { %4711 = vmatprep.subr.bf16.mxu0 %v11592_v54  ;;  %8597 = vmatprep.subr.bf16.mxu1 %v13515_v35 }
0x13e8   : > { %4712 = vmatpush1.bf16.msra.mxu0 %v11603_v10  ;;  %8598 = vmatpush3.bf16.msra.mxu1 %v11613_v11 }
0x13e9   : > { %4713 = vmatprep.subr.bf16.mxu0 %v11608_v8  ;;  %8599 = vmatprep.subr.bf16.mxu1 %v13515_v35 }
0x13ec   : > { %4714 = vmatpush1.bf16.msra.mxu0 %v11619_v28  ;;  %8600 = vmatpush3.bf16.msra.mxu1 %v11629_v2 }
0x13ed   : > { %4715 = vmatprep.subr.bf16.mxu0 %v11624_v6  ;;  %8601 = vmatprep.subr.bf16.mxu1 %v13515_v35 }
0x13f0   : > { %4716 = vmatpush1.bf16.msra.mxu0 %v11635_v20  ;;  %8602 = vmatpush3.bf16.msra.mxu1 %v11645_v29 }
0x13f1   : > { %4783 = vmatprep.subr.bf16.mxu0 %v11640_v24  ;;  %8607 = vmatprep.subr.bf16.mxu1 %v13515_v35 }
0x13f3   : > { %4734 = vmatmul.mubr.bf16.vlgmr.msra.gmra.mrb[16].mxu0 %v7196_v4  ;;  %8604 = vmatmul.mubr.bf16.vlgmr.msra.gmra.mrb[32].mxu1 %v7196_v4 }
0x13f4   : > { %4784 = vmatpush1.bf16.msra.mxu0 %v11652_v32  ;;  %8608 = vmatpush3.bf16.msra.mxu1 %v11662_v40 }
0x13f5   : > { %4785 = vmatprep.subr.bf16.mxu0 %v11657_v5  ;;  %8609 = vmatprep.subr.bf16.mxu1 %v13515_v35 }
0x13f6   : > { %4815 = vmatprep.mubr.bf16.mxu0 %v13516_v45  ;;  %8623 = vmatprep.mubr.msk.bf16.mxu1 %vm9574_vm2, %v13515_v35 }
0x13f8   : > { %4786 = vmatpush1.bf16.msra.mxu0 %v11668_v41  ;;  %8610 = vmatpush3.bf16.msra.mxu1 %v11678_v57 }
0x13f9   : > { %4787 = vmatprep.subr.bf16.mxu0 %v11673_v51  ;;  %8611 = vmatprep.subr.bf16.mxu1 %v13515_v35 }
0x13fc   : > { %4788 = vmatpush1.bf16.msra.mxu0 %v11687_v60  ;;  %8612 = vmatpush3.bf16.msra.mxu1 %v11697_v42 }
0x13fd   : > { %4789 = vmatprep.subr.bf16.mxu0 %v11692_v13  ;;  %8613 = vmatprep.subr.bf16.mxu1 %v13515_v35 }
0x1400   : > { %4790 = vmatpush1.bf16.msra.mxu0 %v11703_v30  ;;  %8614 = vmatpush3.bf16.msra.mxu1 %v11713_v34 }
0x1401   : > { %4791 = vmatprep.subr.bf16.mxu0 %v11708_v46  ;;  %8615 = vmatprep.subr.bf16.mxu1 %v13515_v35 }
0x1404   : > { %4792 = vmatpush1.bf16.msra.mxu0 %v11719_v9  ;;  %8616 = vmatpush3.bf16.msra.mxu1 %v11729_v26 }
0x1405   : > { %4793 = vmatprep.subr.bf16.mxu0 %v11724_v22  ;;  %8617 = vmatprep.subr.bf16.mxu1 %v13515_v35 }
0x1408   : > { %4794 = vmatpush1.bf16.msra.mxu0 %v11735_v27  ;;  %8618 = vmatpush3.bf16.msra.mxu1 %v13533_v16 }
0x1409   : > { %4795 = vmatprep.subr.bf16.mxu0 %v13534_v58  ;;  %8619 = vmatprep.subr.bf16.mxu1 %v13515_v35 }
0x140c   : > { %4796 = vmatpush1.bf16.msra.mxu0 %v13535_v23  ;;  %8620 = vmatpush3.bf16.msra.mxu1 %v13536_v52 }
0x140d   : > { %4797 = vmatprep.subr.bf16.mxu0 %v13537_v56  ;;  %8621 = vmatprep.subr.bf16.mxu1 %v13515_v35 }
0x1410   : > { %4798 = vmatpush1.bf16.msra.mxu0 %v13538_v31  ;;  %8622 = vmatpush3.bf16.msra.mxu1 %v13539_v36 }
0x1411   : > { %4891 = vmatprep.subr.bf16.mxu0 %v13540_v12  ;;  %8627 = vmatprep.subr.bf16.mxu1 %v13515_v35 }
0x14a6   : > { %v4627_v18 = vpop.f32.mrb[12].mxu0  ;;  %v4668_v48 = vpop.f32.mrb[28].mxu1 }
0x14a7   : > { %v9169_v7 = vadd.f32 %v4627_v18, %v13541_v1  ;;  %v4629_v21 = vpop.f32.mrb[13].mxu0  ;;  %v8585_v61 = vpop.f32.mrb[29].mxu1  ;;  %v4684_v16 = vadd.f32 %v4668_v48, %v11862_v49  ;;  %v4587_v18 = vadd.f32 %v4586_v14, %v11865_v38 }
0x14a8   : > { %v4631_v17 = vpop.f32.mrb[14].mxu0  ;;  %v4671_v55 = vpop.f32.mrb[30].mxu1  ;;  %v9170_v31 = vadd.f32 %v4629_v21, %v11858_v33  ;;  %v4696_v21 = vstv %s4694_s16  ;;  %s5643_s16 = scalar_select %p5642_p8, 1, 0 }
0x14a9   : > { %v4676_v4 = vmul.f32 0.5, %v9169_v7  ;;  %v4632_v56 = vpop.f32.mrb[15].mxu0  ;;  %v8586_v52 = vpop.f32.mrb[31].mxu1 }
0x14aa   : > { %v4677_v36 = vmul.f32 0.5, %v9170_v31  ;;  %s5644_s17 = scvt.s32.f32 %s5643_s16  ;;  %s6591_s16 = sadd.s32 13, %s11870_s20 }
0x14ab   : > { %9435 = vtanh.f32 %v4676_v4  ;;  %v7197_v4 = vld [vmem:[%s9701_s15 + $0x14] sm:$0xf]  ;;  %p6592_p13 = scmp.lt.s32.totalorder %s6591_s16, 20 }
0x14ac   : > { %9437 = vtanh.f32 %v4677_v36 }
0x14b5   : > { %v9436_v23 = vpop.eup %9435 }
0x14b6   : > { %v4680_v12 = vmul.f32 0.5, %v9436_v23  ;;  %v9438_v17 = vpop.eup %9437 }
0x14b7   : > { %v4681_v56 = vmul.f32 0.5, %v9438_v17  ;;  %v13544_v17 = vld [vmem:[#allocation84_spill] sm:$0xff] }
0x14b8   : > { %v4682_v58 = vadd.f32 0.5, %v4680_v12 }
0x14b9   : > { %v4683_v7 = vadd.f32 0.5, %v4681_v56  ;;  %v13545_v56 = vld [vmem:[#allocation86_spill] sm:$0xff] }
0x14ba   : > { %v4685_v1 = vmul.f32 %v4684_v16, %v4682_v58 }
0x14bc   : > { %v4686_v61 = vadd.f32 %v4685_v1, %v4587_v18  ;;  %v13542_v18 = vld [vmem:[#allocation83_spill] sm:$0xff] }
0x14be   : > { %9439 = vtanh.f32 %v4686_v61  ;;  %v13543_v61 = vld [vmem:[#allocation82_spill] sm:$0xff] }
0x14c8   : > { %v9440_v52 = vpop.eup %9439 }
0x14c9   : > { %v4688_v31 = vsub.f32 %v12042_v37, %v9440_v52 }
0x14cb   : > { %v4689_v23 = vmul.f32 %v4688_v31, %v4683_v7  ;;  %v13547_v7 = vld [vmem:[#allocation87_spill] sm:$0xff]  ;;  %v13548_v31 = vld [vmem:[#allocation88_spill] sm:$0xff] }
0x14cd   : > { %v4690_v12 = vadd.f32 %v9440_v52, %v4689_v23  ;;  %v13546_v52 = vld [vmem:[#allocation85_spill] sm:$0xff] }
0x14ce   : > { %v13549_v23 = vld [vmem:[#allocation81_spill] sm:$0xff] }
0x14cf   : > { %v4695_v36 = vsub.f32 %v4690_v12, %v12042_v37 }
0x14d1   : > { %v4697_v48 = vmul.f32 %v4696_v21, %v4695_v36  ;;  %v13550_v36 = vld [vmem:[#allocation89_spill] sm:$0xff] }
0x14d3   : > { %v12125_v14 = vadd.f32 %v4697_v48, %v12042_v37  ;;  %v4776_v37 = vpop.f32.mrb[32].mxu1 }
0x14d4   : > { %v8605_v58 = vpop.f32.mrb[33].mxu1 }
0x14d5   : > { %v4782_v16 = vpack.c.bf16 %v12125_v14, %v12125_v14  ;;  %v4779_v1 = vpop.f32.mrb[34].mxu1 }
0x14d6   : > { %v8606_v55 = vpop.f32.mrb[35].mxu1 }
0x14d7   : > { %4816 = vmatmul.mubr.bf16.vlgmr.msra.gmra.mrb[16].mxu0 %v4782_v16  ;;  %8624 = vmatmul.mubr.bf16.vlgmr.msra.gmra.mrb[36].mxu1 %v4782_v16 }
0x14d8   : > { %4892 = vmatpush1.bf16.msra.mxu0 %v11521_v3  ;;  %8628 = vmatpush3.bf16.msra.mxu1 %v11530_v43 }
0x14d9   : > { %4893 = vmatprep.subr.bf16.mxu0 %v11525_v39  ;;  %8629 = vmatprep.subr.bf16.mxu1 %v13515_v35 }
0x14da   : > { %4923 = vmatprep.mubr.bf16.mxu0 %v13516_v45  ;;  %8643 = vmatprep.mubr.msk.bf16.mxu1 %vm9574_vm2, %v13515_v35 }
0x14dc   : > { %4894 = vmatpush1.bf16.msra.mxu0 %v11535_v44  ;;  %8630 = vmatpush3.bf16.msra.mxu1 %v11546_v53 }
0x14dd   : > { %4895 = vmatprep.subr.bf16.mxu0 %v11541_v50  ;;  %8631 = vmatprep.subr.bf16.mxu1 %v13515_v35 }
0x14e0   : > { %4896 = vmatpush1.bf16.msra.mxu0 %v11553_v25  ;;  %8632 = vmatpush3.bf16.msra.mxu1 %v11563_v63 }
0x14e1   : > { %4897 = vmatprep.subr.bf16.mxu0 %v11558_v59  ;;  %8633 = vmatprep.subr.bf16.mxu1 %v13515_v35 }
0x14e4   : > { %4898 = vmatpush1.bf16.msra.mxu0 %v11571_v0  ;;  %8634 = vmatpush3.bf16.msra.mxu1 %v11581_v19 }
0x14e5   : > { %4899 = vmatprep.subr.bf16.mxu0 %v11576_v15  ;;  %8635 = vmatprep.subr.bf16.mxu1 %v13515_v35 }
0x14e8   : > { %4900 = vmatpush1.bf16.msra.mxu0 %v11587_v47  ;;  %8636 = vmatpush3.bf16.msra.mxu1 %v11597_v62 }
0x14e9   : > { %4901 = vmatprep.subr.bf16.mxu0 %v11592_v54  ;;  %8637 = vmatprep.subr.bf16.mxu1 %v13515_v35 }
0x14ec   : > { %4902 = vmatpush1.bf16.msra.mxu0 %v11603_v10  ;;  %8638 = vmatpush3.bf16.msra.mxu1 %v11613_v11 }
0x14ed   : > { %4903 = vmatprep.subr.bf16.mxu0 %v11608_v8  ;;  %8639 = vmatprep.subr.bf16.mxu1 %v13515_v35 }
0x14f0   : > { %4904 = vmatpush1.bf16.msra.mxu0 %v11619_v28  ;;  %8640 = vmatpush3.bf16.msra.mxu1 %v11629_v2 }
0x14f1   : > { %4905 = vmatprep.subr.bf16.mxu0 %v11624_v6  ;;  %8641 = vmatprep.subr.bf16.mxu1 %v13515_v35 }
0x14f4   : > { %4906 = vmatpush1.bf16.msra.mxu0 %v11635_v20  ;;  %8642 = vmatpush3.bf16.msra.mxu1 %v11645_v29 }
0x14f5   : > { %4973 = vmatprep.subr.bf16.mxu0 %v11640_v24  ;;  %8647 = vmatprep.subr.bf16.mxu1 %v13515_v35 }
0x14f7   : > { %4924 = vmatmul.mubr.bf16.vlgmr.msra.gmra.mrb[20].mxu0 %v7197_v4  ;;  %8644 = vmatmul.mubr.bf16.vlgmr.msra.gmra.mrb[40].mxu1 %v7197_v4 }
0x14f8   : > { %4974 = vmatpush1.bf16.msra.mxu0 %v11652_v32  ;;  %8648 = vmatpush3.bf16.msra.mxu1 %v11662_v40 }
0x14f9   : > { %4975 = vmatprep.subr.bf16.mxu0 %v11657_v5  ;;  %8649 = vmatprep.subr.bf16.mxu1 %v13515_v35 }
0x14fa   : > { %5005 = vmatprep.mubr.bf16.mxu0 %v13516_v45  ;;  %8663 = vmatprep.mubr.msk.bf16.mxu1 %vm9574_vm2, %v13515_v35 }
0x14fc   : > { %4976 = vmatpush1.bf16.msra.mxu0 %v11668_v41  ;;  %8650 = vmatpush3.bf16.msra.mxu1 %v11678_v57 }
0x14fd   : > { %4977 = vmatprep.subr.bf16.mxu0 %v11673_v51  ;;  %8651 = vmatprep.subr.bf16.mxu1 %v13515_v35 }
0x1500   : > { %4978 = vmatpush1.bf16.msra.mxu0 %v11687_v60  ;;  %8652 = vmatpush3.bf16.msra.mxu1 %v11697_v42 }
0x1501   : > { %4979 = vmatprep.subr.bf16.mxu0 %v11692_v13  ;;  %8653 = vmatprep.subr.bf16.mxu1 %v13515_v35 }
0x1504   : > { %4980 = vmatpush1.bf16.msra.mxu0 %v11703_v30  ;;  %8654 = vmatpush3.bf16.msra.mxu1 %v11713_v34 }
0x1505   : > { %4981 = vmatprep.subr.bf16.mxu0 %v11708_v46  ;;  %8655 = vmatprep.subr.bf16.mxu1 %v13515_v35 }
0x1508   : > { %4982 = vmatpush1.bf16.msra.mxu0 %v11719_v9  ;;  %8656 = vmatpush3.bf16.msra.mxu1 %v11729_v26 }
0x1509   : > { %4983 = vmatprep.subr.bf16.mxu0 %v11724_v22  ;;  %8657 = vmatprep.subr.bf16.mxu1 %v13515_v35 }
0x150c   : > { %4984 = vmatpush1.bf16.msra.mxu0 %v11735_v27  ;;  %8658 = vmatpush3.bf16.msra.mxu1 %v13542_v18 }
0x150d   : > { %4985 = vmatprep.subr.bf16.mxu0 %v13543_v61  ;;  %8659 = vmatprep.subr.bf16.mxu1 %v13515_v35 }
0x1510   : > { %4986 = vmatpush1.bf16.msra.mxu0 %v13544_v17  ;;  %8660 = vmatpush3.bf16.msra.mxu1 %v13545_v56 }
0x1511   : > { %4987 = vmatprep.subr.bf16.mxu0 %v13546_v52  ;;  %8661 = vmatprep.subr.bf16.mxu1 %v13515_v35 }
0x1514   : > { %4988 = vmatpush1.bf16.msra.mxu0 %v13547_v7  ;;  %8662 = vmatpush3.bf16.msra.mxu1 %v13548_v31 }
0x1515   : > { %5081 = vmatprep.subr.bf16.mxu0 %v13549_v23  ;;  %8667 = vmatprep.subr.bf16.mxu1 %v13515_v35 }
0x15aa   : > { %v4817_v12 = vpop.f32.mrb[16].mxu0  ;;  %v4858_v21 = vpop.f32.mrb[36].mxu1 }
0x15ab   : > { %v9171_v48 = vadd.f32 %v4817_v12, %v13550_v36  ;;  %v4819_v16 = vpop.f32.mrb[17].mxu0  ;;  %v8625_v58 = vpop.f32.mrb[37].mxu1  ;;  %v4874_v18 = vadd.f32 %v4858_v21, %v11862_v49  ;;  %v4777_v12 = vadd.f32 %v4776_v37, %v11865_v38 }
0x15ac   : > { %v4821_v1 = vpop.f32.mrb[18].mxu0  ;;  %v4861_v55 = vpop.f32.mrb[38].mxu1  ;;  %v9172_v7 = vadd.f32 %v4819_v16, %v11858_v33  ;;  %v4886_v16 = vstv %s4884_s19  ;;  %s5833_s19 = scalar_select %p5832_p9, 1, 0 }
0x15ad   : > { %v4866_v4 = vmul.f32 0.5, %v9171_v48  ;;  %v4822_v52 = vpop.f32.mrb[19].mxu0  ;;  %v8626_v56 = vpop.f32.mrb[39].mxu1 }
0x15ae   : > { %v4867_v31 = vmul.f32 0.5, %v9172_v7  ;;  %s5834_s30 = scvt.s32.f32 %s5833_s19 }
0x15af   : > { %9441 = vtanh.f32 %v4866_v4  ;;  %v7198_v4 = vld [vmem:[%s9701_s15 + $0x18] sm:$0xf] }
0x15b0   : > { %9443 = vtanh.f32 %v4867_v31 }
0x15b9   : > { %v9442_v17 = vpop.eup %9441 }
0x15ba   : > { %v4870_v23 = vmul.f32 0.5, %v9442_v17  ;;  %v9444_v1 = vpop.eup %9443 }
0x15bb   : > { %v4871_v52 = vmul.f32 0.5, %v9444_v1  ;;  %v13553_v1 = vld [vmem:[#allocation84_spill] sm:$0xff] }
0x15bc   : > { %v4872_v61 = vadd.f32 0.5, %v4870_v23 }
0x15bd   : > { %v4873_v48 = vadd.f32 0.5, %v4871_v52  ;;  %v13554_v52 = vld [vmem:[#allocation86_spill] sm:$0xff] }
0x15be   : > { %v4875_v36 = vmul.f32 %v4874_v18, %v4872_v61 }
0x15c0   : > { %v4876_v58 = vadd.f32 %v4875_v36, %v4777_v12  ;;  %v13551_v12 = vld [vmem:[#allocation83_spill] sm:$0xff] }
0x15c2   : > { %9445 = vtanh.f32 %v4876_v58  ;;  %v13552_v58 = vld [vmem:[#allocation82_spill] sm:$0xff] }
0x15cc   : > { %v9446_v56 = vpop.eup %9445 }
0x15cd   : > { %v4878_v7 = vsub.f32 %v12125_v14, %v9446_v56 }
0x15cf   : > { %v4879_v17 = vmul.f32 %v4878_v7, %v4873_v48  ;;  %v13556_v48 = vld [vmem:[#allocation87_spill] sm:$0xff]  ;;  %v13557_v7 = vld [vmem:[#allocation88_spill] sm:$0xff] }
0x15d1   : > { %v4880_v23 = vadd.f32 %v9446_v56, %v4879_v17  ;;  %v13555_v56 = vld [vmem:[#allocation85_spill] sm:$0xff] }
0x15d2   : > { %v13558_v17 = vld [vmem:[#allocation81_spill] sm:$0xff] }
0x15d3   : > { %v4885_v31 = vsub.f32 %v4880_v23, %v12125_v14 }
0x15d5   : > { %v4887_v21 = vmul.f32 %v4886_v16, %v4885_v31  ;;  %v13559_v31 = vld [vmem:[#allocation89_spill] sm:$0xff] }
0x15d7   : > { %v12208_v37 = vadd.f32 %v4887_v21, %v12125_v14  ;;  %v4966_v14 = vpop.f32.mrb[40].mxu1 }
0x15d8   : > { %v8645_v61 = vpop.f32.mrb[41].mxu1 }
0x15d9   : > { %v4972_v18 = vpack.c.bf16 %v12208_v37, %v12208_v37  ;;  %v4969_v36 = vpop.f32.mrb[42].mxu1 }
0x15da   : > { %v8646_v55 = vpop.f32.mrb[43].mxu1 }
0x15db   : > { %5006 = vmatmul.mubr.bf16.vlgmr.msra.gmra.mrb[20].mxu0 %v4972_v18  ;;  %8664 = vmatmul.mubr.bf16.vlgmr.msra.gmra.mrb[44].mxu1 %v4972_v18 }
0x15dc   : > { %5082 = vmatpush1.bf16.msra.mxu0 %v11521_v3  ;;  %8668 = vmatpush3.bf16.msra.mxu1 %v11530_v43 }
0x15dd   : > { %5083 = vmatprep.subr.bf16.mxu0 %v11525_v39  ;;  %8669 = vmatprep.subr.bf16.mxu1 %v13515_v35 }
0x15de   : > { %5113 = vmatprep.mubr.bf16.mxu0 %v13516_v45  ;;  %8683 = vmatprep.mubr.msk.bf16.mxu1 %vm9574_vm2, %v13515_v35 }
0x15e0   : > { %5084 = vmatpush1.bf16.msra.mxu0 %v11535_v44  ;;  %8670 = vmatpush3.bf16.msra.mxu1 %v11546_v53 }
0x15e1   : > { %5085 = vmatprep.subr.bf16.mxu0 %v11541_v50  ;;  %8671 = vmatprep.subr.bf16.mxu1 %v13515_v35 }
0x15e4   : > { %5086 = vmatpush1.bf16.msra.mxu0 %v11553_v25  ;;  %8672 = vmatpush3.bf16.msra.mxu1 %v11563_v63 }
0x15e5   : > { %5087 = vmatprep.subr.bf16.mxu0 %v11558_v59  ;;  %8673 = vmatprep.subr.bf16.mxu1 %v13515_v35 }
0x15e8   : > { %5088 = vmatpush1.bf16.msra.mxu0 %v11571_v0  ;;  %8674 = vmatpush3.bf16.msra.mxu1 %v11581_v19 }
0x15e9   : > { %5089 = vmatprep.subr.bf16.mxu0 %v11576_v15  ;;  %8675 = vmatprep.subr.bf16.mxu1 %v13515_v35 }
0x15ec   : > { %5090 = vmatpush1.bf16.msra.mxu0 %v11587_v47  ;;  %8676 = vmatpush3.bf16.msra.mxu1 %v11597_v62 }
0x15ed   : > { %5091 = vmatprep.subr.bf16.mxu0 %v11592_v54  ;;  %8677 = vmatprep.subr.bf16.mxu1 %v13515_v35 }
0x15f0   : > { %5092 = vmatpush1.bf16.msra.mxu0 %v11603_v10  ;;  %8678 = vmatpush3.bf16.msra.mxu1 %v11613_v11 }
0x15f1   : > { %5093 = vmatprep.subr.bf16.mxu0 %v11608_v8  ;;  %8679 = vmatprep.subr.bf16.mxu1 %v13515_v35 }
0x15f4   : > { %5094 = vmatpush1.bf16.msra.mxu0 %v11619_v28  ;;  %8680 = vmatpush3.bf16.msra.mxu1 %v11629_v2 }
0x15f5   : > { %5095 = vmatprep.subr.bf16.mxu0 %v11624_v6  ;;  %8681 = vmatprep.subr.bf16.mxu1 %v13515_v35 }
0x15f8   : > { %5096 = vmatpush1.bf16.msra.mxu0 %v11635_v20  ;;  %8682 = vmatpush3.bf16.msra.mxu1 %v11645_v29 }
0x15f9   : > { %5163 = vmatprep.subr.bf16.mxu0 %v11640_v24  ;;  %8687 = vmatprep.subr.bf16.mxu1 %v13515_v35 }
0x15fb   : > { %5114 = vmatmul.mubr.bf16.vlgmr.msra.gmra.mrb[24].mxu0 %v7198_v4  ;;  %8684 = vmatmul.mubr.bf16.vlgmr.msra.gmra.mrb[48].mxu1 %v7198_v4 }
0x15fc   : > { %5164 = vmatpush1.bf16.msra.mxu0 %v11652_v32  ;;  %8688 = vmatpush3.bf16.msra.mxu1 %v11662_v40 }
0x15fd   : > { %5165 = vmatprep.subr.bf16.mxu0 %v11657_v5  ;;  %8689 = vmatprep.subr.bf16.mxu1 %v13515_v35 }
0x15fe   : > { %5195 = vmatprep.mubr.bf16.mxu0 %v13516_v45  ;;  %8703 = vmatprep.mubr.msk.bf16.mxu1 %vm9574_vm2, %v13515_v35 }
0x1600   : > { %5166 = vmatpush1.bf16.msra.mxu0 %v11668_v41  ;;  %8690 = vmatpush3.bf16.msra.mxu1 %v11678_v57 }
0x1601   : > { %5167 = vmatprep.subr.bf16.mxu0 %v11673_v51  ;;  %8691 = vmatprep.subr.bf16.mxu1 %v13515_v35 }
0x1604   : > { %5168 = vmatpush1.bf16.msra.mxu0 %v11687_v60  ;;  %8692 = vmatpush3.bf16.msra.mxu1 %v11697_v42 }
0x1605   : > { %5169 = vmatprep.subr.bf16.mxu0 %v11692_v13  ;;  %8693 = vmatprep.subr.bf16.mxu1 %v13515_v35 }
0x1608   : > { %5170 = vmatpush1.bf16.msra.mxu0 %v11703_v30  ;;  %8694 = vmatpush3.bf16.msra.mxu1 %v11713_v34 }
0x1609   : > { %5171 = vmatprep.subr.bf16.mxu0 %v11708_v46  ;;  %8695 = vmatprep.subr.bf16.mxu1 %v13515_v35 }
0x160c   : > { %5172 = vmatpush1.bf16.msra.mxu0 %v11719_v9  ;;  %8696 = vmatpush3.bf16.msra.mxu1 %v11729_v26 }
0x160d   : > { %5173 = vmatprep.subr.bf16.mxu0 %v11724_v22  ;;  %8697 = vmatprep.subr.bf16.mxu1 %v13515_v35 }
0x1610   : > { %5174 = vmatpush1.bf16.msra.mxu0 %v11735_v27  ;;  %8698 = vmatpush3.bf16.msra.mxu1 %v13551_v12 }
0x1611   : > { %5175 = vmatprep.subr.bf16.mxu0 %v13552_v58  ;;  %8699 = vmatprep.subr.bf16.mxu1 %v13515_v35 }
0x1614   : > { %5176 = vmatpush1.bf16.msra.mxu0 %v13553_v1  ;;  %8700 = vmatpush3.bf16.msra.mxu1 %v13554_v52 }
0x1615   : > { %5177 = vmatprep.subr.bf16.mxu0 %v13555_v56  ;;  %8701 = vmatprep.subr.bf16.mxu1 %v13515_v35 }
0x1618   : > { %5178 = vmatpush1.bf16.msra.mxu0 %v13556_v48  ;;  %8702 = vmatpush3.bf16.msra.mxu1 %v13557_v7 }
0x1619   : > { %5271 = vmatprep.subr.bf16.mxu0 %v13558_v17  ;;  %8707 = vmatprep.subr.bf16.mxu1 %v13515_v35 }
0x16ae   : > { %v5007_v23 = vpop.f32.mrb[20].mxu0  ;;  %v5048_v16 = vpop.f32.mrb[44].mxu1 }
0x16af   : > { %v9173_v21 = vadd.f32 %v5007_v23, %v13559_v31  ;;  %v5009_v18 = vpop.f32.mrb[21].mxu0  ;;  %v8665_v61 = vpop.f32.mrb[45].mxu1  ;;  %v5064_v12 = vadd.f32 %v5048_v16, %v11862_v49  ;;  %v4967_v23 = vadd.f32 %v4966_v14, %v11865_v38 }
0x16b0   : > { %v5011_v36 = vpop.f32.mrb[22].mxu0  ;;  %v5051_v55 = vpop.f32.mrb[46].mxu1  ;;  %v9174_v48 = vadd.f32 %v5009_v18, %v11858_v33  ;;  %v5076_v18 = vstv %s5074_s23  ;;  %s6023_s23 = scalar_select %p6022_p10, 1, 0 }
0x16b1   : > { %v5056_v4 = vmul.f32 0.5, %v9173_v21  ;;  %v5012_v56 = vpop.f32.mrb[23].mxu0  ;;  %v8666_v52 = vpop.f32.mrb[47].mxu1 }
0x16b2   : > { %v5057_v7 = vmul.f32 0.5, %v9174_v48  ;;  %s6024_s8 = scvt.s32.f32 %s6023_s23 }
0x16b3   : > { %9447 = vtanh.f32 %v5056_v4  ;;  %v7199_v4 = vld [vmem:[%s9701_s15 + $0x1c] sm:$0xf]  ;;  %s6973_s23 = scalar_select %p6972_p1, 1, 0 }
0x16b4   : > { %9449 = vtanh.f32 %v5057_v7 }
0x16bd   : > { %v9448_v1 = vpop.eup %9447 }
0x16be   : > { %v5060_v17 = vmul.f32 0.5, %v9448_v1  ;;  %v9450_v36 = vpop.eup %9449 }
0x16bf   : > { %v5061_v56 = vmul.f32 0.5, %v9450_v36  ;;  %v13562_v36 = vld [vmem:[#allocation84_spill] sm:$0xff] }
0x16c0   : > { %v5062_v58 = vadd.f32 0.5, %v5060_v17 }
0x16c1   : > { %v5063_v21 = vadd.f32 0.5, %v5061_v56  ;;  %v13563_v56 = vld [vmem:[#allocation86_spill] sm:$0xff] }
0x16c2   : > { %v5065_v31 = vmul.f32 %v5064_v12, %v5062_v58 }
0x16c4   : > { %v5066_v61 = vadd.f32 %v5065_v31, %v4967_v23  ;;  %v13560_v23 = vld [vmem:[#allocation83_spill] sm:$0xff] }
0x16c6   : > { %9451 = vtanh.f32 %v5066_v61  ;;  %v13561_v61 = vld [vmem:[#allocation82_spill] sm:$0xff] }
0x16d0   : > { %v9452_v52 = vpop.eup %9451 }
0x16d1   : > { %v5068_v48 = vsub.f32 %v12208_v37, %v9452_v52 }
0x16d3   : > { %v5069_v1 = vmul.f32 %v5068_v48, %v5063_v21  ;;  %v13565_v21 = vld [vmem:[#allocation87_spill] sm:$0xff]  ;;  %v13566_v48 = vld [vmem:[#allocation88_spill] sm:$0xff] }
0x16d5   : > { %v5070_v17 = vadd.f32 %v9452_v52, %v5069_v1  ;;  %v13564_v52 = vld [vmem:[#allocation85_spill] sm:$0xff] }
0x16d6   : > { %v13567_v1 = vld [vmem:[#allocation81_spill] sm:$0xff] }
0x16d7   : > { %v5075_v7 = vsub.f32 %v5070_v17, %v12208_v37 }
0x16d9   : > { %v5077_v16 = vmul.f32 %v5076_v18, %v5075_v7  ;;  %v13568_v7 = vld [vmem:[#allocation89_spill] sm:$0xff] }
0x16db   : > { %v12291_v14 = vadd.f32 %v5077_v16, %v12208_v37  ;;  %v5156_v37 = vpop.f32.mrb[48].mxu1 }
0x16dc   : > { %v8685_v58 = vpop.f32.mrb[49].mxu1 }
0x16dd   : > { %v5162_v12 = vpack.c.bf16 %v12291_v14, %v12291_v14  ;;  %v5159_v31 = vpop.f32.mrb[50].mxu1 }
0x16de   : > { %v8686_v55 = vpop.f32.mrb[51].mxu1 }
0x16df   : > { %5196 = vmatmul.mubr.bf16.vlgmr.msra.gmra.mrb[24].mxu0 %v5162_v12  ;;  %8704 = vmatmul.mubr.bf16.vlgmr.msra.gmra.mrb[52].mxu1 %v5162_v12 }
0x16e0   : > { %5272 = vmatpush1.bf16.msra.mxu0 %v11521_v3  ;;  %8708 = vmatpush3.bf16.msra.mxu1 %v11530_v43 }
0x16e1   : > { %5273 = vmatprep.subr.bf16.mxu0 %v11525_v39  ;;  %8709 = vmatprep.subr.bf16.mxu1 %v13515_v35 }
0x16e2   : > { %5303 = vmatprep.mubr.bf16.mxu0 %v13516_v45  ;;  %8723 = vmatprep.mubr.msk.bf16.mxu1 %vm9574_vm2, %v13515_v35 }
0x16e4   : > { %5274 = vmatpush1.bf16.msra.mxu0 %v11535_v44  ;;  %8710 = vmatpush3.bf16.msra.mxu1 %v11546_v53 }
0x16e5   : > { %5275 = vmatprep.subr.bf16.mxu0 %v11541_v50  ;;  %8711 = vmatprep.subr.bf16.mxu1 %v13515_v35 }
0x16e8   : > { %5276 = vmatpush1.bf16.msra.mxu0 %v11553_v25  ;;  %8712 = vmatpush3.bf16.msra.mxu1 %v11563_v63 }
0x16e9   : > { %5277 = vmatprep.subr.bf16.mxu0 %v11558_v59  ;;  %8713 = vmatprep.subr.bf16.mxu1 %v13515_v35 }
0x16ec   : > { %5278 = vmatpush1.bf16.msra.mxu0 %v11571_v0  ;;  %8714 = vmatpush3.bf16.msra.mxu1 %v11581_v19 }
0x16ed   : > { %5279 = vmatprep.subr.bf16.mxu0 %v11576_v15  ;;  %8715 = vmatprep.subr.bf16.mxu1 %v13515_v35 }
0x16f0   : > { %5280 = vmatpush1.bf16.msra.mxu0 %v11587_v47  ;;  %8716 = vmatpush3.bf16.msra.mxu1 %v11597_v62 }
0x16f1   : > { %5281 = vmatprep.subr.bf16.mxu0 %v11592_v54  ;;  %8717 = vmatprep.subr.bf16.mxu1 %v13515_v35 }
0x16f4   : > { %5282 = vmatpush1.bf16.msra.mxu0 %v11603_v10  ;;  %8718 = vmatpush3.bf16.msra.mxu1 %v11613_v11 }
0x16f5   : > { %5283 = vmatprep.subr.bf16.mxu0 %v11608_v8  ;;  %8719 = vmatprep.subr.bf16.mxu1 %v13515_v35 }
0x16f8   : > { %5284 = vmatpush1.bf16.msra.mxu0 %v11619_v28  ;;  %8720 = vmatpush3.bf16.msra.mxu1 %v11629_v2 }
0x16f9   : > { %5285 = vmatprep.subr.bf16.mxu0 %v11624_v6  ;;  %8721 = vmatprep.subr.bf16.mxu1 %v13515_v35 }
0x16fc   : > { %5286 = vmatpush1.bf16.msra.mxu0 %v11635_v20  ;;  %8722 = vmatpush3.bf16.msra.mxu1 %v11645_v29 }
0x16fd   : > { %5353 = vmatprep.subr.bf16.mxu0 %v11640_v24  ;;  %8727 = vmatprep.subr.bf16.mxu1 %v13515_v35 }
0x16ff   : > { %5304 = vmatmul.mubr.bf16.vlgmr.msra.gmra.mrb[28].mxu0 %v7199_v4  ;;  %8724 = vmatmul.mubr.bf16.vlgmr.msra.gmra.mrb[56].mxu1 %v7199_v4 }
0x1700   : > { %5354 = vmatpush1.bf16.msra.mxu0 %v11652_v32  ;;  %8728 = vmatpush3.bf16.msra.mxu1 %v11662_v40 }
0x1701   : > { %5355 = vmatprep.subr.bf16.mxu0 %v11657_v5  ;;  %8729 = vmatprep.subr.bf16.mxu1 %v13515_v35 }
0x1702   : > { %5385 = vmatprep.mubr.bf16.mxu0 %v13516_v45  ;;  %8743 = vmatprep.mubr.msk.bf16.mxu1 %vm9574_vm2, %v13515_v35 }
0x1704   : > { %5356 = vmatpush1.bf16.msra.mxu0 %v11668_v41  ;;  %8730 = vmatpush3.bf16.msra.mxu1 %v11678_v57 }
0x1705   : > { %5357 = vmatprep.subr.bf16.mxu0 %v11673_v51  ;;  %8731 = vmatprep.subr.bf16.mxu1 %v13515_v35 }
0x1708   : > { %5358 = vmatpush1.bf16.msra.mxu0 %v11687_v60  ;;  %8732 = vmatpush3.bf16.msra.mxu1 %v11697_v42 }
0x1709   : > { %5359 = vmatprep.subr.bf16.mxu0 %v11692_v13  ;;  %8733 = vmatprep.subr.bf16.mxu1 %v13515_v35 }
0x170c   : > { %5360 = vmatpush1.bf16.msra.mxu0 %v11703_v30  ;;  %8734 = vmatpush3.bf16.msra.mxu1 %v11713_v34 }
0x170d   : > { %5361 = vmatprep.subr.bf16.mxu0 %v11708_v46  ;;  %8735 = vmatprep.subr.bf16.mxu1 %v13515_v35 }
0x1710   : > { %5362 = vmatpush1.bf16.msra.mxu0 %v11719_v9  ;;  %8736 = vmatpush3.bf16.msra.mxu1 %v11729_v26 }
0x1711   : > { %5363 = vmatprep.subr.bf16.mxu0 %v11724_v22  ;;  %8737 = vmatprep.subr.bf16.mxu1 %v13515_v35 }
0x1714   : > { %5364 = vmatpush1.bf16.msra.mxu0 %v11735_v27  ;;  %8738 = vmatpush3.bf16.msra.mxu1 %v13560_v23 }
0x1715   : > { %5365 = vmatprep.subr.bf16.mxu0 %v13561_v61  ;;  %8739 = vmatprep.subr.bf16.mxu1 %v13515_v35 }
0x1718   : > { %5366 = vmatpush1.bf16.msra.mxu0 %v13562_v36  ;;  %8740 = vmatpush3.bf16.msra.mxu1 %v13563_v56 }
0x1719   : > { %5367 = vmatprep.subr.bf16.mxu0 %v13564_v52  ;;  %8741 = vmatprep.subr.bf16.mxu1 %v13515_v35 }
0x171c   : > { %5368 = vmatpush1.bf16.msra.mxu0 %v13565_v21  ;;  %8742 = vmatpush3.bf16.msra.mxu1 %v13566_v48 }
0x171d   : > { %5461 = vmatprep.subr.bf16.mxu0 %v13567_v1  ;;  %8747 = vmatprep.subr.bf16.mxu1 %v13515_v35 }
0x17b2   : > { %v5197_v17 = vpop.f32.mrb[24].mxu0  ;;  %v5238_v18 = vpop.f32.mrb[52].mxu1 }
0x17b3   : > { %v9175_v16 = vadd.f32 %v5197_v17, %v13568_v7  ;;  %v5199_v12 = vpop.f32.mrb[25].mxu0  ;;  %v8705_v58 = vpop.f32.mrb[53].mxu1  ;;  %v5254_v23 = vadd.f32 %v5238_v18, %v11862_v49  ;;  %v5157_v17 = vadd.f32 %v5156_v37, %v11865_v38 }
0x17b4   : > { %v5201_v31 = vpop.f32.mrb[26].mxu0  ;;  %v5241_v55 = vpop.f32.mrb[54].mxu1  ;;  %v9176_v21 = vadd.f32 %v5199_v12, %v11858_v33  ;;  %v5266_v12 = vstv %s5264_s11  ;;  %s6213_s11 = scalar_select %p6212_p11, 1, 0 }
0x17b5   : > { %v5246_v4 = vmul.f32 0.5, %v9175_v16  ;;  %v5202_v52 = vpop.f32.mrb[27].mxu0  ;;  %v8706_v56 = vpop.f32.mrb[55].mxu1 }
0x17b6   : > { %v5247_v48 = vmul.f32 0.5, %v9176_v21  ;;  %s6214_s12 = scvt.s32.f32 %s6213_s11 }
0x17b7   : > { %9453 = vtanh.f32 %v5246_v4  ;;  %v7200_v4 = vld [vmem:[%s9701_s15 + $0x20] sm:$0xf] }
0x17b8   : > { %9455 = vtanh.f32 %v5247_v48 }
0x17c1   : > { %v9454_v36 = vpop.eup %9453 }
0x17c2   : > { %v5250_v1 = vmul.f32 0.5, %v9454_v36  ;;  %v9456_v31 = vpop.eup %9455 }
0x17c3   : > { %v5251_v52 = vmul.f32 0.5, %v9456_v31  ;;  %v13571_v31 = vld [vmem:[#allocation84_spill] sm:$0xff] }
0x17c4   : > { %v5252_v61 = vadd.f32 0.5, %v5250_v1 }
0x17c5   : > { %v5253_v16 = vadd.f32 0.5, %v5251_v52  ;;  %v13572_v52 = vld [vmem:[#allocation86_spill] sm:$0xff] }
0x17c6   : > { %v5255_v7 = vmul.f32 %v5254_v23, %v5252_v61 }
0x17c8   : > { %v5256_v58 = vadd.f32 %v5255_v7, %v5157_v17  ;;  %v13569_v17 = vld [vmem:[#allocation83_spill] sm:$0xff] }
0x17ca   : > { %9457 = vtanh.f32 %v5256_v58  ;;  %v13570_v58 = vld [vmem:[#allocation82_spill] sm:$0xff] }
0x17d4   : > { %v9458_v56 = vpop.eup %9457 }
0x17d5   : > { %v5258_v21 = vsub.f32 %v12291_v14, %v9458_v56 }
0x17d7   : > { %v5259_v36 = vmul.f32 %v5258_v21, %v5253_v16  ;;  %v13574_v16 = vld [vmem:[#allocation87_spill] sm:$0xff]  ;;  %v13575_v21 = vld [vmem:[#allocation88_spill] sm:$0xff] }
0x17d9   : > { %v5260_v1 = vadd.f32 %v9458_v56, %v5259_v36  ;;  %v13573_v56 = vld [vmem:[#allocation85_spill] sm:$0xff] }
0x17da   : > { %v13576_v36 = vld [vmem:[#allocation81_spill] sm:$0xff] }
0x17db   : > { %v5265_v48 = vsub.f32 %v5260_v1, %v12291_v14 }
0x17dd   : > { %v5267_v18 = vmul.f32 %v5266_v12, %v5265_v48  ;;  %v13577_v48 = vld [vmem:[#allocation89_spill] sm:$0xff] }
0x17df   : > { %v12374_v37 = vadd.f32 %v5267_v18, %v12291_v14  ;;  %v5346_v14 = vpop.f32.mrb[56].mxu1 }
0x17e0   : > { %v8725_v61 = vpop.f32.mrb[57].mxu1 }
0x17e1   : > { %v5352_v23 = vpack.c.bf16 %v12374_v37, %v12374_v37  ;;  %v5349_v7 = vpop.f32.mrb[58].mxu1 }
0x17e2   : > { %v8726_v55 = vpop.f32.mrb[59].mxu1 }
0x17e3   : > { %5386 = vmatmul.mubr.bf16.vlgmr.msra.gmra.mrb[28].mxu0 %v5352_v23  ;;  %8744 = vmatmul.mubr.bf16.vlgmr.msra.gmra.mrb[60].mxu1 %v5352_v23 }
0x17e4   : > { %5462 = vmatpush1.bf16.msra.mxu0 %v11521_v3  ;;  %8748 = vmatpush3.bf16.msra.mxu1 %v11530_v43 }
0x17e5   : > { %5463 = vmatprep.subr.bf16.mxu0 %v11525_v39  ;;  %8749 = vmatprep.subr.bf16.mxu1 %v13515_v35 }
0x17e6   : > { %5493 = vmatprep.mubr.bf16.mxu0 %v13516_v45  ;;  %8763 = vmatprep.mubr.msk.bf16.mxu1 %vm9574_vm2, %v13515_v35 }
0x17e8   : > { %5464 = vmatpush1.bf16.msra.mxu0 %v11535_v44  ;;  %8750 = vmatpush3.bf16.msra.mxu1 %v11546_v53 }
0x17e9   : > { %5465 = vmatprep.subr.bf16.mxu0 %v11541_v50  ;;  %8751 = vmatprep.subr.bf16.mxu1 %v13515_v35 }
0x17ec   : > { %5466 = vmatpush1.bf16.msra.mxu0 %v11553_v25  ;;  %8752 = vmatpush3.bf16.msra.mxu1 %v11563_v63 }
0x17ed   : > { %5467 = vmatprep.subr.bf16.mxu0 %v11558_v59  ;;  %8753 = vmatprep.subr.bf16.mxu1 %v13515_v35 }
0x17f0   : > { %5468 = vmatpush1.bf16.msra.mxu0 %v11571_v0  ;;  %8754 = vmatpush3.bf16.msra.mxu1 %v11581_v19 }
0x17f1   : > { %5469 = vmatprep.subr.bf16.mxu0 %v11576_v15  ;;  %8755 = vmatprep.subr.bf16.mxu1 %v13515_v35 }
0x17f4   : > { %5470 = vmatpush1.bf16.msra.mxu0 %v11587_v47  ;;  %8756 = vmatpush3.bf16.msra.mxu1 %v11597_v62 }
0x17f5   : > { %5471 = vmatprep.subr.bf16.mxu0 %v11592_v54  ;;  %8757 = vmatprep.subr.bf16.mxu1 %v13515_v35 }
0x17f8   : > { %5472 = vmatpush1.bf16.msra.mxu0 %v11603_v10  ;;  %8758 = vmatpush3.bf16.msra.mxu1 %v11613_v11 }
0x17f9   : > { %5473 = vmatprep.subr.bf16.mxu0 %v11608_v8  ;;  %8759 = vmatprep.subr.bf16.mxu1 %v13515_v35 }
0x17fc   : > { %5474 = vmatpush1.bf16.msra.mxu0 %v11619_v28  ;;  %8760 = vmatpush3.bf16.msra.mxu1 %v11629_v2 }
0x17fd   : > { %5475 = vmatprep.subr.bf16.mxu0 %v11624_v6  ;;  %8761 = vmatprep.subr.bf16.mxu1 %v13515_v35 }
0x1800   : > { %5476 = vmatpush1.bf16.msra.mxu0 %v11635_v20  ;;  %8762 = vmatpush3.bf16.msra.mxu1 %v11645_v29 }
0x1801   : > { %5543 = vmatprep.subr.bf16.mxu0 %v11640_v24  ;;  %8767 = vmatprep.subr.bf16.mxu1 %v13515_v35 }
0x1803   : > { %5494 = vmatmul.mubr.bf16.vlgmr.msra.gmra.mrb[32].mxu0 %v7200_v4  ;;  %8764 = vmatmul.mubr.bf16.vlgmr.msra.gmra.mrb[64].mxu1 %v7200_v4 }
0x1804   : > { %5544 = vmatpush1.bf16.msra.mxu0 %v11652_v32  ;;  %8768 = vmatpush3.bf16.msra.mxu1 %v11662_v40 }
0x1805   : > { %5545 = vmatprep.subr.bf16.mxu0 %v11657_v5  ;;  %8769 = vmatprep.subr.bf16.mxu1 %v13515_v35 }
0x1806   : > { %5575 = vmatprep.mubr.bf16.mxu0 %v13516_v45  ;;  %8783 = vmatprep.mubr.msk.bf16.mxu1 %vm9574_vm2, %v13515_v35 }
0x1808   : > { %5546 = vmatpush1.bf16.msra.mxu0 %v11668_v41  ;;  %8770 = vmatpush3.bf16.msra.mxu1 %v11678_v57 }
0x1809   : > { %5547 = vmatprep.subr.bf16.mxu0 %v11673_v51  ;;  %8771 = vmatprep.subr.bf16.mxu1 %v13515_v35 }
0x180c   : > { %5548 = vmatpush1.bf16.msra.mxu0 %v11687_v60  ;;  %8772 = vmatpush3.bf16.msra.mxu1 %v11697_v42 }
0x180d   : > { %5549 = vmatprep.subr.bf16.mxu0 %v11692_v13  ;;  %8773 = vmatprep.subr.bf16.mxu1 %v13515_v35 }
0x1810   : > { %5550 = vmatpush1.bf16.msra.mxu0 %v11703_v30  ;;  %8774 = vmatpush3.bf16.msra.mxu1 %v11713_v34 }
0x1811   : > { %5551 = vmatprep.subr.bf16.mxu0 %v11708_v46  ;;  %8775 = vmatprep.subr.bf16.mxu1 %v13515_v35 }
0x1814   : > { %5552 = vmatpush1.bf16.msra.mxu0 %v11719_v9  ;;  %8776 = vmatpush3.bf16.msra.mxu1 %v11729_v26 }
0x1815   : > { %5553 = vmatprep.subr.bf16.mxu0 %v11724_v22  ;;  %8777 = vmatprep.subr.bf16.mxu1 %v13515_v35 }
0x1818   : > { %5554 = vmatpush1.bf16.msra.mxu0 %v11735_v27  ;;  %8778 = vmatpush3.bf16.msra.mxu1 %v13569_v17 }
0x1819   : > { %5555 = vmatprep.subr.bf16.mxu0 %v13570_v58  ;;  %8779 = vmatprep.subr.bf16.mxu1 %v13515_v35 }
0x181c   : > { %5556 = vmatpush1.bf16.msra.mxu0 %v13571_v31  ;;  %8780 = vmatpush3.bf16.msra.mxu1 %v13572_v52 }
0x181d   : > { %5557 = vmatprep.subr.bf16.mxu0 %v13573_v56  ;;  %8781 = vmatprep.subr.bf16.mxu1 %v13515_v35 }
0x1820   : > { %5558 = vmatpush1.bf16.msra.mxu0 %v13574_v16  ;;  %8782 = vmatpush3.bf16.msra.mxu1 %v13575_v21 }
0x1821   : > { %5651 = vmatprep.subr.bf16.mxu0 %v13576_v36  ;;  %8787 = vmatprep.subr.bf16.mxu1 %v13515_v35 }
0x18b6   : > { %v5387_v1 = vpop.f32.mrb[28].mxu0  ;;  %v5428_v12 = vpop.f32.mrb[60].mxu1 }
0x18b7   : > { %v9177_v18 = vadd.f32 %v5387_v1, %v13577_v48  ;;  %v5389_v23 = vpop.f32.mrb[29].mxu0  ;;  %v8745_v61 = vpop.f32.mrb[61].mxu1  ;;  %v5444_v17 = vadd.f32 %v5428_v12, %v11862_v49  ;;  %v5347_v1 = vadd.f32 %v5346_v14, %v11865_v38 }
0x18b8   : > { %v5391_v7 = vpop.f32.mrb[30].mxu0  ;;  %v5431_v55 = vpop.f32.mrb[62].mxu1  ;;  %v9178_v16 = vadd.f32 %v5389_v23, %v11858_v33  ;;  %v5456_v23 = vstv %s5454_s21  ;;  %s6403_s21 = scalar_select %p6402_p12, 1, 0 }
0x18b9   : > { %v5436_v4 = vmul.f32 0.5, %v9177_v18  ;;  %v5392_v56 = vpop.f32.mrb[31].mxu0  ;;  %v8746_v52 = vpop.f32.mrb[63].mxu1 }
0x18ba   : > { %v5437_v21 = vmul.f32 0.5, %v9178_v16  ;;  %s6404_s24 = scvt.s32.f32 %s6403_s21 }
0x18bb   : > { %9459 = vtanh.f32 %v5436_v4  ;;  %v7201_v4 = vld [vmem:[%s9701_s15 + $0x24] sm:$0xf] }
0x18bc   : > { %9461 = vtanh.f32 %v5437_v21 }
0x18c5   : > { %v9460_v31 = vpop.eup %9459 }
0x18c6   : > { %v5440_v36 = vmul.f32 0.5, %v9460_v31  ;;  %v9462_v7 = vpop.eup %9461 }
0x18c7   : > { %v5441_v56 = vmul.f32 0.5, %v9462_v7  ;;  %v13580_v7 = vld [vmem:[#allocation84_spill] sm:$0xff] }
0x18c8   : > { %v5442_v58 = vadd.f32 0.5, %v5440_v36 }
0x18c9   : > { %v5443_v18 = vadd.f32 0.5, %v5441_v56  ;;  %v13581_v56 = vld [vmem:[#allocation86_spill] sm:$0xff] }
0x18ca   : > { %v5445_v48 = vmul.f32 %v5444_v17, %v5442_v58 }
0x18cc   : > { %v5446_v61 = vadd.f32 %v5445_v48, %v5347_v1  ;;  %v13578_v1 = vld [vmem:[#allocation83_spill] sm:$0xff] }
0x18ce   : > { %9463 = vtanh.f32 %v5446_v61  ;;  %v13579_v61 = vld [vmem:[#allocation82_spill] sm:$0xff] }
0x18d8   : > { %v9464_v52 = vpop.eup %9463 }
0x18d9   : > { %v5448_v16 = vsub.f32 %v12374_v37, %v9464_v52 }
0x18db   : > { %v5449_v31 = vmul.f32 %v5448_v16, %v5443_v18  ;;  %v13583_v18 = vld [vmem:[#allocation87_spill] sm:$0xff]  ;;  %v13584_v16 = vld [vmem:[#allocation88_spill] sm:$0xff] }
0x18dd   : > { %v5450_v36 = vadd.f32 %v9464_v52, %v5449_v31  ;;  %v13582_v52 = vld [vmem:[#allocation85_spill] sm:$0xff] }
0x18de   : > { %v13585_v31 = vld [vmem:[#allocation81_spill] sm:$0xff] }
0x18df   : > { %v5455_v21 = vsub.f32 %v5450_v36, %v12374_v37 }
0x18e1   : > { %v5457_v12 = vmul.f32 %v5456_v23, %v5455_v21  ;;  %v13586_v21 = vld [vmem:[#allocation89_spill] sm:$0xff] }
0x18e3   : > { %v12457_v14 = vadd.f32 %v5457_v12, %v12374_v37  ;;  %v5536_v37 = vpop.f32.mrb[64].mxu1 }
0x18e4   : > { %v8765_v58 = vpop.f32.mrb[65].mxu1 }
0x18e5   : > { %v5542_v17 = vpack.c.bf16 %v12457_v14, %v12457_v14  ;;  %v5539_v48 = vpop.f32.mrb[66].mxu1 }
0x18e6   : > { %v8766_v55 = vpop.f32.mrb[67].mxu1 }
0x18e7   : > { %5576 = vmatmul.mubr.bf16.vlgmr.msra.gmra.mrb[32].mxu0 %v5542_v17  ;;  %8784 = vmatmul.mubr.bf16.vlgmr.msra.gmra.mrb[68].mxu1 %v5542_v17 }
0x18e8   : > { %5652 = vmatpush1.bf16.msra.mxu0 %v11521_v3  ;;  %8788 = vmatpush3.bf16.msra.mxu1 %v11530_v43 }
0x18e9   : > { %5653 = vmatprep.subr.bf16.mxu0 %v11525_v39  ;;  %8789 = vmatprep.subr.bf16.mxu1 %v13515_v35 }
0x18ea   : > { %5683 = vmatprep.mubr.bf16.mxu0 %v13516_v45  ;;  %8803 = vmatprep.mubr.msk.bf16.mxu1 %vm9574_vm2, %v13515_v35 }
0x18ec   : > { %5654 = vmatpush1.bf16.msra.mxu0 %v11535_v44  ;;  %8790 = vmatpush3.bf16.msra.mxu1 %v11546_v53 }
0x18ed   : > { %5655 = vmatprep.subr.bf16.mxu0 %v11541_v50  ;;  %8791 = vmatprep.subr.bf16.mxu1 %v13515_v35 }
0x18f0   : > { %5656 = vmatpush1.bf16.msra.mxu0 %v11553_v25  ;;  %8792 = vmatpush3.bf16.msra.mxu1 %v11563_v63 }
0x18f1   : > { %5657 = vmatprep.subr.bf16.mxu0 %v11558_v59  ;;  %8793 = vmatprep.subr.bf16.mxu1 %v13515_v35 }
0x18f4   : > { %5658 = vmatpush1.bf16.msra.mxu0 %v11571_v0  ;;  %8794 = vmatpush3.bf16.msra.mxu1 %v11581_v19 }
0x18f5   : > { %5659 = vmatprep.subr.bf16.mxu0 %v11576_v15  ;;  %8795 = vmatprep.subr.bf16.mxu1 %v13515_v35 }
0x18f8   : > { %5660 = vmatpush1.bf16.msra.mxu0 %v11587_v47  ;;  %8796 = vmatpush3.bf16.msra.mxu1 %v11597_v62 }
0x18f9   : > { %5661 = vmatprep.subr.bf16.mxu0 %v11592_v54  ;;  %8797 = vmatprep.subr.bf16.mxu1 %v13515_v35 }
0x18fc   : > { %5662 = vmatpush1.bf16.msra.mxu0 %v11603_v10  ;;  %8798 = vmatpush3.bf16.msra.mxu1 %v11613_v11 }
0x18fd   : > { %5663 = vmatprep.subr.bf16.mxu0 %v11608_v8  ;;  %8799 = vmatprep.subr.bf16.mxu1 %v13515_v35 }
0x1900   : > { %5664 = vmatpush1.bf16.msra.mxu0 %v11619_v28  ;;  %8800 = vmatpush3.bf16.msra.mxu1 %v11629_v2 }
0x1901   : > { %5665 = vmatprep.subr.bf16.mxu0 %v11624_v6  ;;  %8801 = vmatprep.subr.bf16.mxu1 %v13515_v35 }
0x1904   : > { %5666 = vmatpush1.bf16.msra.mxu0 %v11635_v20  ;;  %8802 = vmatpush3.bf16.msra.mxu1 %v11645_v29 }
0x1905   : > { %5733 = vmatprep.subr.bf16.mxu0 %v11640_v24  ;;  %8807 = vmatprep.subr.bf16.mxu1 %v13515_v35 }
0x1907   : > { %5684 = vmatmul.mubr.bf16.vlgmr.msra.gmra.mrb[36].mxu0 %v7201_v4  ;;  %8804 = vmatmul.mubr.bf16.vlgmr.msra.gmra.mrb[72].mxu1 %v7201_v4 }
0x1908   : > { %5734 = vmatpush1.bf16.msra.mxu0 %v11652_v32  ;;  %8808 = vmatpush3.bf16.msra.mxu1 %v11662_v40 }
0x1909   : > { %5735 = vmatprep.subr.bf16.mxu0 %v11657_v5  ;;  %8809 = vmatprep.subr.bf16.mxu1 %v13515_v35 }
0x190a   : > { %5765 = vmatprep.mubr.bf16.mxu0 %v13516_v45  ;;  %8823 = vmatprep.mubr.msk.bf16.mxu1 %vm9574_vm2, %v13515_v35 }
0x190c   : > { %5736 = vmatpush1.bf16.msra.mxu0 %v11668_v41  ;;  %8810 = vmatpush3.bf16.msra.mxu1 %v11678_v57 }
0x190d   : > { %5737 = vmatprep.subr.bf16.mxu0 %v11673_v51  ;;  %8811 = vmatprep.subr.bf16.mxu1 %v13515_v35 }
0x1910   : > { %5738 = vmatpush1.bf16.msra.mxu0 %v11687_v60  ;;  %8812 = vmatpush3.bf16.msra.mxu1 %v11697_v42 }
0x1911   : > { %5739 = vmatprep.subr.bf16.mxu0 %v11692_v13  ;;  %8813 = vmatprep.subr.bf16.mxu1 %v13515_v35 }
0x1914   : > { %5740 = vmatpush1.bf16.msra.mxu0 %v11703_v30  ;;  %8814 = vmatpush3.bf16.msra.mxu1 %v11713_v34 }
0x1915   : > { %5741 = vmatprep.subr.bf16.mxu0 %v11708_v46  ;;  %8815 = vmatprep.subr.bf16.mxu1 %v13515_v35 }
0x1918   : > { %5742 = vmatpush1.bf16.msra.mxu0 %v11719_v9  ;;  %8816 = vmatpush3.bf16.msra.mxu1 %v11729_v26 }
0x1919   : > { %5743 = vmatprep.subr.bf16.mxu0 %v11724_v22  ;;  %8817 = vmatprep.subr.bf16.mxu1 %v13515_v35 }
0x191c   : > { %5744 = vmatpush1.bf16.msra.mxu0 %v11735_v27  ;;  %8818 = vmatpush3.bf16.msra.mxu1 %v13578_v1 }
0x191d   : > { %5745 = vmatprep.subr.bf16.mxu0 %v13579_v61  ;;  %8819 = vmatprep.subr.bf16.mxu1 %v13515_v35 }
0x1920   : > { %5746 = vmatpush1.bf16.msra.mxu0 %v13580_v7  ;;  %8820 = vmatpush3.bf16.msra.mxu1 %v13581_v56 }
0x1921   : > { %5747 = vmatprep.subr.bf16.mxu0 %v13582_v52  ;;  %8821 = vmatprep.subr.bf16.mxu1 %v13515_v35 }
0x1924   : > { %5748 = vmatpush1.bf16.msra.mxu0 %v13583_v18  ;;  %8822 = vmatpush3.bf16.msra.mxu1 %v13584_v16 }
0x1925   : > { %5841 = vmatprep.subr.bf16.mxu0 %v13585_v31  ;;  %8827 = vmatprep.subr.bf16.mxu1 %v13515_v35 }
0x19ba   : > { %v5577_v36 = vpop.f32.mrb[32].mxu0  ;;  %v5618_v23 = vpop.f32.mrb[68].mxu1 }
0x19bb   : > { %v9179_v12 = vadd.f32 %v5577_v36, %v13586_v21  ;;  %v5579_v17 = vpop.f32.mrb[33].mxu0  ;;  %v8785_v58 = vpop.f32.mrb[69].mxu1  ;;  %v5634_v1 = vadd.f32 %v5618_v23, %v11862_v49  ;;  %v5537_v36 = vadd.f32 %v5536_v37, %v11865_v38 }
0x19bc   : > { %v5581_v48 = vpop.f32.mrb[34].mxu0  ;;  %v5621_v55 = vpop.f32.mrb[70].mxu1  ;;  %v9180_v18 = vadd.f32 %v5579_v17, %v11858_v33  ;;  %v5646_v17 = vstv %s5644_s17  ;;  %s6593_s17 = scalar_select %p6592_p13, 1, 0 }
0x19bd   : > { %v5626_v4 = vmul.f32 0.5, %v9179_v12  ;;  %v5582_v52 = vpop.f32.mrb[35].mxu0  ;;  %v8786_v56 = vpop.f32.mrb[71].mxu1 }
0x19be   : > { %v5627_v16 = vmul.f32 0.5, %v9180_v18  ;;  %s6594_s18 = scvt.s32.f32 %s6593_s17 }
0x19bf   : > { %9465 = vtanh.f32 %v5626_v4  ;;  %v7202_v4 = vld [vmem:[%s9701_s15 + $0x28] sm:$0xf] }
0x19c0   : > { %9467 = vtanh.f32 %v5627_v16 }
0x19c9   : > { %v9466_v7 = vpop.eup %9465 }
0x19ca   : > { %v5630_v31 = vmul.f32 0.5, %v9466_v7  ;;  %v9468_v48 = vpop.eup %9467 }
0x19cb   : > { %v5631_v52 = vmul.f32 0.5, %v9468_v48  ;;  %v13589_v48 = vld [vmem:[#allocation84_spill] sm:$0xff] }
0x19cc   : > { %v5632_v61 = vadd.f32 0.5, %v5630_v31 }
0x19cd   : > { %v5633_v12 = vadd.f32 0.5, %v5631_v52  ;;  %v13590_v52 = vld [vmem:[#allocation86_spill] sm:$0xff] }
0x19ce   : > { %v5635_v21 = vmul.f32 %v5634_v1, %v5632_v61 }
0x19d0   : > { %v5636_v58 = vadd.f32 %v5635_v21, %v5537_v36  ;;  %v13587_v36 = vld [vmem:[#allocation83_spill] sm:$0xff] }
0x19d2   : > { %9469 = vtanh.f32 %v5636_v58  ;;  %v13588_v58 = vld [vmem:[#allocation82_spill] sm:$0xff] }
0x19dc   : > { %v9470_v56 = vpop.eup %9469 }
0x19dd   : > { %v5638_v18 = vsub.f32 %v12457_v14, %v9470_v56 }
0x19df   : > { %v5639_v7 = vmul.f32 %v5638_v18, %v5633_v12  ;;  %v13592_v12 = vld [vmem:[#allocation87_spill] sm:$0xff]  ;;  %v13593_v18 = vld [vmem:[#allocation88_spill] sm:$0xff] }
0x19e1   : > { %v5640_v31 = vadd.f32 %v9470_v56, %v5639_v7  ;;  %v13591_v56 = vld [vmem:[#allocation85_spill] sm:$0xff] }
0x19e2   : > { %v13594_v7 = vld [vmem:[#allocation81_spill] sm:$0xff] }
0x19e3   : > { %v5645_v16 = vsub.f32 %v5640_v31, %v12457_v14 }
0x19e5   : > { %v5647_v23 = vmul.f32 %v5646_v17, %v5645_v16  ;;  %v13595_v16 = vld [vmem:[#allocation89_spill] sm:$0xff] }
0x19e7   : > { %v12540_v37 = vadd.f32 %v5647_v23, %v12457_v14  ;;  %v5726_v14 = vpop.f32.mrb[72].mxu1 }
0x19e8   : > { %v8805_v61 = vpop.f32.mrb[73].mxu1 }
0x19e9   : > { %v5732_v1 = vpack.c.bf16 %v12540_v37, %v12540_v37  ;;  %v5729_v21 = vpop.f32.mrb[74].mxu1 }
0x19ea   : > { %v8806_v55 = vpop.f32.mrb[75].mxu1 }
0x19eb   : > { %5766 = vmatmul.mubr.bf16.vlgmr.msra.gmra.mrb[36].mxu0 %v5732_v1  ;;  %8824 = vmatmul.mubr.bf16.vlgmr.msra.gmra.mrb[76].mxu1 %v5732_v1 }
0x19ec   : > { %5842 = vmatpush1.bf16.msra.mxu0 %v11521_v3  ;;  %8828 = vmatpush3.bf16.msra.mxu1 %v11530_v43 }
0x19ed   : > { %5843 = vmatprep.subr.bf16.mxu0 %v11525_v39  ;;  %8829 = vmatprep.subr.bf16.mxu1 %v13515_v35 }
0x19ee   : > { %5873 = vmatprep.mubr.bf16.mxu0 %v13516_v45  ;;  %8843 = vmatprep.mubr.msk.bf16.mxu1 %vm9574_vm2, %v13515_v35 }
0x19f0   : > { %5844 = vmatpush1.bf16.msra.mxu0 %v11535_v44  ;;  %8830 = vmatpush3.bf16.msra.mxu1 %v11546_v53 }
0x19f1   : > { %5845 = vmatprep.subr.bf16.mxu0 %v11541_v50  ;;  %8831 = vmatprep.subr.bf16.mxu1 %v13515_v35 }
0x19f4   : > { %5846 = vmatpush1.bf16.msra.mxu0 %v11553_v25  ;;  %8832 = vmatpush3.bf16.msra.mxu1 %v11563_v63 }
0x19f5   : > { %5847 = vmatprep.subr.bf16.mxu0 %v11558_v59  ;;  %8833 = vmatprep.subr.bf16.mxu1 %v13515_v35 }
0x19f8   : > { %5848 = vmatpush1.bf16.msra.mxu0 %v11571_v0  ;;  %8834 = vmatpush3.bf16.msra.mxu1 %v11581_v19 }
0x19f9   : > { %5849 = vmatprep.subr.bf16.mxu0 %v11576_v15  ;;  %8835 = vmatprep.subr.bf16.mxu1 %v13515_v35 }
0x19fc   : > { %5850 = vmatpush1.bf16.msra.mxu0 %v11587_v47  ;;  %8836 = vmatpush3.bf16.msra.mxu1 %v11597_v62 }
0x19fd   : > { %5851 = vmatprep.subr.bf16.mxu0 %v11592_v54  ;;  %8837 = vmatprep.subr.bf16.mxu1 %v13515_v35 }
0x1a00   : > { %5852 = vmatpush1.bf16.msra.mxu0 %v11603_v10  ;;  %8838 = vmatpush3.bf16.msra.mxu1 %v11613_v11 }
0x1a01   : > { %5853 = vmatprep.subr.bf16.mxu0 %v11608_v8  ;;  %8839 = vmatprep.subr.bf16.mxu1 %v13515_v35 }
0x1a04   : > { %5854 = vmatpush1.bf16.msra.mxu0 %v11619_v28  ;;  %8840 = vmatpush3.bf16.msra.mxu1 %v11629_v2 }
0x1a05   : > { %5855 = vmatprep.subr.bf16.mxu0 %v11624_v6  ;;  %8841 = vmatprep.subr.bf16.mxu1 %v13515_v35 }
0x1a08   : > { %5856 = vmatpush1.bf16.msra.mxu0 %v11635_v20  ;;  %8842 = vmatpush3.bf16.msra.mxu1 %v11645_v29 }
0x1a09   : > { %5923 = vmatprep.subr.bf16.mxu0 %v11640_v24  ;;  %8847 = vmatprep.subr.bf16.mxu1 %v13515_v35 }
0x1a0b   : > { %5874 = vmatmul.mubr.bf16.vlgmr.msra.gmra.mrb[40].mxu0 %v7202_v4  ;;  %8844 = vmatmul.mubr.bf16.vlgmr.msra.gmra.mrb[80].mxu1 %v7202_v4 }
0x1a0c   : > { %5924 = vmatpush1.bf16.msra.mxu0 %v11652_v32  ;;  %8848 = vmatpush3.bf16.msra.mxu1 %v11662_v40 }
0x1a0d   : > { %5925 = vmatprep.subr.bf16.mxu0 %v11657_v5  ;;  %8849 = vmatprep.subr.bf16.mxu1 %v13515_v35 }
0x1a0e   : > { %5955 = vmatprep.mubr.bf16.mxu0 %v13516_v45  ;;  %8863 = vmatprep.mubr.msk.bf16.mxu1 %vm9574_vm2, %v13515_v35 }
0x1a10   : > { %5926 = vmatpush1.bf16.msra.mxu0 %v11668_v41  ;;  %8850 = vmatpush3.bf16.msra.mxu1 %v11678_v57 }
0x1a11   : > { %5927 = vmatprep.subr.bf16.mxu0 %v11673_v51  ;;  %8851 = vmatprep.subr.bf16.mxu1 %v13515_v35 }
0x1a14   : > { %5928 = vmatpush1.bf16.msra.mxu0 %v11687_v60  ;;  %8852 = vmatpush3.bf16.msra.mxu1 %v11697_v42 }
0x1a15   : > { %5929 = vmatprep.subr.bf16.mxu0 %v11692_v13  ;;  %8853 = vmatprep.subr.bf16.mxu1 %v13515_v35 }
0x1a18   : > { %5930 = vmatpush1.bf16.msra.mxu0 %v11703_v30  ;;  %8854 = vmatpush3.bf16.msra.mxu1 %v11713_v34 }
0x1a19   : > { %5931 = vmatprep.subr.bf16.mxu0 %v11708_v46  ;;  %8855 = vmatprep.subr.bf16.mxu1 %v13515_v35 }
0x1a1c   : > { %5932 = vmatpush1.bf16.msra.mxu0 %v11719_v9  ;;  %8856 = vmatpush3.bf16.msra.mxu1 %v11729_v26 }
0x1a1d   : > { %5933 = vmatprep.subr.bf16.mxu0 %v11724_v22  ;;  %8857 = vmatprep.subr.bf16.mxu1 %v13515_v35 }
0x1a20   : > { %5934 = vmatpush1.bf16.msra.mxu0 %v11735_v27  ;;  %8858 = vmatpush3.bf16.msra.mxu1 %v13587_v36 }
0x1a21   : > { %5935 = vmatprep.subr.bf16.mxu0 %v13588_v58  ;;  %8859 = vmatprep.subr.bf16.mxu1 %v13515_v35 }
0x1a24   : > { %5936 = vmatpush1.bf16.msra.mxu0 %v13589_v48  ;;  %8860 = vmatpush3.bf16.msra.mxu1 %v13590_v52 }
0x1a25   : > { %5937 = vmatprep.subr.bf16.mxu0 %v13591_v56  ;;  %8861 = vmatprep.subr.bf16.mxu1 %v13515_v35 }
0x1a28   : > { %5938 = vmatpush1.bf16.msra.mxu0 %v13592_v12  ;;  %8862 = vmatpush3.bf16.msra.mxu1 %v13593_v18 }
0x1a29   : > { %6031 = vmatprep.subr.bf16.mxu0 %v13594_v7  ;;  %8867 = vmatprep.subr.bf16.mxu1 %v13515_v35 }
0x1abe   : > { %v5767_v31 = vpop.f32.mrb[36].mxu0  ;;  %v5808_v17 = vpop.f32.mrb[76].mxu1 }
0x1abf   : > { %v9181_v23 = vadd.f32 %v5767_v31, %v13595_v16  ;;  %v5769_v1 = vpop.f32.mrb[37].mxu0  ;;  %v8825_v61 = vpop.f32.mrb[77].mxu1  ;;  %v5824_v36 = vadd.f32 %v5808_v17, %v11862_v49  ;;  %v5727_v31 = vadd.f32 %v5726_v14, %v11865_v38 }
0x1ac0   : > { %v5771_v21 = vpop.f32.mrb[38].mxu0  ;;  %v5811_v55 = vpop.f32.mrb[78].mxu1  ;;  %v9182_v12 = vadd.f32 %v5769_v1, %v11858_v33  ;;  %v5836_v1 = vstv %s5834_s30 }
0x1ac1   : > { %v5816_v4 = vmul.f32 0.5, %v9181_v23  ;;  %v5772_v56 = vpop.f32.mrb[39].mxu0  ;;  %v8826_v52 = vpop.f32.mrb[79].mxu1 }
0x1ac2   : > { %v5817_v18 = vmul.f32 0.5, %v9182_v12 }
0x1ac3   : > { %9471 = vtanh.f32 %v5816_v4  ;;  %v7203_v4 = vld [vmem:[%s9701_s15 + $0x2c] sm:$0xf] }
0x1ac4   : > { %9473 = vtanh.f32 %v5817_v18 }
0x1acd   : > { %v9472_v48 = vpop.eup %9471 }
0x1ace   : > { %v5820_v7 = vmul.f32 0.5, %v9472_v48  ;;  %v9474_v21 = vpop.eup %9473 }
0x1acf   : > { %v5821_v56 = vmul.f32 0.5, %v9474_v21  ;;  %v13598_v21 = vld [vmem:[#allocation84_spill] sm:$0xff] }
0x1ad0   : > { %v5822_v58 = vadd.f32 0.5, %v5820_v7 }
0x1ad1   : > { %v5823_v23 = vadd.f32 0.5, %v5821_v56  ;;  %v13599_v56 = vld [vmem:[#allocation86_spill] sm:$0xff] }
0x1ad2   : > { %v5825_v16 = vmul.f32 %v5824_v36, %v5822_v58 }
0x1ad4   : > { %v5826_v61 = vadd.f32 %v5825_v16, %v5727_v31  ;;  %v13596_v31 = vld [vmem:[#allocation83_spill] sm:$0xff] }
0x1ad6   : > { %9475 = vtanh.f32 %v5826_v61  ;;  %v13597_v61 = vld [vmem:[#allocation82_spill] sm:$0xff] }
0x1ae0   : > { %v9476_v52 = vpop.eup %9475 }
0x1ae1   : > { %v5828_v12 = vsub.f32 %v12540_v37, %v9476_v52 }
0x1ae3   : > { %v5829_v48 = vmul.f32 %v5828_v12, %v5823_v23  ;;  %v13601_v23 = vld [vmem:[#allocation87_spill] sm:$0xff]  ;;  %v13602_v12 = vld [vmem:[#allocation88_spill] sm:$0xff] }
0x1ae5   : > { %v5830_v7 = vadd.f32 %v9476_v52, %v5829_v48  ;;  %v13600_v52 = vld [vmem:[#allocation85_spill] sm:$0xff] }
0x1ae6   : > { %v13603_v48 = vld [vmem:[#allocation81_spill] sm:$0xff] }
0x1ae7   : > { %v5835_v18 = vsub.f32 %v5830_v7, %v12540_v37 }
0x1ae9   : > { %v5837_v17 = vmul.f32 %v5836_v1, %v5835_v18  ;;  %v13604_v18 = vld [vmem:[#allocation89_spill] sm:$0xff] }
0x1aeb   : > { %v12623_v14 = vadd.f32 %v5837_v17, %v12540_v37  ;;  %v5916_v37 = vpop.f32.mrb[80].mxu1 }
0x1aec   : > { %v8845_v58 = vpop.f32.mrb[81].mxu1 }
0x1aed   : > { %v5922_v36 = vpack.c.bf16 %v12623_v14, %v12623_v14  ;;  %v5919_v16 = vpop.f32.mrb[82].mxu1 }
0x1aee   : > { %v8846_v55 = vpop.f32.mrb[83].mxu1 }
0x1aef   : > { %5956 = vmatmul.mubr.bf16.vlgmr.msra.gmra.mrb[40].mxu0 %v5922_v36  ;;  %8864 = vmatmul.mubr.bf16.vlgmr.msra.gmra.mrb[84].mxu1 %v5922_v36 }
0x1af0   : > { %6032 = vmatpush1.bf16.msra.mxu0 %v11521_v3  ;;  %8868 = vmatpush3.bf16.msra.mxu1 %v11530_v43 }
0x1af1   : > { %6033 = vmatprep.subr.bf16.mxu0 %v11525_v39  ;;  %8869 = vmatprep.subr.bf16.mxu1 %v13515_v35 }
0x1af2   : > { %6063 = vmatprep.mubr.bf16.mxu0 %v13516_v45  ;;  %8883 = vmatprep.mubr.msk.bf16.mxu1 %vm9574_vm2, %v13515_v35 }
0x1af4   : > { %6034 = vmatpush1.bf16.msra.mxu0 %v11535_v44  ;;  %8870 = vmatpush3.bf16.msra.mxu1 %v11546_v53 }
0x1af5   : > { %6035 = vmatprep.subr.bf16.mxu0 %v11541_v50  ;;  %8871 = vmatprep.subr.bf16.mxu1 %v13515_v35 }
0x1af8   : > { %6036 = vmatpush1.bf16.msra.mxu0 %v11553_v25  ;;  %8872 = vmatpush3.bf16.msra.mxu1 %v11563_v63 }
0x1af9   : > { %6037 = vmatprep.subr.bf16.mxu0 %v11558_v59  ;;  %8873 = vmatprep.subr.bf16.mxu1 %v13515_v35 }
0x1afc   : > { %6038 = vmatpush1.bf16.msra.mxu0 %v11571_v0  ;;  %8874 = vmatpush3.bf16.msra.mxu1 %v11581_v19 }
0x1afd   : > { %6039 = vmatprep.subr.bf16.mxu0 %v11576_v15  ;;  %8875 = vmatprep.subr.bf16.mxu1 %v13515_v35 }
0x1b00   : > { %6040 = vmatpush1.bf16.msra.mxu0 %v11587_v47  ;;  %8876 = vmatpush3.bf16.msra.mxu1 %v11597_v62 }
0x1b01   : > { %6041 = vmatprep.subr.bf16.mxu0 %v11592_v54  ;;  %8877 = vmatprep.subr.bf16.mxu1 %v13515_v35 }
0x1b04   : > { %6042 = vmatpush1.bf16.msra.mxu0 %v11603_v10  ;;  %8878 = vmatpush3.bf16.msra.mxu1 %v11613_v11 }
0x1b05   : > { %6043 = vmatprep.subr.bf16.mxu0 %v11608_v8  ;;  %8879 = vmatprep.subr.bf16.mxu1 %v13515_v35 }
0x1b08   : > { %6044 = vmatpush1.bf16.msra.mxu0 %v11619_v28  ;;  %8880 = vmatpush3.bf16.msra.mxu1 %v11629_v2 }
0x1b09   : > { %6045 = vmatprep.subr.bf16.mxu0 %v11624_v6  ;;  %8881 = vmatprep.subr.bf16.mxu1 %v13515_v35 }
0x1b0c   : > { %6046 = vmatpush1.bf16.msra.mxu0 %v11635_v20  ;;  %8882 = vmatpush3.bf16.msra.mxu1 %v11645_v29 }
0x1b0d   : > { %6113 = vmatprep.subr.bf16.mxu0 %v11640_v24  ;;  %8887 = vmatprep.subr.bf16.mxu1 %v13515_v35 }
0x1b0f   : > { %6064 = vmatmul.mubr.bf16.vlgmr.msra.gmra.mrb[44].mxu0 %v7203_v4  ;;  %8884 = vmatmul.mubr.bf16.vlgmr.msra.gmra.mrb[88].mxu1 %v7203_v4 }
0x1b10   : > { %6114 = vmatpush1.bf16.msra.mxu0 %v11652_v32  ;;  %8888 = vmatpush3.bf16.msra.mxu1 %v11662_v40 }
0x1b11   : > { %6115 = vmatprep.subr.bf16.mxu0 %v11657_v5  ;;  %8889 = vmatprep.subr.bf16.mxu1 %v13515_v35 }
0x1b12   : > { %6145 = vmatprep.mubr.bf16.mxu0 %v13516_v45  ;;  %8903 = vmatprep.mubr.msk.bf16.mxu1 %vm9574_vm2, %v13515_v35 }
0x1b14   : > { %6116 = vmatpush1.bf16.msra.mxu0 %v11668_v41  ;;  %8890 = vmatpush3.bf16.msra.mxu1 %v11678_v57 }
0x1b15   : > { %6117 = vmatprep.subr.bf16.mxu0 %v11673_v51  ;;  %8891 = vmatprep.subr.bf16.mxu1 %v13515_v35 }
0x1b18   : > { %6118 = vmatpush1.bf16.msra.mxu0 %v11687_v60  ;;  %8892 = vmatpush3.bf16.msra.mxu1 %v11697_v42 }
0x1b19   : > { %6119 = vmatprep.subr.bf16.mxu0 %v11692_v13  ;;  %8893 = vmatprep.subr.bf16.mxu1 %v13515_v35 }
0x1b1c   : > { %6120 = vmatpush1.bf16.msra.mxu0 %v11703_v30  ;;  %8894 = vmatpush3.bf16.msra.mxu1 %v11713_v34 }
0x1b1d   : > { %6121 = vmatprep.subr.bf16.mxu0 %v11708_v46  ;;  %8895 = vmatprep.subr.bf16.mxu1 %v13515_v35 }
0x1b20   : > { %6122 = vmatpush1.bf16.msra.mxu0 %v11719_v9  ;;  %8896 = vmatpush3.bf16.msra.mxu1 %v11729_v26 }
0x1b21   : > { %6123 = vmatprep.subr.bf16.mxu0 %v11724_v22  ;;  %8897 = vmatprep.subr.bf16.mxu1 %v13515_v35 }
0x1b24   : > { %6124 = vmatpush1.bf16.msra.mxu0 %v11735_v27  ;;  %8898 = vmatpush3.bf16.msra.mxu1 %v13596_v31 }
0x1b25   : > { %6125 = vmatprep.subr.bf16.mxu0 %v13597_v61  ;;  %8899 = vmatprep.subr.bf16.mxu1 %v13515_v35 }
0x1b28   : > { %6126 = vmatpush1.bf16.msra.mxu0 %v13598_v21  ;;  %8900 = vmatpush3.bf16.msra.mxu1 %v13599_v56 }
0x1b29   : > { %6127 = vmatprep.subr.bf16.mxu0 %v13600_v52  ;;  %8901 = vmatprep.subr.bf16.mxu1 %v13515_v35 }
0x1b2c   : > { %6128 = vmatpush1.bf16.msra.mxu0 %v13601_v23  ;;  %8902 = vmatpush3.bf16.msra.mxu1 %v13602_v12 }
0x1b2d   : > { %6221 = vmatprep.subr.bf16.mxu0 %v13603_v48  ;;  %8907 = vmatprep.subr.bf16.mxu1 %v13515_v35 }
0x1bc2   : > { %v5957_v7 = vpop.f32.mrb[40].mxu0  ;;  %v5998_v1 = vpop.f32.mrb[84].mxu1 }
0x1bc3   : > { %v9183_v17 = vadd.f32 %v5957_v7, %v13604_v18  ;;  %v5959_v36 = vpop.f32.mrb[41].mxu0  ;;  %v8865_v58 = vpop.f32.mrb[85].mxu1  ;;  %v6014_v31 = vadd.f32 %v5998_v1, %v11862_v49  ;;  %v5917_v7 = vadd.f32 %v5916_v37, %v11865_v38 }
0x1bc4   : > { %v5961_v16 = vpop.f32.mrb[42].mxu0  ;;  %v6001_v55 = vpop.f32.mrb[86].mxu1  ;;  %v9184_v23 = vadd.f32 %v5959_v36, %v11858_v33  ;;  %v6026_v36 = vstv %s6024_s8  ;;  %s6974_s8 = scvt.s32.f32 %s6973_s23 }
0x1bc5   : > { %v6006_v4 = vmul.f32 0.5, %v9183_v17  ;;  %v5962_v52 = vpop.f32.mrb[43].mxu0  ;;  %v8866_v56 = vpop.f32.mrb[87].mxu1 }
0x1bc6   : > { %v6007_v12 = vmul.f32 0.5, %v9184_v23 }
0x1bc7   : > { %9477 = vtanh.f32 %v6006_v4  ;;  %v7204_v4 = vld [vmem:[%s9701_s15 + $0x30] sm:$0xf] }
0x1bc8   : > { %9479 = vtanh.f32 %v6007_v12 }
0x1bd1   : > { %v9478_v21 = vpop.eup %9477 }
0x1bd2   : > { %v6010_v48 = vmul.f32 0.5, %v9478_v21  ;;  %v9480_v16 = vpop.eup %9479 }
0x1bd3   : > { %v6011_v52 = vmul.f32 0.5, %v9480_v16  ;;  %v13607_v16 = vld [vmem:[#allocation84_spill] sm:$0xff] }
0x1bd4   : > { %v6012_v61 = vadd.f32 0.5, %v6010_v48 }
0x1bd5   : > { %v6013_v17 = vadd.f32 0.5, %v6011_v52  ;;  %v13608_v52 = vld [vmem:[#allocation86_spill] sm:$0xff] }
0x1bd6   : > { %v6015_v18 = vmul.f32 %v6014_v31, %v6012_v61 }
0x1bd8   : > { %v6016_v58 = vadd.f32 %v6015_v18, %v5917_v7  ;;  %v13605_v7 = vld [vmem:[#allocation83_spill] sm:$0xff] }
0x1bda   : > { %9481 = vtanh.f32 %v6016_v58  ;;  %v13606_v58 = vld [vmem:[#allocation82_spill] sm:$0xff] }
0x1be4   : > { %v9482_v56 = vpop.eup %9481 }
0x1be5   : > { %v6018_v23 = vsub.f32 %v12623_v14, %v9482_v56 }
0x1be7   : > { %v6019_v21 = vmul.f32 %v6018_v23, %v6013_v17  ;;  %v13610_v17 = vld [vmem:[#allocation87_spill] sm:$0xff]  ;;  %v13611_v23 = vld [vmem:[#allocation88_spill] sm:$0xff] }
0x1be9   : > { %v6020_v48 = vadd.f32 %v9482_v56, %v6019_v21  ;;  %v13609_v56 = vld [vmem:[#allocation85_spill] sm:$0xff] }
0x1bea   : > { %v13612_v21 = vld [vmem:[#allocation81_spill] sm:$0xff] }
0x1beb   : > { %v6025_v12 = vsub.f32 %v6020_v48, %v12623_v14 }
0x1bed   : > { %v6027_v1 = vmul.f32 %v6026_v36, %v6025_v12  ;;  %v13613_v12 = vld [vmem:[#allocation89_spill] sm:$0xff] }
0x1bef   : > { %v12706_v37 = vadd.f32 %v6027_v1, %v12623_v14  ;;  %v6106_v14 = vpop.f32.mrb[88].mxu1 }
0x1bf0   : > { %v8885_v61 = vpop.f32.mrb[89].mxu1 }
0x1bf1   : > { %v6112_v31 = vpack.c.bf16 %v12706_v37, %v12706_v37  ;;  %v6109_v18 = vpop.f32.mrb[90].mxu1 }
0x1bf2   : > { %v8886_v55 = vpop.f32.mrb[91].mxu1 }
0x1bf3   : > { %6146 = vmatmul.mubr.bf16.vlgmr.msra.gmra.mrb[44].mxu0 %v6112_v31  ;;  %8904 = vmatmul.mubr.bf16.vlgmr.msra.gmra.mrb[92].mxu1 %v6112_v31 }
0x1bf4   : > { %6222 = vmatpush1.bf16.msra.mxu0 %v11521_v3  ;;  %8908 = vmatpush3.bf16.msra.mxu1 %v11530_v43 }
0x1bf5   : > { %6223 = vmatprep.subr.bf16.mxu0 %v11525_v39  ;;  %8909 = vmatprep.subr.bf16.mxu1 %v13515_v35 }
0x1bf6   : > { %6253 = vmatprep.mubr.bf16.mxu0 %v13516_v45  ;;  %8923 = vmatprep.mubr.msk.bf16.mxu1 %vm9574_vm2, %v13515_v35 }
0x1bf8   : > { %6224 = vmatpush1.bf16.msra.mxu0 %v11535_v44  ;;  %8910 = vmatpush3.bf16.msra.mxu1 %v11546_v53 }
0x1bf9   : > { %6225 = vmatprep.subr.bf16.mxu0 %v11541_v50  ;;  %8911 = vmatprep.subr.bf16.mxu1 %v13515_v35 }
0x1bfc   : > { %6226 = vmatpush1.bf16.msra.mxu0 %v11553_v25  ;;  %8912 = vmatpush3.bf16.msra.mxu1 %v11563_v63 }
0x1bfd   : > { %6227 = vmatprep.subr.bf16.mxu0 %v11558_v59  ;;  %8913 = vmatprep.subr.bf16.mxu1 %v13515_v35 }
0x1c00   : > { %6228 = vmatpush1.bf16.msra.mxu0 %v11571_v0  ;;  %8914 = vmatpush3.bf16.msra.mxu1 %v11581_v19 }
0x1c01   : > { %6229 = vmatprep.subr.bf16.mxu0 %v11576_v15  ;;  %8915 = vmatprep.subr.bf16.mxu1 %v13515_v35 }
0x1c04   : > { %6230 = vmatpush1.bf16.msra.mxu0 %v11587_v47  ;;  %8916 = vmatpush3.bf16.msra.mxu1 %v11597_v62 }
0x1c05   : > { %6231 = vmatprep.subr.bf16.mxu0 %v11592_v54  ;;  %8917 = vmatprep.subr.bf16.mxu1 %v13515_v35 }
0x1c08   : > { %6232 = vmatpush1.bf16.msra.mxu0 %v11603_v10  ;;  %8918 = vmatpush3.bf16.msra.mxu1 %v11613_v11 }
0x1c09   : > { %6233 = vmatprep.subr.bf16.mxu0 %v11608_v8  ;;  %8919 = vmatprep.subr.bf16.mxu1 %v13515_v35 }
0x1c0c   : > { %6234 = vmatpush1.bf16.msra.mxu0 %v11619_v28  ;;  %8920 = vmatpush3.bf16.msra.mxu1 %v11629_v2 }
0x1c0d   : > { %6235 = vmatprep.subr.bf16.mxu0 %v11624_v6  ;;  %8921 = vmatprep.subr.bf16.mxu1 %v13515_v35 }
0x1c10   : > { %6236 = vmatpush1.bf16.msra.mxu0 %v11635_v20  ;;  %8922 = vmatpush3.bf16.msra.mxu1 %v11645_v29 }
0x1c11   : > { %6303 = vmatprep.subr.bf16.mxu0 %v11640_v24  ;;  %8927 = vmatprep.subr.bf16.mxu1 %v13515_v35 }
0x1c13   : > { %6254 = vmatmul.mubr.bf16.vlgmr.msra.gmra.mrb[48].mxu0 %v7204_v4  ;;  %8924 = vmatmul.mubr.bf16.vlgmr.msra.gmra.mrb[96].mxu1 %v7204_v4 }
0x1c14   : > { %6304 = vmatpush1.bf16.msra.mxu0 %v11652_v32  ;;  %8928 = vmatpush3.bf16.msra.mxu1 %v11662_v40 }
0x1c15   : > { %6305 = vmatprep.subr.bf16.mxu0 %v11657_v5  ;;  %8929 = vmatprep.subr.bf16.mxu1 %v13515_v35 }
0x1c16   : > { %6335 = vmatprep.mubr.bf16.mxu0 %v13516_v45  ;;  %8943 = vmatprep.mubr.msk.bf16.mxu1 %vm9574_vm2, %v13515_v35 }
0x1c18   : > { %6306 = vmatpush1.bf16.msra.mxu0 %v11668_v41  ;;  %8930 = vmatpush3.bf16.msra.mxu1 %v11678_v57 }
0x1c19   : > { %6307 = vmatprep.subr.bf16.mxu0 %v11673_v51  ;;  %8931 = vmatprep.subr.bf16.mxu1 %v13515_v35 }
0x1c1c   : > { %6308 = vmatpush1.bf16.msra.mxu0 %v11687_v60  ;;  %8932 = vmatpush3.bf16.msra.mxu1 %v11697_v42 }
0x1c1d   : > { %6309 = vmatprep.subr.bf16.mxu0 %v11692_v13  ;;  %8933 = vmatprep.subr.bf16.mxu1 %v13515_v35 }
0x1c20   : > { %6310 = vmatpush1.bf16.msra.mxu0 %v11703_v30  ;;  %8934 = vmatpush3.bf16.msra.mxu1 %v11713_v34 }
0x1c21   : > { %6311 = vmatprep.subr.bf16.mxu0 %v11708_v46  ;;  %8935 = vmatprep.subr.bf16.mxu1 %v13515_v35 }
0x1c24   : > { %6312 = vmatpush1.bf16.msra.mxu0 %v11719_v9  ;;  %8936 = vmatpush3.bf16.msra.mxu1 %v11729_v26 }
0x1c25   : > { %6313 = vmatprep.subr.bf16.mxu0 %v11724_v22  ;;  %8937 = vmatprep.subr.bf16.mxu1 %v13515_v35 }
0x1c28   : > { %6314 = vmatpush1.bf16.msra.mxu0 %v11735_v27  ;;  %8938 = vmatpush3.bf16.msra.mxu1 %v13605_v7 }
0x1c29   : > { %6315 = vmatprep.subr.bf16.mxu0 %v13606_v58  ;;  %8939 = vmatprep.subr.bf16.mxu1 %v13515_v35 }
0x1c2c   : > { %6316 = vmatpush1.bf16.msra.mxu0 %v13607_v16  ;;  %8940 = vmatpush3.bf16.msra.mxu1 %v13608_v52 }
0x1c2d   : > { %6317 = vmatprep.subr.bf16.mxu0 %v13609_v56  ;;  %8941 = vmatprep.subr.bf16.mxu1 %v13515_v35 }
0x1c30   : > { %6318 = vmatpush1.bf16.msra.mxu0 %v13610_v17  ;;  %8942 = vmatpush3.bf16.msra.mxu1 %v13611_v23 }
0x1c31   : > { %6411 = vmatprep.subr.bf16.mxu0 %v13612_v21  ;;  %8947 = vmatprep.subr.bf16.mxu1 %v13515_v35 }
0x1cc6   : > { %v6147_v48 = vpop.f32.mrb[44].mxu0  ;;  %v6188_v36 = vpop.f32.mrb[92].mxu1 }
0x1cc7   : > { %v9185_v1 = vadd.f32 %v6147_v48, %v13613_v12  ;;  %v6149_v31 = vpop.f32.mrb[45].mxu0  ;;  %v8905_v61 = vpop.f32.mrb[93].mxu1  ;;  %v6204_v7 = vadd.f32 %v6188_v36, %v11862_v49  ;;  %v6107_v48 = vadd.f32 %v6106_v14, %v11865_v38 }
0x1cc8   : > { %v6151_v18 = vpop.f32.mrb[46].mxu0  ;;  %v6191_v55 = vpop.f32.mrb[94].mxu1  ;;  %v9186_v17 = vadd.f32 %v6149_v31, %v11858_v33  ;;  %v6216_v31 = vstv %s6214_s12 }
0x1cc9   : > { %v6196_v4 = vmul.f32 0.5, %v9185_v1  ;;  %v6152_v56 = vpop.f32.mrb[47].mxu0  ;;  %v8906_v52 = vpop.f32.mrb[95].mxu1 }
0x1cca   : > { %v6197_v23 = vmul.f32 0.5, %v9186_v17 }
0x1ccb   : > { %9483 = vtanh.f32 %v6196_v4  ;;  %v7205_v4 = vld [vmem:[%s9701_s15 + $0x34] sm:$0xf] }
0x1ccc   : > { %9485 = vtanh.f32 %v6197_v23 }
0x1cd5   : > { %v9484_v16 = vpop.eup %9483 }
0x1cd6   : > { %v6200_v21 = vmul.f32 0.5, %v9484_v16  ;;  %v9486_v18 = vpop.eup %9485 }
0x1cd7   : > { %v6201_v56 = vmul.f32 0.5, %v9486_v18  ;;  %v13616_v18 = vld [vmem:[#allocation84_spill] sm:$0xff] }
0x1cd8   : > { %v6202_v58 = vadd.f32 0.5, %v6200_v21 }
0x1cd9   : > { %v6203_v1 = vadd.f32 0.5, %v6201_v56  ;;  %v13617_v56 = vld [vmem:[#allocation86_spill] sm:$0xff] }
0x1cda   : > { %v6205_v12 = vmul.f32 %v6204_v7, %v6202_v58 }
0x1cdc   : > { %v6206_v61 = vadd.f32 %v6205_v12, %v6107_v48  ;;  %v13614_v48 = vld [vmem:[#allocation83_spill] sm:$0xff] }
0x1cde   : > { %9487 = vtanh.f32 %v6206_v61  ;;  %v13615_v61 = vld [vmem:[#allocation82_spill] sm:$0xff] }
0x1ce8   : > { %v9488_v52 = vpop.eup %9487 }
0x1ce9   : > { %v6208_v17 = vsub.f32 %v12706_v37, %v9488_v52 }
0x1ceb   : > { %v6209_v16 = vmul.f32 %v6208_v17, %v6203_v1  ;;  %v13619_v1 = vld [vmem:[#allocation87_spill] sm:$0xff]  ;;  %v13620_v17 = vld [vmem:[#allocation88_spill] sm:$0xff] }
0x1ced   : > { %v6210_v21 = vadd.f32 %v9488_v52, %v6209_v16  ;;  %v13618_v52 = vld [vmem:[#allocation85_spill] sm:$0xff] }
0x1cee   : > { %v13621_v16 = vld [vmem:[#allocation81_spill] sm:$0xff] }
0x1cef   : > { %v6215_v23 = vsub.f32 %v6210_v21, %v12706_v37 }
0x1cf1   : > { %v6217_v36 = vmul.f32 %v6216_v31, %v6215_v23  ;;  %v13622_v23 = vld [vmem:[#allocation89_spill] sm:$0xff] }
0x1cf3   : > { %v12789_v14 = vadd.f32 %v6217_v36, %v12706_v37  ;;  %v6296_v37 = vpop.f32.mrb[96].mxu1 }
0x1cf4   : > { %v8925_v58 = vpop.f32.mrb[97].mxu1 }
0x1cf5   : > { %v6302_v7 = vpack.c.bf16 %v12789_v14, %v12789_v14  ;;  %v6299_v12 = vpop.f32.mrb[98].mxu1 }
0x1cf6   : > { %v8926_v55 = vpop.f32.mrb[99].mxu1 }
0x1cf7   : > { %6336 = vmatmul.mubr.bf16.vlgmr.msra.gmra.mrb[48].mxu0 %v6302_v7  ;;  %8944 = vmatmul.mubr.bf16.vlgmr.msra.gmra.mrb[100].mxu1 %v6302_v7 }
0x1cf8   : > { %6412 = vmatpush1.bf16.msra.mxu0 %v11521_v3  ;;  %8948 = vmatpush3.bf16.msra.mxu1 %v11530_v43 }
0x1cf9   : > { %6413 = vmatprep.subr.bf16.mxu0 %v11525_v39  ;;  %8949 = vmatprep.subr.bf16.mxu1 %v13515_v35 }
0x1cfa   : > { %6443 = vmatprep.mubr.bf16.mxu0 %v13516_v45  ;;  %8963 = vmatprep.mubr.msk.bf16.mxu1 %vm9574_vm2, %v13515_v35 }
0x1cfc   : > { %6414 = vmatpush1.bf16.msra.mxu0 %v11535_v44  ;;  %8950 = vmatpush3.bf16.msra.mxu1 %v11546_v53 }
0x1cfd   : > { %6415 = vmatprep.subr.bf16.mxu0 %v11541_v50  ;;  %8951 = vmatprep.subr.bf16.mxu1 %v13515_v35 }
0x1d00   : > { %6416 = vmatpush1.bf16.msra.mxu0 %v11553_v25  ;;  %8952 = vmatpush3.bf16.msra.mxu1 %v11563_v63 }
0x1d01   : > { %6417 = vmatprep.subr.bf16.mxu0 %v11558_v59  ;;  %8953 = vmatprep.subr.bf16.mxu1 %v13515_v35 }
0x1d04   : > { %6418 = vmatpush1.bf16.msra.mxu0 %v11571_v0  ;;  %8954 = vmatpush3.bf16.msra.mxu1 %v11581_v19 }
0x1d05   : > { %6419 = vmatprep.subr.bf16.mxu0 %v11576_v15  ;;  %8955 = vmatprep.subr.bf16.mxu1 %v13515_v35 }
0x1d08   : > { %6420 = vmatpush1.bf16.msra.mxu0 %v11587_v47  ;;  %8956 = vmatpush3.bf16.msra.mxu1 %v11597_v62 }
0x1d09   : > { %6421 = vmatprep.subr.bf16.mxu0 %v11592_v54  ;;  %8957 = vmatprep.subr.bf16.mxu1 %v13515_v35 }
0x1d0c   : > { %6422 = vmatpush1.bf16.msra.mxu0 %v11603_v10  ;;  %8958 = vmatpush3.bf16.msra.mxu1 %v11613_v11 }
0x1d0d   : > { %6423 = vmatprep.subr.bf16.mxu0 %v11608_v8  ;;  %8959 = vmatprep.subr.bf16.mxu1 %v13515_v35 }
0x1d10   : > { %6424 = vmatpush1.bf16.msra.mxu0 %v11619_v28  ;;  %8960 = vmatpush3.bf16.msra.mxu1 %v11629_v2 }
0x1d11   : > { %6425 = vmatprep.subr.bf16.mxu0 %v11624_v6  ;;  %8961 = vmatprep.subr.bf16.mxu1 %v13515_v35 }
0x1d14   : > { %6426 = vmatpush1.bf16.msra.mxu0 %v11635_v20  ;;  %8962 = vmatpush3.bf16.msra.mxu1 %v11645_v29 }
0x1d15   : > { %6493 = vmatprep.subr.bf16.mxu0 %v11640_v24  ;;  %8967 = vmatprep.subr.bf16.mxu1 %v13515_v35 }
0x1d17   : > { %6444 = vmatmul.mubr.bf16.vlgmr.msra.gmra.mrb[52].mxu0 %v7205_v4  ;;  %8964 = vmatmul.mubr.bf16.vlgmr.msra.gmra.mrb[104].mxu1 %v7205_v4 }
0x1d18   : > { %6494 = vmatpush1.bf16.msra.mxu0 %v11652_v32  ;;  %8968 = vmatpush3.bf16.msra.mxu1 %v11662_v40 }
0x1d19   : > { %6495 = vmatprep.subr.bf16.mxu0 %v11657_v5  ;;  %8969 = vmatprep.subr.bf16.mxu1 %v13515_v35 }
0x1d1a   : > { %6525 = vmatprep.mubr.bf16.mxu0 %v13516_v45  ;;  %8983 = vmatprep.mubr.msk.bf16.mxu1 %vm9574_vm2, %v13515_v35 }
0x1d1c   : > { %6496 = vmatpush1.bf16.msra.mxu0 %v11668_v41  ;;  %8970 = vmatpush3.bf16.msra.mxu1 %v11678_v57 }
0x1d1d   : > { %6497 = vmatprep.subr.bf16.mxu0 %v11673_v51  ;;  %8971 = vmatprep.subr.bf16.mxu1 %v13515_v35 }
0x1d20   : > { %6498 = vmatpush1.bf16.msra.mxu0 %v11687_v60  ;;  %8972 = vmatpush3.bf16.msra.mxu1 %v11697_v42 }
0x1d21   : > { %6499 = vmatprep.subr.bf16.mxu0 %v11692_v13  ;;  %8973 = vmatprep.subr.bf16.mxu1 %v13515_v35 }
0x1d24   : > { %6500 = vmatpush1.bf16.msra.mxu0 %v11703_v30  ;;  %8974 = vmatpush3.bf16.msra.mxu1 %v11713_v34 }
0x1d25   : > { %6501 = vmatprep.subr.bf16.mxu0 %v11708_v46  ;;  %8975 = vmatprep.subr.bf16.mxu1 %v13515_v35 }
0x1d28   : > { %6502 = vmatpush1.bf16.msra.mxu0 %v11719_v9  ;;  %8976 = vmatpush3.bf16.msra.mxu1 %v11729_v26 }
0x1d29   : > { %6503 = vmatprep.subr.bf16.mxu0 %v11724_v22  ;;  %8977 = vmatprep.subr.bf16.mxu1 %v13515_v35 }
0x1d2c   : > { %6504 = vmatpush1.bf16.msra.mxu0 %v11735_v27  ;;  %8978 = vmatpush3.bf16.msra.mxu1 %v13614_v48 }
0x1d2d   : > { %6505 = vmatprep.subr.bf16.mxu0 %v13615_v61  ;;  %8979 = vmatprep.subr.bf16.mxu1 %v13515_v35 }
0x1d30   : > { %6506 = vmatpush1.bf16.msra.mxu0 %v13616_v18  ;;  %8980 = vmatpush3.bf16.msra.mxu1 %v13617_v56 }
0x1d31   : > { %6507 = vmatprep.subr.bf16.mxu0 %v13618_v52  ;;  %8981 = vmatprep.subr.bf16.mxu1 %v13515_v35 }
0x1d34   : > { %6508 = vmatpush1.bf16.msra.mxu0 %v13619_v1  ;;  %8982 = vmatpush3.bf16.msra.mxu1 %v13620_v17 }
0x1d35   : > { %6601 = vmatprep.subr.bf16.mxu0 %v13621_v16  ;;  %8987 = vmatprep.subr.bf16.mxu1 %v13515_v35 }
0x1dca   : > { %v6337_v21 = vpop.f32.mrb[48].mxu0  ;;  %v6378_v31 = vpop.f32.mrb[100].mxu1 }
0x1dcb   : > { %v9187_v36 = vadd.f32 %v6337_v21, %v13622_v23  ;;  %v6339_v7 = vpop.f32.mrb[49].mxu0  ;;  %v8945_v58 = vpop.f32.mrb[101].mxu1  ;;  %v6394_v48 = vadd.f32 %v6378_v31, %v11862_v49  ;;  %v6297_v21 = vadd.f32 %v6296_v37, %v11865_v38 }
0x1dcc   : > { %v6341_v12 = vpop.f32.mrb[50].mxu0  ;;  %v6381_v55 = vpop.f32.mrb[102].mxu1  ;;  %v9188_v1 = vadd.f32 %v6339_v7, %v11858_v33  ;;  %v6406_v7 = vstv %s6404_s24 }
0x1dcd   : > { %v6386_v4 = vmul.f32 0.5, %v9187_v36  ;;  %v6342_v52 = vpop.f32.mrb[51].mxu0  ;;  %v8946_v56 = vpop.f32.mrb[103].mxu1 }
0x1dce   : > { %v6387_v17 = vmul.f32 0.5, %v9188_v1 }
0x1dcf   : > { %9489 = vtanh.f32 %v6386_v4  ;;  %v7206_v4 = vld [vmem:[%s9701_s15 + $0x38] sm:$0xf] }
0x1dd0   : > { %9491 = vtanh.f32 %v6387_v17 }
0x1dd9   : > { %v9490_v18 = vpop.eup %9489 }
0x1dda   : > { %v6390_v16 = vmul.f32 0.5, %v9490_v18  ;;  %v9492_v12 = vpop.eup %9491 }
0x1ddb   : > { %v6391_v52 = vmul.f32 0.5, %v9492_v12  ;;  %v13625_v12 = vld [vmem:[#allocation84_spill] sm:$0xff] }
0x1ddc   : > { %v6392_v61 = vadd.f32 0.5, %v6390_v16 }
0x1ddd   : > { %v6393_v36 = vadd.f32 0.5, %v6391_v52  ;;  %v13626_v52 = vld [vmem:[#allocation86_spill] sm:$0xff] }
0x1dde   : > { %v6395_v23 = vmul.f32 %v6394_v48, %v6392_v61 }
0x1de0   : > { %v6396_v58 = vadd.f32 %v6395_v23, %v6297_v21  ;;  %v13623_v21 = vld [vmem:[#allocation83_spill] sm:$0xff] }
0x1de2   : > { %9493 = vtanh.f32 %v6396_v58  ;;  %v13624_v58 = vld [vmem:[#allocation82_spill] sm:$0xff] }
0x1dec   : > { %v9494_v56 = vpop.eup %9493 }
0x1ded   : > { %v6398_v1 = vsub.f32 %v12789_v14, %v9494_v56 }
0x1def   : > { %v6399_v18 = vmul.f32 %v6398_v1, %v6393_v36  ;;  %v13628_v36 = vld [vmem:[#allocation87_spill] sm:$0xff]  ;;  %v13629_v1 = vld [vmem:[#allocation88_spill] sm:$0xff] }
0x1df1   : > { %v6400_v16 = vadd.f32 %v9494_v56, %v6399_v18  ;;  %v13627_v56 = vld [vmem:[#allocation85_spill] sm:$0xff] }
0x1df2   : > { %v13630_v18 = vld [vmem:[#allocation81_spill] sm:$0xff] }
0x1df3   : > { %v6405_v17 = vsub.f32 %v6400_v16, %v12789_v14 }
0x1df5   : > { %v6407_v31 = vmul.f32 %v6406_v7, %v6405_v17  ;;  %v13631_v17 = vld [vmem:[#allocation89_spill] sm:$0xff] }
0x1df7   : > { %v12872_v37 = vadd.f32 %v6407_v31, %v12789_v14  ;;  %v6486_v14 = vpop.f32.mrb[104].mxu1 }
0x1df8   : > { %v8965_v61 = vpop.f32.mrb[105].mxu1 }
0x1df9   : > { %v6492_v48 = vpack.c.bf16 %v12872_v37, %v12872_v37  ;;  %v6489_v23 = vpop.f32.mrb[106].mxu1 }
0x1dfa   : > { %v8966_v55 = vpop.f32.mrb[107].mxu1 }
0x1dfb   : > { %6526 = vmatmul.mubr.bf16.vlgmr.msra.gmra.mrb[52].mxu0 %v6492_v48  ;;  %8984 = vmatmul.mubr.bf16.vlgmr.msra.gmra.mrb[108].mxu1 %v6492_v48 }
0x1dfc   : > { %6602 = vmatpush1.bf16.msra.mxu0 %v11521_v3  ;;  %8988 = vmatpush3.bf16.msra.mxu1 %v11530_v43 }
0x1dfd   : > { %6603 = vmatprep.subr.bf16.mxu0 %v11525_v39  ;;  %8989 = vmatprep.subr.bf16.mxu1 %v13515_v35 }
0x1dfe   : > { %6633 = vmatprep.mubr.bf16.mxu0 %v13516_v45  ;;  %9003 = vmatprep.mubr.msk.bf16.mxu1 %vm9574_vm2, %v13515_v35 }
0x1e00   : > { %6604 = vmatpush1.bf16.msra.mxu0 %v11535_v44  ;;  %8990 = vmatpush3.bf16.msra.mxu1 %v11546_v53 }
0x1e01   : > { %6605 = vmatprep.subr.bf16.mxu0 %v11541_v50  ;;  %8991 = vmatprep.subr.bf16.mxu1 %v13515_v35 }
0x1e04   : > { %6606 = vmatpush1.bf16.msra.mxu0 %v11553_v25  ;;  %8992 = vmatpush3.bf16.msra.mxu1 %v11563_v63 }
0x1e05   : > { %6607 = vmatprep.subr.bf16.mxu0 %v11558_v59  ;;  %8993 = vmatprep.subr.bf16.mxu1 %v13515_v35 }
0x1e08   : > { %6608 = vmatpush1.bf16.msra.mxu0 %v11571_v0  ;;  %8994 = vmatpush3.bf16.msra.mxu1 %v11581_v19 }
0x1e09   : > { %6609 = vmatprep.subr.bf16.mxu0 %v11576_v15  ;;  %8995 = vmatprep.subr.bf16.mxu1 %v13515_v35 }
0x1e0c   : > { %6610 = vmatpush1.bf16.msra.mxu0 %v11587_v47  ;;  %8996 = vmatpush3.bf16.msra.mxu1 %v11597_v62 }
0x1e0d   : > { %6611 = vmatprep.subr.bf16.mxu0 %v11592_v54  ;;  %8997 = vmatprep.subr.bf16.mxu1 %v13515_v35 }
0x1e10   : > { %6612 = vmatpush1.bf16.msra.mxu0 %v11603_v10  ;;  %8998 = vmatpush3.bf16.msra.mxu1 %v11613_v11 }
0x1e11   : > { %6613 = vmatprep.subr.bf16.mxu0 %v11608_v8  ;;  %8999 = vmatprep.subr.bf16.mxu1 %v13515_v35 }
0x1e14   : > { %6614 = vmatpush1.bf16.msra.mxu0 %v11619_v28  ;;  %9000 = vmatpush3.bf16.msra.mxu1 %v11629_v2 }
0x1e15   : > { %6615 = vmatprep.subr.bf16.mxu0 %v11624_v6  ;;  %9001 = vmatprep.subr.bf16.mxu1 %v13515_v35 }
0x1e18   : > { %6616 = vmatpush1.bf16.msra.mxu0 %v11635_v20  ;;  %9002 = vmatpush3.bf16.msra.mxu1 %v11645_v29 }
0x1e19   : > { %6683 = vmatprep.subr.bf16.mxu0 %v11640_v24  ;;  %9007 = vmatprep.subr.bf16.mxu1 %v13515_v35 }
0x1e1b   : > { %6634 = vmatmul.mubr.bf16.vlgmr.msra.gmra.mrb[56].mxu0 %v7206_v4  ;;  %9004 = vmatmul.mubr.bf16.vlgmr.msra.gmra.mrb[112].mxu1 %v7206_v4 }
0x1e1c   : > { %6684 = vmatpush1.bf16.msra.mxu0 %v11652_v32  ;;  %9008 = vmatpush3.bf16.msra.mxu1 %v11662_v40 }
0x1e1d   : > { %6685 = vmatprep.subr.bf16.mxu0 %v11657_v5  ;;  %9009 = vmatprep.subr.bf16.mxu1 %v13515_v35 }
0x1e1e   : > { %6715 = vmatprep.mubr.bf16.mxu0 %v13516_v45  ;;  %9023 = vmatprep.mubr.msk.bf16.mxu1 %vm9574_vm2, %v13515_v35 }
0x1e20   : > { %6686 = vmatpush1.bf16.msra.mxu0 %v11668_v41  ;;  %9010 = vmatpush3.bf16.msra.mxu1 %v11678_v57 }
0x1e21   : > { %6687 = vmatprep.subr.bf16.mxu0 %v11673_v51  ;;  %9011 = vmatprep.subr.bf16.mxu1 %v13515_v35 }
0x1e24   : > { %6688 = vmatpush1.bf16.msra.mxu0 %v11687_v60  ;;  %9012 = vmatpush3.bf16.msra.mxu1 %v11697_v42 }
0x1e25   : > { %6689 = vmatprep.subr.bf16.mxu0 %v11692_v13  ;;  %9013 = vmatprep.subr.bf16.mxu1 %v13515_v35 }
0x1e28   : > { %6690 = vmatpush1.bf16.msra.mxu0 %v11703_v30  ;;  %9014 = vmatpush3.bf16.msra.mxu1 %v11713_v34 }
0x1e29   : > { %6691 = vmatprep.subr.bf16.mxu0 %v11708_v46  ;;  %9015 = vmatprep.subr.bf16.mxu1 %v13515_v35 }
0x1e2c   : > { %6692 = vmatpush1.bf16.msra.mxu0 %v11719_v9  ;;  %9016 = vmatpush3.bf16.msra.mxu1 %v11729_v26 }
0x1e2d   : > { %6693 = vmatprep.subr.bf16.mxu0 %v11724_v22  ;;  %9017 = vmatprep.subr.bf16.mxu1 %v13515_v35 }
0x1e30   : > { %6694 = vmatpush1.bf16.msra.mxu0 %v11735_v27  ;;  %9018 = vmatpush3.bf16.msra.mxu1 %v13623_v21 }
0x1e31   : > { %6695 = vmatprep.subr.bf16.mxu0 %v13624_v58  ;;  %9019 = vmatprep.subr.bf16.mxu1 %v13515_v35 }
0x1e34   : > { %6696 = vmatpush1.bf16.msra.mxu0 %v13625_v12  ;;  %9020 = vmatpush3.bf16.msra.mxu1 %v13626_v52 }
0x1e35   : > { %6697 = vmatprep.subr.bf16.mxu0 %v13627_v56  ;;  %9021 = vmatprep.subr.bf16.mxu1 %v13515_v35 }
0x1e38   : > { %6698 = vmatpush1.bf16.msra.mxu0 %v13628_v36  ;;  %9022 = vmatpush3.bf16.msra.mxu1 %v13629_v1 }
0x1e39   : > { %6791 = vmatprep.subr.bf16.mxu0 %v13630_v18  ;;  %9027 = vmatprep.subr.bf16.mxu1 %v13515_v35 }
0x1ece   : > { %v6527_v16 = vpop.f32.mrb[52].mxu0  ;;  %v6568_v7 = vpop.f32.mrb[108].mxu1 }
0x1ecf   : > { %v9189_v31 = vadd.f32 %v6527_v16, %v13631_v17  ;;  %v6529_v48 = vpop.f32.mrb[53].mxu0  ;;  %v8985_v61 = vpop.f32.mrb[109].mxu1  ;;  %v6584_v21 = vadd.f32 %v6568_v7, %v11862_v49  ;;  %v6487_v16 = vadd.f32 %v6486_v14, %v11865_v38 }
0x1ed0   : > { %v6531_v23 = vpop.f32.mrb[54].mxu0  ;;  %v6571_v55 = vpop.f32.mrb[110].mxu1  ;;  %v9190_v36 = vadd.f32 %v6529_v48, %v11858_v33 }
0x1ed1   : > { %v6576_v4 = vmul.f32 0.5, %v9189_v31  ;;  %v6532_v56 = vpop.f32.mrb[55].mxu0  ;;  %v8986_v52 = vpop.f32.mrb[111].mxu1  ;;  %v6596_v55 = vstv %s6594_s18 }
0x1ed2   : > { %v6577_v1 = vmul.f32 0.5, %v9190_v36 }
0x1ed3   : > { %9495 = vtanh.f32 %v6576_v4 }
0x1ed4   : > { %9497 = vtanh.f32 %v6577_v1 }
0x1edd   : > { %v9496_v12 = vpop.eup %9495 }
0x1ede   : > { %v6580_v18 = vmul.f32 0.5, %v9496_v12  ;;  %v9498_v23 = vpop.eup %9497 }
0x1edf   : > { %v6581_v56 = vmul.f32 0.5, %v9498_v23 }
0x1ee0   : > { %v6582_v58 = vadd.f32 0.5, %v6580_v18 }
0x1ee1   : > { %v6583_v31 = vadd.f32 0.5, %v6581_v56 }
0x1ee2   : > { %v6585_v17 = vmul.f32 %v6584_v21, %v6582_v58 }
0x1ee4   : > { %v6586_v61 = vadd.f32 %v6585_v17, %v6487_v16 }
0x1ee6   : > { %9499 = vtanh.f32 %v6586_v61 }
0x1ef0   : > { %v9500_v52 = vpop.eup %9499 }
0x1ef1   : > { %v6588_v36 = vsub.f32 %v12872_v37, %v9500_v52 }
0x1ef3   : > { %v6589_v12 = vmul.f32 %v6588_v36, %v6583_v31 }
0x1ef5   : > { %v6590_v48 = vadd.f32 %v9500_v52, %v6589_v12 }
0x1ef7   : > { %v6595_v1 = vsub.f32 %v6590_v48, %v12872_v37 }
0x1ef9   : > { %v6597_v7 = vmul.f32 %v6596_v55, %v6595_v1 }
0x1efb   : > { %v12955_v14 = vadd.f32 %v6597_v7, %v12872_v37 }
0x1efd   : > { %v6682_v21 = vpack.c.bf16 %v12955_v14, %v12955_v14 }
0x1eff   : > { %6716 = vmatmul.mubr.bf16.vlgmr.msra.gmra.mrb[56].mxu0 %v6682_v21  ;;  %9024 = vmatmul.mubr.bf16.vlgmr.msra.gmra.mrb[116].mxu1 %v6682_v21 }
0x1f00   : > { %6792 = vmatpush1.bf16.msra.mxu0 %v11521_v3  ;;  %9028 = vmatpush3.bf16.msra.mxu1 %v11530_v43  ;;  %v6676_v3 = vpop.f32.mrb[112].mxu1 }
0x1f01   : > { %6793 = vmatprep.subr.bf16.mxu0 %v11525_v39  ;;  %9029 = vmatprep.subr.bf16.mxu1 %v13515_v35  ;;  %v9005_v39 = vpop.f32.mrb[113].mxu1 }
0x1f02   : > { %6823 = vmatprep.mubr.bf16.mxu0 %v13516_v45  ;;  %9043 = vmatprep.mubr.msk.bf16.mxu1 %vm9574_vm2, %v13515_v35  ;;  %v6679_v43 = vpop.f32.mrb[114].mxu1 }
0x1f04   : > { %6794 = vmatpush1.bf16.msra.mxu0 %v11535_v44  ;;  %9030 = vmatpush3.bf16.msra.mxu1 %v11546_v53  ;;  %v9006_v44 = vpop.f32.mrb[115].mxu1  ;;  %v13632_v53 = vld [vmem:[#allocation83_spill] sm:$0xff] }
0x1f05   : > { %6795 = vmatprep.subr.bf16.mxu0 %v11541_v50  ;;  %9031 = vmatprep.subr.bf16.mxu1 %v13515_v35  ;;  %v7207_v50 = vld [vmem:[%s9701_s15 + $0x3c] sm:$0xf]  ;;  %s6781_s15 = sadd.s32 14, %s11870_s20 }
0x1f06   : > { %p6782_p0 = scmp.lt.s32.totalorder %s6781_s15, 20 }
0x1f08   : > { %6796 = vmatpush1.bf16.msra.mxu0 %v11553_v25  ;;  %9032 = vmatpush3.bf16.msra.mxu1 %v11563_v63  ;;  %v13633_v25 = vld [vmem:[#allocation82_spill] sm:$0xff]  ;;  %s6783_s19 = scalar_select %p6782_p0, 1, 0 }
0x1f09   : > { %6797 = vmatprep.subr.bf16.mxu0 %v11558_v59  ;;  %9033 = vmatprep.subr.bf16.mxu1 %v13515_v35  ;;  %v13634_v59 = vld [vmem:[#allocation84_spill] sm:$0xff]  ;;  %v13635_v63 = vld [vmem:[#allocation86_spill] sm:$0xff] }
0x1f0a   : > { %s6784_s30 = scvt.s32.f32 %s6783_s19 }
0x1f0c   : > { %6798 = vmatpush1.bf16.msra.mxu0 %v11571_v0  ;;  %9034 = vmatpush3.bf16.msra.mxu1 %v11581_v19  ;;  %v13636_v0 = vld [vmem:[#allocation85_spill] sm:$0xff]  ;;  %v13638_v19 = vld [vmem:[#allocation88_spill] sm:$0xff] }
0x1f0d   : > { %6799 = vmatprep.subr.bf16.mxu0 %v11576_v15  ;;  %9035 = vmatprep.subr.bf16.mxu1 %v13515_v35  ;;  %v13637_v15 = vld [vmem:[#allocation87_spill] sm:$0xff] }
0x1f10   : > { %6800 = vmatpush1.bf16.msra.mxu0 %v11587_v47  ;;  %9036 = vmatpush3.bf16.msra.mxu1 %v11597_v62  ;;  %v13639_v62 = vld [vmem:[#allocation89_spill] sm:$0xff] }
0x1f11   : > { %6801 = vmatprep.subr.bf16.mxu0 %v11592_v54  ;;  %9037 = vmatprep.subr.bf16.mxu1 %v13515_v35 }
0x1f14   : > { %6802 = vmatpush1.bf16.msra.mxu0 %v11603_v10  ;;  %9038 = vmatpush3.bf16.msra.mxu1 %v11613_v11 }
0x1f15   : > { %6803 = vmatprep.subr.bf16.mxu0 %v11608_v8  ;;  %9039 = vmatprep.subr.bf16.mxu1 %v13515_v35 }
0x1f18   : > { %6804 = vmatpush1.bf16.msra.mxu0 %v11619_v28  ;;  %9040 = vmatpush3.bf16.msra.mxu1 %v11629_v2 }
0x1f19   : > { %6805 = vmatprep.subr.bf16.mxu0 %v11624_v6  ;;  %9041 = vmatprep.subr.bf16.mxu1 %v13515_v35 }
0x1f1c   : > { %6806 = vmatpush1.bf16.msra.mxu0 %v11635_v20  ;;  %9042 = vmatpush3.bf16.msra.mxu1 %v11645_v29 }
0x1f1d   : > { %6873 = vmatprep.subr.bf16.mxu0 %v11640_v24  ;;  %9047 = vmatprep.subr.bf16.mxu1 %v13515_v35 }
0x1f1f   : > { %6824 = vmatmul.mubr.bf16.vlgmr.msra.gmra.mrb[60].mxu0 %v7207_v50  ;;  %9044 = vmatmul.mubr.bf16.vlgmr.msra.gmra.mrb[120].mxu1 %v7207_v50 }
0x1f20   : > { %6874 = vmatpush1.bf16.msra.mxu0 %v11652_v32  ;;  %9048 = vmatpush3.bf16.msra.mxu1 %v11662_v40 }
0x1f21   : > { %6875 = vmatprep.subr.bf16.mxu0 %v11657_v5  ;;  %9049 = vmatprep.subr.bf16.mxu1 %v13515_v35 }
0x1f22   : > { %6905 = vmatprep.mubr.bf16.mxu0 %v13516_v45  ;;  %9063 = vmatprep.mubr.msk.bf16.mxu1 %vm9574_vm2, %v13515_v35 }
0x1f24   : > { %6876 = vmatpush1.bf16.msra.mxu0 %v11668_v41  ;;  %9050 = vmatpush3.bf16.msra.mxu1 %v11678_v57  ;;  %v6677_v57 = vadd.f32 %v6676_v3, %v11865_v38 }
0x1f25   : > { %6877 = vmatprep.subr.bf16.mxu0 %v11673_v51  ;;  %9051 = vmatprep.subr.bf16.mxu1 %v13515_v35 }
0x1f28   : > { %6878 = vmatpush1.bf16.msra.mxu0 %v11687_v60  ;;  %9052 = vmatpush3.bf16.msra.mxu1 %v11697_v42 }
0x1f29   : > { %6879 = vmatprep.subr.bf16.mxu0 %v11692_v13  ;;  %9053 = vmatprep.subr.bf16.mxu1 %v13515_v35 }
0x1f2c   : > { %6880 = vmatpush1.bf16.msra.mxu0 %v11703_v30  ;;  %9054 = vmatpush3.bf16.msra.mxu1 %v11713_v34 }
0x1f2d   : > { %6881 = vmatprep.subr.bf16.mxu0 %v11708_v46  ;;  %9055 = vmatprep.subr.bf16.mxu1 %v13515_v35 }
0x1f30   : > { %6882 = vmatpush1.bf16.msra.mxu0 %v11719_v9  ;;  %9056 = vmatpush3.bf16.msra.mxu1 %v11729_v26 }
0x1f31   : > { %6883 = vmatprep.subr.bf16.mxu0 %v11724_v22  ;;  %9057 = vmatprep.subr.bf16.mxu1 %v13515_v35 }
0x1f34   : > { %6884 = vmatpush1.bf16.msra.mxu0 %v11735_v27  ;;  %9058 = vmatpush3.bf16.msra.mxu1 %v13632_v53  ;;  %v6786_v27 = vstv %s6784_s30 }
0x1f35   : > { %6885 = vmatprep.subr.bf16.mxu0 %v13633_v25  ;;  %9059 = vmatprep.subr.bf16.mxu1 %v13515_v35 }
0x1f38   : > { %6886 = vmatpush1.bf16.msra.mxu0 %v13634_v59  ;;  %9060 = vmatpush3.bf16.msra.mxu1 %v13635_v63 }
0x1f39   : > { %6887 = vmatprep.subr.bf16.mxu0 %v13636_v0  ;;  %9061 = vmatprep.subr.bf16.mxu1 %v13515_v35 }
0x1f3c   : > { %6888 = vmatpush1.bf16.msra.mxu0 %v13637_v15  ;;  %9062 = vmatpush3.bf16.msra.mxu1 %v13638_v19 }
0x1fd2   : > { %v6717_v47 = vpop.f32.mrb[56].mxu0  ;;  %v6758_v54 = vpop.f32.mrb[116].mxu1 }
0x1fd3   : > { %v9191_v10 = vadd.f32 %v6717_v47, %v13639_v62  ;;  %v6719_v8 = vpop.f32.mrb[57].mxu0  ;;  %v9025_v11 = vpop.f32.mrb[117].mxu1  ;;  %v6774_v51 = vadd.f32 %v6758_v54, %v11862_v49  ;;  %v6976_v47 = vstv %s6974_s8 }
0x1fd4   : > { %v6721_v28 = vpop.f32.mrb[58].mxu0  ;;  %v6761_v6 = vpop.f32.mrb[118].mxu1  ;;  %v9192_v29 = vadd.f32 %v6719_v8, %v11858_v33 }
0x1fd5   : > { %v6766_v2 = vmul.f32 0.5, %v9191_v10  ;;  %v6722_v20 = vpop.f32.mrb[59].mxu0  ;;  %v9026_v24 = vpop.f32.mrb[119].mxu1 }
0x1fd6   : > { %v6767_v32 = vmul.f32 0.5, %v9192_v29 }
0x1fd7   : > { %9501 = vtanh.f32 %v6766_v2 }
0x1fd8   : > { %9503 = vtanh.f32 %v6767_v32 }
0x1fe1   : > { %v9502_v5 = vpop.eup %9501 }
0x1fe2   : > { %v6770_v40 = vmul.f32 0.5, %v9502_v5  ;;  %v9504_v42 = vpop.eup %9503 }
0x1fe3   : > { %v6771_v30 = vmul.f32 0.5, %v9504_v42 }
0x1fe4   : > { %v6772_v41 = vadd.f32 0.5, %v6770_v40 }
0x1fe5   : > { %v6773_v34 = vadd.f32 0.5, %v6771_v30 }
0x1fe6   : > { %v6775_v60 = vmul.f32 %v6774_v51, %v6772_v41 }
0x1fe8   : > { %v6776_v13 = vadd.f32 %v6775_v60, %v6677_v57 }
0x1fea   : > { %9505 = vtanh.f32 %v6776_v13 }
0x1ff2   : > { %v6866_v17 = vpop.f32.mrb[120].mxu1 }
0x1ff3   : > { %v9045_v4 = vpop.f32.mrb[121].mxu1  ;;  %v6867_v44 = vadd.f32 %v6866_v17, %v11865_v38 }
0x1ff4   : > { %v9506_v46 = vpop.eup %9505  ;;  %v6869_v18 = vpop.f32.mrb[122].mxu1 }
0x1ff5   : > { %v6778_v9 = vsub.f32 %v12955_v14, %v9506_v46  ;;  %v9046_v16 = vpop.f32.mrb[123].mxu1 }
0x1ff7   : > { %v6779_v22 = vmul.f32 %v6778_v9, %v6773_v34 }
0x1ff9   : > { %v6780_v26 = vadd.f32 %v9506_v46, %v6779_v22 }
0x1ffb   : > { %v6785_v35 = vsub.f32 %v6780_v26, %v12955_v14 }
0x1ffd   : > { %v6787_v45 = vmul.f32 %v6786_v27, %v6785_v35 }
0x1fff   : > { %v6788_v37 = vadd.f32 %v6787_v45, %v12955_v14 }
0x2001   : > { %v6872_v58 = vpack.c.bf16 %v6788_v37, %v6788_v37 }
0x2003   : > { %6906 = vmatmul.mubr.bf16.vlgmr.msra.gmra.mrb[60].mxu0 %v6872_v58  ;;  %9064 = vmatmul.mubr.bf16.vlgmr.msra.gmra.mrb[124].mxu1 %v6872_v58 }
0x20d6   : > { %v6907_v61 = vpop.f32.mrb[60].mxu0  ;;  %v6948_v23 = vpop.f32.mrb[124].mxu1 }
0x20d7   : > { %v9193_v56 = vadd.f32 %v6907_v61, %v13639_v62  ;;  %v6909_v52 = vpop.f32.mrb[61].mxu0  ;;  %v9065_v31 = vpop.f32.mrb[125].mxu1  ;;  %v6964_v43 = vadd.f32 %v6948_v23, %v11862_v49 }
0x20d8   : > { %v6911_v36 = vpop.f32.mrb[62].mxu0  ;;  %v6951_v12 = vpop.f32.mrb[126].mxu1  ;;  %v9194_v7 = vadd.f32 %v6909_v52, %v11858_v33 }
0x20d9   : > { %v6956_v48 = vmul.f32 0.5, %v9193_v56  ;;  %v6912_v55 = vpop.f32.mrb[63].mxu0  ;;  %v9066_v1 = vpop.f32.mrb[127].mxu1 }
0x20da   : > { %v6957_v14 = vmul.f32 0.5, %v9194_v7 }
0x20db   : > { %9507 = vtanh.f32 %v6956_v48 }
0x20dc   : > { %9509 = vtanh.f32 %v6957_v14 }
0x20e5   : > { %v9508_v21 = vpop.eup %9507 }
0x20e6   : > { %v6960_v3 = vmul.f32 0.5, %v9508_v21  ;;  %v9510_v25 = vpop.eup %9509 }
0x20e7   : > { %v6961_v59 = vmul.f32 0.5, %v9510_v25 }
0x20e8   : > { %v6962_v39 = vadd.f32 0.5, %v6960_v3 }
0x20e9   : > { %v6963_v33 = vadd.f32 0.5, %v6961_v59 }
0x20ea   : > { %v6965_v50 = vmul.f32 %v6964_v43, %v6962_v39 }
0x20ec   : > { %v6966_v53 = vadd.f32 %v6965_v50, %v6867_v44 }
0x20ee   : > { %9511 = vtanh.f32 %v6966_v53 }
0x20f8   : > { %v9512_v63 = vpop.eup %9511 }
0x20f9   : > { %v6968_v0 = vsub.f32 %v6788_v37, %v9512_v63 }
0x20fb   : > { %v6969_v15 = vmul.f32 %v6968_v0, %v6963_v33 }
0x20fd   : > { %v6970_v19 = vadd.f32 %v9512_v63, %v6969_v15 }
0x20ff   : > { %v6975_v49 = vsub.f32 %v6970_v19, %v6788_v37 }
0x2101   : > { %v6977_v54 = vmul.f32 %v6976_v47, %v6975_v49 }
0x2103   : > { %v6978_v62 = vadd.f32 %v6977_v54, %v6788_v37 }
0x2105   : > { %6979 = vst [vmem:[#allocation2] sm:$0xff] %v6978_v62  ;;  %6981 = vst [vmem:[%s9699_s14] sm:$0xff] %v6978_v62 }
0x2106 PF: > { %s16_s27 = sadd.s32 1, %s9567_s27   ;;  %s13640_s21 = smov %s9547_s22 }
0x2107   : > { %p13_p2 = scmp.ge.s32.totalorder %s16_s27, 6   ;;  %s13641_s22 = smov %s9661_s10 }
0x2108   : > { %s13642_s23 = smov %s9559_s25  ;;  %s13643_s24 = smov %s9563_s26 }
0x2109   : > { %s13644_s25 = smov %s13647_s28  ;;  %s13645_s26 = smov %s13651_s29 }
0x210a   :  { %15 = sbr.rel (!%p13_p2) target bundleno = 4 (0x4), region = 165 }

</bundles_post_ra>
